<compile_context>
chip_gen: v6e
topology: v6e:2x2x1
jax: 0.10.0
libtpu: 0.0.40
codegen_flags: <defaults>
</compile_context>

<pallas_src>
import math
import functools

import jax
import jax.numpy as jnp
from jax.experimental import pallas as pl
from jax.experimental.pallas import tpu as pltpu

# <= 48 MiB: above v5e/v6e scoped defaults (16/32 MiB), headroom below v7x's
# 64 MiB physical VMEM.
_VMEM_LIMIT = 48 * 1024 * 1024


def _round_up(x, m):
    return ((x + m - 1) // m) * m


# ---------------------------------------------------------------------------
# Pallas kernels
# ---------------------------------------------------------------------------

def conv1x1_relu_kernel(x_ref, m_ref, w_ref, wm_ref, o_ref):
    """relu(x @ w + m * wm).

    x_ref: (TR, 2E) bf16, w_ref: (2E, Cout_p) bf16   -> MXU matmul (f32 acc)
    m_ref: (TR, 1) f32,  wm_ref: (1, Cout_p) f32     -> rank-1 mask-channel add
    """
    acc = jnp.dot(x_ref[...], w_ref[...], preferred_element_type=jnp.float32)
    acc = acc + m_ref[...] * wm_ref[...]          # (TR,1)*(1,Cout) outer product
    o_ref[...] = jnp.maximum(acc, 0.0).astype(o_ref.dtype)


def _mha_body(q, k, v, res, add_mask,
              wq, wk, wv, bq, bk, bv, wo, bo, lnw, lnb,
              out_ref, attn_ref, nheads):
    """One batch element of multi-head attention + residual + LayerNorm.

    q/res: (L, E); k/v: (S, E); add_mask: (1, S) f32 or None.
    wq/wk/wv/wo: (E, E) bf16 (wq pre-scaled by 1/sqrt(hd));
    bq/bk/bv/bo/lnw/lnb: (1, E) f32 (bq pre-scaled by 1/sqrt(hd)).
    """
    L, E = q.shape
    S = k.shape[0]
    hd = E // nheads
    bf = jnp.bfloat16
    f32 = jnp.float32

    # Full-E lane-dense projections: single MXU matmul each, f32 accumulation.
    qf = (jnp.dot(q, wq, preferred_element_type=f32) + bq).astype(bf)   # (L, E)
    kf = (jnp.dot(k, wk, preferred_element_type=f32) + bk).astype(bf)   # (S, E)
    vf = (jnp.dot(v, wv, preferred_element_type=f32) + bv).astype(bf)   # (S, E)

    attn_acc = jnp.zeros((L, S), f32)
    out_acc = jnp.zeros((L, E), f32)

    # Per-head attention over static lane slices of the projected activations.
    # The hd-wide contractions here are inherent to MHA; the FLOP-dominant
    # projections above already run at full MXU width.
    for h in range(nheads):
        sl = slice(h * hd, (h + 1) * hd)
        q_h = qf[:, sl]                                                  # (L, hd)
        k_h = kf[:, sl]                                                  # (S, hd)
        v_h = vf[:, sl]                                                  # (S, hd)

        s = jax.lax.dot_general(q_h, k_h, (((1,), (1,)), ((), ())),
                                preferred_element_type=f32)              # (L, S)
        if add_mask is not None:
            s = s + add_mask                                             # (1,S) bcast

        s = s - jnp.max(s, axis=-1, keepdims=True)
        e = jnp.exp(s)
        # Exact division (not approx reciprocal): these probabilities also feed
        # the returned attention maps / pseudo-mask normalization.
        p = e / jnp.sum(e, axis=-1, keepdims=True)

        attn_acc = attn_acc + p
        ctx = jnp.dot(p.astype(bf), v_h, preferred_element_type=f32)     # (L, hd)
        out_acc = out_acc + jnp.dot(ctx.astype(bf), wo[sl, :],
                                    preferred_element_type=f32)          # (L, E)

    # Head-averaged attention weights (PyTorch MultiheadAttention default).
    attn_ref[0] = (attn_acc * (1.0 / nheads)).astype(attn_ref.dtype)

    # Residual (dropout = identity) + LayerNorm, all f32.
    x = res + out_acc + bo
    mean = jnp.mean(x, axis=-1, keepdims=True)
    var = jnp.mean((x - mean) ** 2, axis=-1, keepdims=True)
    y = (x - mean) * jax.lax.rsqrt(var + 1e-5) * lnw + lnb
    out_ref[0] = y.astype(out_ref.dtype)


def mha_masked_kernel(q_ref, k_ref, v_ref, res_ref, mask_ref,
                      wq_ref, wk_ref, wv_ref, bq_ref, bk_ref, bv_ref,
                      wo_ref, bo_ref, lnw_ref, lnb_ref,
                      out_ref, attn_ref, *, nheads):
    _mha_body(q_ref[0], k_ref[0], v_ref[0], res_ref[0], mask_ref[0],
              wq_ref[...], wk_ref[...], wv_ref[...],
              bq_ref[...], bk_ref[...], bv_ref[...],
              wo_ref[...], bo_ref[...], lnw_ref[...], lnb_ref[...],
              out_ref, attn_ref, nheads)


def mha_nomask_kernel(q_ref, k_ref, v_ref, res_ref,
                      wq_ref, wk_ref, wv_ref, bq_ref, bk_ref, bv_ref,
                      wo_ref, bo_ref, lnw_ref, lnb_ref,
                      out_ref, attn_ref, *, nheads):
    _mha_body(q_ref[0], k_ref[0], v_ref[0], res_ref[0], None,
              wq_ref[...], wk_ref[...], wv_ref[...],
              bq_ref[...], bk_ref[...], bv_ref[...],
              wo_ref[...], bo_ref[...], lnw_ref[...], lnb_ref[...],
              out_ref, attn_ref, nheads)


# ---------------------------------------------------------------------------
# Wrappers around the kernels
# ---------------------------------------------------------------------------

def conv1x1_relu_tokens(x_a, x_b, mask, w):
    """1x1 conv (no bias) + ReLU over channels [x_a; x_b; mask*10].

    x_a, x_b: (bs, E, H, W); mask: (bs, 1, H, W); w: (2E+1, E).
    Returns batch-first tokens (bs, H*W, E) in bf16.
    """
    bs, E, H, W = x_a.shape
    hw = H * W
    rows = bs * hw
    cin = 2 * E
    cout = w.shape[1]

    # Token-major activations; main 2E channels in bf16, mask column stays f32
    # and is handled as a rank-1 post-matmul add (no 2E+1 -> 128 padding).
    x_tok = (jnp.concatenate([x_a, x_b], axis=1)
             .reshape(bs, cin, hw).transpose(0, 2, 1)
             .reshape(rows, cin).astype(jnp.bfloat16))
    m_tok = ((mask * 10.0).reshape(bs, 1, hw).transpose(0, 2, 1)
             .reshape(rows, 1).astype(jnp.float32))

    cout_p = _round_up(cout, 128)
    w_main = jnp.pad(w[:cin].astype(jnp.bfloat16), ((0, 0), (0, cout_p - cout)))
    w_mask = jnp.pad(w[cin:cin + 1].astype(jnp.float32),
                     ((0, 0), (0, cout_p - cout)))

    # Tile rows (parallel grid) so DMA overlaps compute and VMEM stays bounded.
    tr = min(512, _round_up(rows, 8))
    rows_p = _round_up(rows, tr)
    x_tok = jnp.pad(x_tok, ((0, rows_p - rows), (0, 0)))
    m_tok = jnp.pad(m_tok, ((0, rows_p - rows), (0, 0)))

    out = pl.pallas_call(
        conv1x1_relu_kernel,
        out_shape=jax.ShapeDtypeStruct((rows_p, cout_p), jnp.bfloat16),
        grid=(rows_p // tr,),
        in_specs=[pl.BlockSpec((tr, cin), lambda i: (i, 0)),
                  pl.BlockSpec((tr, 1), lambda i: (i, 0)),
                  pl.BlockSpec((cin, cout_p), lambda i: (0, 0)),
                  pl.BlockSpec((1, cout_p), lambda i: (0, 0))],
        out_specs=pl.BlockSpec((tr, cout_p), lambda i: (i, 0)),
        compiler_params=pltpu.CompilerParams(
            dimension_semantics=("parallel",),
            vmem_limit_bytes=_VMEM_LIMIT),
    )(x_tok, m_tok, w_main, w_mask)
    out = out[:rows, :cout]
    return out.reshape(bs, hw, cout)


def mha_layer(p, tgt, mem_key, mem_val, nheads, add_mask=None,
              pos=None, query_pos=None, value_pos=None):
    """CrossAttentionLayer.forward_post semantics (pre_norm=False), batch-first.

    tgt: (bs, L, E); mem_key/mem_val: (bs, S, E); add_mask: (bs, 1, S) or None.
    Returns ((bs, L, E) f32, (bs, L, S) f32).
    """
    bs, L, E = tgt.shape
    S = mem_key.shape[1]
    hd = E // nheads
    scale = 1.0 / math.sqrt(hd)
    bf = jnp.bfloat16

    # Pre-cast big DMA operands to bf16 (they are only consumed via bf16 MXU
    # matmuls inside the kernel).  Residual stays f32.
    q_in = (tgt if query_pos is None else tgt + query_pos).astype(bf)
    k_in = (mem_key if pos is None else mem_key + pos).astype(bf)
    v_in = (mem_val if value_pos is None else mem_val + value_pos).astype(bf)
    res = tgt.astype(jnp.float32)

    # 2D lane-dense weights; fold the 1/sqrt(hd) scale into the Q projection.
    wq = (p["wq"] * scale).astype(bf)
    wk = p["wk"].astype(bf)
    wv = p["wv"].astype(bf)
    wo = p["wo"].astype(bf)
    bq = (p["bq"] * scale).astype(jnp.float32)

    seq_L = pl.BlockSpec((1, L, E), lambda b: (b, 0, 0))
    seq_S = pl.BlockSpec((1, S, E), lambda b: (b, 0, 0))
    w2d = pl.BlockSpec((E, E), lambda b: (0, 0))
    vec = pl.BlockSpec((1, E), lambda b: (0, 0))

    param_specs = [w2d, w2d, w2d, vec, vec, vec, w2d, vec, vec, vec]
    param_args = (wq, wk, wv, bq, p["bk"], p["bv"], wo,
                  p["bo"], p["ln_w"], p["ln_b"])

    if add_mask is not None:
        kern = functools.partial(mha_masked_kernel, nheads=nheads)
        in_specs = [seq_L, seq_S, seq_S, seq_L,
                    pl.BlockSpec((1, 1, S), lambda b: (b, 0, 0))] + param_specs
        args = (q_in, k_in, v_in, res, add_mask) + param_args
    else:
        kern = functools.partial(mha_nomask_kernel, nheads=nheads)
        in_specs = [seq_L, seq_S, seq_S, seq_L] + param_specs
        args = (q_in, k_in, v_in, res) + param_args

    out_b, attn = pl.pallas_call(
        kern,
        out_shape=(jax.ShapeDtypeStruct((bs, L, E), jnp.float32),
                   jax.ShapeDtypeStruct((bs, L, S), jnp.float32)),
        grid=(bs,),
        in_specs=in_specs,
        out_specs=(pl.BlockSpec((1, L, E), lambda b: (b, 0, 0)),
                   pl.BlockSpec((1, L, S), lambda b: (b, 0, 0))),
        compiler_params=pltpu.CompilerParams(
            dimension_semantics=("parallel",),
            vmem_limit_bytes=_VMEM_LIMIT),
    )(*args)
    return out_b, attn


# ---------------------------------------------------------------------------
# Pure-JAX glue
# ---------------------------------------------------------------------------

def position_embedding_sine(bs, H, W, num_pos_feats, temperature=10000,
                            normalize=True, scale=2 * math.pi):
    not_mask = jnp.ones((bs, H, W), jnp.float32)
    y_embed = jnp.cumsum(not_mask, axis=1)
    x_embed = jnp.cumsum(not_mask, axis=2)
    if normalize:
        eps = 1e-6
        y_embed = y_embed / (y_embed[:, -1:, :] + eps) * scale
        x_embed = x_embed / (x_embed[:, :, -1:] + eps) * scale
    dim_t = jnp.arange(num_pos_feats, dtype=jnp.float32)
    dim_t = temperature ** (2.0 * jnp.floor(dim_t / 2.0) / num_pos_feats)
    pos_x = x_embed[:, :, :, None] / dim_t
    pos_y = y_embed[:, :, :, None] / dim_t
    pos_x = jnp.stack((jnp.sin(pos_x[:, :, :, 0::2]),
                       jnp.cos(pos_x[:, :, :, 1::2])), axis=4).reshape(bs, H, W, -1)
    pos_y = jnp.stack((jnp.sin(pos_y[:, :, :, 0::2]),
                       jnp.cos(pos_y[:, :, :, 1::2])), axis=4).reshape(bs, H, W, -1)
    pos = jnp.concatenate((pos_y, pos_x), axis=3).transpose(0, 3, 1, 2)
    return pos   # (bs, 2*num_pos_feats, H, W)


def build_support_attn_mask(support_mask):
    # processing_for_attn_mask: masked (True) where mask == 0 -> additive -1e30.
    # Shared across heads and query rows -> keep it (bs, 1, S); the kernel
    # broadcasts it (no (bs, nheads, L, S) materialization / DMA).
    bs = support_mask.shape[0]
    m = support_mask.reshape(bs, 1, -1)
    return jnp.where(m == 0.0, -1e30, 0.0).astype(jnp.float32)


def transformer_decoder_forward(params, cfg, x_q, x_s, x_q_sam, x_s_sam,
                                support_mask, spt_prototype, qry_res_feat_4,
                                pseudo_mask, supp_feat_bin, supp_feat_bin_sam):
    bs, C, H, W = x_q.shape
    nheads = cfg["nheads"]
    num_layers = cfg["num_layers"]
    spt_nq = cfg["spt_num_query"]
    nq = cfg["num_queries"]
    hw = H * W

    # (unused in reference after squeeze)
    _ = spt_prototype.squeeze(-1).squeeze(-1)[:, None, :]
    _ = qry_res_feat_4

    pos = position_embedding_sine(bs, H, W, C // 2, normalize=True)
    pos_tok = pos.reshape(bs, C, hw).transpose(0, 2, 1)      # (bs, HW, C) batch-first
    pos_x_q = pos_tok
    pos_x_s = pos_tok

    # ------------------- support branch -------------------
    spt_mask_add = build_support_attn_mask(support_mask)     # (bs, 1, HW)
    output = jnp.broadcast_to(params["spt_protos"][None], (bs, spt_nq, C))
    support_sam_c_attn = []
    s_c_attn_map = None

    # Hoisted out of the layer loop: input does not depend on the layer index.
    src_x_s_sam = conv1x1_relu_tokens(x_s_sam, supp_feat_bin_sam, support_mask,
                                      params["merge_sam_mask_w"])

    for i in range(num_layers):
        if i != num_layers - 1:
            output, s_c_attn_map = mha_layer(
                params["spt"][i], output, src_x_s_sam, src_x_s_sam, nheads,
                add_mask=spt_mask_add, pos=pos_x_s)
        else:
            src_x_s = conv1x1_relu_tokens(x_s, supp_feat_bin, support_mask,
                                          params["merge_w"])
            output, s_c_attn_map = mha_layer(
                params["spt"][i], output, src_x_s_sam, src_x_s, nheads,
                add_mask=spt_mask_add, pos=pos_x_s)
        support_sam_c_attn.append(s_c_attn_map)
    spt_protos = output

    # ------------------- query branch -------------------
    pseudo_mask_loss = []
    query_sam_c_attn = []
    pseudo_mask_vis = [pseudo_mask.astype(jnp.float32),
                       (pseudo_mask > 0.5).astype(jnp.float32)]
    pm = pseudo_mask
    output = jnp.broadcast_to(params["qry_protos"][None], (bs, nq, C))
    q_c_attn_map = None
    for i in range(num_layers):
        pm_naive = pm
        src_x_q_sam = conv1x1_relu_tokens(x_q_sam, supp_feat_bin_sam, pm_naive,
                                          params["merge_sam_mask_w"])
        if i != num_layers - 1:
            output, q_c_attn_map = mha_layer(
                params["qry"][i], output, src_x_q_sam, src_x_q_sam, nheads,
                add_mask=None, pos=pos_x_q)
            query_sam_c_attn.append(q_c_attn_map)
            a_min = jnp.min(q_c_attn_map, axis=-1, keepdims=True)
            a_max = jnp.max(q_c_attn_map, axis=-1, keepdims=True)
            a_norm = (q_c_attn_map - a_min) / (a_max - a_min + 1e-9)
            cur_pm = jnp.max(a_norm, axis=1, keepdims=True)       # (bs, 1, HW)
            pm = cur_pm.reshape(bs, 1, H, W)   # reference hard-codes (bs,1,64,64)
            pseudo_mask_loss.append(pm)
            pseudo_mask_vis.append(pm)
            pseudo_mask_vis.append((pm > 0.5).astype(jnp.float32))
        else:
            pm_concat = (pm > 0.5).astype(jnp.float32) if cfg["concat_th"] else pm
            src_x_q = conv1x1_relu_tokens(x_q, supp_feat_bin, pm_concat,
                                          params["merge_w"])
            output, q_c_attn_map = mha_layer(
                params["qry"][i], output, src_x_q_sam, src_x_q, nheads,
                add_mask=None, pos=pos_x_q)
            query_sam_c_attn.append(q_c_attn_map)
    qry_protos = output

    # ------------------- fusion stage -------------------
    output, _ = mha_layer(params["cross1"], spt_protos, qry_protos, qry_protos,
                          nheads, add_mask=None)
    output, _ = mha_layer(params["self1"], output, output, output,
                          nheads, add_mask=None)

    # output is already batch-first (bs, spt_nq, C) == reference's permute(1,0,2)
    return (output,
            [s_c_attn_map, q_c_attn_map, pseudo_mask_vis,
             q_c_attn_map.astype(jnp.float32)],
            {"pseudo_mask_loss": pseudo_mask_loss,
             "query_sam_c_attn": query_sam_c_attn,
             "support_sam_c_attn": support_sam_c_attn})


# ---------------------------------------------------------------------------
# Deterministic parameter init (synthetic, not a checkpoint load)
# ---------------------------------------------------------------------------

def _xavier(key, shape):
    a = math.sqrt(6.0 / (shape[0] + shape[1]))
    return jax.random.uniform(key, shape, jnp.float32, -a, a)


def init_attn_layer_params(key, d_model):
    ks = jax.random.split(key, 4)
    return {
        "wq": _xavier(ks[0], (d_model, d_model)),
        "wk": _xavier(ks[1], (d_model, d_model)),
        "wv": _xavier(ks[2], (d_model, d_model)),
        "wo": _xavier(ks[3], (d_model, d_model)),
        "bq": jnp.zeros((1, d_model), jnp.float32),
        "bk": jnp.zeros((1, d_model), jnp.float32),
        "bv": jnp.zeros((1, d_model), jnp.float32),
        "bo": jnp.zeros((1, d_model), jnp.float32),
        "ln_w": jnp.ones((1, d_model), jnp.float32),
        "ln_b": jnp.zeros((1, d_model), jnp.float32),
    }


def init_params(key, hidden_dim, num_layers, num_queries, spt_num_query):
    keys = jax.random.split(key, 2 * num_layers + 6)
    it = iter(keys)
    params = {
        "spt": [init_attn_layer_params(next(it), hidden_dim) for _ in range(num_layers)],
        "qry": [init_attn_layer_params(next(it), hidden_dim) for _ in range(num_layers)],
        "cross1": init_attn_layer_params(next(it), hidden_dim),
        "self1": init_attn_layer_params(next(it), hidden_dim),
        "merge_sam_mask_w": _xavier(next(it), (2 * hidden_dim + 1, hidden_dim)),
        "merge_w": _xavier(next(it), (2 * hidden_dim + 1, hidden_dim)),
        "spt_protos": jax.random.normal(next(it), (spt_num_query, hidden_dim), jnp.float32),
        "qry_protos": jax.random.normal(next(it), (num_queries, hidden_dim), jnp.float32),
    }
    return params


# ---------------------------------------------------------------------------
# Main
# ---------------------------------------------------------------------------

if __name__ == "__main__":
    # Small config consistent with the module.
    bs, hidden_dim, H, W = 2, 32, 8, 8
    nheads, num_layers = 4, 3
    num_queries, spt_num_query = 8, 8
    cfg = {"nheads": nheads, "num_layers": num_layers,
           "num_queries": num_queries, "spt_num_query": spt_num_query,
           "concat_th": False}

    key = jax.random.PRNGKey(0)
    k_par, k_in = jax.random.split(key)
    params = init_params(k_par, hidden_dim, num_layers, num_queries, spt_num_query)

    ks = jax.random.split(k_in, 10)
    x_q = jax.random.normal(ks[0], (bs, hidden_dim, H, W), jnp.float32)
    x_s = jax.random.normal(ks[1], (bs, hidden_dim, H, W), jnp.float32)
    x_q_sam = jax.random.normal(ks[2], (bs, hidden_dim, H, W), jnp.float32)
    x_s_sam = jax.random.normal(ks[3], (bs, hidden_dim, H, W), jnp.float32)
    support_mask = (jax.random.uniform(ks[4], (bs, 1, H, W)) > 0.4).astype(jnp.float32)
    spt_prototype = jax.random.normal(ks[5], (bs, hidden_dim, 1, 1), jnp.float32)
    qry_res_feat_4 = jax.random.normal(ks[6], (bs, hidden_dim, H, W), jnp.float32)
    pseudo_mask = jax.random.uniform(ks[7], (bs, 1, H, W), jnp.float32)
    supp_feat_bin = jax.random.normal(ks[8], (bs, hidden_dim, H, W), jnp.float32)
    supp_feat_bin_sam = jax.random.normal(ks[9], (bs, hidden_dim, H, W), jnp.float32)

    fwd = jax.jit(functools.partial(transformer_decoder_forward, params, cfg))
    out, aux_list, aux_dict = fwd(x_q, x_s, x_q_sam, x_s_sam, support_mask,
                                  spt_prototype, qry_res_feat_4, pseudo_mask,
                                  supp_feat_bin, supp_feat_bin_sam)
    jax.block_until_ready(out)
    jax.block_until_ready(aux_list[1])
    jax.block_until_ready(aux_dict["pseudo_mask_loss"][0])
    assert out.shape == (bs, spt_num_query, hidden_dim)
    assert aux_list[1].shape == (bs, num_queries, H * W)
    print("KERNEL_OK")
</pallas_src>

<mosaic_0001>
module attributes {stable_mosaic.version = 11 : i64} {
  func.func @conv1x1_relu_kernel(%arg0: i32, %arg1: memref<128x64xbf16, #tpu.memory_space<vmem>>, %arg2: memref<128x1xf32, #tpu.memory_space<vmem>>, %arg3: memref<64x128xbf16, #tpu.memory_space<vmem>>, %arg4: memref<1x128xf32, #tpu.memory_space<vmem>>, %arg5: memref<128x128xbf16, #tpu.memory_space<vmem>>) attributes {dimension_semantics = [#tpu.dimension_semantics<parallel>], iteration_bounds = array<i64: 1>, scalar_prefetch = 0 : i64, scratch_operands = 0 : i64, tpu.core_type = #tpu.core_type<tc>, window_params = [{transform_indices = @transform_0, window_bounds = array<i64: 128, 64>}, {transform_indices = @transform_1, window_bounds = array<i64: 128, 1>}, {pipeline_mode = #tpu.pipeline_mode<synchronous>, transform_indices = @transform_2, window_bounds = array<i64: 64, 128>}, {pipeline_mode = #tpu.pipeline_mode<synchronous>, transform_indices = @transform_3, window_bounds = array<i64: 1, 128>}, {transform_indices = @transform_4, window_bounds = array<i64: 128, 128>}]} {
    %c0 = arith.constant 0 : index
    %c0_0 = arith.constant 0 : index
    %0 = vector.load %arg1[%c0, %c0_0] : memref<128x64xbf16, #tpu.memory_space<vmem>>, vector<128x64xbf16>
    %c0_1 = arith.constant 0 : index
    %c0_2 = arith.constant 0 : index
    %1 = vector.load %arg3[%c0_1, %c0_2] : memref<64x128xbf16, #tpu.memory_space<vmem>>, vector<64x128xbf16>
    %cst = arith.constant dense<0.000000e+00> : vector<128x128xf32>
    %2 = tpu.matmul %0, %1, %cst {dimension_numbers = #tpu.dot_dimension_numbers<[1], [0], [0], [1], [0, 0, 1, 1], [], []>} : vector<128x64xbf16>, vector<64x128xbf16>, vector<128x128xf32> -> vector<128x128xf32>
    %c0_3 = arith.constant 0 : index
    %c0_4 = arith.constant 0 : index
    %3 = vector.load %arg2[%c0_3, %c0_4] : memref<128x1xf32, #tpu.memory_space<vmem>>, vector<128x1xf32>
    %c0_5 = arith.constant 0 : index
    %c0_6 = arith.constant 0 : index
    %4 = vector.load %arg4[%c0_5, %c0_6] : memref<1x128xf32, #tpu.memory_space<vmem>>, vector<1x128xf32>
    %5 = vector.broadcast %3 : vector<128x1xf32> to vector<128x128xf32>
    %6 = vector.broadcast %4 : vector<1x128xf32> to vector<128x128xf32>
    %7 = arith.mulf %5, %6 : vector<128x128xf32>
    %8 = arith.addf %2, %7 : vector<128x128xf32>
    %cst_7 = arith.constant 0.000000e+00 : f32
    %9 = vector.broadcast %cst_7 : f32 to vector<128x128xf32>
    %10 = arith.maximumf %8, %9 : vector<128x128xf32>
    %11 = arith.truncf %10 : vector<128x128xf32> to vector<128x128xbf16>
    %c0_8 = arith.constant 0 : index
    %c0_9 = arith.constant 0 : index
    %12 = vector.load %arg5[%c0_8, %c0_9] : memref<128x128xbf16, #tpu.memory_space<vmem>>, vector<128x128xbf16>
    tpu.vector_store %arg5[%c0_8, %c0_9], %11 {strides = array<i32>} : memref<128x128xbf16, #tpu.memory_space<vmem>>, vector<128x128xbf16>,
    return
  }
  func.func @transform_0(%arg0: i32) -> (i32, i32) {
    %c0_i32 = arith.constant 0 : i32
    %c0_i32_0 = arith.constant 0 : i32
    return %arg0, %c0_i32 : i32, i32
  }
  func.func @transform_1(%arg0: i32) -> (i32, i32) {
    %c0_i32 = arith.constant 0 : i32
    %c0_i32_0 = arith.constant 0 : i32
    return %arg0, %c0_i32 : i32, i32
  }
  func.func @transform_2(%arg0: i32) -> (i32, i32) {
    %c0_i32 = arith.constant 0 : i32
    %c0_i32_0 = arith.constant 0 : i32
    %c0_i32_1 = arith.constant 0 : i32
    return %c0_i32, %c0_i32_0 : i32, i32
  }
  func.func @transform_3(%arg0: i32) -> (i32, i32) {
    %c0_i32 = arith.constant 0 : i32
    %c0_i32_0 = arith.constant 0 : i32
    %c0_i32_1 = arith.constant 0 : i32
    return %c0_i32, %c0_i32_0 : i32, i32
  }
  func.func @transform_4(%arg0: i32) -> (i32, i32) {
    %c0_i32 = arith.constant 0 : i32
    %c0_i32_0 = arith.constant 0 : i32
    return %arg0, %c0_i32 : i32, i32
  }
}

module attributes {stable_mosaic.version = 11 : i64} {
  func.func @mha_nomask_kernel(%arg0: i32, %arg1: memref<1x8x32xbf16, #tpu.memory_space<vmem>>, %arg2: memref<1x64x32xbf16, #tpu.memory_space<vmem>>, %arg3: memref<1x64x32xbf16, #tpu.memory_space<vmem>>, %arg4: memref<1x8x32xf32, #tpu.memory_space<vmem>>, %arg5: memref<32x32xbf16, #tpu.memory_space<vmem>>, %arg6: memref<32x32xbf16, #tpu.memory_space<vmem>>, %arg7: memref<32x32xbf16, #tpu.memory_space<vmem>>, %arg8: memref<1x32xf32, #tpu.memory_space<vmem>>, %arg9: memref<1x32xf32, #tpu.memory_space<vmem>>, %arg10: memref<1x32xf32, #tpu.memory_space<vmem>>, %arg11: memref<32x32xbf16, #tpu.memory_space<vmem>>, %arg12: memref<1x32xf32, #tpu.memory_space<vmem>>, %arg13: memref<1x32xf32, #tpu.memory_space<vmem>>, %arg14: memref<1x32xf32, #tpu.memory_space<vmem>>, %arg15: memref<1x8x32xf32, #tpu.memory_space<vmem>>, %arg16: memref<1x8x64xf32, #tpu.memory_space<vmem>>) attributes {dimension_semantics = [#tpu.dimension_semantics<parallel>], iteration_bounds = array<i64: 2>, scalar_prefetch = 0 : i64, scratch_operands = 0 : i64, tpu.core_type = #tpu.core_type<tc>, window_params = [{transform_indices = @transform_0, window_bounds = array<i64: 1, 8, 32>}, {transform_indices = @transform_1, window_bounds = array<i64: 1, 64, 32>}, {transform_indices = @transform_2, window_bounds = array<i64: 1, 64, 32>}, {transform_indices = @transform_3, window_bounds = array<i64: 1, 8, 32>}, {pipeline_mode = #tpu.pipeline_mode<synchronous>, transform_indices = @transform_4, window_bounds = array<i64: 32, 32>}, {pipeline_mode = #tpu.pipeline_mode<synchronous>, transform_indices = @transform_5, window_bounds = array<i64: 32, 32>}, {pipeline_mode = #tpu.pipeline_mode<synchronous>, transform_indices = @transform_6, window_bounds = array<i64: 32, 32>}, {pipeline_mode = #tpu.pipeline_mode<synchronous>, transform_indices = @transform_7, window_bounds = array<i64: 1, 32>}, {pipeline_mode = #tpu.pipeline_mode<synchronous>, transform_indices = @transform_8, window_bounds = array<i64: 1, 32>}, {pipeline_mode = #tpu.pipeline_mode<synchronous>, transform_indices = @transform_9, window_bounds = array<i64: 1, 32>}, {pipeline_mode = #tpu.pipeline_mode<synchronous>, transform_indices = @transform_10, window_bounds = array<i64: 32, 32>}, {pipeline_mode = #tpu.pipeline_mode<synchronous>, transform_indices = @transform_11, window_bounds = array<i64: 1, 32>}, {pipeline_mode = #tpu.pipeline_mode<synchronous>, transform_indices = @transform_12, window_bounds = array<i64: 1, 32>}, {pipeline_mode = #tpu.pipeline_mode<synchronous>, transform_indices = @transform_13, window_bounds = array<i64: 1, 32>}, {transform_indices = @transform_14, window_bounds = array<i64: 1, 8, 32>}, {transform_indices = @transform_15, window_bounds = array<i64: 1, 8, 64>}]} {
    %c0 = arith.constant 0 : index
    %c0_0 = arith.constant 0 : index
    %c0_1 = arith.constant 0 : index
    %0 = vector.load %arg1[%c0, %c0_0, %c0_1] : memref<1x8x32xbf16, #tpu.memory_space<vmem>>, vector<1x8x32xbf16>
    %1 = vector.shape_cast %0 : vector<1x8x32xbf16> to vector<8x32xbf16>
    %c0_2 = arith.constant 0 : index
    %c0_3 = arith.constant 0 : index
    %c0_4 = arith.constant 0 : index
    %2 = vector.load %arg2[%c0_2, %c0_3, %c0_4] : memref<1x64x32xbf16, #tpu.memory_space<vmem>>, vector<1x64x32xbf16>
    %3 = vector.shape_cast %2 : vector<1x64x32xbf16> to vector<64x32xbf16>
    %c0_5 = arith.constant 0 : index
    %c0_6 = arith.constant 0 : index
    %c0_7 = arith.constant 0 : index
    %4 = vector.load %arg3[%c0_5, %c0_6, %c0_7] : memref<1x64x32xbf16, #tpu.memory_space<vmem>>, vector<1x64x32xbf16>
    %5 = vector.shape_cast %4 : vector<1x64x32xbf16> to vector<64x32xbf16>
    %c0_8 = arith.constant 0 : index
    %c0_9 = arith.constant 0 : index
    %c0_10 = arith.constant 0 : index
    %6 = vector.load %arg4[%c0_8, %c0_9, %c0_10] : memref<1x8x32xf32, #tpu.memory_space<vmem>>, vector<1x8x32xf32>
    %7 = vector.shape_cast %6 : vector<1x8x32xf32> to vector<8x32xf32>
    %c0_11 = arith.constant 0 : index
    %c0_12 = arith.constant 0 : index
    %8 = vector.load %arg5[%c0_11, %c0_12] : memref<32x32xbf16, #tpu.memory_space<vmem>>, vector<32x32xbf16>
    %c0_13 = arith.constant 0 : index
    %c0_14 = arith.constant 0 : index
    %9 = vector.load %arg6[%c0_13, %c0_14] : memref<32x32xbf16, #tpu.memory_space<vmem>>, vector<32x32xbf16>
    %c0_15 = arith.constant 0 : index
    %c0_16 = arith.constant 0 : index
    %10 = vector.load %arg7[%c0_15, %c0_16] : memref<32x32xbf16, #tpu.memory_space<vmem>>, vector<32x32xbf16>
    %c0_17 = arith.constant 0 : index
    %c0_18 = arith.constant 0 : index
    %11 = vector.load %arg8[%c0_17, %c0_18] : memref<1x32xf32, #tpu.memory_space<vmem>>, vector<1x32xf32>
    %c0_19 = arith.constant 0 : index
    %c0_20 = arith.constant 0 : index
    %12 = vector.load %arg9[%c0_19, %c0_20] : memref<1x32xf32, #tpu.memory_space<vmem>>, vector<1x32xf32>
    %c0_21 = arith.constant 0 : index
    %c0_22 = arith.constant 0 : index
    %13 = vector.load %arg10[%c0_21, %c0_22] : memref<1x32xf32, #tpu.memory_space<vmem>>, vector<1x32xf32>
    %c0_23 = arith.constant 0 : index
    %c0_24 = arith.constant 0 : index
    %14 = vector.load %arg11[%c0_23, %c0_24] : memref<32x32xbf16, #tpu.memory_space<vmem>>, vector<32x32xbf16>
    %c0_25 = arith.constant 0 : index
    %c0_26 = arith.constant 0 : index
    %15 = vector.load %arg12[%c0_25, %c0_26] : memref<1x32xf32, #tpu.memory_space<vmem>>, vector<1x32xf32>
    %c0_27 = arith.constant 0 : index
    %c0_28 = arith.constant 0 : index
    %16 = vector.load %arg13[%c0_27, %c0_28] : memref<1x32xf32, #tpu.memory_space<vmem>>, vector<1x32xf32>
    %c0_29 = arith.constant 0 : index
    %c0_30 = arith.constant 0 : index
    %17 = vector.load %arg14[%c0_29, %c0_30] : memref<1x32xf32, #tpu.memory_space<vmem>>, vector<1x32xf32>
    %cst = arith.constant dense<0.000000e+00> : vector<8x32xf32>
    %18 = tpu.matmul %1, %8, %cst {dimension_numbers = #tpu.dot_dimension_numbers<[1], [0], [0], [1], [0, 0, 1, 1], [], []>} : vector<8x32xbf16>, vector<32x32xbf16>, vector<8x32xf32> -> vector<8x32xf32>
    %19 = vector.broadcast %11 : vector<1x32xf32> to vector<8x32xf32>
    %20 = arith.addf %18, %19 : vector<8x32xf32>
    %21 = arith.truncf %20 : vector<8x32xf32> to vector<8x32xbf16>
    %cst_31 = arith.constant dense<0.000000e+00> : vector<64x32xf32>
    %22 = tpu.matmul %3, %9, %cst_31 {dimension_numbers = #tpu.dot_dimension_numbers<[1], [0], [0], [1], [0, 0, 1, 1], [], []>} : vector<64x32xbf16>, vector<32x32xbf16>, vector<64x32xf32> -> vector<64x32xf32>
    %23 = vector.broadcast %12 : vector<1x32xf32> to vector<64x32xf32>
    %24 = arith.addf %22, %23 : vector<64x32xf32>
    %25 = arith.truncf %24 : vector<64x32xf32> to vector<64x32xbf16>
    %cst_32 = arith.constant dense<0.000000e+00> : vector<64x32xf32>
    %26 = tpu.matmul %5, %10, %cst_32 {dimension_numbers = #tpu.dot_dimension_numbers<[1], [0], [0], [1], [0, 0, 1, 1], [], []>} : vector<64x32xbf16>, vector<32x32xbf16>, vector<64x32xf32> -> vector<64x32xf32>
    %27 = vector.broadcast %13 : vector<1x32xf32> to vector<64x32xf32>
    %28 = arith.addf %26, %27 : vector<64x32xf32>
    %29 = arith.truncf %28 : vector<64x32xf32> to vector<64x32xbf16>
    %cst_33 = arith.constant 0.000000e+00 : f32
    %30 = vector.broadcast %cst_33 : f32 to vector<8x64xf32>
    %cst_34 = arith.constant 0.000000e+00 : f32
    %31 = vector.broadcast %cst_34 : f32 to vector<8x32xf32>
    %32 = vector.extract_strided_slice %21 {offsets = [0, 0], sizes = [8, 8], strides = [1, 1]} : vector<8x32xbf16> to vector<8x8xbf16>
    %33 = vector.extract_strided_slice %25 {offsets = [0, 0], sizes = [64, 8], strides = [1, 1]} : vector<64x32xbf16> to vector<64x8xbf16>
    %34 = vector.extract_strided_slice %29 {offsets = [0, 0], sizes = [64, 8], strides = [1, 1]} : vector<64x32xbf16> to vector<64x8xbf16>
    %cst_35 = arith.constant dense<0.000000e+00> : vector<8x64xf32>
    %35 = tpu.matmul %32, %33, %cst_35 {dimension_numbers = #tpu.dot_dimension_numbers<[1], [1], [0], [0], [0, 0, 1, 0], [], []>} : vector<8x8xbf16>, vector<64x8xbf16>, vector<8x64xf32> -> vector<8x64xf32>
    %cst_36 = arith.constant dense<0xFF800000> : vector<8xf32>
    %36 = vector.multi_reduction <maximumf>, %35, %cst_36 [1] : vector<8x64xf32> to vector<8xf32>
    %37 = vector.shape_cast %36 : vector<8xf32> to vector<8x1xf32>
    %38 = vector.broadcast %37 : vector<8x1xf32> to vector<8x64xf32>
    %39 = arith.subf %35, %38 : vector<8x64xf32>
    %40 = math.exp %39 : vector<8x64xf32>
    %cst_37 = arith.constant dense<0.000000e+00> : vector<8xf32>
    %41 = vector.multi_reduction <add>, %40, %cst_37 [1] : vector<8x64xf32> to vector<8xf32>
    %42 = vector.shape_cast %41 : vector<8xf32> to vector<8x1xf32>
    %43 = vector.broadcast %42 : vector<8x1xf32> to vector<8x64xf32>
    %44 = arith.divf %40, %43 : vector<8x64xf32>
    %45 = arith.addf %30, %44 : vector<8x64xf32>
    %46 = arith.truncf %44 : vector<8x64xf32> to vector<8x64xbf16>
    %cst_38 = arith.constant dense<0.000000e+00> : vector<8x8xf32>
    %47 = tpu.matmul %46, %34, %cst_38 {dimension_numbers = #tpu.dot_dimension_numbers<[1], [0], [0], [1], [0, 0, 1, 1], [], []>} : vector<8x64xbf16>, vector<64x8xbf16>, vector<8x8xf32> -> vector<8x8xf32>
    %48 = arith.truncf %47 : vector<8x8xf32> to vector<8x8xbf16>
    %49 = vector.extract_strided_slice %14 {offsets = [0, 0], sizes = [8, 32], strides = [1, 1]} : vector<32x32xbf16> to vector<8x32xbf16>
    %cst_39 = arith.constant dense<0.000000e+00> : vector<8x32xf32>
    %50 = tpu.matmul %48, %49, %cst_39 {dimension_numbers = #tpu.dot_dimension_numbers<[1], [0], [0], [1], [0, 0, 1, 1], [], []>} : vector<8x8xbf16>, vector<8x32xbf16>, vector<8x32xf32> -> vector<8x32xf32>
    %51 = arith.addf %31, %50 : vector<8x32xf32>
    %52 = vector.extract_strided_slice %21 {offsets = [0, 8], sizes = [8, 8], strides = [1, 1]} : vector<8x32xbf16> to vector<8x8xbf16>
    %53 = vector.extract_strided_slice %25 {offsets = [0, 8], sizes = [64, 8], strides = [1, 1]} : vector<64x32xbf16> to vector<64x8xbf16>
    %54 = vector.extract_strided_slice %29 {offsets = [0, 8], sizes = [64, 8], strides = [1, 1]} : vector<64x32xbf16> to vector<64x8xbf16>
    %cst_40 = arith.constant dense<0.000000e+00> : vector<8x64xf32>
    %55 = tpu.matmul %52, %53, %cst_40 {dimension_numbers = #tpu.dot_dimension_numbers<[1], [1], [0], [0], [0, 0, 1, 0], [], []>} : vector<8x8xbf16>, vector<64x8xbf16>, vector<8x64xf32> -> vector<8x64xf32>
    %cst_41 = arith.constant dense<0xFF800000> : vector<8xf32>
    %56 = vector.multi_reduction <maximumf>, %55, %cst_41 [1] : vector<8x64xf32> to vector<8xf32>
    %57 = vector.shape_cast %56 : vector<8xf32> to vector<8x1xf32>
    %58 = vector.broadcast %57 : vector<8x1xf32> to vector<8x64xf32>
    %59 = arith.subf %55, %58 : vector<8x64xf32>
    %60 = math.exp %59 : vector<8x64xf32>
    %cst_42 = arith.constant dense<0.000000e+00> : vector<8xf32>
    %61 = vector.multi_reduction <add>, %60, %cst_42 [1] : vector<8x64xf32> to vector<8xf32>
    %62 = vector.shape_cast %61 : vector<8xf32> to vector<8x1xf32>
    %63 = vector.broadcast %62 : vector<8x1xf32> to vector<8x64xf32>
    %64 = arith.divf %60, %63 : vector<8x64xf32>
    %65 = arith.addf %45, %64 : vector<8x64xf32>
    %66 = arith.truncf %64 : vector<8x64xf32> to vector<8x64xbf16>
    %cst_43 = arith.constant dense<0.000000e+00> : vector<8x8xf32>
    %67 = tpu.matmul %66, %54, %cst_43 {dimension_numbers = #tpu.dot_dimension_numbers<[1], [0], [0], [1], [0, 0, 1, 1], [], []>} : vector<8x64xbf16>, vector<64x8xbf16>, vector<8x8xf32> -> vector<8x8xf32>
    %68 = arith.truncf %67 : vector<8x8xf32> to vector<8x8xbf16>
    %69 = vector.extract_strided_slice %14 {offsets = [8, 0], sizes = [8, 32], strides = [1, 1]} : vector<32x32xbf16> to vector<8x32xbf16>
    %cst_44 = arith.constant dense<0.000000e+00> : vector<8x32xf32>
    %70 = tpu.matmul %68, %69, %cst_44 {dimension_numbers = #tpu.dot_dimension_numbers<[1], [0], [0], [1], [0, 0, 1, 1], [], []>} : vector<8x8xbf16>, vector<8x32xbf16>, vector<8x32xf32> -> vector<8x32xf32>
    %71 = arith.addf %51, %70 : vector<8x32xf32>
    %72 = vector.extract_strided_slice %21 {offsets = [0, 16], sizes = [8, 8], strides = [1, 1]} : vector<8x32xbf16> to vector<8x8xbf16>
    %73 = vector.extract_strided_slice %25 {offsets = [0, 16], sizes = [64, 8], strides = [1, 1]} : vector<64x32xbf16> to vector<64x8xbf16>
    %74 = vector.extract_strided_slice %29 {offsets = [0, 16], sizes = [64, 8], strides = [1, 1]} : vector<64x32xbf16> to vector<64x8xbf16>
    %cst_45 = arith.constant dense<0.000000e+00> : vector<8x64xf32>
    %75 = tpu.matmul %72, %73, %cst_45 {dimension_numbers = #tpu.dot_dimension_numbers<[1], [1], [0], [0], [0, 0, 1, 0], [], []>} : vector<8x8xbf16>, vector<64x8xbf16>, vector<8x64xf32> -> vector<8x64xf32>
    %cst_46 = arith.constant dense<0xFF800000> : vector<8xf32>
    %76 = vector.multi_reduction <maximumf>, %75, %cst_46 [1] : vector<8x64xf32> to vector<8xf32>
    %77 = vector.shape_cast %76 : vector<8xf32> to vector<8x1xf32>
    %78 = vector.broadcast %77 : vector<8x1xf32> to vector<8x64xf32>
    %79 = arith.subf %75, %78 : vector<8x64xf32>
    %80 = math.exp %79 : vector<8x64xf32>
    %cst_47 = arith.constant dense<0.000000e+00> : vector<8xf32>
    %81 = vector.multi_reduction <add>, %80, %cst_47 [1] : vector<8x64xf32> to vector<8xf32>
    %82 = vector.shape_cast %81 : vector<8xf32> to vector<8x1xf32>
    %83 = vector.broadcast %82 : vector<8x1xf32> to vector<8x64xf32>
    %84 = arith.divf %80, %83 : vector<8x64xf32>
    %85 = arith.addf %65, %84 : vector<8x64xf32>
    %86 = arith.truncf %84 : vector<8x64xf32> to vector<8x64xbf16>
    %cst_48 = arith.constant dense<0.000000e+00> : vector<8x8xf32>
    %87 = tpu.matmul %86, %74, %cst_48 {dimension_numbers = #tpu.dot_dimension_numbers<[1], [0], [0], [1], [0, 0, 1, 1], [], []>} : vector<8x64xbf16>, vector<64x8xbf16>, vector<8x8xf32> -> vector<8x8xf32>
    %88 = arith.truncf %87 : vector<8x8xf32> to vector<8x8xbf16>
    %89 = vector.extract_strided_slice %14 {offsets = [16, 0], sizes = [8, 32], strides = [1, 1]} : vector<32x32xbf16> to vector<8x32xbf16>
    %cst_49 = arith.constant dense<0.000000e+00> : vector<8x32xf32>
    %90 = tpu.matmul %88, %89, %cst_49 {dimension_numbers = #tpu.dot_dimension_numbers<[1], [0], [0], [1], [0, 0, 1, 1], [], []>} : vector<8x8xbf16>, vector<8x32xbf16>, vector<8x32xf32> -> vector<8x32xf32>
    %91 = arith.addf %71, %90 : vector<8x32xf32>
    %92 = vector.extract_strided_slice %21 {offsets = [0, 24], sizes = [8, 8], strides = [1, 1]} : vector<8x32xbf16> to vector<8x8xbf16>
    %93 = vector.extract_strided_slice %25 {offsets = [0, 24], sizes = [64, 8], strides = [1, 1]} : vector<64x32xbf16> to vector<64x8xbf16>
    %94 = vector.extract_strided_slice %29 {offsets = [0, 24], sizes = [64, 8], strides = [1, 1]} : vector<64x32xbf16> to vector<64x8xbf16>
    %cst_50 = arith.constant dense<0.000000e+00> : vector<8x64xf32>
    %95 = tpu.matmul %92, %93, %cst_50 {dimension_numbers = #tpu.dot_dimension_numbers<[1], [1], [0], [0], [0, 0, 1, 0], [], []>} : vector<8x8xbf16>, vector<64x8xbf16>, vector<8x64xf32> -> vector<8x64xf32>
    %cst_51 = arith.constant dense<0xFF800000> : vector<8xf32>
    %96 = vector.multi_reduction <maximumf>, %95, %cst_51 [1] : vector<8x64xf32> to vector<8xf32>
    %97 = vector.shape_cast %96 : vector<8xf32> to vector<8x1xf32>
    %98 = vector.broadcast %97 : vector<8x1xf32> to vector<8x64xf32>
    %99 = arith.subf %95, %98 : vector<8x64xf32>
    %100 = math.exp %99 : vector<8x64xf32>
    %cst_52 = arith.constant dense<0.000000e+00> : vector<8xf32>
    %101 = vector.multi_reduction <add>, %100, %cst_52 [1] : vector<8x64xf32> to vector<8xf32>
    %102 = vector.shape_cast %101 : vector<8xf32> to vector<8x1xf32>
    %103 = vector.broadcast %102 : vector<8x1xf32> to vector<8x64xf32>
    %104 = arith.divf %100, %103 : vector<8x64xf32>
    %105 = arith.addf %85, %104 : vector<8x64xf32>
    %106 = arith.truncf %104 : vector<8x64xf32> to vector<8x64xbf16>
    %cst_53 = arith.constant dense<0.000000e+00> : vector<8x8xf32>
    %107 = tpu.matmul %106, %94, %cst_53 {dimension_numbers = #tpu.dot_dimension_numbers<[1], [0], [0], [1], [0, 0, 1, 1], [], []>} : vector<8x64xbf16>, vector<64x8xbf16>, vector<8x8xf32> -> vector<8x8xf32>
    %108 = arith.truncf %107 : vector<8x8xf32> to vector<8x8xbf16>
    %109 = vector.extract_strided_slice %14 {offsets = [24, 0], sizes = [8, 32], strides = [1, 1]} : vector<32x32xbf16> to vector<8x32xbf16>
    %cst_54 = arith.constant dense<0.000000e+00> : vector<8x32xf32>
    %110 = tpu.matmul %108, %109, %cst_54 {dimension_numbers = #tpu.dot_dimension_numbers<[1], [0], [0], [1], [0, 0, 1, 1], [], []>} : vector<8x8xbf16>, vector<8x32xbf16>, vector<8x32xf32> -> vector<8x32xf32>
    %111 = arith.addf %91, %110 : vector<8x32xf32>
    %cst_55 = arith.constant 2.500000e-01 : f32
    %112 = vector.broadcast %cst_55 : f32 to vector<8x64xf32>
    %113 = arith.mulf %105, %112 : vector<8x64xf32>
    %c0_56 = arith.constant 0 : index
    %c0_57 = arith.constant 0 : index
    %c0_58 = arith.constant 0 : index
    %114 = vector.load %arg16[%c0_56, %c0_57, %c0_58] : memref<1x8x64xf32, #tpu.memory_space<vmem>>, vector<1x8x64xf32>
    %115 = vector.shape_cast %114 : vector<1x8x64xf32> to vector<8x64xf32>
    %116 = vector.shape_cast %113 : vector<8x64xf32> to vector<1x8x64xf32>
    tpu.vector_store %arg16[%c0_56, %c0_57, %c0_58], %116 {strides = array<i32>} : memref<1x8x64xf32, #tpu.memory_space<vmem>>, vector<1x8x64xf32>,
    %117 = arith.addf %7, %111 : vector<8x32xf32>
    %118 = vector.broadcast %15 : vector<1x32xf32> to vector<8x32xf32>
    %119 = arith.addf %117, %118 : vector<8x32xf32>
    %cst_59 = arith.constant dense<0.000000e+00> : vector<8xf32>
    %120 = vector.multi_reduction <add>, %119, %cst_59 [1] : vector<8x32xf32> to vector<8xf32>
    %121 = vector.shape_cast %120 : vector<8xf32> to vector<8x1xf32>
    %cst_60 = arith.constant 3.200000e+01 : f32
    %122 = vector.broadcast %cst_60 : f32 to vector<8x1xf32>
    %123 = arith.divf %121, %122 : vector<8x1xf32>
    %124 = vector.broadcast %123 : vector<8x1xf32> to vector<8x32xf32>
    %125 = arith.subf %119, %124 : vector<8x32xf32>
    %126 = arith.mulf %125, %125 : vector<8x32xf32>
    %cst_61 = arith.constant dense<0.000000e+00> : vector<8xf32>
    %127 = vector.multi_reduction <add>, %126, %cst_61 [1] : vector<8x32xf32> to vector<8xf32>
    %128 = vector.shape_cast %127 : vector<8xf32> to vector<8x1xf32>
    %cst_62 = arith.constant 3.200000e+01 : f32
    %129 = vector.broadcast %cst_62 : f32 to vector<8x1xf32>
    %130 = arith.divf %128, %129 : vector<8x1xf32>
    %131 = vector.broadcast %123 : vector<8x1xf32> to vector<8x32xf32>
    %132 = arith.subf %119, %131 : vector<8x32xf32>
    %cst_63 = arith.constant 9.99999974E-6 : f32
    %133 = vector.broadcast %cst_63 : f32 to vector<8x1xf32>
    %134 = arith.addf %130, %133 : vector<8x1xf32>
    %135 = math.rsqrt %134 : vector<8x1xf32>
    %136 = vector.broadcast %135 : vector<8x1xf32> to vector<8x32xf32>
    %137 = arith.mulf %132, %136 : vector<8x32xf32>
    %138 = vector.broadcast %16 : vector<1x32xf32> to vector<8x32xf32>
    %139 = arith.mulf %137, %138 : vector<8x32xf32>
    %140 = vector.broadcast %17 : vector<1x32xf32> to vector<8x32xf32>
    %141 = arith.addf %139, %140 : vector<8x32xf32>
    %c0_64 = arith.constant 0 : index
    %c0_65 = arith.constant 0 : index
    %c0_66 = arith.constant 0 : index
    %142 = vector.load %arg15[%c0_64, %c0_65, %c0_66] : memref<1x8x32xf32, #tpu.memory_space<vmem>>, vector<1x8x32xf32>
    %143 = vector.shape_cast %142 : vector<1x8x32xf32> to vector<8x32xf32>
    %144 = vector.shape_cast %141 : vector<8x32xf32> to vector<1x8x32xf32>
    tpu.vector_store %arg15[%c0_64, %c0_65, %c0_66], %144 {strides = array<i32>} : memref<1x8x32xf32, #tpu.memory_space<vmem>>, vector<1x8x32xf32>,
    return
  }
  func.func @transform_0(%arg0: i32) -> (i32, i32, i32) {
    %c0_i32 = arith.constant 0 : i32
    %c0_i32_0 = arith.constant 0 : i32
    %c0_i32_1 = arith.constant 0 : i32
    return %arg0, %c0_i32, %c0_i32_0 : i32, i32, i32
  }
  func.func @transform_1(%arg0: i32) -> (i32, i32, i32) {
    %c0_i32 = arith.constant 0 : i32
    %c0_i32_0 = arith.constant 0 : i32
    %c0_i32_1 = arith.constant 0 : i32
    return %arg0, %c0_i32, %c0_i32_0 : i32, i32, i32
  }
  func.func @transform_2(%arg0: i32) -> (i32, i32, i32) {
    %c0_i32 = arith.constant 0 : i32
    %c0_i32_0 = arith.constant 0 : i32
    %c0_i32_1 = arith.constant 0 : i32
    return %arg0, %c0_i32, %c0_i32_0 : i32, i32, i32
  }
  func.func @transform_3(%arg0: i32) -> (i32, i32, i32) {
    %c0_i32 = arith.constant 0 : i32
    %c0_i32_0 = arith.constant 0 : i32
    %c0_i32_1 = arith.constant 0 : i32
    return %arg0, %c0_i32, %c0_i32_0 : i32, i32, i32
  }
  func.func @transform_4(%arg0: i32) -> (i32, i32) {
    %c0_i32 = arith.constant 0 : i32
    %c0_i32_0 = arith.constant 0 : i32
    %c0_i32_1 = arith.constant 0 : i32
    return %c0_i32, %c0_i32_0 : i32, i32
  }
  func.func @transform_5(%arg0: i32) -> (i32, i32) {
    %c0_i32 = arith.constant 0 : i32
    %c0_i32_0 = arith.constant 0 : i32
    %c0_i32_1 = arith.constant 0 : i32
    return %c0_i32, %c0_i32_0 : i32, i32
  }
  func.func @transform_6(%arg0: i32) -> (i32, i32) {
    %c0_i32 = arith.constant 0 : i32
    %c0_i32_0 = arith.constant 0 : i32
    %c0_i32_1 = arith.constant 0 : i32
    return %c0_i32, %c0_i32_0 : i32, i32
  }
  func.func @transform_7(%arg0: i32) -> (i32, i32) {
    %c0_i32 = arith.constant 0 : i32
    %c0_i32_0 = arith.constant 0 : i32
    %c0_i32_1 = arith.constant 0 : i32
    return %c0_i32, %c0_i32_0 : i32, i32
  }
  func.func @transform_8(%arg0: i32) -> (i32, i32) {
    %c0_i32 = arith.constant 0 : i32
    %c0_i32_0 = arith.constant 0 : i32
    %c0_i32_1 = arith.constant 0 : i32
    return %c0_i32, %c0_i32_0 : i32, i32
  }
  func.func @transform_9(%arg0: i32) -> (i32, i32) {
    %c0_i32 = arith.constant 0 : i32
    %c0_i32_0 = arith.constant 0 : i32
    %c0_i32_1 = arith.constant 0 : i32
    return %c0_i32, %c0_i32_0 : i32, i32
  }
  func.func @transform_10(%arg0: i32) -> (i32, i32) {
    %c0_i32 = arith.constant 0 : i32
    %c0_i32_0 = arith.constant 0 : i32
    %c0_i32_1 = arith.constant 0 : i32
    return %c0_i32, %c0_i32_0 : i32, i32
  }
  func.func @transform_11(%arg0: i32) -> (i32, i32) {
    %c0_i32 = arith.constant 0 : i32
    %c0_i32_0 = arith.constant 0 : i32
    %c0_i32_1 = arith.constant 0 : i32
    return %c0_i32, %c0_i32_0 : i32, i32
  }
  func.func @transform_12(%arg0: i32) -> (i32, i32) {
    %c0_i32 = arith.constant 0 : i32
    %c0_i32_0 = arith.constant 0 : i32
    %c0_i32_1 = arith.constant 0 : i32
    return %c0_i32, %c0_i32_0 : i32, i32
  }
  func.func @transform_13(%arg0: i32) -> (i32, i32) {
    %c0_i32 = arith.constant 0 : i32
    %c0_i32_0 = arith.constant 0 : i32
    %c0_i32_1 = arith.constant 0 : i32
    return %c0_i32, %c0_i32_0 : i32, i32
  }
  func.func @transform_14(%arg0: i32) -> (i32, i32, i32) {
    %c0_i32 = arith.constant 0 : i32
    %c0_i32_0 = arith.constant 0 : i32
    %c0_i32_1 = arith.constant 0 : i32
    return %arg0, %c0_i32, %c0_i32_0 : i32, i32, i32
  }
  func.func @transform_15(%arg0: i32) -> (i32, i32, i32) {
    %c0_i32 = arith.constant 0 : i32
    %c0_i32_0 = arith.constant 0 : i32
    %c0_i32_1 = arith.constant 0 : i32
    return %arg0, %c0_i32, %c0_i32_0 : i32, i32, i32
  }
}

module attributes {stable_mosaic.version = 11 : i64} {
  func.func @mha_masked_kernel(%arg0: i32, %arg1: memref<1x8x32xbf16, #tpu.memory_space<vmem>>, %arg2: memref<1x64x32xbf16, #tpu.memory_space<vmem>>, %arg3: memref<1x64x32xbf16, #tpu.memory_space<vmem>>, %arg4: memref<1x8x32xf32, #tpu.memory_space<vmem>>, %arg5: memref<1x1x64xf32, #tpu.memory_space<vmem>>, %arg6: memref<32x32xbf16, #tpu.memory_space<vmem>>, %arg7: memref<32x32xbf16, #tpu.memory_space<vmem>>, %arg8: memref<32x32xbf16, #tpu.memory_space<vmem>>, %arg9: memref<1x32xf32, #tpu.memory_space<vmem>>, %arg10: memref<1x32xf32, #tpu.memory_space<vmem>>, %arg11: memref<1x32xf32, #tpu.memory_space<vmem>>, %arg12: memref<32x32xbf16, #tpu.memory_space<vmem>>, %arg13: memref<1x32xf32, #tpu.memory_space<vmem>>, %arg14: memref<1x32xf32, #tpu.memory_space<vmem>>, %arg15: memref<1x32xf32, #tpu.memory_space<vmem>>, %arg16: memref<1x8x32xf32, #tpu.memory_space<vmem>>, %arg17: memref<1x8x64xf32, #tpu.memory_space<vmem>>) attributes {dimension_semantics = [#tpu.dimension_semantics<parallel>], iteration_bounds = array<i64: 2>, scalar_prefetch = 0 : i64, scratch_operands = 0 : i64, tpu.core_type = #tpu.core_type<tc>, window_params = [{transform_indices = @transform_0, window_bounds = array<i64: 1, 8, 32>}, {transform_indices = @transform_1, window_bounds = array<i64: 1, 64, 32>}, {transform_indices = @transform_2, window_bounds = array<i64: 1, 64, 32>}, {transform_indices = @transform_3, window_bounds = array<i64: 1, 8, 32>}, {transform_indices = @transform_4, window_bounds = array<i64: 1, 1, 64>}, {pipeline_mode = #tpu.pipeline_mode<synchronous>, transform_indices = @transform_5, window_bounds = array<i64: 32, 32>}, {pipeline_mode = #tpu.pipeline_mode<synchronous>, transform_indices = @transform_6, window_bounds = array<i64: 32, 32>}, {pipeline_mode = #tpu.pipeline_mode<synchronous>, transform_indices = @transform_7, window_bounds = array<i64: 32, 32>}, {pipeline_mode = #tpu.pipeline_mode<synchronous>, transform_indices = @transform_8, window_bounds = array<i64: 1, 32>}, {pipeline_mode = #tpu.pipeline_mode<synchronous>, transform_indices = @transform_9, window_bounds = array<i64: 1, 32>}, {pipeline_mode = #tpu.pipeline_mode<synchronous>, transform_indices = @transform_10, window_bounds = array<i64: 1, 32>}, {pipeline_mode = #tpu.pipeline_mode<synchronous>, transform_indices = @transform_11, window_bounds = array<i64: 32, 32>}, {pipeline_mode = #tpu.pipeline_mode<synchronous>, transform_indices = @transform_12, window_bounds = array<i64: 1, 32>}, {pipeline_mode = #tpu.pipeline_mode<synchronous>, transform_indices = @transform_13, window_bounds = array<i64: 1, 32>}, {pipeline_mode = #tpu.pipeline_mode<synchronous>, transform_indices = @transform_14, window_bounds = array<i64: 1, 32>}, {transform_indices = @transform_15, window_bounds = array<i64: 1, 8, 32>}, {transform_indices = @transform_16, window_bounds = array<i64: 1, 8, 64>}]} {
    %c0 = arith.constant 0 : index
    %c0_0 = arith.constant 0 : index
    %c0_1 = arith.constant 0 : index
    %0 = vector.load %arg1[%c0, %c0_0, %c0_1] : memref<1x8x32xbf16, #tpu.memory_space<vmem>>, vector<1x8x32xbf16>
    %1 = vector.shape_cast %0 : vector<1x8x32xbf16> to vector<8x32xbf16>
    %c0_2 = arith.constant 0 : index
    %c0_3 = arith.constant 0 : index
    %c0_4 = arith.constant 0 : index
    %2 = vector.load %arg2[%c0_2, %c0_3, %c0_4] : memref<1x64x32xbf16, #tpu.memory_space<vmem>>, vector<1x64x32xbf16>
    %3 = vector.shape_cast %2 : vector<1x64x32xbf16> to vector<64x32xbf16>
    %c0_5 = arith.constant 0 : index
    %c0_6 = arith.constant 0 : index
    %c0_7 = arith.constant 0 : index
    %4 = vector.load %arg3[%c0_5, %c0_6, %c0_7] : memref<1x64x32xbf16, #tpu.memory_space<vmem>>, vector<1x64x32xbf16>
    %5 = vector.shape_cast %4 : vector<1x64x32xbf16> to vector<64x32xbf16>
    %c0_8 = arith.constant 0 : index
    %c0_9 = arith.constant 0 : index
    %c0_10 = arith.constant 0 : index
    %6 = vector.load %arg4[%c0_8, %c0_9, %c0_10] : memref<1x8x32xf32, #tpu.memory_space<vmem>>, vector<1x8x32xf32>
    %7 = vector.shape_cast %6 : vector<1x8x32xf32> to vector<8x32xf32>
    %c0_11 = arith.constant 0 : index
    %c0_12 = arith.constant 0 : index
    %c0_13 = arith.constant 0 : index
    %8 = vector.load %arg5[%c0_11, %c0_12, %c0_13] : memref<1x1x64xf32, #tpu.memory_space<vmem>>, vector<1x1x64xf32>
    %9 = vector.shape_cast %8 : vector<1x1x64xf32> to vector<1x64xf32>
    %c0_14 = arith.constant 0 : index
    %c0_15 = arith.constant 0 : index
    %10 = vector.load %arg6[%c0_14, %c0_15] : memref<32x32xbf16, #tpu.memory_space<vmem>>, vector<32x32xbf16>
    %c0_16 = arith.constant 0 : index
    %c0_17 = arith.constant 0 : index
    %11 = vector.load %arg7[%c0_16, %c0_17] : memref<32x32xbf16, #tpu.memory_space<vmem>>, vector<32x32xbf16>
    %c0_18 = arith.constant 0 : index
    %c0_19 = arith.constant 0 : index
    %12 = vector.load %arg8[%c0_18, %c0_19] : memref<32x32xbf16, #tpu.memory_space<vmem>>, vector<32x32xbf16>
    %c0_20 = arith.constant 0 : index
    %c0_21 = arith.constant 0 : index
    %13 = vector.load %arg9[%c0_20, %c0_21] : memref<1x32xf32, #tpu.memory_space<vmem>>, vector<1x32xf32>
    %c0_22 = arith.constant 0 : index
    %c0_23 = arith.constant 0 : index
    %14 = vector.load %arg10[%c0_22, %c0_23] : memref<1x32xf32, #tpu.memory_space<vmem>>, vector<1x32xf32>
    %c0_24 = arith.constant 0 : index
    %c0_25 = arith.constant 0 : index
    %15 = vector.load %arg11[%c0_24, %c0_25] : memref<1x32xf32, #tpu.memory_space<vmem>>, vector<1x32xf32>
    %c0_26 = arith.constant 0 : index
    %c0_27 = arith.constant 0 : index
    %16 = vector.load %arg12[%c0_26, %c0_27] : memref<32x32xbf16, #tpu.memory_space<vmem>>, vector<32x32xbf16>
    %c0_28 = arith.constant 0 : index
    %c0_29 = arith.constant 0 : index
    %17 = vector.load %arg13[%c0_28, %c0_29] : memref<1x32xf32, #tpu.memory_space<vmem>>, vector<1x32xf32>
    %c0_30 = arith.constant 0 : index
    %c0_31 = arith.constant 0 : index
    %18 = vector.load %arg14[%c0_30, %c0_31] : memref<1x32xf32, #tpu.memory_space<vmem>>, vector<1x32xf32>
    %c0_32 = arith.constant 0 : index
    %c0_33 = arith.constant 0 : index
    %19 = vector.load %arg15[%c0_32, %c0_33] : memref<1x32xf32, #tpu.memory_space<vmem>>, vector<1x32xf32>
    %cst = arith.constant dense<0.000000e+00> : vector<8x32xf32>
    %20 = tpu.matmul %1, %10, %cst {dimension_numbers = #tpu.dot_dimension_numbers<[1], [0], [0], [1], [0, 0, 1, 1], [], []>} : vector<8x32xbf16>, vector<32x32xbf16>, vector<8x32xf32> -> vector<8x32xf32>
    %21 = vector.broadcast %13 : vector<1x32xf32> to vector<8x32xf32>
    %22 = arith.addf %20, %21 : vector<8x32xf32>
    %23 = arith.truncf %22 : vector<8x32xf32> to vector<8x32xbf16>
    %cst_34 = arith.constant dense<0.000000e+00> : vector<64x32xf32>
    %24 = tpu.matmul %3, %11, %cst_34 {dimension_numbers = #tpu.dot_dimension_numbers<[1], [0], [0], [1], [0, 0, 1, 1], [], []>} : vector<64x32xbf16>, vector<32x32xbf16>, vector<64x32xf32> -> vector<64x32xf32>
    %25 = vector.broadcast %14 : vector<1x32xf32> to vector<64x32xf32>
    %26 = arith.addf %24, %25 : vector<64x32xf32>
    %27 = arith.truncf %26 : vector<64x32xf32> to vector<64x32xbf16>
    %cst_35 = arith.constant dense<0.000000e+00> : vector<64x32xf32>
    %28 = tpu.matmul %5, %12, %cst_35 {dimension_numbers = #tpu.dot_dimension_numbers<[1], [0], [0], [1], [0, 0, 1, 1], [], []>} : vector<64x32xbf16>, vector<32x32xbf16>, vector<64x32xf32> -> vector<64x32xf32>
    %29 = vector.broadcast %15 : vector<1x32xf32> to vector<64x32xf32>
    %30 = arith.addf %28, %29 : vector<64x32xf32>
    %31 = arith.truncf %30 : vector<64x32xf32> to vector<64x32xbf16>
    %cst_36 = arith.constant 0.000000e+00 : f32
    %32 = vector.broadcast %cst_36 : f32 to vector<8x64xf32>
    %cst_37 = arith.constant 0.000000e+00 : f32
    %33 = vector.broadcast %cst_37 : f32 to vector<8x32xf32>
    %34 = vector.extract_strided_slice %23 {offsets = [0, 0], sizes = [8, 8], strides = [1, 1]} : vector<8x32xbf16> to vector<8x8xbf16>
    %35 = vector.extract_strided_slice %27 {offsets = [0, 0], sizes = [64, 8], strides = [1, 1]} : vector<64x32xbf16> to vector<64x8xbf16>
    %36 = vector.extract_strided_slice %31 {offsets = [0, 0], sizes = [64, 8], strides = [1, 1]} : vector<64x32xbf16> to vector<64x8xbf16>
    %cst_38 = arith.constant dense<0.000000e+00> : vector<8x64xf32>
    %37 = tpu.matmul %34, %35, %cst_38 {dimension_numbers = #tpu.dot_dimension_numbers<[1], [1], [0], [0], [0, 0, 1, 0], [], []>} : vector<8x8xbf16>, vector<64x8xbf16>, vector<8x64xf32> -> vector<8x64xf32>
    %38 = vector.broadcast %9 : vector<1x64xf32> to vector<8x64xf32>
    %39 = arith.addf %37, %38 : vector<8x64xf32>
    %cst_39 = arith.constant dense<0xFF800000> : vector<8xf32>
    %40 = vector.multi_reduction <maximumf>, %39, %cst_39 [1] : vector<8x64xf32> to vector<8xf32>
    %41 = vector.shape_cast %40 : vector<8xf32> to vector<8x1xf32>
    %42 = vector.broadcast %41 : vector<8x1xf32> to vector<8x64xf32>
    %43 = arith.subf %39, %42 : vector<8x64xf32>
    %44 = math.exp %43 : vector<8x64xf32>
    %cst_40 = arith.constant dense<0.000000e+00> : vector<8xf32>
    %45 = vector.multi_reduction <add>, %44, %cst_40 [1] : vector<8x64xf32> to vector<8xf32>
    %46 = vector.shape_cast %45 : vector<8xf32> to vector<8x1xf32>
    %47 = vector.broadcast %46 : vector<8x1xf32> to vector<8x64xf32>
    %48 = arith.divf %44, %47 : vector<8x64xf32>
    %49 = arith.addf %32, %48 : vector<8x64xf32>
    %50 = arith.truncf %48 : vector<8x64xf32> to vector<8x64xbf16>
    %cst_41 = arith.constant dense<0.000000e+00> : vector<8x8xf32>
    %51 = tpu.matmul %50, %36, %cst_41 {dimension_numbers = #tpu.dot_dimension_numbers<[1], [0], [0], [1], [0, 0, 1, 1], [], []>} : vector<8x64xbf16>, vector<64x8xbf16>, vector<8x8xf32> -> vector<8x8xf32>
    %52 = arith.truncf %51 : vector<8x8xf32> to vector<8x8xbf16>
    %53 = vector.extract_strided_slice %16 {offsets = [0, 0], sizes = [8, 32], strides = [1, 1]} : vector<32x32xbf16> to vector<8x32xbf16>
    %cst_42 = arith.constant dense<0.000000e+00> : vector<8x32xf32>
    %54 = tpu.matmul %52, %53, %cst_42 {dimension_numbers = #tpu.dot_dimension_numbers<[1], [0], [0], [1], [0, 0, 1, 1], [], []>} : vector<8x8xbf16>, vector<8x32xbf16>, vector<8x32xf32> -> vector<8x32xf32>
    %55 = arith.addf %33, %54 : vector<8x32xf32>
    %56 = vector.extract_strided_slice %23 {offsets = [0, 8], sizes = [8, 8], strides = [1, 1]} : vector<8x32xbf16> to vector<8x8xbf16>
    %57 = vector.extract_strided_slice %27 {offsets = [0, 8], sizes = [64, 8], strides = [1, 1]} : vector<64x32xbf16> to vector<64x8xbf16>
    %58 = vector.extract_strided_slice %31 {offsets = [0, 8], sizes = [64, 8], strides = [1, 1]} : vector<64x32xbf16> to vector<64x8xbf16>
    %cst_43 = arith.constant dense<0.000000e+00> : vector<8x64xf32>
    %59 = tpu.matmul %56, %57, %cst_43 {dimension_numbers = #tpu.dot_dimension_numbers<[1], [1], [0], [0], [0, 0, 1, 0], [], []>} : vector<8x8xbf16>, vector<64x8xbf16>, vector<8x64xf32> -> vector<8x64xf32>
    %60 = vector.broadcast %9 : vector<1x64xf32> to vector<8x64xf32>
    %61 = arith.addf %59, %60 : vector<8x64xf32>
    %cst_44 = arith.constant dense<0xFF800000> : vector<8xf32>
    %62 = vector.multi_reduction <maximumf>, %61, %cst_44 [1] : vector<8x64xf32> to vector<8xf32>
    %63 = vector.shape_cast %62 : vector<8xf32> to vector<8x1xf32>
    %64 = vector.broadcast %63 : vector<8x1xf32> to vector<8x64xf32>
    %65 = arith.subf %61, %64 : vector<8x64xf32>
    %66 = math.exp %65 : vector<8x64xf32>
    %cst_45 = arith.constant dense<0.000000e+00> : vector<8xf32>
    %67 = vector.multi_reduction <add>, %66, %cst_45 [1] : vector<8x64xf32> to vector<8xf32>
    %68 = vector.shape_cast %67 : vector<8xf32> to vector<8x1xf32>
    %69 = vector.broadcast %68 : vector<8x1xf32> to vector<8x64xf32>
    %70 = arith.divf %66, %69 : vector<8x64xf32>
    %71 = arith.addf %49, %70 : vector<8x64xf32>
    %72 = arith.truncf %70 : vector<8x64xf32> to vector<8x64xbf16>
    %cst_46 = arith.constant dense<0.000000e+00> : vector<8x8xf32>
    %73 = tpu.matmul %72, %58, %cst_46 {dimension_numbers = #tpu.dot_dimension_numbers<[1], [0], [0], [1], [0, 0, 1, 1], [], []>} : vector<8x64xbf16>, vector<64x8xbf16>, vector<8x8xf32> -> vector<8x8xf32>
    %74 = arith.truncf %73 : vector<8x8xf32> to vector<8x8xbf16>
    %75 = vector.extract_strided_slice %16 {offsets = [8, 0], sizes = [8, 32], strides = [1, 1]} : vector<32x32xbf16> to vector<8x32xbf16>
    %cst_47 = arith.constant dense<0.000000e+00> : vector<8x32xf32>
    %76 = tpu.matmul %74, %75, %cst_47 {dimension_numbers = #tpu.dot_dimension_numbers<[1], [0], [0], [1], [0, 0, 1, 1], [], []>} : vector<8x8xbf16>, vector<8x32xbf16>, vector<8x32xf32> -> vector<8x32xf32>
    %77 = arith.addf %55, %76 : vector<8x32xf32>
    %78 = vector.extract_strided_slice %23 {offsets = [0, 16], sizes = [8, 8], strides = [1, 1]} : vector<8x32xbf16> to vector<8x8xbf16>
    %79 = vector.extract_strided_slice %27 {offsets = [0, 16], sizes = [64, 8], strides = [1, 1]} : vector<64x32xbf16> to vector<64x8xbf16>
    %80 = vector.extract_strided_slice %31 {offsets = [0, 16], sizes = [64, 8], strides = [1, 1]} : vector<64x32xbf16> to vector<64x8xbf16>
    %cst_48 = arith.constant dense<0.000000e+00> : vector<8x64xf32>
    %81 = tpu.matmul %78, %79, %cst_48 {dimension_numbers = #tpu.dot_dimension_numbers<[1], [1], [0], [0], [0, 0, 1, 0], [], []>} : vector<8x8xbf16>, vector<64x8xbf16>, vector<8x64xf32> -> vector<8x64xf32>
    %82 = vector.broadcast %9 : vector<1x64xf32> to vector<8x64xf32>
    %83 = arith.addf %81, %82 : vector<8x64xf32>
    %cst_49 = arith.constant dense<0xFF800000> : vector<8xf32>
    %84 = vector.multi_reduction <maximumf>, %83, %cst_49 [1] : vector<8x64xf32> to vector<8xf32>
    %85 = vector.shape_cast %84 : vector<8xf32> to vector<8x1xf32>
    %86 = vector.broadcast %85 : vector<8x1xf32> to vector<8x64xf32>
    %87 = arith.subf %83, %86 : vector<8x64xf32>
    %88 = math.exp %87 : vector<8x64xf32>
    %cst_50 = arith.constant dense<0.000000e+00> : vector<8xf32>
    %89 = vector.multi_reduction <add>, %88, %cst_50 [1] : vector<8x64xf32> to vector<8xf32>
    %90 = vector.shape_cast %89 : vector<8xf32> to vector<8x1xf32>
    %91 = vector.broadcast %90 : vector<8x1xf32> to vector<8x64xf32>
    %92 = arith.divf %88, %91 : vector<8x64xf32>
    %93 = arith.addf %71, %92 : vector<8x64xf32>
    %94 = arith.truncf %92 : vector<8x64xf32> to vector<8x64xbf16>
    %cst_51 = arith.constant dense<0.000000e+00> : vector<8x8xf32>
    %95 = tpu.matmul %94, %80, %cst_51 {dimension_numbers = #tpu.dot_dimension_numbers<[1], [0], [0], [1], [0, 0, 1, 1], [], []>} : vector<8x64xbf16>, vector<64x8xbf16>, vector<8x8xf32> -> vector<8x8xf32>
    %96 = arith.truncf %95 : vector<8x8xf32> to vector<8x8xbf16>
    %97 = vector.extract_strided_slice %16 {offsets = [16, 0], sizes = [8, 32], strides = [1, 1]} : vector<32x32xbf16> to vector<8x32xbf16>
    %cst_52 = arith.constant dense<0.000000e+00> : vector<8x32xf32>
    %98 = tpu.matmul %96, %97, %cst_52 {dimension_numbers = #tpu.dot_dimension_numbers<[1], [0], [0], [1], [0, 0, 1, 1], [], []>} : vector<8x8xbf16>, vector<8x32xbf16>, vector<8x32xf32> -> vector<8x32xf32>
    %99 = arith.addf %77, %98 : vector<8x32xf32>
    %100 = vector.extract_strided_slice %23 {offsets = [0, 24], sizes = [8, 8], strides = [1, 1]} : vector<8x32xbf16> to vector<8x8xbf16>
    %101 = vector.extract_strided_slice %27 {offsets = [0, 24], sizes = [64, 8], strides = [1, 1]} : vector<64x32xbf16> to vector<64x8xbf16>
    %102 = vector.extract_strided_slice %31 {offsets = [0, 24], sizes = [64, 8], strides = [1, 1]} : vector<64x32xbf16> to vector<64x8xbf16>
    %cst_53 = arith.constant dense<0.000000e+00> : vector<8x64xf32>
    %103 = tpu.matmul %100, %101, %cst_53 {dimension_numbers = #tpu.dot_dimension_numbers<[1], [1], [0], [0], [0, 0, 1, 0], [], []>} : vector<8x8xbf16>, vector<64x8xbf16>, vector<8x64xf32> -> vector<8x64xf32>
    %104 = vector.broadcast %9 : vector<1x64xf32> to vector<8x64xf32>
    %105 = arith.addf %103, %104 : vector<8x64xf32>
    %cst_54 = arith.constant dense<0xFF800000> : vector<8xf32>
    %106 = vector.multi_reduction <maximumf>, %105, %cst_54 [1] : vector<8x64xf32> to vector<8xf32>
    %107 = vector.shape_cast %106 : vector<8xf32> to vector<8x1xf32>
    %108 = vector.broadcast %107 : vector<8x1xf32> to vector<8x64xf32>
    %109 = arith.subf %105, %108 : vector<8x64xf32>
    %110 = math.exp %109 : vector<8x64xf32>
    %cst_55 = arith.constant dense<0.000000e+00> : vector<8xf32>
    %111 = vector.multi_reduction <add>, %110, %cst_55 [1] : vector<8x64xf32> to vector<8xf32>
    %112 = vector.shape_cast %111 : vector<8xf32> to vector<8x1xf32>
    %113 = vector.broadcast %112 : vector<8x1xf32> to vector<8x64xf32>
    %114 = arith.divf %110, %113 : vector<8x64xf32>
    %115 = arith.addf %93, %114 : vector<8x64xf32>
    %116 = arith.truncf %114 : vector<8x64xf32> to vector<8x64xbf16>
    %cst_56 = arith.constant dense<0.000000e+00> : vector<8x8xf32>
    %117 = tpu.matmul %116, %102, %cst_56 {dimension_numbers = #tpu.dot_dimension_numbers<[1], [0], [0], [1], [0, 0, 1, 1], [], []>} : vector<8x64xbf16>, vector<64x8xbf16>, vector<8x8xf32> -> vector<8x8xf32>
    %118 = arith.truncf %117 : vector<8x8xf32> to vector<8x8xbf16>
    %119 = vector.extract_strided_slice %16 {offsets = [24, 0], sizes = [8, 32], strides = [1, 1]} : vector<32x32xbf16> to vector<8x32xbf16>
    %cst_57 = arith.constant dense<0.000000e+00> : vector<8x32xf32>
    %120 = tpu.matmul %118, %119, %cst_57 {dimension_numbers = #tpu.dot_dimension_numbers<[1], [0], [0], [1], [0, 0, 1, 1], [], []>} : vector<8x8xbf16>, vector<8x32xbf16>, vector<8x32xf32> -> vector<8x32xf32>
    %121 = arith.addf %99, %120 : vector<8x32xf32>
    %cst_58 = arith.constant 2.500000e-01 : f32
    %122 = vector.broadcast %cst_58 : f32 to vector<8x64xf32>
    %123 = arith.mulf %115, %122 : vector<8x64xf32>
    %c0_59 = arith.constant 0 : index
    %c0_60 = arith.constant 0 : index
    %c0_61 = arith.constant 0 : index
    %124 = vector.load %arg17[%c0_59, %c0_60, %c0_61] : memref<1x8x64xf32, #tpu.memory_space<vmem>>, vector<1x8x64xf32>
    %125 = vector.shape_cast %124 : vector<1x8x64xf32> to vector<8x64xf32>
    %126 = vector.shape_cast %123 : vector<8x64xf32> to vector<1x8x64xf32>
    tpu.vector_store %arg17[%c0_59, %c0_60, %c0_61], %126 {strides = array<i32>} : memref<1x8x64xf32, #tpu.memory_space<vmem>>, vector<1x8x64xf32>,
    %127 = arith.addf %7, %121 : vector<8x32xf32>
    %128 = vector.broadcast %17 : vector<1x32xf32> to vector<8x32xf32>
    %129 = arith.addf %127, %128 : vector<8x32xf32>
    %cst_62 = arith.constant dense<0.000000e+00> : vector<8xf32>
    %130 = vector.multi_reduction <add>, %129, %cst_62 [1] : vector<8x32xf32> to vector<8xf32>
    %131 = vector.shape_cast %130 : vector<8xf32> to vector<8x1xf32>
    %cst_63 = arith.constant 3.200000e+01 : f32
    %132 = vector.broadcast %cst_63 : f32 to vector<8x1xf32>
    %133 = arith.divf %131, %132 : vector<8x1xf32>
    %134 = vector.broadcast %133 : vector<8x1xf32> to vector<8x32xf32>
    %135 = arith.subf %129, %134 : vector<8x32xf32>
    %136 = arith.mulf %135, %135 : vector<8x32xf32>
    %cst_64 = arith.constant dense<0.000000e+00> : vector<8xf32>
    %137 = vector.multi_reduction <add>, %136, %cst_64 [1] : vector<8x32xf32> to vector<8xf32>
    %138 = vector.shape_cast %137 : vector<8xf32> to vector<8x1xf32>
    %cst_65 = arith.constant 3.200000e+01 : f32
    %139 = vector.broadcast %cst_65 : f32 to vector<8x1xf32>
    %140 = arith.divf %138, %139 : vector<8x1xf32>
    %141 = vector.broadcast %133 : vector<8x1xf32> to vector<8x32xf32>
    %142 = arith.subf %129, %141 : vector<8x32xf32>
    %cst_66 = arith.constant 9.99999974E-6 : f32
    %143 = vector.broadcast %cst_66 : f32 to vector<8x1xf32>
    %144 = arith.addf %140, %143 : vector<8x1xf32>
    %145 = math.rsqrt %144 : vector<8x1xf32>
    %146 = vector.broadcast %145 : vector<8x1xf32> to vector<8x32xf32>
    %147 = arith.mulf %142, %146 : vector<8x32xf32>
    %148 = vector.broadcast %18 : vector<1x32xf32> to vector<8x32xf32>
    %149 = arith.mulf %147, %148 : vector<8x32xf32>
    %150 = vector.broadcast %19 : vector<1x32xf32> to vector<8x32xf32>
    %151 = arith.addf %149, %150 : vector<8x32xf32>
    %c0_67 = arith.constant 0 : index
    %c0_68 = arith.constant 0 : index
    %c0_69 = arith.constant 0 : index
    %152 = vector.load %arg16[%c0_67, %c0_68, %c0_69] : memref<1x8x32xf32, #tpu.memory_space<vmem>>, vector<1x8x32xf32>
    %153 = vector.shape_cast %152 : vector<1x8x32xf32> to vector<8x32xf32>
    %154 = vector.shape_cast %151 : vector<8x32xf32> to vector<1x8x32xf32>
    tpu.vector_store %arg16[%c0_67, %c0_68, %c0_69], %154 {strides = array<i32>} : memref<1x8x32xf32, #tpu.memory_space<vmem>>, vector<1x8x32xf32>,
    return
  }
  func.func @transform_0(%arg0: i32) -> (i32, i32, i32) {
    %c0_i32 = arith.constant 0 : i32
    %c0_i32_0 = arith.constant 0 : i32
    %c0_i32_1 = arith.constant 0 : i32
    return %arg0, %c0_i32, %c0_i32_0 : i32, i32, i32
  }
  func.func @transform_1(%arg0: i32) -> (i32, i32, i32) {
    %c0_i32 = arith.constant 0 : i32
    %c0_i32_0 = arith.constant 0 : i32
    %c0_i32_1 = arith.constant 0 : i32
    return %arg0, %c0_i32, %c0_i32_0 : i32, i32, i32
  }
  func.func @transform_2(%arg0: i32) -> (i32, i32, i32) {
    %c0_i32 = arith.constant 0 : i32
    %c0_i32_0 = arith.constant 0 : i32
    %c0_i32_1 = arith.constant 0 : i32
    return %arg0, %c0_i32, %c0_i32_0 : i32, i32, i32
  }
  func.func @transform_3(%arg0: i32) -> (i32, i32, i32) {
    %c0_i32 = arith.constant 0 : i32
    %c0_i32_0 = arith.constant 0 : i32
    %c0_i32_1 = arith.constant 0 : i32
    return %arg0, %c0_i32, %c0_i32_0 : i32, i32, i32
  }
  func.func @transform_4(%arg0: i32) -> (i32, i32, i32) {
    %c0_i32 = arith.constant 0 : i32
    %c0_i32_0 = arith.constant 0 : i32
    %c0_i32_1 = arith.constant 0 : i32
    return %arg0, %c0_i32, %c0_i32_0 : i32, i32, i32
  }
  func.func @transform_5(%arg0: i32) -> (i32, i32) {
    %c0_i32 = arith.constant 0 : i32
    %c0_i32_0 = arith.constant 0 : i32
    %c0_i32_1 = arith.constant 0 : i32
    return %c0_i32, %c0_i32_0 : i32, i32
  }
  func.func @transform_6(%arg0: i32) -> (i32, i32) {
    %c0_i32 = arith.constant 0 : i32
    %c0_i32_0 = arith.constant 0 : i32
    %c0_i32_1 = arith.constant 0 : i32
    return %c0_i32, %c0_i32_0 : i32, i32
  }
  func.func @transform_7(%arg0: i32) -> (i32, i32) {
    %c0_i32 = arith.constant 0 : i32
    %c0_i32_0 = arith.constant 0 : i32
    %c0_i32_1 = arith.constant 0 : i32
    return %c0_i32, %c0_i32_0 : i32, i32
  }
  func.func @transform_8(%arg0: i32) -> (i32, i32) {
    %c0_i32 = arith.constant 0 : i32
    %c0_i32_0 = arith.constant 0 : i32
    %c0_i32_1 = arith.constant 0 : i32
    return %c0_i32, %c0_i32_0 : i32, i32
  }
  func.func @transform_9(%arg0: i32) -> (i32, i32) {
    %c0_i32 = arith.constant 0 : i32
    %c0_i32_0 = arith.constant 0 : i32
    %c0_i32_1 = arith.constant 0 : i32
    return %c0_i32, %c0_i32_0 : i32, i32
  }
  func.func @transform_10(%arg0: i32) -> (i32, i32) {
    %c0_i32 = arith.constant 0 : i32
    %c0_i32_0 = arith.constant 0 : i32
    %c0_i32_1 = arith.constant 0 : i32
    return %c0_i32, %c0_i32_0 : i32, i32
  }
  func.func @transform_11(%arg0: i32) -> (i32, i32) {
    %c0_i32 = arith.constant 0 : i32
    %c0_i32_0 = arith.constant 0 : i32
    %c0_i32_1 = arith.constant 0 : i32
    return %c0_i32, %c0_i32_0 : i32, i32
  }
  func.func @transform_12(%arg0: i32) -> (i32, i32) {
    %c0_i32 = arith.constant 0 : i32
    %c0_i32_0 = arith.constant 0 : i32
    %c0_i32_1 = arith.constant 0 : i32
    return %c0_i32, %c0_i32_0 : i32, i32
  }
  func.func @transform_13(%arg0: i32) -> (i32, i32) {
    %c0_i32 = arith.constant 0 : i32
    %c0_i32_0 = arith.constant 0 : i32
    %c0_i32_1 = arith.constant 0 : i32
    return %c0_i32, %c0_i32_0 : i32, i32
  }
  func.func @transform_14(%arg0: i32) -> (i32, i32) {
    %c0_i32 = arith.constant 0 : i32
    %c0_i32_0 = arith.constant 0 : i32
    %c0_i32_1 = arith.constant 0 : i32
    return %c0_i32, %c0_i32_0 : i32, i32
  }
  func.func @transform_15(%arg0: i32) -> (i32, i32, i32) {
    %c0_i32 = arith.constant 0 : i32
    %c0_i32_0 = arith.constant 0 : i32
    %c0_i32_1 = arith.constant 0 : i32
    return %arg0, %c0_i32, %c0_i32_0 : i32, i32, i32
  }
  func.func @transform_16(%arg0: i32) -> (i32, i32, i32) {
    %c0_i32 = arith.constant 0 : i32
    %c0_i32_0 = arith.constant 0 : i32
    %c0_i32_1 = arith.constant 0 : i32
    return %arg0, %c0_i32, %c0_i32_0 : i32, i32, i32
  }
}

module attributes {stable_mosaic.version = 11 : i64} {
  func.func @mha_nomask_kernel(%arg0: i32, %arg1: memref<1x8x32xbf16, #tpu.memory_space<vmem>>, %arg2: memref<1x8x32xbf16, #tpu.memory_space<vmem>>, %arg3: memref<1x8x32xbf16, #tpu.memory_space<vmem>>, %arg4: memref<1x8x32xf32, #tpu.memory_space<vmem>>, %arg5: memref<32x32xbf16, #tpu.memory_space<vmem>>, %arg6: memref<32x32xbf16, #tpu.memory_space<vmem>>, %arg7: memref<32x32xbf16, #tpu.memory_space<vmem>>, %arg8: memref<1x32xf32, #tpu.memory_space<vmem>>, %arg9: memref<1x32xf32, #tpu.memory_space<vmem>>, %arg10: memref<1x32xf32, #tpu.memory_space<vmem>>, %arg11: memref<32x32xbf16, #tpu.memory_space<vmem>>, %arg12: memref<1x32xf32, #tpu.memory_space<vmem>>, %arg13: memref<1x32xf32, #tpu.memory_space<vmem>>, %arg14: memref<1x32xf32, #tpu.memory_space<vmem>>, %arg15: memref<1x8x32xf32, #tpu.memory_space<vmem>>, %arg16: memref<1x8x8xf32, #tpu.memory_space<vmem>>) attributes {dimension_semantics = [#tpu.dimension_semantics<parallel>], iteration_bounds = array<i64: 2>, scalar_prefetch = 0 : i64, scratch_operands = 0 : i64, tpu.core_type = #tpu.core_type<tc>, window_params = [{transform_indices = @transform_0, window_bounds = array<i64: 1, 8, 32>}, {transform_indices = @transform_1, window_bounds = array<i64: 1, 8, 32>}, {transform_indices = @transform_2, window_bounds = array<i64: 1, 8, 32>}, {transform_indices = @transform_3, window_bounds = array<i64: 1, 8, 32>}, {pipeline_mode = #tpu.pipeline_mode<synchronous>, transform_indices = @transform_4, window_bounds = array<i64: 32, 32>}, {pipeline_mode = #tpu.pipeline_mode<synchronous>, transform_indices = @transform_5, window_bounds = array<i64: 32, 32>}, {pipeline_mode = #tpu.pipeline_mode<synchronous>, transform_indices = @transform_6, window_bounds = array<i64: 32, 32>}, {pipeline_mode = #tpu.pipeline_mode<synchronous>, transform_indices = @transform_7, window_bounds = array<i64: 1, 32>}, {pipeline_mode = #tpu.pipeline_mode<synchronous>, transform_indices = @transform_8, window_bounds = array<i64: 1, 32>}, {pipeline_mode = #tpu.pipeline_mode<synchronous>, transform_indices = @transform_9, window_bounds = array<i64: 1, 32>}, {pipeline_mode = #tpu.pipeline_mode<synchronous>, transform_indices = @transform_10, window_bounds = array<i64: 32, 32>}, {pipeline_mode = #tpu.pipeline_mode<synchronous>, transform_indices = @transform_11, window_bounds = array<i64: 1, 32>}, {pipeline_mode = #tpu.pipeline_mode<synchronous>, transform_indices = @transform_12, window_bounds = array<i64: 1, 32>}, {pipeline_mode = #tpu.pipeline_mode<synchronous>, transform_indices = @transform_13, window_bounds = array<i64: 1, 32>}, {transform_indices = @transform_14, window_bounds = array<i64: 1, 8, 32>}, {transform_indices = @transform_15, window_bounds = array<i64: 1, 8, 8>}]} {
    %c0 = arith.constant 0 : index
    %c0_0 = arith.constant 0 : index
    %c0_1 = arith.constant 0 : index
    %0 = vector.load %arg1[%c0, %c0_0, %c0_1] : memref<1x8x32xbf16, #tpu.memory_space<vmem>>, vector<1x8x32xbf16>
    %1 = vector.shape_cast %0 : vector<1x8x32xbf16> to vector<8x32xbf16>
    %c0_2 = arith.constant 0 : index
    %c0_3 = arith.constant 0 : index
    %c0_4 = arith.constant 0 : index
    %2 = vector.load %arg2[%c0_2, %c0_3, %c0_4] : memref<1x8x32xbf16, #tpu.memory_space<vmem>>, vector<1x8x32xbf16>
    %3 = vector.shape_cast %2 : vector<1x8x32xbf16> to vector<8x32xbf16>
    %c0_5 = arith.constant 0 : index
    %c0_6 = arith.constant 0 : index
    %c0_7 = arith.constant 0 : index
    %4 = vector.load %arg3[%c0_5, %c0_6, %c0_7] : memref<1x8x32xbf16, #tpu.memory_space<vmem>>, vector<1x8x32xbf16>
    %5 = vector.shape_cast %4 : vector<1x8x32xbf16> to vector<8x32xbf16>
    %c0_8 = arith.constant 0 : index
    %c0_9 = arith.constant 0 : index
    %c0_10 = arith.constant 0 : index
    %6 = vector.load %arg4[%c0_8, %c0_9, %c0_10] : memref<1x8x32xf32, #tpu.memory_space<vmem>>, vector<1x8x32xf32>
    %7 = vector.shape_cast %6 : vector<1x8x32xf32> to vector<8x32xf32>
    %c0_11 = arith.constant 0 : index
    %c0_12 = arith.constant 0 : index
    %8 = vector.load %arg5[%c0_11, %c0_12] : memref<32x32xbf16, #tpu.memory_space<vmem>>, vector<32x32xbf16>
    %c0_13 = arith.constant 0 : index
    %c0_14 = arith.constant 0 : index
    %9 = vector.load %arg6[%c0_13, %c0_14] : memref<32x32xbf16, #tpu.memory_space<vmem>>, vector<32x32xbf16>
    %c0_15 = arith.constant 0 : index
    %c0_16 = arith.constant 0 : index
    %10 = vector.load %arg7[%c0_15, %c0_16] : memref<32x32xbf16, #tpu.memory_space<vmem>>, vector<32x32xbf16>
    %c0_17 = arith.constant 0 : index
    %c0_18 = arith.constant 0 : index
    %11 = vector.load %arg8[%c0_17, %c0_18] : memref<1x32xf32, #tpu.memory_space<vmem>>, vector<1x32xf32>
    %c0_19 = arith.constant 0 : index
    %c0_20 = arith.constant 0 : index
    %12 = vector.load %arg9[%c0_19, %c0_20] : memref<1x32xf32, #tpu.memory_space<vmem>>, vector<1x32xf32>
    %c0_21 = arith.constant 0 : index
    %c0_22 = arith.constant 0 : index
    %13 = vector.load %arg10[%c0_21, %c0_22] : memref<1x32xf32, #tpu.memory_space<vmem>>, vector<1x32xf32>
    %c0_23 = arith.constant 0 : index
    %c0_24 = arith.constant 0 : index
    %14 = vector.load %arg11[%c0_23, %c0_24] : memref<32x32xbf16, #tpu.memory_space<vmem>>, vector<32x32xbf16>
    %c0_25 = arith.constant 0 : index
    %c0_26 = arith.constant 0 : index
    %15 = vector.load %arg12[%c0_25, %c0_26] : memref<1x32xf32, #tpu.memory_space<vmem>>, vector<1x32xf32>
    %c0_27 = arith.constant 0 : index
    %c0_28 = arith.constant 0 : index
    %16 = vector.load %arg13[%c0_27, %c0_28] : memref<1x32xf32, #tpu.memory_space<vmem>>, vector<1x32xf32>
    %c0_29 = arith.constant 0 : index
    %c0_30 = arith.constant 0 : index
    %17 = vector.load %arg14[%c0_29, %c0_30] : memref<1x32xf32, #tpu.memory_space<vmem>>, vector<1x32xf32>
    %cst = arith.constant dense<0.000000e+00> : vector<8x32xf32>
    %18 = tpu.matmul %1, %8, %cst {dimension_numbers = #tpu.dot_dimension_numbers<[1], [0], [0], [1], [0, 0, 1, 1], [], []>} : vector<8x32xbf16>, vector<32x32xbf16>, vector<8x32xf32> -> vector<8x32xf32>
    %19 = vector.broadcast %11 : vector<1x32xf32> to vector<8x32xf32>
    %20 = arith.addf %18, %19 : vector<8x32xf32>
    %21 = arith.truncf %20 : vector<8x32xf32> to vector<8x32xbf16>
    %cst_31 = arith.constant dense<0.000000e+00> : vector<8x32xf32>
    %22 = tpu.matmul %3, %9, %cst_31 {dimension_numbers = #tpu.dot_dimension_numbers<[1], [0], [0], [1], [0, 0, 1, 1], [], []>} : vector<8x32xbf16>, vector<32x32xbf16>, vector<8x32xf32> -> vector<8x32xf32>
    %23 = vector.broadcast %12 : vector<1x32xf32> to vector<8x32xf32>
    %24 = arith.addf %22, %23 : vector<8x32xf32>
    %25 = arith.truncf %24 : vector<8x32xf32> to vector<8x32xbf16>
    %cst_32 = arith.constant dense<0.000000e+00> : vector<8x32xf32>
    %26 = tpu.matmul %5, %10, %cst_32 {dimension_numbers = #tpu.dot_dimension_numbers<[1], [0], [0], [1], [0, 0, 1, 1], [], []>} : vector<8x32xbf16>, vector<32x32xbf16>, vector<8x32xf32> -> vector<8x32xf32>
    %27 = vector.broadcast %13 : vector<1x32xf32> to vector<8x32xf32>
    %28 = arith.addf %26, %27 : vector<8x32xf32>
    %29 = arith.truncf %28 : vector<8x32xf32> to vector<8x32xbf16>
    %cst_33 = arith.constant 0.000000e+00 : f32
    %30 = vector.broadcast %cst_33 : f32 to vector<8x8xf32>
    %cst_34 = arith.constant 0.000000e+00 : f32
    %31 = vector.broadcast %cst_34 : f32 to vector<8x32xf32>
    %32 = vector.extract_strided_slice %21 {offsets = [0, 0], sizes = [8, 8], strides = [1, 1]} : vector<8x32xbf16> to vector<8x8xbf16>
    %33 = vector.extract_strided_slice %25 {offsets = [0, 0], sizes = [8, 8], strides = [1, 1]} : vector<8x32xbf16> to vector<8x8xbf16>
    %34 = vector.extract_strided_slice %29 {offsets = [0, 0], sizes = [8, 8], strides = [1, 1]} : vector<8x32xbf16> to vector<8x8xbf16>
    %cst_35 = arith.constant dense<0.000000e+00> : vector<8x8xf32>
    %35 = tpu.matmul %32, %33, %cst_35 {dimension_numbers = #tpu.dot_dimension_numbers<[1], [1], [0], [0], [0, 0, 1, 0], [], []>} : vector<8x8xbf16>, vector<8x8xbf16>, vector<8x8xf32> -> vector<8x8xf32>
    %cst_36 = arith.constant dense<0xFF800000> : vector<8xf32>
    %36 = vector.multi_reduction <maximumf>, %35, %cst_36 [1] : vector<8x8xf32> to vector<8xf32>
    %37 = vector.shape_cast %36 : vector<8xf32> to vector<8x1xf32>
    %38 = vector.broadcast %37 : vector<8x1xf32> to vector<8x8xf32>
    %39 = arith.subf %35, %38 : vector<8x8xf32>
    %40 = math.exp %39 : vector<8x8xf32>
    %cst_37 = arith.constant dense<0.000000e+00> : vector<8xf32>
    %41 = vector.multi_reduction <add>, %40, %cst_37 [1] : vector<8x8xf32> to vector<8xf32>
    %42 = vector.shape_cast %41 : vector<8xf32> to vector<8x1xf32>
    %43 = vector.broadcast %42 : vector<8x1xf32> to vector<8x8xf32>
    %44 = arith.divf %40, %43 : vector<8x8xf32>
    %45 = arith.addf %30, %44 : vector<8x8xf32>
    %46 = arith.truncf %44 : vector<8x8xf32> to vector<8x8xbf16>
    %cst_38 = arith.constant dense<0.000000e+00> : vector<8x8xf32>
    %47 = tpu.matmul %46, %34, %cst_38 {dimension_numbers = #tpu.dot_dimension_numbers<[1], [0], [0], [1], [0, 0, 1, 1], [], []>} : vector<8x8xbf16>, vector<8x8xbf16>, vector<8x8xf32> -> vector<8x8xf32>
    %48 = arith.truncf %47 : vector<8x8xf32> to vector<8x8xbf16>
    %49 = vector.extract_strided_slice %14 {offsets = [0, 0], sizes = [8, 32], strides = [1, 1]} : vector<32x32xbf16> to vector<8x32xbf16>
    %cst_39 = arith.constant dense<0.000000e+00> : vector<8x32xf32>
    %50 = tpu.matmul %48, %49, %cst_39 {dimension_numbers = #tpu.dot_dimension_numbers<[1], [0], [0], [1], [0, 0, 1, 1], [], []>} : vector<8x8xbf16>, vector<8x32xbf16>, vector<8x32xf32> -> vector<8x32xf32>
    %51 = arith.addf %31, %50 : vector<8x32xf32>
    %52 = vector.extract_strided_slice %21 {offsets = [0, 8], sizes = [8, 8], strides = [1, 1]} : vector<8x32xbf16> to vector<8x8xbf16>
    %53 = vector.extract_strided_slice %25 {offsets = [0, 8], sizes = [8, 8], strides = [1, 1]} : vector<8x32xbf16> to vector<8x8xbf16>
    %54 = vector.extract_strided_slice %29 {offsets = [0, 8], sizes = [8, 8], strides = [1, 1]} : vector<8x32xbf16> to vector<8x8xbf16>
    %cst_40 = arith.constant dense<0.000000e+00> : vector<8x8xf32>
    %55 = tpu.matmul %52, %53, %cst_40 {dimension_numbers = #tpu.dot_dimension_numbers<[1], [1], [0], [0], [0, 0, 1, 0], [], []>} : vector<8x8xbf16>, vector<8x8xbf16>, vector<8x8xf32> -> vector<8x8xf32>
    %cst_41 = arith.constant dense<0xFF800000> : vector<8xf32>
    %56 = vector.multi_reduction <maximumf>, %55, %cst_41 [1] : vector<8x8xf32> to vector<8xf32>
    %57 = vector.shape_cast %56 : vector<8xf32> to vector<8x1xf32>
    %58 = vector.broadcast %57 : vector<8x1xf32> to vector<8x8xf32>
    %59 = arith.subf %55, %58 : vector<8x8xf32>
    %60 = math.exp %59 : vector<8x8xf32>
    %cst_42 = arith.constant dense<0.000000e+00> : vector<8xf32>
    %61 = vector.multi_reduction <add>, %60, %cst_42 [1] : vector<8x8xf32> to vector<8xf32>
    %62 = vector.shape_cast %61 : vector<8xf32> to vector<8x1xf32>
    %63 = vector.broadcast %62 : vector<8x1xf32> to vector<8x8xf32>
    %64 = arith.divf %60, %63 : vector<8x8xf32>
    %65 = arith.addf %45, %64 : vector<8x8xf32>
    %66 = arith.truncf %64 : vector<8x8xf32> to vector<8x8xbf16>
    %cst_43 = arith.constant dense<0.000000e+00> : vector<8x8xf32>
    %67 = tpu.matmul %66, %54, %cst_43 {dimension_numbers = #tpu.dot_dimension_numbers<[1], [0], [0], [1], [0, 0, 1, 1], [], []>} : vector<8x8xbf16>, vector<8x8xbf16>, vector<8x8xf32> -> vector<8x8xf32>
    %68 = arith.truncf %67 : vector<8x8xf32> to vector<8x8xbf16>
    %69 = vector.extract_strided_slice %14 {offsets = [8, 0], sizes = [8, 32], strides = [1, 1]} : vector<32x32xbf16> to vector<8x32xbf16>
    %cst_44 = arith.constant dense<0.000000e+00> : vector<8x32xf32>
    %70 = tpu.matmul %68, %69, %cst_44 {dimension_numbers = #tpu.dot_dimension_numbers<[1], [0], [0], [1], [0, 0, 1, 1], [], []>} : vector<8x8xbf16>, vector<8x32xbf16>, vector<8x32xf32> -> vector<8x32xf32>
    %71 = arith.addf %51, %70 : vector<8x32xf32>
    %72 = vector.extract_strided_slice %21 {offsets = [0, 16], sizes = [8, 8], strides = [1, 1]} : vector<8x32xbf16> to vector<8x8xbf16>
    %73 = vector.extract_strided_slice %25 {offsets = [0, 16], sizes = [8, 8], strides = [1, 1]} : vector<8x32xbf16> to vector<8x8xbf16>
    %74 = vector.extract_strided_slice %29 {offsets = [0, 16], sizes = [8, 8], strides = [1, 1]} : vector<8x32xbf16> to vector<8x8xbf16>
    %cst_45 = arith.constant dense<0.000000e+00> : vector<8x8xf32>
    %75 = tpu.matmul %72, %73, %cst_45 {dimension_numbers = #tpu.dot_dimension_numbers<[1], [1], [0], [0], [0, 0, 1, 0], [], []>} : vector<8x8xbf16>, vector<8x8xbf16>, vector<8x8xf32> -> vector<8x8xf32>
    %cst_46 = arith.constant dense<0xFF800000> : vector<8xf32>
    %76 = vector.multi_reduction <maximumf>, %75, %cst_46 [1] : vector<8x8xf32> to vector<8xf32>
    %77 = vector.shape_cast %76 : vector<8xf32> to vector<8x1xf32>
    %78 = vector.broadcast %77 : vector<8x1xf32> to vector<8x8xf32>
    %79 = arith.subf %75, %78 : vector<8x8xf32>
    %80 = math.exp %79 : vector<8x8xf32>
    %cst_47 = arith.constant dense<0.000000e+00> : vector<8xf32>
    %81 = vector.multi_reduction <add>, %80, %cst_47 [1] : vector<8x8xf32> to vector<8xf32>
    %82 = vector.shape_cast %81 : vector<8xf32> to vector<8x1xf32>
    %83 = vector.broadcast %82 : vector<8x1xf32> to vector<8x8xf32>
    %84 = arith.divf %80, %83 : vector<8x8xf32>
    %85 = arith.addf %65, %84 : vector<8x8xf32>
    %86 = arith.truncf %84 : vector<8x8xf32> to vector<8x8xbf16>
    %cst_48 = arith.constant dense<0.000000e+00> : vector<8x8xf32>
    %87 = tpu.matmul %86, %74, %cst_48 {dimension_numbers = #tpu.dot_dimension_numbers<[1], [0], [0], [1], [0, 0, 1, 1], [], []>} : vector<8x8xbf16>, vector<8x8xbf16>, vector<8x8xf32> -> vector<8x8xf32>
    %88 = arith.truncf %87 : vector<8x8xf32> to vector<8x8xbf16>
    %89 = vector.extract_strided_slice %14 {offsets = [16, 0], sizes = [8, 32], strides = [1, 1]} : vector<32x32xbf16> to vector<8x32xbf16>
    %cst_49 = arith.constant dense<0.000000e+00> : vector<8x32xf32>
    %90 = tpu.matmul %88, %89, %cst_49 {dimension_numbers = #tpu.dot_dimension_numbers<[1], [0], [0], [1], [0, 0, 1, 1], [], []>} : vector<8x8xbf16>, vector<8x32xbf16>, vector<8x32xf32> -> vector<8x32xf32>
    %91 = arith.addf %71, %90 : vector<8x32xf32>
    %92 = vector.extract_strided_slice %21 {offsets = [0, 24], sizes = [8, 8], strides = [1, 1]} : vector<8x32xbf16> to vector<8x8xbf16>
    %93 = vector.extract_strided_slice %25 {offsets = [0, 24], sizes = [8, 8], strides = [1, 1]} : vector<8x32xbf16> to vector<8x8xbf16>
    %94 = vector.extract_strided_slice %29 {offsets = [0, 24], sizes = [8, 8], strides = [1, 1]} : vector<8x32xbf16> to vector<8x8xbf16>
    %cst_50 = arith.constant dense<0.000000e+00> : vector<8x8xf32>
    %95 = tpu.matmul %92, %93, %cst_50 {dimension_numbers = #tpu.dot_dimension_numbers<[1], [1], [0], [0], [0, 0, 1, 0], [], []>} : vector<8x8xbf16>, vector<8x8xbf16>, vector<8x8xf32> -> vector<8x8xf32>
    %cst_51 = arith.constant dense<0xFF800000> : vector<8xf32>
    %96 = vector.multi_reduction <maximumf>, %95, %cst_51 [1] : vector<8x8xf32> to vector<8xf32>
    %97 = vector.shape_cast %96 : vector<8xf32> to vector<8x1xf32>
    %98 = vector.broadcast %97 : vector<8x1xf32> to vector<8x8xf32>
    %99 = arith.subf %95, %98 : vector<8x8xf32>
    %100 = math.exp %99 : vector<8x8xf32>
    %cst_52 = arith.constant dense<0.000000e+00> : vector<8xf32>
    %101 = vector.multi_reduction <add>, %100, %cst_52 [1] : vector<8x8xf32> to vector<8xf32>
    %102 = vector.shape_cast %101 : vector<8xf32> to vector<8x1xf32>
    %103 = vector.broadcast %102 : vector<8x1xf32> to vector<8x8xf32>
    %104 = arith.divf %100, %103 : vector<8x8xf32>
    %105 = arith.addf %85, %104 : vector<8x8xf32>
    %106 = arith.truncf %104 : vector<8x8xf32> to vector<8x8xbf16>
    %cst_53 = arith.constant dense<0.000000e+00> : vector<8x8xf32>
    %107 = tpu.matmul %106, %94, %cst_53 {dimension_numbers = #tpu.dot_dimension_numbers<[1], [0], [0], [1], [0, 0, 1, 1], [], []>} : vector<8x8xbf16>, vector<8x8xbf16>, vector<8x8xf32> -> vector<8x8xf32>
    %108 = arith.truncf %107 : vector<8x8xf32> to vector<8x8xbf16>
    %109 = vector.extract_strided_slice %14 {offsets = [24, 0], sizes = [8, 32], strides = [1, 1]} : vector<32x32xbf16> to vector<8x32xbf16>
    %cst_54 = arith.constant dense<0.000000e+00> : vector<8x32xf32>
    %110 = tpu.matmul %108, %109, %cst_54 {dimension_numbers = #tpu.dot_dimension_numbers<[1], [0], [0], [1], [0, 0, 1, 1], [], []>} : vector<8x8xbf16>, vector<8x32xbf16>, vector<8x32xf32> -> vector<8x32xf32>
    %111 = arith.addf %91, %110 : vector<8x32xf32>
    %cst_55 = arith.constant 2.500000e-01 : f32
    %112 = vector.broadcast %cst_55 : f32 to vector<8x8xf32>
    %113 = arith.mulf %105, %112 : vector<8x8xf32>
    %c0_56 = arith.constant 0 : index
    %c0_57 = arith.constant 0 : index
    %c0_58 = arith.constant 0 : index
    %114 = vector.load %arg16[%c0_56, %c0_57, %c0_58] : memref<1x8x8xf32, #tpu.memory_space<vmem>>, vector<1x8x8xf32>
    %115 = vector.shape_cast %114 : vector<1x8x8xf32> to vector<8x8xf32>
    %116 = vector.shape_cast %113 : vector<8x8xf32> to vector<1x8x8xf32>
    tpu.vector_store %arg16[%c0_56, %c0_57, %c0_58], %116 {strides = array<i32>} : memref<1x8x8xf32, #tpu.memory_space<vmem>>, vector<1x8x8xf32>,
    %117 = arith.addf %7, %111 : vector<8x32xf32>
    %118 = vector.broadcast %15 : vector<1x32xf32> to vector<8x32xf32>
    %119 = arith.addf %117, %118 : vector<8x32xf32>
    %cst_59 = arith.constant dense<0.000000e+00> : vector<8xf32>
    %120 = vector.multi_reduction <add>, %119, %cst_59 [1] : vector<8x32xf32> to vector<8xf32>
    %121 = vector.shape_cast %120 : vector<8xf32> to vector<8x1xf32>
    %cst_60 = arith.constant 3.200000e+01 : f32
    %122 = vector.broadcast %cst_60 : f32 to vector<8x1xf32>
    %123 = arith.divf %121, %122 : vector<8x1xf32>
    %124 = vector.broadcast %123 : vector<8x1xf32> to vector<8x32xf32>
    %125 = arith.subf %119, %124 : vector<8x32xf32>
    %126 = arith.mulf %125, %125 : vector<8x32xf32>
    %cst_61 = arith.constant dense<0.000000e+00> : vector<8xf32>
    %127 = vector.multi_reduction <add>, %126, %cst_61 [1] : vector<8x32xf32> to vector<8xf32>
    %128 = vector.shape_cast %127 : vector<8xf32> to vector<8x1xf32>
    %cst_62 = arith.constant 3.200000e+01 : f32
    %129 = vector.broadcast %cst_62 : f32 to vector<8x1xf32>
    %130 = arith.divf %128, %129 : vector<8x1xf32>
    %131 = vector.broadcast %123 : vector<8x1xf32> to vector<8x32xf32>
    %132 = arith.subf %119, %131 : vector<8x32xf32>
    %cst_63 = arith.constant 9.99999974E-6 : f32
    %133 = vector.broadcast %cst_63 : f32 to vector<8x1xf32>
    %134 = arith.addf %130, %133 : vector<8x1xf32>
    %135 = math.rsqrt %134 : vector<8x1xf32>
    %136 = vector.broadcast %135 : vector<8x1xf32> to vector<8x32xf32>
    %137 = arith.mulf %132, %136 : vector<8x32xf32>
    %138 = vector.broadcast %16 : vector<1x32xf32> to vector<8x32xf32>
    %139 = arith.mulf %137, %138 : vector<8x32xf32>
    %140 = vector.broadcast %17 : vector<1x32xf32> to vector<8x32xf32>
    %141 = arith.addf %139, %140 : vector<8x32xf32>
    %c0_64 = arith.constant 0 : index
    %c0_65 = arith.constant 0 : index
    %c0_66 = arith.constant 0 : index
    %142 = vector.load %arg15[%c0_64, %c0_65, %c0_66] : memref<1x8x32xf32, #tpu.memory_space<vmem>>, vector<1x8x32xf32>
    %143 = vector.shape_cast %142 : vector<1x8x32xf32> to vector<8x32xf32>
    %144 = vector.shape_cast %141 : vector<8x32xf32> to vector<1x8x32xf32>
    tpu.vector_store %arg15[%c0_64, %c0_65, %c0_66], %144 {strides = array<i32>} : memref<1x8x32xf32, #tpu.memory_space<vmem>>, vector<1x8x32xf32>,
    return
  }
  func.func @transform_0(%arg0: i32) -> (i32, i32, i32) {
    %c0_i32 = arith.constant 0 : i32
    %c0_i32_0 = arith.constant 0 : i32
    %c0_i32_1 = arith.constant 0 : i32
    return %arg0, %c0_i32, %c0_i32_0 : i32, i32, i32
  }
  func.func @transform_1(%arg0: i32) -> (i32, i32, i32) {
    %c0_i32 = arith.constant 0 : i32
    %c0_i32_0 = arith.constant 0 : i32
    %c0_i32_1 = arith.constant 0 : i32
    return %arg0, %c0_i32, %c0_i32_0 : i32, i32, i32
  }
  func.func @transform_2(%arg0: i32) -> (i32, i32, i32) {
    %c0_i32 = arith.constant 0 : i32
    %c0_i32_0 = arith.constant 0 : i32
    %c0_i32_1 = arith.constant 0 : i32
    return %arg0, %c0_i32, %c0_i32_0 : i32, i32, i32
  }
  func.func @transform_3(%arg0: i32) -> (i32, i32, i32) {
    %c0_i32 = arith.constant 0 : i32
    %c0_i32_0 = arith.constant 0 : i32
    %c0_i32_1 = arith.constant 0 : i32
    return %arg0, %c0_i32, %c0_i32_0 : i32, i32, i32
  }
  func.func @transform_4(%arg0: i32) -> (i32, i32) {
    %c0_i32 = arith.constant 0 : i32
    %c0_i32_0 = arith.constant 0 : i32
    %c0_i32_1 = arith.constant 0 : i32
    return %c0_i32, %c0_i32_0 : i32, i32
  }
  func.func @transform_5(%arg0: i32) -> (i32, i32) {
    %c0_i32 = arith.constant 0 : i32
    %c0_i32_0 = arith.constant 0 : i32
    %c0_i32_1 = arith.constant 0 : i32
    return %c0_i32, %c0_i32_0 : i32, i32
  }
  func.func @transform_6(%arg0: i32) -> (i32, i32) {
    %c0_i32 = arith.constant 0 : i32
    %c0_i32_0 = arith.constant 0 : i32
    %c0_i32_1 = arith.constant 0 : i32
    return %c0_i32, %c0_i32_0 : i32, i32
  }
  func.func @transform_7(%arg0: i32) -> (i32, i32) {
    %c0_i32 = arith.constant 0 : i32
    %c0_i32_0 = arith.constant 0 : i32
    %c0_i32_1 = arith.constant 0 : i32
    return %c0_i32, %c0_i32_0 : i32, i32
  }
  func.func @transform_8(%arg0: i32) -> (i32, i32) {
    %c0_i32 = arith.constant 0 : i32
    %c0_i32_0 = arith.constant 0 : i32
    %c0_i32_1 = arith.constant 0 : i32
    return %c0_i32, %c0_i32_0 : i32, i32
  }
  func.func @transform_9(%arg0: i32) -> (i32, i32) {
    %c0_i32 = arith.constant 0 : i32
    %c0_i32_0 = arith.constant 0 : i32
    %c0_i32_1 = arith.constant 0 : i32
    return %c0_i32, %c0_i32_0 : i32, i32
  }
  func.func @transform_10(%arg0: i32) -> (i32, i32) {
    %c0_i32 = arith.constant 0 : i32
    %c0_i32_0 = arith.constant 0 : i32
    %c0_i32_1 = arith.constant 0 : i32
    return %c0_i32, %c0_i32_0 : i32, i32
  }
  func.func @transform_11(%arg0: i32) -> (i32, i32) {
    %c0_i32 = arith.constant 0 : i32
    %c0_i32_0 = arith.constant 0 : i32
    %c0_i32_1 = arith.constant 0 : i32
    return %c0_i32, %c0_i32_0 : i32, i32
  }
  func.func @transform_12(%arg0: i32) -> (i32, i32) {
    %c0_i32 = arith.constant 0 : i32
    %c0_i32_0 = arith.constant 0 : i32
    %c0_i32_1 = arith.constant 0 : i32
    return %c0_i32, %c0_i32_0 : i32, i32
  }
  func.func @transform_13(%arg0: i32) -> (i32, i32) {
    %c0_i32 = arith.constant 0 : i32
    %c0_i32_0 = arith.constant 0 : i32
    %c0_i32_1 = arith.constant 0 : i32
    return %c0_i32, %c0_i32_0 : i32, i32
  }
  func.func @transform_14(%arg0: i32) -> (i32, i32, i32) {
    %c0_i32 = arith.constant 0 : i32
    %c0_i32_0 = arith.constant 0 : i32
    %c0_i32_1 = arith.constant 0 : i32
    return %arg0, %c0_i32, %c0_i32_0 : i32, i32, i32
  }
  func.func @transform_15(%arg0: i32) -> (i32, i32, i32) {
    %c0_i32 = arith.constant 0 : i32
    %c0_i32_0 = arith.constant 0 : i32
    %c0_i32_1 = arith.constant 0 : i32
    return %arg0, %c0_i32, %c0_i32_0 : i32, i32, i32
  }
}

module attributes {stable_mosaic.version = 11 : i64} {
  func.func @mha_masked_kernel(%arg0: i32, %arg1: memref<1x8x32xbf16, #tpu.memory_space<vmem>>, %arg2: memref<1x64x32xbf16, #tpu.memory_space<vmem>>, %arg3: memref<1x64x32xbf16, #tpu.memory_space<vmem>>, %arg4: memref<1x8x32xf32, #tpu.memory_space<vmem>>, %arg5: memref<1x1x64xf32, #tpu.memory_space<vmem>>, %arg6: memref<32x32xbf16, #tpu.memory_space<vmem>>, %arg7: memref<32x32xbf16, #tpu.memory_space<vmem>>, %arg8: memref<32x32xbf16, #tpu.memory_space<vmem>>, %arg9: memref<1x32xf32, #tpu.memory_space<vmem>>, %arg10: memref<1x32xf32, #tpu.memory_space<vmem>>, %arg11: memref<1x32xf32, #tpu.memory_space<vmem>>, %arg12: memref<32x32xbf16, #tpu.memory_space<vmem>>, %arg13: memref<1x32xf32, #tpu.memory_space<vmem>>, %arg14: memref<1x32xf32, #tpu.memory_space<vmem>>, %arg15: memref<1x32xf32, #tpu.memory_space<vmem>>, %arg16: memref<1x8x32xf32, #tpu.memory_space<vmem>>, %arg17: memref<1x8x64xf32, #tpu.memory_space<vmem>>) attributes {dimension_semantics = [#tpu.dimension_semantics<parallel>], iteration_bounds = array<i64: 2>, scalar_prefetch = 0 : i64, scratch_operands = 0 : i64, tpu.core_type = #tpu.core_type<tc>, window_params = [{transform_indices = @transform_0, window_bounds = array<i64: 1, 8, 32>}, {transform_indices = @transform_1, window_bounds = array<i64: 1, 64, 32>}, {transform_indices = @transform_2, window_bounds = array<i64: 1, 64, 32>}, {transform_indices = @transform_3, window_bounds = array<i64: 1, 8, 32>}, {transform_indices = @transform_4, window_bounds = array<i64: 1, 1, 64>}, {pipeline_mode = #tpu.pipeline_mode<synchronous>, transform_indices = @transform_5, window_bounds = array<i64: 32, 32>}, {pipeline_mode = #tpu.pipeline_mode<synchronous>, transform_indices = @transform_6, window_bounds = array<i64: 32, 32>}, {pipeline_mode = #tpu.pipeline_mode<synchronous>, transform_indices = @transform_7, window_bounds = array<i64: 32, 32>}, {pipeline_mode = #tpu.pipeline_mode<synchronous>, transform_indices = @transform_8, window_bounds = array<i64: 1, 32>}, {pipeline_mode = #tpu.pipeline_mode<synchronous>, transform_indices = @transform_9, window_bounds = array<i64: 1, 32>}, {pipeline_mode = #tpu.pipeline_mode<synchronous>, transform_indices = @transform_10, window_bounds = array<i64: 1, 32>}, {pipeline_mode = #tpu.pipeline_mode<synchronous>, transform_indices = @transform_11, window_bounds = array<i64: 32, 32>}, {pipeline_mode = #tpu.pipeline_mode<synchronous>, transform_indices = @transform_12, window_bounds = array<i64: 1, 32>}, {pipeline_mode = #tpu.pipeline_mode<synchronous>, transform_indices = @transform_13, window_bounds = array<i64: 1, 32>}, {pipeline_mode = #tpu.pipeline_mode<synchronous>, transform_indices = @transform_14, window_bounds = array<i64: 1, 32>}, {transform_indices = @transform_15, window_bounds = array<i64: 1, 8, 32>}, {transform_indices = @transform_16, window_bounds = array<i64: 1, 8, 64>}]} {
    %c0 = arith.constant 0 : index
    %c0_0 = arith.constant 0 : index
    %c0_1 = arith.constant 0 : index
    %0 = vector.load %arg1[%c0, %c0_0, %c0_1] : memref<1x8x32xbf16, #tpu.memory_space<vmem>>, vector<1x8x32xbf16>
    %1 = vector.shape_cast %0 : vector<1x8x32xbf16> to vector<8x32xbf16>
    %c0_2 = arith.constant 0 : index
    %c0_3 = arith.constant 0 : index
    %c0_4 = arith.constant 0 : index
    %2 = vector.load %arg2[%c0_2, %c0_3, %c0_4] : memref<1x64x32xbf16, #tpu.memory_space<vmem>>, vector<1x64x32xbf16>
    %3 = vector.shape_cast %2 : vector<1x64x32xbf16> to vector<64x32xbf16>
    %c0_5 = arith.constant 0 : index
    %c0_6 = arith.constant 0 : index
    %c0_7 = arith.constant 0 : index
    %4 = vector.load %arg3[%c0_5, %c0_6, %c0_7] : memref<1x64x32xbf16, #tpu.memory_space<vmem>>, vector<1x64x32xbf16>
    %5 = vector.shape_cast %4 : vector<1x64x32xbf16> to vector<64x32xbf16>
    %c0_8 = arith.constant 0 : index
    %c0_9 = arith.constant 0 : index
    %c0_10 = arith.constant 0 : index
    %6 = vector.load %arg4[%c0_8, %c0_9, %c0_10] : memref<1x8x32xf32, #tpu.memory_space<vmem>>, vector<1x8x32xf32>
    %7 = vector.shape_cast %6 : vector<1x8x32xf32> to vector<8x32xf32>
    %c0_11 = arith.constant 0 : index
    %c0_12 = arith.constant 0 : index
    %c0_13 = arith.constant 0 : index
    %8 = vector.load %arg5[%c0_11, %c0_12, %c0_13] : memref<1x1x64xf32, #tpu.memory_space<vmem>>, vector<1x1x64xf32>
    %9 = vector.shape_cast %8 : vector<1x1x64xf32> to vector<1x64xf32>
    %c0_14 = arith.constant 0 : index
    %c0_15 = arith.constant 0 : index
    %10 = vector.load %arg6[%c0_14, %c0_15] : memref<32x32xbf16, #tpu.memory_space<vmem>>, vector<32x32xbf16>
    %c0_16 = arith.constant 0 : index
    %c0_17 = arith.constant 0 : index
    %11 = vector.load %arg7[%c0_16, %c0_17] : memref<32x32xbf16, #tpu.memory_space<vmem>>, vector<32x32xbf16>
    %c0_18 = arith.constant 0 : index
    %c0_19 = arith.constant 0 : index
    %12 = vector.load %arg8[%c0_18, %c0_19] : memref<32x32xbf16, #tpu.memory_space<vmem>>, vector<32x32xbf16>
    %c0_20 = arith.constant 0 : index
    %c0_21 = arith.constant 0 : index
    %13 = vector.load %arg9[%c0_20, %c0_21] : memref<1x32xf32, #tpu.memory_space<vmem>>, vector<1x32xf32>
    %c0_22 = arith.constant 0 : index
    %c0_23 = arith.constant 0 : index
    %14 = vector.load %arg10[%c0_22, %c0_23] : memref<1x32xf32, #tpu.memory_space<vmem>>, vector<1x32xf32>
    %c0_24 = arith.constant 0 : index
    %c0_25 = arith.constant 0 : index
    %15 = vector.load %arg11[%c0_24, %c0_25] : memref<1x32xf32, #tpu.memory_space<vmem>>, vector<1x32xf32>
    %c0_26 = arith.constant 0 : index
    %c0_27 = arith.constant 0 : index
    %16 = vector.load %arg12[%c0_26, %c0_27] : memref<32x32xbf16, #tpu.memory_space<vmem>>, vector<32x32xbf16>
    %c0_28 = arith.constant 0 : index
    %c0_29 = arith.constant 0 : index
    %17 = vector.load %arg13[%c0_28, %c0_29] : memref<1x32xf32, #tpu.memory_space<vmem>>, vector<1x32xf32>
    %c0_30 = arith.constant 0 : index
    %c0_31 = arith.constant 0 : index
    %18 = vector.load %arg14[%c0_30, %c0_31] : memref<1x32xf32, #tpu.memory_space<vmem>>, vector<1x32xf32>
    %c0_32 = arith.constant 0 : index
    %c0_33 = arith.constant 0 : index
    %19 = vector.load %arg15[%c0_32, %c0_33] : memref<1x32xf32, #tpu.memory_space<vmem>>, vector<1x32xf32>
    %cst = arith.constant dense<0.000000e+00> : vector<8x32xf32>
    %20 = tpu.matmul %1, %10, %cst {dimension_numbers = #tpu.dot_dimension_numbers<[1], [0], [0], [1], [0, 0, 1, 1], [], []>} : vector<8x32xbf16>, vector<32x32xbf16>, vector<8x32xf32> -> vector<8x32xf32>
    %21 = vector.broadcast %13 : vector<1x32xf32> to vector<8x32xf32>
    %22 = arith.addf %20, %21 : vector<8x32xf32>
    %23 = arith.truncf %22 : vector<8x32xf32> to vector<8x32xbf16>
    %cst_34 = arith.constant dense<0.000000e+00> : vector<64x32xf32>
    %24 = tpu.matmul %3, %11, %cst_34 {dimension_numbers = #tpu.dot_dimension_numbers<[1], [0], [0], [1], [0, 0, 1, 1], [], []>} : vector<64x32xbf16>, vector<32x32xbf16>, vector<64x32xf32> -> vector<64x32xf32>
    %25 = vector.broadcast %14 : vector<1x32xf32> to vector<64x32xf32>
    %26 = arith.addf %24, %25 : vector<64x32xf32>
    %27 = arith.truncf %26 : vector<64x32xf32> to vector<64x32xbf16>
    %cst_35 = arith.constant dense<0.000000e+00> : vector<64x32xf32>
    %28 = tpu.matmul %5, %12, %cst_35 {dimension_numbers = #tpu.dot_dimension_numbers<[1], [0], [0], [1], [0, 0, 1, 1], [], []>} : vector<64x32xbf16>, vector<32x32xbf16>, vector<64x32xf32> -> vector<64x32xf32>
    %29 = vector.broadcast %15 : vector<1x32xf32> to vector<64x32xf32>
    %30 = arith.addf %28, %29 : vector<64x32xf32>
    %31 = arith.truncf %30 : vector<64x32xf32> to vector<64x32xbf16>
    %cst_36 = arith.constant 0.000000e+00 : f32
    %32 = vector.broadcast %cst_36 : f32 to vector<8x64xf32>
    %cst_37 = arith.constant 0.000000e+00 : f32
    %33 = vector.broadcast %cst_37 : f32 to vector<8x32xf32>
    %34 = vector.extract_strided_slice %23 {offsets = [0, 0], sizes = [8, 8], strides = [1, 1]} : vector<8x32xbf16> to vector<8x8xbf16>
    %35 = vector.extract_strided_slice %27 {offsets = [0, 0], sizes = [64, 8], strides = [1, 1]} : vector<64x32xbf16> to vector<64x8xbf16>
    %36 = vector.extract_strided_slice %31 {offsets = [0, 0], sizes = [64, 8], strides = [1, 1]} : vector<64x32xbf16> to vector<64x8xbf16>
    %cst_38 = arith.constant dense<0.000000e+00> : vector<8x64xf32>
    %37 = tpu.matmul %34, %35, %cst_38 {dimension_numbers = #tpu.dot_dimension_numbers<[1], [1], [0], [0], [0, 0, 1, 0], [], []>} : vector<8x8xbf16>, vector<64x8xbf16>, vector<8x64xf32> -> vector<8x64xf32>
    %38 = vector.broadcast %9 : vector<1x64xf32> to vector<8x64xf32>
    %39 = arith.addf %37, %38 : vector<8x64xf32>
    %cst_39 = arith.constant dense<0xFF800000> : vector<8xf32>
    %40 = vector.multi_reduction <maximumf>, %39, %cst_39 [1] : vector<8x64xf32> to vector<8xf32>
    %41 = vector.shape_cast %40 : vector<8xf32> to vector<8x1xf32>
    %42 = vector.broadcast %41 : vector<8x1xf32> to vector<8x64xf32>
    %43 = arith.subf %39, %42 : vector<8x64xf32>
    %44 = math.exp %43 : vector<8x64xf32>
    %cst_40 = arith.constant dense<0.000000e+00> : vector<8xf32>
    %45 = vector.multi_reduction <add>, %44, %cst_40 [1] : vector<8x64xf32> to vector<8xf32>
    %46 = vector.shape_cast %45 : vector<8xf32> to vector<8x1xf32>
    %47 = vector.broadcast %46 : vector<8x1xf32> to vector<8x64xf32>
    %48 = arith.divf %44, %47 : vector<8x64xf32>
    %49 = arith.addf %32, %48 : vector<8x64xf32>
    %50 = arith.truncf %48 : vector<8x64xf32> to vector<8x64xbf16>
    %cst_41 = arith.constant dense<0.000000e+00> : vector<8x8xf32>
    %51 = tpu.matmul %50, %36, %cst_41 {dimension_numbers = #tpu.dot_dimension_numbers<[1], [0], [0], [1], [0, 0, 1, 1], [], []>} : vector<8x64xbf16>, vector<64x8xbf16>, vector<8x8xf32> -> vector<8x8xf32>
    %52 = arith.truncf %51 : vector<8x8xf32> to vector<8x8xbf16>
    %53 = vector.extract_strided_slice %16 {offsets = [0, 0], sizes = [8, 32], strides = [1, 1]} : vector<32x32xbf16> to vector<8x32xbf16>
    %cst_42 = arith.constant dense<0.000000e+00> : vector<8x32xf32>
    %54 = tpu.matmul %52, %53, %cst_42 {dimension_numbers = #tpu.dot_dimension_numbers<[1], [0], [0], [1], [0, 0, 1, 1], [], []>} : vector<8x8xbf16>, vector<8x32xbf16>, vector<8x32xf32> -> vector<8x32xf32>
    %55 = arith.addf %33, %54 : vector<8x32xf32>
    %56 = vector.extract_strided_slice %23 {offsets = [0, 8], sizes = [8, 8], strides = [1, 1]} : vector<8x32xbf16> to vector<8x8xbf16>
    %57 = vector.extract_strided_slice %27 {offsets = [0, 8], sizes = [64, 8], strides = [1, 1]} : vector<64x32xbf16> to vector<64x8xbf16>
    %58 = vector.extract_strided_slice %31 {offsets = [0, 8], sizes = [64, 8], strides = [1, 1]} : vector<64x32xbf16> to vector<64x8xbf16>
    %cst_43 = arith.constant dense<0.000000e+00> : vector<8x64xf32>
    %59 = tpu.matmul %56, %57, %cst_43 {dimension_numbers = #tpu.dot_dimension_numbers<[1], [1], [0], [0], [0, 0, 1, 0], [], []>} : vector<8x8xbf16>, vector<64x8xbf16>, vector<8x64xf32> -> vector<8x64xf32>
    %60 = vector.broadcast %9 : vector<1x64xf32> to vector<8x64xf32>
    %61 = arith.addf %59, %60 : vector<8x64xf32>
    %cst_44 = arith.constant dense<0xFF800000> : vector<8xf32>
    %62 = vector.multi_reduction <maximumf>, %61, %cst_44 [1] : vector<8x64xf32> to vector<8xf32>
    %63 = vector.shape_cast %62 : vector<8xf32> to vector<8x1xf32>
    %64 = vector.broadcast %63 : vector<8x1xf32> to vector<8x64xf32>
    %65 = arith.subf %61, %64 : vector<8x64xf32>
    %66 = math.exp %65 : vector<8x64xf32>
    %cst_45 = arith.constant dense<0.000000e+00> : vector<8xf32>
    %67 = vector.multi_reduction <add>, %66, %cst_45 [1] : vector<8x64xf32> to vector<8xf32>
    %68 = vector.shape_cast %67 : vector<8xf32> to vector<8x1xf32>
    %69 = vector.broadcast %68 : vector<8x1xf32> to vector<8x64xf32>
    %70 = arith.divf %66, %69 : vector<8x64xf32>
    %71 = arith.addf %49, %70 : vector<8x64xf32>
    %72 = arith.truncf %70 : vector<8x64xf32> to vector<8x64xbf16>
    %cst_46 = arith.constant dense<0.000000e+00> : vector<8x8xf32>
    %73 = tpu.matmul %72, %58, %cst_46 {dimension_numbers = #tpu.dot_dimension_numbers<[1], [0], [0], [1], [0, 0, 1, 1], [], []>} : vector<8x64xbf16>, vector<64x8xbf16>, vector<8x8xf32> -> vector<8x8xf32>
    %74 = arith.truncf %73 : vector<8x8xf32> to vector<8x8xbf16>
    %75 = vector.extract_strided_slice %16 {offsets = [8, 0], sizes = [8, 32], strides = [1, 1]} : vector<32x32xbf16> to vector<8x32xbf16>
    %cst_47 = arith.constant dense<0.000000e+00> : vector<8x32xf32>
    %76 = tpu.matmul %74, %75, %cst_47 {dimension_numbers = #tpu.dot_dimension_numbers<[1], [0], [0], [1], [0, 0, 1, 1], [], []>} : vector<8x8xbf16>, vector<8x32xbf16>, vector<8x32xf32> -> vector<8x32xf32>
    %77 = arith.addf %55, %76 : vector<8x32xf32>
    %78 = vector.extract_strided_slice %23 {offsets = [0, 16], sizes = [8, 8], strides = [1, 1]} : vector<8x32xbf16> to vector<8x8xbf16>
    %79 = vector.extract_strided_slice %27 {offsets = [0, 16], sizes = [64, 8], strides = [1, 1]} : vector<64x32xbf16> to vector<64x8xbf16>
    %80 = vector.extract_strided_slice %31 {offsets = [0, 16], sizes = [64, 8], strides = [1, 1]} : vector<64x32xbf16> to vector<64x8xbf16>
    %cst_48 = arith.constant dense<0.000000e+00> : vector<8x64xf32>
    %81 = tpu.matmul %78, %79, %cst_48 {dimension_numbers = #tpu.dot_dimension_numbers<[1], [1], [0], [0], [0, 0, 1, 0], [], []>} : vector<8x8xbf16>, vector<64x8xbf16>, vector<8x64xf32> -> vector<8x64xf32>
    %82 = vector.broadcast %9 : vector<1x64xf32> to vector<8x64xf32>
    %83 = arith.addf %81, %82 : vector<8x64xf32>
    %cst_49 = arith.constant dense<0xFF800000> : vector<8xf32>
    %84 = vector.multi_reduction <maximumf>, %83, %cst_49 [1] : vector<8x64xf32> to vector<8xf32>
    %85 = vector.shape_cast %84 : vector<8xf32> to vector<8x1xf32>
    %86 = vector.broadcast %85 : vector<8x1xf32> to vector<8x64xf32>
    %87 = arith.subf %83, %86 : vector<8x64xf32>
    %88 = math.exp %87 : vector<8x64xf32>
    %cst_50 = arith.constant dense<0.000000e+00> : vector<8xf32>
    %89 = vector.multi_reduction <add>, %88, %cst_50 [1] : vector<8x64xf32> to vector<8xf32>
    %90 = vector.shape_cast %89 : vector<8xf32> to vector<8x1xf32>
    %91 = vector.broadcast %90 : vector<8x1xf32> to vector<8x64xf32>
    %92 = arith.divf %88, %91 : vector<8x64xf32>
    %93 = arith.addf %71, %92 : vector<8x64xf32>
    %94 = arith.truncf %92 : vector<8x64xf32> to vector<8x64xbf16>
    %cst_51 = arith.constant dense<0.000000e+00> : vector<8x8xf32>
    %95 = tpu.matmul %94, %80, %cst_51 {dimension_numbers = #tpu.dot_dimension_numbers<[1], [0], [0], [1], [0, 0, 1, 1], [], []>} : vector<8x64xbf16>, vector<64x8xbf16>, vector<8x8xf32> -> vector<8x8xf32>
    %96 = arith.truncf %95 : vector<8x8xf32> to vector<8x8xbf16>
    %97 = vector.extract_strided_slice %16 {offsets = [16, 0], sizes = [8, 32], strides = [1, 1]} : vector<32x32xbf16> to vector<8x32xbf16>
    %cst_52 = arith.constant dense<0.000000e+00> : vector<8x32xf32>
    %98 = tpu.matmul %96, %97, %cst_52 {dimension_numbers = #tpu.dot_dimension_numbers<[1], [0], [0], [1], [0, 0, 1, 1], [], []>} : vector<8x8xbf16>, vector<8x32xbf16>, vector<8x32xf32> -> vector<8x32xf32>
    %99 = arith.addf %77, %98 : vector<8x32xf32>
    %100 = vector.extract_strided_slice %23 {offsets = [0, 24], sizes = [8, 8], strides = [1, 1]} : vector<8x32xbf16> to vector<8x8xbf16>
    %101 = vector.extract_strided_slice %27 {offsets = [0, 24], sizes = [64, 8], strides = [1, 1]} : vector<64x32xbf16> to vector<64x8xbf16>
    %102 = vector.extract_strided_slice %31 {offsets = [0, 24], sizes = [64, 8], strides = [1, 1]} : vector<64x32xbf16> to vector<64x8xbf16>
    %cst_53 = arith.constant dense<0.000000e+00> : vector<8x64xf32>
    %103 = tpu.matmul %100, %101, %cst_53 {dimension_numbers = #tpu.dot_dimension_numbers<[1], [1], [0], [0], [0, 0, 1, 0], [], []>} : vector<8x8xbf16>, vector<64x8xbf16>, vector<8x64xf32> -> vector<8x64xf32>
    %104 = vector.broadcast %9 : vector<1x64xf32> to vector<8x64xf32>
    %105 = arith.addf %103, %104 : vector<8x64xf32>
    %cst_54 = arith.constant dense<0xFF800000> : vector<8xf32>
    %106 = vector.multi_reduction <maximumf>, %105, %cst_54 [1] : vector<8x64xf32> to vector<8xf32>
    %107 = vector.shape_cast %106 : vector<8xf32> to vector<8x1xf32>
    %108 = vector.broadcast %107 : vector<8x1xf32> to vector<8x64xf32>
    %109 = arith.subf %105, %108 : vector<8x64xf32>
    %110 = math.exp %109 : vector<8x64xf32>
    %cst_55 = arith.constant dense<0.000000e+00> : vector<8xf32>
    %111 = vector.multi_reduction <add>, %110, %cst_55 [1] : vector<8x64xf32> to vector<8xf32>
    %112 = vector.shape_cast %111 : vector<8xf32> to vector<8x1xf32>
    %113 = vector.broadcast %112 : vector<8x1xf32> to vector<8x64xf32>
    %114 = arith.divf %110, %113 : vector<8x64xf32>
    %115 = arith.addf %93, %114 : vector<8x64xf32>
    %116 = arith.truncf %114 : vector<8x64xf32> to vector<8x64xbf16>
    %cst_56 = arith.constant dense<0.000000e+00> : vector<8x8xf32>
    %117 = tpu.matmul %116, %102, %cst_56 {dimension_numbers = #tpu.dot_dimension_numbers<[1], [0], [0], [1], [0, 0, 1, 1], [], []>} : vector<8x64xbf16>, vector<64x8xbf16>, vector<8x8xf32> -> vector<8x8xf32>
    %118 = arith.truncf %117 : vector<8x8xf32> to vector<8x8xbf16>
    %119 = vector.extract_strided_slice %16 {offsets = [24, 0], sizes = [8, 32], strides = [1, 1]} : vector<32x32xbf16> to vector<8x32xbf16>
    %cst_57 = arith.constant dense<0.000000e+00> : vector<8x32xf32>
    %120 = tpu.matmul %118, %119, %cst_57 {dimension_numbers = #tpu.dot_dimension_numbers<[1], [0], [0], [1], [0, 0, 1, 1], [], []>} : vector<8x8xbf16>, vector<8x32xbf16>, vector<8x32xf32> -> vector<8x32xf32>
    %121 = arith.addf %99, %120 : vector<8x32xf32>
    %cst_58 = arith.constant 2.500000e-01 : f32
    %122 = vector.broadcast %cst_58 : f32 to vector<8x64xf32>
    %123 = arith.mulf %115, %122 : vector<8x64xf32>
    %c0_59 = arith.constant 0 : index
    %c0_60 = arith.constant 0 : index
    %c0_61 = arith.constant 0 : index
    %124 = vector.load %arg17[%c0_59, %c0_60, %c0_61] : memref<1x8x64xf32, #tpu.memory_space<vmem>>, vector<1x8x64xf32>
    %125 = vector.shape_cast %124 : vector<1x8x64xf32> to vector<8x64xf32>
    %126 = vector.shape_cast %123 : vector<8x64xf32> to vector<1x8x64xf32>
    tpu.vector_store %arg17[%c0_59, %c0_60, %c0_61], %126 {strides = array<i32>} : memref<1x8x64xf32, #tpu.memory_space<vmem>>, vector<1x8x64xf32>,
    %127 = arith.addf %7, %121 : vector<8x32xf32>
    %128 = vector.broadcast %17 : vector<1x32xf32> to vector<8x32xf32>
    %129 = arith.addf %127, %128 : vector<8x32xf32>
    %cst_62 = arith.constant dense<0.000000e+00> : vector<8xf32>
    %130 = vector.multi_reduction <add>, %129, %cst_62 [1] : vector<8x32xf32> to vector<8xf32>
    %131 = vector.shape_cast %130 : vector<8xf32> to vector<8x1xf32>
    %cst_63 = arith.constant 3.200000e+01 : f32
    %132 = vector.broadcast %cst_63 : f32 to vector<8x1xf32>
    %133 = arith.divf %131, %132 : vector<8x1xf32>
    %134 = vector.broadcast %133 : vector<8x1xf32> to vector<8x32xf32>
    %135 = arith.subf %129, %134 : vector<8x32xf32>
    %136 = arith.mulf %135, %135 : vector<8x32xf32>
    %cst_64 = arith.constant dense<0.000000e+00> : vector<8xf32>
    %137 = vector.multi_reduction <add>, %136, %cst_64 [1] : vector<8x32xf32> to vector<8xf32>
    %138 = vector.shape_cast %137 : vector<8xf32> to vector<8x1xf32>
    %cst_65 = arith.constant 3.200000e+01 : f32
    %139 = vector.broadcast %cst_65 : f32 to vector<8x1xf32>
    %140 = arith.divf %138, %139 : vector<8x1xf32>
    %141 = vector.broadcast %133 : vector<8x1xf32> to vector<8x32xf32>
    %142 = arith.subf %129, %141 : vector<8x32xf32>
    %cst_66 = arith.constant 9.99999974E-6 : f32
    %143 = vector.broadcast %cst_66 : f32 to vector<8x1xf32>
    %144 = arith.addf %140, %143 : vector<8x1xf32>
    %145 = math.rsqrt %144 : vector<8x1xf32>
    %146 = vector.broadcast %145 : vector<8x1xf32> to vector<8x32xf32>
    %147 = arith.mulf %142, %146 : vector<8x32xf32>
    %148 = vector.broadcast %18 : vector<1x32xf32> to vector<8x32xf32>
    %149 = arith.mulf %147, %148 : vector<8x32xf32>
    %150 = vector.broadcast %19 : vector<1x32xf32> to vector<8x32xf32>
    %151 = arith.addf %149, %150 : vector<8x32xf32>
    %c0_67 = arith.constant 0 : index
    %c0_68 = arith.constant 0 : index
    %c0_69 = arith.constant 0 : index
    %152 = vector.load %arg16[%c0_67, %c0_68, %c0_69] : memref<1x8x32xf32, #tpu.memory_space<vmem>>, vector<1x8x32xf32>
    %153 = vector.shape_cast %152 : vector<1x8x32xf32> to vector<8x32xf32>
    %154 = vector.shape_cast %151 : vector<8x32xf32> to vector<1x8x32xf32>
    tpu.vector_store %arg16[%c0_67, %c0_68, %c0_69], %154 {strides = array<i32>} : memref<1x8x32xf32, #tpu.memory_space<vmem>>, vector<1x8x32xf32>,
    return
  }
  func.func @transform_0(%arg0: i32) -> (i32, i32, i32) {
    %c0_i32 = arith.constant 0 : i32
    %c0_i32_0 = arith.constant 0 : i32
    %c0_i32_1 = arith.constant 0 : i32
    return %arg0, %c0_i32, %c0_i32_0 : i32, i32, i32
  }
  func.func @transform_1(%arg0: i32) -> (i32, i32, i32) {
    %c0_i32 = arith.constant 0 : i32
    %c0_i32_0 = arith.constant 0 : i32
    %c0_i32_1 = arith.constant 0 : i32
    return %arg0, %c0_i32, %c0_i32_0 : i32, i32, i32
  }
  func.func @transform_2(%arg0: i32) -> (i32, i32, i32) {
    %c0_i32 = arith.constant 0 : i32
    %c0_i32_0 = arith.constant 0 : i32
    %c0_i32_1 = arith.constant 0 : i32
    return %arg0, %c0_i32, %c0_i32_0 : i32, i32, i32
  }
  func.func @transform_3(%arg0: i32) -> (i32, i32, i32) {
    %c0_i32 = arith.constant 0 : i32
    %c0_i32_0 = arith.constant 0 : i32
    %c0_i32_1 = arith.constant 0 : i32
    return %arg0, %c0_i32, %c0_i32_0 : i32, i32, i32
  }
  func.func @transform_4(%arg0: i32) -> (i32, i32, i32) {
    %c0_i32 = arith.constant 0 : i32
    %c0_i32_0 = arith.constant 0 : i32
    %c0_i32_1 = arith.constant 0 : i32
    return %arg0, %c0_i32, %c0_i32_0 : i32, i32, i32
  }
  func.func @transform_5(%arg0: i32) -> (i32, i32) {
    %c0_i32 = arith.constant 0 : i32
    %c0_i32_0 = arith.constant 0 : i32
    %c0_i32_1 = arith.constant 0 : i32
    return %c0_i32, %c0_i32_0 : i32, i32
  }
  func.func @transform_6(%arg0: i32) -> (i32, i32) {
    %c0_i32 = arith.constant 0 : i32
    %c0_i32_0 = arith.constant 0 : i32
    %c0_i32_1 = arith.constant 0 : i32
    return %c0_i32, %c0_i32_0 : i32, i32
  }
  func.func @transform_7(%arg0: i32) -> (i32, i32) {
    %c0_i32 = arith.constant 0 : i32
    %c0_i32_0 = arith.constant 0 : i32
    %c0_i32_1 = arith.constant 0 : i32
    return %c0_i32, %c0_i32_0 : i32, i32
  }
  func.func @transform_8(%arg0: i32) -> (i32, i32) {
    %c0_i32 = arith.constant 0 : i32
    %c0_i32_0 = arith.constant 0 : i32
    %c0_i32_1 = arith.constant 0 : i32
    return %c0_i32, %c0_i32_0 : i32, i32
  }
  func.func @transform_9(%arg0: i32) -> (i32, i32) {
    %c0_i32 = arith.constant 0 : i32
    %c0_i32_0 = arith.constant 0 : i32
    %c0_i32_1 = arith.constant 0 : i32
    return %c0_i32, %c0_i32_0 : i32, i32
  }
  func.func @transform_10(%arg0: i32) -> (i32, i32) {
    %c0_i32 = arith.constant 0 : i32
    %c0_i32_0 = arith.constant 0 : i32
    %c0_i32_1 = arith.constant 0 : i32
    return %c0_i32, %c0_i32_0 : i32, i32
  }
  func.func @transform_11(%arg0: i32) -> (i32, i32) {
    %c0_i32 = arith.constant 0 : i32
    %c0_i32_0 = arith.constant 0 : i32
    %c0_i32_1 = arith.constant 0 : i32
    return %c0_i32, %c0_i32_0 : i32, i32
  }
  func.func @transform_12(%arg0: i32) -> (i32, i32) {
    %c0_i32 = arith.constant 0 : i32
    %c0_i32_0 = arith.constant 0 : i32
    %c0_i32_1 = arith.constant 0 : i32
    return %c0_i32, %c0_i32_0 : i32, i32
  }
  func.func @transform_13(%arg0: i32) -> (i32, i32) {
    %c0_i32 = arith.constant 0 : i32
    %c0_i32_0 = arith.constant 0 : i32
    %c0_i32_1 = arith.constant 0 : i32
    return %c0_i32, %c0_i32_0 : i32, i32
  }
  func.func @transform_14(%arg0: i32) -> (i32, i32) {
    %c0_i32 = arith.constant 0 : i32
    %c0_i32_0 = arith.constant 0 : i32
    %c0_i32_1 = arith.constant 0 : i32
    return %c0_i32, %c0_i32_0 : i32, i32
  }
  func.func @transform_15(%arg0: i32) -> (i32, i32, i32) {
    %c0_i32 = arith.constant 0 : i32
    %c0_i32_0 = arith.constant 0 : i32
    %c0_i32_1 = arith.constant 0 : i32
    return %arg0, %c0_i32, %c0_i32_0 : i32, i32, i32
  }
  func.func @transform_16(%arg0: i32) -> (i32, i32, i32) {
    %c0_i32 = arith.constant 0 : i32
    %c0_i32_0 = arith.constant 0 : i32
    %c0_i32_1 = arith.constant 0 : i32
    return %arg0, %c0_i32, %c0_i32_0 : i32, i32, i32
  }
}

module attributes {stable_mosaic.version = 11 : i64} {
  func.func @mha_nomask_kernel(%arg0: i32, %arg1: memref<1x8x32xbf16, #tpu.memory_space<vmem>>, %arg2: memref<1x8x32xbf16, #tpu.memory_space<vmem>>, %arg3: memref<1x8x32xbf16, #tpu.memory_space<vmem>>, %arg4: memref<1x8x32xf32, #tpu.memory_space<vmem>>, %arg5: memref<32x32xbf16, #tpu.memory_space<vmem>>, %arg6: memref<32x32xbf16, #tpu.memory_space<vmem>>, %arg7: memref<32x32xbf16, #tpu.memory_space<vmem>>, %arg8: memref<1x32xf32, #tpu.memory_space<vmem>>, %arg9: memref<1x32xf32, #tpu.memory_space<vmem>>, %arg10: memref<1x32xf32, #tpu.memory_space<vmem>>, %arg11: memref<32x32xbf16, #tpu.memory_space<vmem>>, %arg12: memref<1x32xf32, #tpu.memory_space<vmem>>, %arg13: memref<1x32xf32, #tpu.memory_space<vmem>>, %arg14: memref<1x32xf32, #tpu.memory_space<vmem>>, %arg15: memref<1x8x32xf32, #tpu.memory_space<vmem>>, %arg16: memref<1x8x8xf32, #tpu.memory_space<vmem>>) attributes {dimension_semantics = [#tpu.dimension_semantics<parallel>], iteration_bounds = array<i64: 2>, scalar_prefetch = 0 : i64, scratch_operands = 0 : i64, tpu.core_type = #tpu.core_type<tc>, window_params = [{transform_indices = @transform_0, window_bounds = array<i64: 1, 8, 32>}, {transform_indices = @transform_1, window_bounds = array<i64: 1, 8, 32>}, {transform_indices = @transform_2, window_bounds = array<i64: 1, 8, 32>}, {transform_indices = @transform_3, window_bounds = array<i64: 1, 8, 32>}, {pipeline_mode = #tpu.pipeline_mode<synchronous>, transform_indices = @transform_4, window_bounds = array<i64: 32, 32>}, {pipeline_mode = #tpu.pipeline_mode<synchronous>, transform_indices = @transform_5, window_bounds = array<i64: 32, 32>}, {pipeline_mode = #tpu.pipeline_mode<synchronous>, transform_indices = @transform_6, window_bounds = array<i64: 32, 32>}, {pipeline_mode = #tpu.pipeline_mode<synchronous>, transform_indices = @transform_7, window_bounds = array<i64: 1, 32>}, {pipeline_mode = #tpu.pipeline_mode<synchronous>, transform_indices = @transform_8, window_bounds = array<i64: 1, 32>}, {pipeline_mode = #tpu.pipeline_mode<synchronous>, transform_indices = @transform_9, window_bounds = array<i64: 1, 32>}, {pipeline_mode = #tpu.pipeline_mode<synchronous>, transform_indices = @transform_10, window_bounds = array<i64: 32, 32>}, {pipeline_mode = #tpu.pipeline_mode<synchronous>, transform_indices = @transform_11, window_bounds = array<i64: 1, 32>}, {pipeline_mode = #tpu.pipeline_mode<synchronous>, transform_indices = @transform_12, window_bounds = array<i64: 1, 32>}, {pipeline_mode = #tpu.pipeline_mode<synchronous>, transform_indices = @transform_13, window_bounds = array<i64: 1, 32>}, {transform_indices = @transform_14, window_bounds = array<i64: 1, 8, 32>}, {transform_indices = @transform_15, window_bounds = array<i64: 1, 8, 8>}]} {
    %c0 = arith.constant 0 : index
    %c0_0 = arith.constant 0 : index
    %c0_1 = arith.constant 0 : index
    %0 = vector.load %arg1[%c0, %c0_0, %c0_1] : memref<1x8x32xbf16, #tpu.memory_space<vmem>>, vector<1x8x32xbf16>
    %1 = vector.shape_cast %0 : vector<1x8x32xbf16> to vector<8x32xbf16>
    %c0_2 = arith.constant 0 : index
    %c0_3 = arith.constant 0 : index
    %c0_4 = arith.constant 0 : index
    %2 = vector.load %arg2[%c0_2, %c0_3, %c0_4] : memref<1x8x32xbf16, #tpu.memory_space<vmem>>, vector<1x8x32xbf16>
    %3 = vector.shape_cast %2 : vector<1x8x32xbf16> to vector<8x32xbf16>
    %c0_5 = arith.constant 0 : index
    %c0_6 = arith.constant 0 : index
    %c0_7 = arith.constant 0 : index
    %4 = vector.load %arg3[%c0_5, %c0_6, %c0_7] : memref<1x8x32xbf16, #tpu.memory_space<vmem>>, vector<1x8x32xbf16>
    %5 = vector.shape_cast %4 : vector<1x8x32xbf16> to vector<8x32xbf16>
    %c0_8 = arith.constant 0 : index
    %c0_9 = arith.constant 0 : index
    %c0_10 = arith.constant 0 : index
    %6 = vector.load %arg4[%c0_8, %c0_9, %c0_10] : memref<1x8x32xf32, #tpu.memory_space<vmem>>, vector<1x8x32xf32>
    %7 = vector.shape_cast %6 : vector<1x8x32xf32> to vector<8x32xf32>
    %c0_11 = arith.constant 0 : index
    %c0_12 = arith.constant 0 : index
    %8 = vector.load %arg5[%c0_11, %c0_12] : memref<32x32xbf16, #tpu.memory_space<vmem>>, vector<32x32xbf16>
    %c0_13 = arith.constant 0 : index
    %c0_14 = arith.constant 0 : index
    %9 = vector.load %arg6[%c0_13, %c0_14] : memref<32x32xbf16, #tpu.memory_space<vmem>>, vector<32x32xbf16>
    %c0_15 = arith.constant 0 : index
    %c0_16 = arith.constant 0 : index
    %10 = vector.load %arg7[%c0_15, %c0_16] : memref<32x32xbf16, #tpu.memory_space<vmem>>, vector<32x32xbf16>
    %c0_17 = arith.constant 0 : index
    %c0_18 = arith.constant 0 : index
    %11 = vector.load %arg8[%c0_17, %c0_18] : memref<1x32xf32, #tpu.memory_space<vmem>>, vector<1x32xf32>
    %c0_19 = arith.constant 0 : index
    %c0_20 = arith.constant 0 : index
    %12 = vector.load %arg9[%c0_19, %c0_20] : memref<1x32xf32, #tpu.memory_space<vmem>>, vector<1x32xf32>
    %c0_21 = arith.constant 0 : index
    %c0_22 = arith.constant 0 : index
    %13 = vector.load %arg10[%c0_21, %c0_22] : memref<1x32xf32, #tpu.memory_space<vmem>>, vector<1x32xf32>
    %c0_23 = arith.constant 0 : index
    %c0_24 = arith.constant 0 : index
    %14 = vector.load %arg11[%c0_23, %c0_24] : memref<32x32xbf16, #tpu.memory_space<vmem>>, vector<32x32xbf16>
    %c0_25 = arith.constant 0 : index
    %c0_26 = arith.constant 0 : index
    %15 = vector.load %arg12[%c0_25, %c0_26] : memref<1x32xf32, #tpu.memory_space<vmem>>, vector<1x32xf32>
    %c0_27 = arith.constant 0 : index
    %c0_28 = arith.constant 0 : index
    %16 = vector.load %arg13[%c0_27, %c0_28] : memref<1x32xf32, #tpu.memory_space<vmem>>, vector<1x32xf32>
    %c0_29 = arith.constant 0 : index
    %c0_30 = arith.constant 0 : index
    %17 = vector.load %arg14[%c0_29, %c0_30] : memref<1x32xf32, #tpu.memory_space<vmem>>, vector<1x32xf32>
    %cst = arith.constant dense<0.000000e+00> : vector<8x32xf32>
    %18 = tpu.matmul %1, %8, %cst {dimension_numbers = #tpu.dot_dimension_numbers<[1], [0], [0], [1], [0, 0, 1, 1], [], []>} : vector<8x32xbf16>, vector<32x32xbf16>, vector<8x32xf32> -> vector<8x32xf32>
    %19 = vector.broadcast %11 : vector<1x32xf32> to vector<8x32xf32>
    %20 = arith.addf %18, %19 : vector<8x32xf32>
    %21 = arith.truncf %20 : vector<8x32xf32> to vector<8x32xbf16>
    %cst_31 = arith.constant dense<0.000000e+00> : vector<8x32xf32>
    %22 = tpu.matmul %3, %9, %cst_31 {dimension_numbers = #tpu.dot_dimension_numbers<[1], [0], [0], [1], [0, 0, 1, 1], [], []>} : vector<8x32xbf16>, vector<32x32xbf16>, vector<8x32xf32> -> vector<8x32xf32>
    %23 = vector.broadcast %12 : vector<1x32xf32> to vector<8x32xf32>
    %24 = arith.addf %22, %23 : vector<8x32xf32>
    %25 = arith.truncf %24 : vector<8x32xf32> to vector<8x32xbf16>
    %cst_32 = arith.constant dense<0.000000e+00> : vector<8x32xf32>
    %26 = tpu.matmul %5, %10, %cst_32 {dimension_numbers = #tpu.dot_dimension_numbers<[1], [0], [0], [1], [0, 0, 1, 1], [], []>} : vector<8x32xbf16>, vector<32x32xbf16>, vector<8x32xf32> -> vector<8x32xf32>
    %27 = vector.broadcast %13 : vector<1x32xf32> to vector<8x32xf32>
    %28 = arith.addf %26, %27 : vector<8x32xf32>
    %29 = arith.truncf %28 : vector<8x32xf32> to vector<8x32xbf16>
    %cst_33 = arith.constant 0.000000e+00 : f32
    %30 = vector.broadcast %cst_33 : f32 to vector<8x8xf32>
    %cst_34 = arith.constant 0.000000e+00 : f32
    %31 = vector.broadcast %cst_34 : f32 to vector<8x32xf32>
    %32 = vector.extract_strided_slice %21 {offsets = [0, 0], sizes = [8, 8], strides = [1, 1]} : vector<8x32xbf16> to vector<8x8xbf16>
    %33 = vector.extract_strided_slice %25 {offsets = [0, 0], sizes = [8, 8], strides = [1, 1]} : vector<8x32xbf16> to vector<8x8xbf16>
    %34 = vector.extract_strided_slice %29 {offsets = [0, 0], sizes = [8, 8], strides = [1, 1]} : vector<8x32xbf16> to vector<8x8xbf16>
    %cst_35 = arith.constant dense<0.000000e+00> : vector<8x8xf32>
    %35 = tpu.matmul %32, %33, %cst_35 {dimension_numbers = #tpu.dot_dimension_numbers<[1], [1], [0], [0], [0, 0, 1, 0], [], []>} : vector<8x8xbf16>, vector<8x8xbf16>, vector<8x8xf32> -> vector<8x8xf32>
    %cst_36 = arith.constant dense<0xFF800000> : vector<8xf32>
    %36 = vector.multi_reduction <maximumf>, %35, %cst_36 [1] : vector<8x8xf32> to vector<8xf32>
    %37 = vector.shape_cast %36 : vector<8xf32> to vector<8x1xf32>
    %38 = vector.broadcast %37 : vector<8x1xf32> to vector<8x8xf32>
    %39 = arith.subf %35, %38 : vector<8x8xf32>
    %40 = math.exp %39 : vector<8x8xf32>
    %cst_37 = arith.constant dense<0.000000e+00> : vector<8xf32>
    %41 = vector.multi_reduction <add>, %40, %cst_37 [1] : vector<8x8xf32> to vector<8xf32>
    %42 = vector.shape_cast %41 : vector<8xf32> to vector<8x1xf32>
    %43 = vector.broadcast %42 : vector<8x1xf32> to vector<8x8xf32>
    %44 = arith.divf %40, %43 : vector<8x8xf32>
    %45 = arith.addf %30, %44 : vector<8x8xf32>
    %46 = arith.truncf %44 : vector<8x8xf32> to vector<8x8xbf16>
    %cst_38 = arith.constant dense<0.000000e+00> : vector<8x8xf32>
    %47 = tpu.matmul %46, %34, %cst_38 {dimension_numbers = #tpu.dot_dimension_numbers<[1], [0], [0], [1], [0, 0, 1, 1], [], []>} : vector<8x8xbf16>, vector<8x8xbf16>, vector<8x8xf32> -> vector<8x8xf32>
    %48 = arith.truncf %47 : vector<8x8xf32> to vector<8x8xbf16>
    %49 = vector.extract_strided_slice %14 {offsets = [0, 0], sizes = [8, 32], strides = [1, 1]} : vector<32x32xbf16> to vector<8x32xbf16>
    %cst_39 = arith.constant dense<0.000000e+00> : vector<8x32xf32>
    %50 = tpu.matmul %48, %49, %cst_39 {dimension_numbers = #tpu.dot_dimension_numbers<[1], [0], [0], [1], [0, 0, 1, 1], [], []>} : vector<8x8xbf16>, vector<8x32xbf16>, vector<8x32xf32> -> vector<8x32xf32>
    %51 = arith.addf %31, %50 : vector<8x32xf32>
    %52 = vector.extract_strided_slice %21 {offsets = [0, 8], sizes = [8, 8], strides = [1, 1]} : vector<8x32xbf16> to vector<8x8xbf16>
    %53 = vector.extract_strided_slice %25 {offsets = [0, 8], sizes = [8, 8], strides = [1, 1]} : vector<8x32xbf16> to vector<8x8xbf16>
    %54 = vector.extract_strided_slice %29 {offsets = [0, 8], sizes = [8, 8], strides = [1, 1]} : vector<8x32xbf16> to vector<8x8xbf16>
    %cst_40 = arith.constant dense<0.000000e+00> : vector<8x8xf32>
    %55 = tpu.matmul %52, %53, %cst_40 {dimension_numbers = #tpu.dot_dimension_numbers<[1], [1], [0], [0], [0, 0, 1, 0], [], []>} : vector<8x8xbf16>, vector<8x8xbf16>, vector<8x8xf32> -> vector<8x8xf32>
    %cst_41 = arith.constant dense<0xFF800000> : vector<8xf32>
    %56 = vector.multi_reduction <maximumf>, %55, %cst_41 [1] : vector<8x8xf32> to vector<8xf32>
    %57 = vector.shape_cast %56 : vector<8xf32> to vector<8x1xf32>
    %58 = vector.broadcast %57 : vector<8x1xf32> to vector<8x8xf32>
    %59 = arith.subf %55, %58 : vector<8x8xf32>
    %60 = math.exp %59 : vector<8x8xf32>
    %cst_42 = arith.constant dense<0.000000e+00> : vector<8xf32>
    %61 = vector.multi_reduction <add>, %60, %cst_42 [1] : vector<8x8xf32> to vector<8xf32>
    %62 = vector.shape_cast %61 : vector<8xf32> to vector<8x1xf32>
    %63 = vector.broadcast %62 : vector<8x1xf32> to vector<8x8xf32>
    %64 = arith.divf %60, %63 : vector<8x8xf32>
    %65 = arith.addf %45, %64 : vector<8x8xf32>
    %66 = arith.truncf %64 : vector<8x8xf32> to vector<8x8xbf16>
    %cst_43 = arith.constant dense<0.000000e+00> : vector<8x8xf32>
    %67 = tpu.matmul %66, %54, %cst_43 {dimension_numbers = #tpu.dot_dimension_numbers<[1], [0], [0], [1], [0, 0, 1, 1], [], []>} : vector<8x8xbf16>, vector<8x8xbf16>, vector<8x8xf32> -> vector<8x8xf32>
    %68 = arith.truncf %67 : vector<8x8xf32> to vector<8x8xbf16>
    %69 = vector.extract_strided_slice %14 {offsets = [8, 0], sizes = [8, 32], strides = [1, 1]} : vector<32x32xbf16> to vector<8x32xbf16>
    %cst_44 = arith.constant dense<0.000000e+00> : vector<8x32xf32>
    %70 = tpu.matmul %68, %69, %cst_44 {dimension_numbers = #tpu.dot_dimension_numbers<[1], [0], [0], [1], [0, 0, 1, 1], [], []>} : vector<8x8xbf16>, vector<8x32xbf16>, vector<8x32xf32> -> vector<8x32xf32>
    %71 = arith.addf %51, %70 : vector<8x32xf32>
    %72 = vector.extract_strided_slice %21 {offsets = [0, 16], sizes = [8, 8], strides = [1, 1]} : vector<8x32xbf16> to vector<8x8xbf16>
    %73 = vector.extract_strided_slice %25 {offsets = [0, 16], sizes = [8, 8], strides = [1, 1]} : vector<8x32xbf16> to vector<8x8xbf16>
    %74 = vector.extract_strided_slice %29 {offsets = [0, 16], sizes = [8, 8], strides = [1, 1]} : vector<8x32xbf16> to vector<8x8xbf16>
    %cst_45 = arith.constant dense<0.000000e+00> : vector<8x8xf32>
    %75 = tpu.matmul %72, %73, %cst_45 {dimension_numbers = #tpu.dot_dimension_numbers<[1], [1], [0], [0], [0, 0, 1, 0], [], []>} : vector<8x8xbf16>, vector<8x8xbf16>, vector<8x8xf32> -> vector<8x8xf32>
    %cst_46 = arith.constant dense<0xFF800000> : vector<8xf32>
    %76 = vector.multi_reduction <maximumf>, %75, %cst_46 [1] : vector<8x8xf32> to vector<8xf32>
    %77 = vector.shape_cast %76 : vector<8xf32> to vector<8x1xf32>
    %78 = vector.broadcast %77 : vector<8x1xf32> to vector<8x8xf32>
    %79 = arith.subf %75, %78 : vector<8x8xf32>
    %80 = math.exp %79 : vector<8x8xf32>
    %cst_47 = arith.constant dense<0.000000e+00> : vector<8xf32>
    %81 = vector.multi_reduction <add>, %80, %cst_47 [1] : vector<8x8xf32> to vector<8xf32>
    %82 = vector.shape_cast %81 : vector<8xf32> to vector<8x1xf32>
    %83 = vector.broadcast %82 : vector<8x1xf32> to vector<8x8xf32>
    %84 = arith.divf %80, %83 : vector<8x8xf32>
    %85 = arith.addf %65, %84 : vector<8x8xf32>
    %86 = arith.truncf %84 : vector<8x8xf32> to vector<8x8xbf16>
    %cst_48 = arith.constant dense<0.000000e+00> : vector<8x8xf32>
    %87 = tpu.matmul %86, %74, %cst_48 {dimension_numbers = #tpu.dot_dimension_numbers<[1], [0], [0], [1], [0, 0, 1, 1], [], []>} : vector<8x8xbf16>, vector<8x8xbf16>, vector<8x8xf32> -> vector<8x8xf32>
    %88 = arith.truncf %87 : vector<8x8xf32> to vector<8x8xbf16>
    %89 = vector.extract_strided_slice %14 {offsets = [16, 0], sizes = [8, 32], strides = [1, 1]} : vector<32x32xbf16> to vector<8x32xbf16>
    %cst_49 = arith.constant dense<0.000000e+00> : vector<8x32xf32>
    %90 = tpu.matmul %88, %89, %cst_49 {dimension_numbers = #tpu.dot_dimension_numbers<[1], [0], [0], [1], [0, 0, 1, 1], [], []>} : vector<8x8xbf16>, vector<8x32xbf16>, vector<8x32xf32> -> vector<8x32xf32>
    %91 = arith.addf %71, %90 : vector<8x32xf32>
    %92 = vector.extract_strided_slice %21 {offsets = [0, 24], sizes = [8, 8], strides = [1, 1]} : vector<8x32xbf16> to vector<8x8xbf16>
    %93 = vector.extract_strided_slice %25 {offsets = [0, 24], sizes = [8, 8], strides = [1, 1]} : vector<8x32xbf16> to vector<8x8xbf16>
    %94 = vector.extract_strided_slice %29 {offsets = [0, 24], sizes = [8, 8], strides = [1, 1]} : vector<8x32xbf16> to vector<8x8xbf16>
    %cst_50 = arith.constant dense<0.000000e+00> : vector<8x8xf32>
    %95 = tpu.matmul %92, %93, %cst_50 {dimension_numbers = #tpu.dot_dimension_numbers<[1], [1], [0], [0], [0, 0, 1, 0], [], []>} : vector<8x8xbf16>, vector<8x8xbf16>, vector<8x8xf32> -> vector<8x8xf32>
    %cst_51 = arith.constant dense<0xFF800000> : vector<8xf32>
    %96 = vector.multi_reduction <maximumf>, %95, %cst_51 [1] : vector<8x8xf32> to vector<8xf32>
    %97 = vector.shape_cast %96 : vector<8xf32> to vector<8x1xf32>
    %98 = vector.broadcast %97 : vector<8x1xf32> to vector<8x8xf32>
    %99 = arith.subf %95, %98 : vector<8x8xf32>
    %100 = math.exp %99 : vector<8x8xf32>
    %cst_52 = arith.constant dense<0.000000e+00> : vector<8xf32>
    %101 = vector.multi_reduction <add>, %100, %cst_52 [1] : vector<8x8xf32> to vector<8xf32>
    %102 = vector.shape_cast %101 : vector<8xf32> to vector<8x1xf32>
    %103 = vector.broadcast %102 : vector<8x1xf32> to vector<8x8xf32>
    %104 = arith.divf %100, %103 : vector<8x8xf32>
    %105 = arith.addf %85, %104 : vector<8x8xf32>
    %106 = arith.truncf %104 : vector<8x8xf32> to vector<8x8xbf16>
    %cst_53 = arith.constant dense<0.000000e+00> : vector<8x8xf32>
    %107 = tpu.matmul %106, %94, %cst_53 {dimension_numbers = #tpu.dot_dimension_numbers<[1], [0], [0], [1], [0, 0, 1, 1], [], []>} : vector<8x8xbf16>, vector<8x8xbf16>, vector<8x8xf32> -> vector<8x8xf32>
    %108 = arith.truncf %107 : vector<8x8xf32> to vector<8x8xbf16>
    %109 = vector.extract_strided_slice %14 {offsets = [24, 0], sizes = [8, 32], strides = [1, 1]} : vector<32x32xbf16> to vector<8x32xbf16>
    %cst_54 = arith.constant dense<0.000000e+00> : vector<8x32xf32>
    %110 = tpu.matmul %108, %109, %cst_54 {dimension_numbers = #tpu.dot_dimension_numbers<[1], [0], [0], [1], [0, 0, 1, 1], [], []>} : vector<8x8xbf16>, vector<8x32xbf16>, vector<8x32xf32> -> vector<8x32xf32>
    %111 = arith.addf %91, %110 : vector<8x32xf32>
    %cst_55 = arith.constant 2.500000e-01 : f32
    %112 = vector.broadcast %cst_55 : f32 to vector<8x8xf32>
    %113 = arith.mulf %105, %112 : vector<8x8xf32>
    %c0_56 = arith.constant 0 : index
    %c0_57 = arith.constant 0 : index
    %c0_58 = arith.constant 0 : index
    %114 = vector.load %arg16[%c0_56, %c0_57, %c0_58] : memref<1x8x8xf32, #tpu.memory_space<vmem>>, vector<1x8x8xf32>
    %115 = vector.shape_cast %114 : vector<1x8x8xf32> to vector<8x8xf32>
    %116 = vector.shape_cast %113 : vector<8x8xf32> to vector<1x8x8xf32>
    tpu.vector_store %arg16[%c0_56, %c0_57, %c0_58], %116 {strides = array<i32>} : memref<1x8x8xf32, #tpu.memory_space<vmem>>, vector<1x8x8xf32>,
    %117 = arith.addf %7, %111 : vector<8x32xf32>
    %118 = vector.broadcast %15 : vector<1x32xf32> to vector<8x32xf32>
    %119 = arith.addf %117, %118 : vector<8x32xf32>
    %cst_59 = arith.constant dense<0.000000e+00> : vector<8xf32>
    %120 = vector.multi_reduction <add>, %119, %cst_59 [1] : vector<8x32xf32> to vector<8xf32>
    %121 = vector.shape_cast %120 : vector<8xf32> to vector<8x1xf32>
    %cst_60 = arith.constant 3.200000e+01 : f32
    %122 = vector.broadcast %cst_60 : f32 to vector<8x1xf32>
    %123 = arith.divf %121, %122 : vector<8x1xf32>
    %124 = vector.broadcast %123 : vector<8x1xf32> to vector<8x32xf32>
    %125 = arith.subf %119, %124 : vector<8x32xf32>
    %126 = arith.mulf %125, %125 : vector<8x32xf32>
    %cst_61 = arith.constant dense<0.000000e+00> : vector<8xf32>
    %127 = vector.multi_reduction <add>, %126, %cst_61 [1] : vector<8x32xf32> to vector<8xf32>
    %128 = vector.shape_cast %127 : vector<8xf32> to vector<8x1xf32>
    %cst_62 = arith.constant 3.200000e+01 : f32
    %129 = vector.broadcast %cst_62 : f32 to vector<8x1xf32>
    %130 = arith.divf %128, %129 : vector<8x1xf32>
    %131 = vector.broadcast %123 : vector<8x1xf32> to vector<8x32xf32>
    %132 = arith.subf %119, %131 : vector<8x32xf32>
    %cst_63 = arith.constant 9.99999974E-6 : f32
    %133 = vector.broadcast %cst_63 : f32 to vector<8x1xf32>
    %134 = arith.addf %130, %133 : vector<8x1xf32>
    %135 = math.rsqrt %134 : vector<8x1xf32>
    %136 = vector.broadcast %135 : vector<8x1xf32> to vector<8x32xf32>
    %137 = arith.mulf %132, %136 : vector<8x32xf32>
    %138 = vector.broadcast %16 : vector<1x32xf32> to vector<8x32xf32>
    %139 = arith.mulf %137, %138 : vector<8x32xf32>
    %140 = vector.broadcast %17 : vector<1x32xf32> to vector<8x32xf32>
    %141 = arith.addf %139, %140 : vector<8x32xf32>
    %c0_64 = arith.constant 0 : index
    %c0_65 = arith.constant 0 : index
    %c0_66 = arith.constant 0 : index
    %142 = vector.load %arg15[%c0_64, %c0_65, %c0_66] : memref<1x8x32xf32, #tpu.memory_space<vmem>>, vector<1x8x32xf32>
    %143 = vector.shape_cast %142 : vector<1x8x32xf32> to vector<8x32xf32>
    %144 = vector.shape_cast %141 : vector<8x32xf32> to vector<1x8x32xf32>
    tpu.vector_store %arg15[%c0_64, %c0_65, %c0_66], %144 {strides = array<i32>} : memref<1x8x32xf32, #tpu.memory_space<vmem>>, vector<1x8x32xf32>,
    return
  }
  func.func @transform_0(%arg0: i32) -> (i32, i32, i32) {
    %c0_i32 = arith.constant 0 : i32
    %c0_i32_0 = arith.constant 0 : i32
    %c0_i32_1 = arith.constant 0 : i32
    return %arg0, %c0_i32, %c0_i32_0 : i32, i32, i32
  }
  func.func @transform_1(%arg0: i32) -> (i32, i32, i32) {
    %c0_i32 = arith.constant 0 : i32
    %c0_i32_0 = arith.constant 0 : i32
    %c0_i32_1 = arith.constant 0 : i32
    return %arg0, %c0_i32, %c0_i32_0 : i32, i32, i32
  }
  func.func @transform_2(%arg0: i32) -> (i32, i32, i32) {
    %c0_i32 = arith.constant 0 : i32
    %c0_i32_0 = arith.constant 0 : i32
    %c0_i32_1 = arith.constant 0 : i32
    return %arg0, %c0_i32, %c0_i32_0 : i32, i32, i32
  }
  func.func @transform_3(%arg0: i32) -> (i32, i32, i32) {
    %c0_i32 = arith.constant 0 : i32
    %c0_i32_0 = arith.constant 0 : i32
    %c0_i32_1 = arith.constant 0 : i32
    return %arg0, %c0_i32, %c0_i32_0 : i32, i32, i32
  }
  func.func @transform_4(%arg0: i32) -> (i32, i32) {
    %c0_i32 = arith.constant 0 : i32
    %c0_i32_0 = arith.constant 0 : i32
    %c0_i32_1 = arith.constant 0 : i32
    return %c0_i32, %c0_i32_0 : i32, i32
  }
  func.func @transform_5(%arg0: i32) -> (i32, i32) {
    %c0_i32 = arith.constant 0 : i32
    %c0_i32_0 = arith.constant 0 : i32
    %c0_i32_1 = arith.constant 0 : i32
    return %c0_i32, %c0_i32_0 : i32, i32
  }
  func.func @transform_6(%arg0: i32) -> (i32, i32) {
    %c0_i32 = arith.constant 0 : i32
    %c0_i32_0 = arith.constant 0 : i32
    %c0_i32_1 = arith.constant 0 : i32
    return %c0_i32, %c0_i32_0 : i32, i32
  }
  func.func @transform_7(%arg0: i32) -> (i32, i32) {
    %c0_i32 = arith.constant 0 : i32
    %c0_i32_0 = arith.constant 0 : i32
    %c0_i32_1 = arith.constant 0 : i32
    return %c0_i32, %c0_i32_0 : i32, i32
  }
  func.func @transform_8(%arg0: i32) -> (i32, i32) {
    %c0_i32 = arith.constant 0 : i32
    %c0_i32_0 = arith.constant 0 : i32
    %c0_i32_1 = arith.constant 0 : i32
    return %c0_i32, %c0_i32_0 : i32, i32
  }
  func.func @transform_9(%arg0: i32) -> (i32, i32) {
    %c0_i32 = arith.constant 0 : i32
    %c0_i32_0 = arith.constant 0 : i32
    %c0_i32_1 = arith.constant 0 : i32
    return %c0_i32, %c0_i32_0 : i32, i32
  }
  func.func @transform_10(%arg0: i32) -> (i32, i32) {
    %c0_i32 = arith.constant 0 : i32
    %c0_i32_0 = arith.constant 0 : i32
    %c0_i32_1 = arith.constant 0 : i32
    return %c0_i32, %c0_i32_0 : i32, i32
  }
  func.func @transform_11(%arg0: i32) -> (i32, i32) {
    %c0_i32 = arith.constant 0 : i32
    %c0_i32_0 = arith.constant 0 : i32
    %c0_i32_1 = arith.constant 0 : i32
    return %c0_i32, %c0_i32_0 : i32, i32
  }
  func.func @transform_12(%arg0: i32) -> (i32, i32) {
    %c0_i32 = arith.constant 0 : i32
    %c0_i32_0 = arith.constant 0 : i32
    %c0_i32_1 = arith.constant 0 : i32
    return %c0_i32, %c0_i32_0 : i32, i32
  }
  func.func @transform_13(%arg0: i32) -> (i32, i32) {
    %c0_i32 = arith.constant 0 : i32
    %c0_i32_0 = arith.constant 0 : i32
    %c0_i32_1 = arith.constant 0 : i32
    return %c0_i32, %c0_i32_0 : i32, i32
  }
  func.func @transform_14(%arg0: i32) -> (i32, i32, i32) {
    %c0_i32 = arith.constant 0 : i32
    %c0_i32_0 = arith.constant 0 : i32
    %c0_i32_1 = arith.constant 0 : i32
    return %arg0, %c0_i32, %c0_i32_0 : i32, i32, i32
  }
  func.func @transform_15(%arg0: i32) -> (i32, i32, i32) {
    %c0_i32 = arith.constant 0 : i32
    %c0_i32_0 = arith.constant 0 : i32
    %c0_i32_1 = arith.constant 0 : i32
    return %arg0, %c0_i32, %c0_i32_0 : i32, i32, i32
  }
}

</mosaic_0001>

<bundles_post_ra>
// kernel: transformer_decoder_forward.19
= control target key start
LH: loop header
LB: loop body
LE: loop exit
PB: predicated region body
PF: predicated region fallthrough
CT: control target
= control target key end

     0   :  { %v606_v1 = vmov 0   ;;  %vm225_vm0 = vcmask 523264   ;;  %s754_s2 = inlined_call_operand.vmem [shape: bf16[64,128], index: 2, kind: input, shape index: {}]   ;;  %s755_s0 = inlined_call_operand.vmem [shape: bf16[128,64], index: 0, kind: input, shape index: {}]   ;;  %s756_s1 = inlined_call_operand.vmem [shape: f32[128,1], index: 1, kind: input, shape index: {}]   ;;  %s757_s3 = inlined_call_operand.vmem [shape: f32[1,128], index: 3, kind: input, shape index: {}]   ;;  %s758_s4 = inlined_call_operand.vmem [shape: bf16[128,128], index: 4, kind: output, shape index: {}]  }
   0x1   :  { %v594_v0 = vld [vmem:[%s754_s2 + $0x18] sm:$0xff]   ;;  %593 = vset.pattern.permute.xlu1 %v606_v1  ;;  %592 = vset.pattern.permute.xlu0 %v606_v1  ;;  %v595_v2 = vld [vmem:[%s754_s2 + $0x10] sm:$0xff]   ;;  %v596_v3 = vld [vmem:[%s754_s2 + $0x8] sm:$0xff]  }
   0x2   :  { %559 = vmatprep.subr.bf16.mxu0 %v594_v0  ;;  %583 = vmatprep.subr.bf16.mxu1 %v594_v0  ;;  %v598_v4 = vld [vmem:[%s755_s0] sm:$0xff]   ;;  %v44_v7 = vld [vmem:[%s756_s1 + $0x10] sm:$0xff]  ;;  %v600_v9 = vld [vmem:[%s755_s0 + $0x8] sm:$0xff]  }
   0x3   :  { %560 = vmatpush3.bf16.msra.mxu0 %v594_v0  ;;  %587 = vmatpush3.bf16.msra.mxu1 %v594_v0  ;;  %v599_v5 = vld [vmem:[%s755_s0 + $0x20] sm:$0xff]   ;;  %v601_v10 = vld [vmem:[%s755_s0 + $0x28] sm:$0xff]   ;;  %v45_v11 = vld [vmem:[%s756_s1 + $0x18] sm:$0xff] }
   0x4   :  { %561 = vmatprep.subr.bf16.mxu0 %v595_v2  ;;  %584 = vmatprep.subr.bf16.mxu1 %v595_v2  ;;  %v597_v6 = vld [vmem:[%s754_s2] sm:$0xff]   ;;  %v43_v12 = vld [vmem:[%s756_s1 + $0x8] sm:$0xff]  ;;  %v602_v13 = vld [vmem:[%s755_s0 + $0x10] sm:$0xff]  }
   0x5   :  { %567 = vmatprep.mubr.msk.bf16.mxu0 %vm225_vm0, %v598_v4  ;;  %575 = vmatprep.mubr.msk.bf16.mxu1 %vm225_vm0, %v599_v5  ;;  %v42_v8 = vld [vmem:[%s756_s1] sm:$0xff]  ;;  %v603_v14 = vld [vmem:[%s755_s0 + $0x30] sm:$0xff]   ;;  %v47_v15 = vld [vmem:[%s756_s1 + $0x28] sm:$0xff] }
   0x6   :  { %71 = vperm.xlu1 %593, %v44_v7   ;;  %61 = vperm.xlu0 %592, %v42_v8   ;;  %v46_v16 = vld [vmem:[%s756_s1 + $0x20] sm:$0xff]  ;;  %v604_v17 = vld [vmem:[%s755_s0 + $0x18] sm:$0xff]   ;;  %v48_v20 = vld [vmem:[%s756_s1 + $0x30] sm:$0xff] }
   0x7   :  { %562 = vmatpush3.bf16.msra.mxu0 %v595_v2  ;;  %588 = vmatpush3.bf16.msra.mxu1 %v595_v2  ;;  %v605_v18 = vld [vmem:[%s755_s0 + $0x38] sm:$0xff]   ;;  %v51_v21 = vld [vmem:[%s756_s1 + $0x48] sm:$0xff]  ;;  %v50_v22 = vld [vmem:[%s756_s1 + $0x40] sm:$0xff] }
   0x8   :  { %563 = vmatprep.subr.bf16.mxu0 %v596_v3  ;;  %585 = vmatprep.subr.bf16.mxu1 %v596_v3  ;;  %v49_v19 = vld [vmem:[%s756_s1 + $0x38] sm:$0xff]  ;;  %v52_v24 = vld [vmem:[%s756_s1 + $0x50] sm:$0xff]  ;;  %v55_v25 = vld [vmem:[%s756_s1 + $0x68] sm:$0xff] }
   0x9   :  { %v53_v23 = vld [vmem:[%s756_s1 + $0x58] sm:$0xff]  ;;  %v54_v26 = vld [vmem:[%s756_s1 + $0x60] sm:$0xff]  ;;  %v56_v28 = vld [vmem:[%s756_s1 + $0x70] sm:$0xff] }
   0xa   :  { %76 = vperm.xlu1 %593, %v45_v11   ;;  %66 = vperm.xlu0 %592, %v43_v12   ;;  %v57_v27 = vld [vmem:[%s756_s1 + $0x78] sm:$0xff]  ;;  %v447_v41 = vld [vmem:[%s757_s3] ss:$0 sm:$0xff] }
   0xb   :  { %564 = vmatpush3.bf16.msra.mxu0 %v596_v3  ;;  %589 = vmatpush3.bf16.msra.mxu1 %v596_v3 }
   0xc   :  { %565 = vmatprep.subr.bf16.mxu0 %v597_v6  ;;  %586 = vmatprep.subr.bf16.mxu1 %v597_v6 }
   0xe   :  { %86 = vperm.xlu1 %593, %v47_v15   ;;  %81 = vperm.xlu0 %592, %v46_v16  }
   0xf   :  { %566 = vmatpush3.bf16.msra.mxu0 %v597_v6  ;;  %590 = vmatpush3.bf16.msra.mxu1 %v597_v6 }
  0x12   :  { %568 = vmatmul.mubr.msk.bf16.vlgmr.msra.gmra.mxu0 %vm225_vm0, %v600_v9  ;;  %576 = vmatmul.mubr.msk.bf16.vlgmr.msra.gmra.mxu1 %vm225_vm0, %v601_v10 }
  0x13   :  { %571 = vmatprep.mubr.msk.bf16.mxu0 %vm225_vm0, %v602_v13  ;;  %579 = vmatprep.mubr.msk.bf16.mxu1 %vm225_vm0, %v603_v14 }
  0x14   :  { %96 = vperm.xlu1 %593, %v49_v19   ;;  %91 = vperm.xlu0 %592, %v48_v20  }
  0x18   :  { %106 = vperm.xlu1 %593, %v51_v21   ;;  %101 = vperm.xlu0 %592, %v50_v22  }
  0x1a   :  { %572 = vmatmul.mubr.msk.bf16.gmra.mxu0 %vm225_vm0, %v604_v17  ;;  %580 = vmatmul.mubr.msk.bf16.gmra.mxu1 %vm225_vm0, %v605_v18 }
  0x1c   :  { %116 = vperm.xlu1 %593, %v53_v23   ;;  %111 = vperm.xlu0 %592, %v52_v24  }
  0x20   :  { %126 = vperm.xlu1 %593, %v55_v25   ;;  %121 = vperm.xlu0 %592, %v54_v26  }
  0x24   :  { %136 = vperm.xlu1 %593, %v57_v27   ;;  %131 = vperm.xlu0 %592, %v56_v28  }
  0x81   :  { %v62_v29 = vpop.permute.xlu0 %61  ;;  %v72_v30 = vpop.permute.xlu1 %71 }
  0x82   :  { %v147_v43 = vmul.f32 %v447_v41, %v72_v30  ;;  %v145_v48 = vmul.f32 %v447_v41, %v62_v29 }
  0x85   :  { %v67_v31 = vpop.permute.xlu0 %66  ;;  %v77_v32 = vpop.permute.xlu1 %76 }
  0x86   :  { %v148_v54 = vmul.f32 %v447_v41, %v77_v32  ;;  %v146_v60 = vmul.f32 %v447_v41, %v67_v31 }
  0x89   :  { %v82_v33 = vpop.permute.xlu0 %81  ;;  %v724_v34 = vpop.permute.xlu1 %86 }
  0x8a   :  { %v149_v20 = vmul.f32 %v447_v41, %v82_v33 }
  0x8f   :  { %v92_v35 = vpop.permute.xlu0 %91  ;;  %v97_v36 = vpop.permute.xlu1 %96 }
  0x90   :  { %v151_v10 = vmul.f32 %v447_v41, %v92_v35  ;;  %v152_v26 = vmul.f32 %v447_v41, %v97_v36  ;;  %v150_v35 = vmul.f32 %v447_v41, %v724_v34 }
  0x93   :  { %v102_v37 = vpop.permute.xlu0 %101  ;;  %v107_v38 = vpop.permute.xlu1 %106 }
  0x94   :  { %v153_v49 = vmul.f32 %v447_v41, %v102_v37  ;;  %v154_v61 = vmul.f32 %v447_v41, %v107_v38 }
  0x97   :  { %v112_v39 = vpop.permute.xlu0 %111  ;;  %v117_v40 = vpop.permute.xlu1 %116 }
  0x98   :  { %v155_v44 = vmul.f32 %v447_v41, %v112_v39  ;;  %v156_v55 = vmul.f32 %v447_v41, %v117_v40 }
  0x9b   :  { %v122_v42 = vpop.permute.xlu0 %121  ;;  %v127_v47 = vpop.permute.xlu1 %126 }
  0x9c   :  { %v157_v21 = vmul.f32 %v447_v41, %v122_v42  ;;  %v158_v37 = vmul.f32 %v447_v41, %v127_v47 }
  0x9f   :  { %v132_v62 = vpop.permute.xlu0 %131  ;;  %v137_v5 = vpop.permute.xlu1 %136 }
  0xa0   :  { %v159_v11 = vmul.f32 %v447_v41, %v132_v62  ;;  %v160_v27 = vmul.f32 %v447_v41, %v137_v5 }
  0xd2   :  { %v569_v45 = vpop.f32.mrf.mxu0  ;;  %v577_v46 = vpop.f32.mrf.mxu1 }
  0xd3   :  { %v293_v50 = vadd.f32 %v569_v45, %v147_v43  ;;  %v325_v51 = vadd.f32 %v577_v46, %v155_v44 }
  0xd4   :  { %v284_v52 = vpop.f32.mrf.mxu0  ;;  %v316_v53 = vpop.f32.mrf.mxu1 }
  0xd5   :  { %v285_v56 = vadd.f32 %v284_v52, %v145_v48  ;;  %v317_v57 = vadd.f32 %v316_v53, %v153_v49  ;;  %v349_v1 = vmax.f32 %v293_v50, 0.0  ;;  %v357_v2 = vmax.f32 %v325_v51, 0.0 }
  0xd6   :  { %v570_v58 = vpop.f32.mrf.mxu0  ;;  %v578_v59 = vpop.f32.mrf.mxu1 }
  0xd7   :  { %v296_v63 = vadd.f32 %v570_v58, %v148_v54  ;;  %v328_v0 = vadd.f32 %v578_v59, %v156_v55  ;;  %v347_v12 = vmax.f32 %v285_v56, 0.0  ;;  %v355_v13 = vmax.f32 %v317_v57, 0.0 }
  0xd8   :  { %v287_v3 = vpop.f32.mrf.mxu0  ;;  %v319_v4 = vpop.f32.mrf.mxu1 }
  0xd9   :  { %v350_v6 = vmax.f32 %v296_v63, 0.0  ;;  %v358_v7 = vmax.f32 %v328_v0, 0.0  ;;  %v288_v8 = vadd.f32 %v287_v3, %v146_v60  ;;  %v320_v9 = vadd.f32 %v319_v4, %v154_v61 }
  0xda   :  { %v573_v14 = vpop.f32.mrf.mxu0  ;;  %v581_v15 = vpop.f32.mrf.mxu1 }
  0xdb   :  { %v508_v16 = vpack.c.bf16 %v350_v6, %v349_v1  ;;  %v528_v17 = vpack.c.bf16 %v358_v7, %v357_v2  ;;  %v348_v18 = vmax.f32 %v288_v8, 0.0  ;;  %v356_v19 = vmax.f32 %v320_v9, 0.0 }
  0xdc   :  { %v309_v22 = vadd.f32 %v573_v14, %v151_v10  ;;  %v341_v23 = vadd.f32 %v581_v15, %v159_v11  ;;  %v300_v24 = vpop.f32.mrf.mxu0  ;;  %v332_v25 = vpop.f32.mrf.mxu1 }
  0xdd   :  { %540 = vst [vmem:[%s758_s4 + $0x8] sm:$0xff] %v508_v16   ;;  %544 = vst [vmem:[%s758_s4 + $0x28] sm:$0xff] %v528_v17   ;;  %v503_v28 = vpack.c.bf16 %v348_v18, %v347_v12  ;;  %v523_v29 = vpack.c.bf16 %v356_v19, %v355_v13  ;;  %v301_v30 = vadd.f32 %v300_v24, %v149_v20 }
  0xde   :  { %v333_v31 = vadd.f32 %v332_v25, %v157_v21  ;;  %v574_v32 = vpop.f32.mrf.mxu0  ;;  %v582_v33 = vpop.f32.mrf.mxu1  ;;  %v353_v39 = vmax.f32 %v309_v22, 0.0  ;;  %v361_v40 = vmax.f32 %v341_v23, 0.0 }
  0xdf   :  { %504 = vst [vmem:[%s758_s4] sm:$0xff] %v503_v28   ;;  %543 = vst [vmem:[%s758_s4 + $0x20] sm:$0xff] %v523_v29   ;;  %v312_v36 = vadd.f32 %v574_v32, %v152_v26  ;;  %v344_v38 = vadd.f32 %v582_v33, %v160_v27  ;;  %v351_v34 = vmax.f32 %v301_v30, 0.0 }
  0xe0   :  { %v303_v42 = vpop.f32.mrf.mxu0  ;;  %v335_v43 = vpop.f32.mrf.mxu1  ;;  %v359_v41 = vmax.f32 %v333_v31, 0.0 }
  0xe1   :  { %v354_v44 = vmax.f32 %v312_v36, 0.0  ;;  %v362_v45 = vmax.f32 %v344_v38, 0.0  ;;  %v304_v46 = vadd.f32 %v303_v42, %v150_v35  ;;  %v336_v48 = vadd.f32 %v335_v43, %v158_v37 }
  0xe3   :  { %v518_v47 = vpack.c.bf16 %v354_v44, %v353_v39  ;;  %v538_v49 = vpack.c.bf16 %v362_v45, %v361_v40  ;;  %v352_v50 = vmax.f32 %v304_v46, 0.0  ;;  %v360_v51 = vmax.f32 %v336_v48, 0.0 }
  0xe5   :  { %542 = vst [vmem:[%s758_s4 + $0x18] sm:$0xff] %v518_v47   ;;  %546 = vst [vmem:[%s758_s4 + $0x38] sm:$0xff] %v538_v49   ;;  %v513_v52 = vpack.c.bf16 %v352_v50, %v351_v34  ;;  %v533_v53 = vpack.c.bf16 %v360_v51, %v359_v41 }
  0xe7   :  { %541 = vst [vmem:[%s758_s4 + $0x10] sm:$0xff] %v513_v52   ;;  %545 = vst [vmem:[%s758_s4 + $0x30] sm:$0xff] %v533_v53  }

// kernel: transformer_decoder_forward.20
= control target key start
LH: loop header
LB: loop body
LE: loop exit
PB: predicated region body
PF: predicated region fallthrough
CT: control target
= control target key end

     0   :  { %s2182_s18 = smov 0   ;;  %s2492_s0 = inlined_call_operand.vmem [shape: bf16[2,8,32], index: 0, kind: input, shape index: {}]   ;;  %s2493_s1 = inlined_call_operand.vmem [shape: bf16[2,64,32], index: 1, kind: input, shape index: {}]   ;;  %s2494_s2 = inlined_call_operand.vmem [shape: bf16[2,64,32], index: 2, kind: input, shape index: {}]   ;;  %s2495_s3 = inlined_call_operand.vmem [shape: f32[2,8,32], index: 3, kind: input, shape index: {}]   ;;  %s2496_s4 = inlined_call_operand.vmem [shape: bf16[32,32], index: 4, kind: input, shape index: {}]   ;;  %s2497_s5 = inlined_call_operand.vmem [shape: bf16[32,32], index: 5, kind: input, shape index: {}]   ;;  %s2498_s6 = inlined_call_operand.vmem [shape: bf16[32,32], index: 6, kind: input, shape index: {}]   ;;  %s2499_s7 = inlined_call_operand.vmem [shape: f32[1,32], index: 7, kind: input, shape index: {}, may-alias: {7,8,9,11,13}]   ;;  %s2500_s8 = inlined_call_operand.vmem [shape: f32[1,32], index: 8, kind: input, shape index: {}, may-alias: {7,8,9,11,13}]   ;;  %s2501_s9 = inlined_call_operand.vmem [shape: f32[1,32], index: 9, kind: input, shape index: {}, may-alias: {7,8,9,11,13}]   ;;  %s2502_s10 = inlined_call_operand.vmem [shape: bf16[32,32], index: 10, kind: input, shape index: {}]   ;;  %s2503_s11 = inlined_call_operand.vmem [shape: f32[1,32], index: 11, kind: input, shape index: {}, may-alias: {7,8,9,11,13}]   ;;  %s2504_s12 = inlined_call_operand.vmem [shape: f32[1,32], index: 12, kind: input, shape index: {}]   ;;  %s2505_s13 = inlined_call_operand.vmem [shape: f32[1,32], index: 13, kind: input, shape index: {}, may-alias: {7,8,9,11,13}]   ;;  %s2506_s14 = inlined_call_operand.vmem [shape: f32[2,8,32], index: 14, kind: output, shape index: {0}]   ;;  %s2507_s15 = inlined_call_operand.vmem [shape: f32[2,8,64], index: 15, kind: output, shape index: {1}]  }
   0x1 LB: > { %s1771_s19 = sadd.s32 4294967295, %s2095_s18   ;;  %p1775_p0 = scmp.ge.s32.totalorder %s2095_s18, 1  ;;  %s2095_s18 = sphi %s2182_s18, %s26_s18  }
   0x2   : > { %p468_p1 = scmp.lt.s32.totalorder %s2095_s18, 3 }
   0x4   : > { %p469_p2 = pnand %p1775_p0, %p468_p1 }
   0x5   : > { %p532_p3 = scmp.lt.s32.totalorder (!%p469_p2), %s1771_s19, 1  ;;  %s2099_s28 = smov (!%p469_p2), 120  }
   0x6   : > { %472 = sbr.rel (%p469_p2) target bundleno = 3478 (0xd96), region = 76 }
   0xb   : > { %v2057_v0 = vld [vmem:[%s2497_s5 + $0x8] sm:$0xff]   ;;  %v2058_v1 = vld [vmem:[%s2497_s5] sm:$0xff]   ;;  %s2509_s19 = smov (!%p532_p3, %s1771_s19), 1  ;;  %v2097_v2 = vmov 0.0   ;;  %vm617_vm0 = vcmask 261120   ;;  %vm2098_vm1 = vmmov 0  }
   0xc   : > { %1900 = vmatprep.subr.bf16.mxu1 %v2057_v0  ;;  %1892 = vmatprep.subr.bf16.mxu0 %v2097_v2  ;;  %v2063_v3 = vld [vmem:[%s2496_s4 + $0x8] sm:$0xff]   ;;  %s1827_s26 = sshll.u32 %s2509_s19, 5  ;;  %v2064_v4 = vld [vmem:[%s2496_s4] sm:$0xff]   ;;  %s1776_s29 = sshll.u32 %s2509_s19, 2  ;;  %vm900_vm2 = vcmask 64512   ;;  %vm956_vm3 = vcmask 523264  }
   0xd   : > { %1901 = vmatpush3.bf16.msra.mxu1 %v2057_v0  ;;  %1896 = vmatprep.mubr.msk.bf16.mxu0 %vm2098_vm1, %v2097_v2  ;;  %s540_s17 = scalar_lea.vmem %s2493_s1, %s1827_s26  ;;  %s535_s22 = scalar_lea.vmem %s2492_s0, %s1776_s29  ;;  %v1788_v20 = vld [vmem:[%s2500_s8] ss:$0 sm:$0xff]  ;;  %v2065_v42 = vld [vmem:[%s2498_s6 + $0x8] sm:$0xff]   ;;  %vm1160_vm4 = vcmask 1043456  }
   0xe   : > { %1902 = vmatprep.subr.bf16.mxu1 %v2058_v1  ;;  %1893 = vmatpush3.bf16.msra.mxu0 %v2063_v3  ;;  %v2059_v5 = vld [vmem:[%s540_s17] sm:$0xff]   ;;  %v2060_v6 = vld [vmem:[%s540_s17 + $0x8] sm:$0xff]   ;;  %v2061_v7 = vld [vmem:[%s540_s17 + $0x10] sm:$0xff]   ;;  %s2221_s25 = scalar_lea.vmem %s2494_s2, %s1827_s26  ;;  %s2100_s26 = smov 112  }
   0xf   : > { %1894 = vmatprep.subr.bf16.mxu0 %v2097_v2  ;;  %1904 = vmatprep.mubr.msk.bf16.mxu1 %vm617_vm0, %v2059_v5  ;;  %v559_v8 = vld [vmem:[%s535_s22] sm:$0xf]  ;;  %v2062_v9 = vld [vmem:[%s540_s17 + $0x18] sm:$0xff]   ;;  %v2068_v45 = vld [vmem:[%s2221_s25 + $0x8] sm:$0xff]   ;;  %s2101_s29 = smov 104   ;;  %s2456_s21 = sshll.u32 %s2509_s19, 3 }
  0x10   : > { %v1784_v29 = vld [vmem:[%s2499_s7] ss:$0 sm:$0xff]  ;;  %v2069_v46 = vld [vmem:[%s2221_s25 + $0x10] sm:$0xff]   ;;  %v2070_v47 = vld [vmem:[%s2221_s25 + $0x18] sm:$0xff]   ;;  %s557_s24 = scalar_lea.vmem %s2507_s15, %s2456_s21  ;;  %s553_s23 = scalar_lea.vmem %s2506_s14, %s2456_s21 }
  0x11   : > { %1903 = vmatpush3.bf16.msra.mxu1 %v2058_v1  ;;  %v2066_v43 = vld [vmem:[%s2498_s6] sm:$0xff]  }
  0x12   : > { %1924 = vmatprep.subr.bf16.mxu1 %v2097_v2  ;;  %1895 = vmatpush3.bf16.msra.mxu0 %v2064_v4  ;;  %v2067_v44 = vld [vmem:[%s2221_s25] sm:$0xff]  }
  0x13   : > { %1912 = vmatprep.subr.bf16.mxu0 %v2065_v42  ;;  %v1799_v57 = vld [vmem:[%s2501_s9] ss:$0 sm:$0xff] }
  0x14   : > { %1905 = vmatmul.mubr.msk.bf16.vlgmr.msra.gmra.mxu1 %vm617_vm0, %v2060_v6 }
  0x15   : > { %1908 = vmatprep.mubr.msk.bf16.mxu1 %vm617_vm0, %v2061_v7  ;;  %1897 = vmatmul.mubr.msk.bf16.vlgmr.msra.gmra.mxu0 %vm617_vm0, %v559_v8 }
  0x16   : > { %1916 = vmatprep.mubr.msk.bf16.mxu0 %vm617_vm0, %v2067_v44  ;;  %1913 = vmatpush3.bf16.msra.mxu0 %v2065_v42 }
  0x17   : > { %1914 = vmatprep.subr.bf16.mxu0 %v2066_v43 }
  0x1a   : > { %1915 = vmatpush3.bf16.msra.mxu0 %v2066_v43 }
  0x1b   : > { %1936 = vmatprep.subr.bf16.mxu0 %v2097_v2 }
  0x1c   : > { %1909 = vmatmul.mubr.msk.bf16.gmra.mxu1 %vm617_vm0, %v2062_v9 }
  0x1d   : > { %1932 = vmatprep.mubr.msk.bf16.mxu1 %vm2098_vm1, %v2097_v2  ;;  %1917 = vmatmul.mubr.msk.bf16.vlgmr.msra.gmra.mxu0 %vm617_vm0, %v2068_v45 }
  0x1e   : > { %1920 = vmatprep.mubr.msk.bf16.mxu0 %vm617_vm0, %v2069_v46 }
  0x25   : > { %1921 = vmatmul.mubr.msk.bf16.gmra.mxu0 %vm617_vm0, %v2070_v47 }
  0x26   : > { %1944 = vmatprep.mubr.msk.bf16.mxu0 %vm2098_vm1, %v2097_v2 }
  0xd4   : > { %v1906_v10 = vpop.f32.mrf.mxu1 }
  0xd5   : > { %v655_v12 = vpop.f32.mrf.mxu0  ;;  %v755_v38 = vadd.f32 %v1906_v10, %v1788_v20 }
  0xd6   : > { %v746_v11 = vpop.f32.mrf.mxu1  ;;  %v656_v33 = vadd.f32 %v1784_v29, %v655_v12 }
  0xd7   : > { %v1898_v14 = vpop.f32.mrf.mxu0  ;;  %v747_v32 = vadd.f32 %v1788_v20, %v746_v11 }
  0xd8   : > { %v1907_v13 = vpop.f32.mrf.mxu1  ;;  %v2252_v37 = vpack.c.bf16 %v656_v33, %v656_v33 }
  0xd9   : > { %v658_v16 = vpop.f32.mrf.mxu0  ;;  %v758_v35 = vadd.f32 %v1907_v13, %v1788_v20 }
  0xda   : > { %v749_v15 = vpop.f32.mrf.mxu1 }
  0xdb   : > { %v1899_v18 = vpop.f32.mrf.mxu0  ;;  %v750_v30 = vadd.f32 %v1788_v20, %v749_v15  ;;  %v2255_v39 = vpack.c.bf16 %v758_v35, %v755_v38 }
  0xdc   : > { %v1910_v17 = vpop.f32.mrf.mxu1 }
  0xdd   : > { %v771_v22 = vadd.f32 %v1910_v17, %v1788_v20  ;;  %v2246_v34 = vpack.c.bf16 %v750_v30, %v747_v32  ;;  %v908_v40 = vsel %vm900_vm2, %v2255_v39, 0  ;;  %v1918_v53 = vpop.f32.mrf.mxu0  ;;  %v592_v30 = vld [vmem:[%s2502_s10] sm:$0xf] }
  0xde   : > { %v762_v19 = vpop.f32.mrf.mxu1  ;;  %v874_v4 = vadd.f32 %v1918_v53, %v1799_v57  ;;  %v1208_v32 = vsel %vm1160_vm4, %v592_v30, 0 }
  0xdf   : > { %v763_v27 = vadd.f32 %v1788_v20, %v762_v19  ;;  %v905_v41 = vsel %vm900_vm2, %v2246_v34, 0  ;;  %v865_v54 = vpop.f32.mrf.mxu0 }
  0xe0   : > { %v1911_v21 = vpop.f32.mrf.mxu1  ;;  %v866_v7 = vadd.f32 %v1799_v57, %v865_v54 }
  0xe1   : > { %v774_v23 = vadd.f32 %v1911_v21, %v1788_v20  ;;  %v1919_v55 = vpop.f32.mrf.mxu0 }
  0xe2   : > { %v765_v24 = vpop.f32.mrf.mxu1  ;;  %v877_v5 = vadd.f32 %v1919_v55, %v1799_v57 }
  0xe3   : > { %v2232_v25 = vpack.c.bf16 %v774_v23, %v771_v22  ;;  %v766_v26 = vadd.f32 %v1788_v20, %v765_v24  ;;  %v868_v56 = vpop.f32.mrf.mxu0 }
  0xe4   : > { %v2296_v8 = vpack.c.bf16 %v877_v5, %v874_v4  ;;  %v869_v9 = vadd.f32 %v1799_v57, %v868_v56 }
  0xe5   : > { %1027 = vrot.lane.b32.xlu1 %v2232_v25, %s2099_s28  ;;  %v914_v28 = vsel %vm900_vm2, %v2232_v25, 0  ;;  %v2241_v31 = vpack.c.bf16 %v766_v26, %v763_v27  ;;  %v1922_v58 = vpop.f32.mrf.mxu0 }
  0xe6   : > { %1925 = vmatpush3.bf16.xpose.msra.mxu1 %v914_v28  ;;  %v890_v60 = vadd.f32 %v1922_v58, %v1799_v57  ;;  %v2300_v10 = vpack.c.bf16 %v869_v9, %v866_v7 }
  0xe7   : > { %1926 = vmatprep.subr.bf16.mxu1 %v2097_v2  ;;  %v911_v36 = vsel %vm900_vm2, %v2241_v31, 0  ;;  %v881_v59 = vpop.f32.mrf.mxu0 }
  0xe8   : > { %v882_v62 = vadd.f32 %v1799_v57, %v881_v59 }
  0xe9   : > { %1025 = vrot.lane.b32.xlu1 %v2241_v31, %s2099_s28  ;;  %v1923_v61 = vpop.f32.mrf.mxu0 }
  0xea   : > { %v893_v63 = vadd.f32 %v1923_v61, %v1799_v57 }
  0xeb   : > { %v884_v0 = vpop.f32.mrf.mxu0 }
  0xec   : > { %v2290_v1 = vpack.c.bf16 %v893_v63, %v890_v60  ;;  %v885_v3 = vadd.f32 %v1799_v57, %v884_v0  ;;  %v593_v63 = vld [vmem:[%s2502_s10 + $0x4] sm:$0xf] }
  0xed   : > { %1021 = vrot.lane.b32.xlu1 %v2246_v34, %s2099_s28  ;;  %v1162_v5 = vsel %vm1160_vm4, %v593_v63, 0 }
  0xee   : > { %1927 = vmatpush3.bf16.xpose.msra.mxu1 %v911_v36  ;;  %v2292_v6 = vpack.c.bf16 %v885_v3, %v882_v62  ;;  %1937 = vmatpush3.bf16.msra.mxu0 %v2290_v1 }
  0xef   : > { %1928 = vmatprep.subr.bf16.mxu1 %v2097_v2  ;;  %1938 = vmatprep.subr.bf16.mxu0 %v2097_v2 }
  0xf1   : > { %1015 = vrot.lane.b32.xlu1 %v2252_v37, %s2099_s28 }
  0xf2   : > { %1939 = vmatpush3.bf16.msra.mxu0 %v2292_v6 }
  0xf3   : > { %1940 = vmatprep.subr.bf16.mxu0 %v2097_v2 }
  0xf6   : > { %1929 = vmatpush3.bf16.xpose.msra.mxu1 %v908_v40  ;;  %1941 = vmatpush3.bf16.msra.mxu0 %v2296_v8 }
  0xf7   : > { %1930 = vmatprep.subr.bf16.mxu1 %v2097_v2  ;;  %1942 = vmatprep.subr.bf16.mxu0 %v2097_v2 }
  0xfa   : > { %1943 = vmatpush3.bf16.msra.mxu0 %v2300_v10 }
  0xfb   : > { %1948 = vmatprep.subr.bf16.mxu0 %v2097_v2 }
  0xfe   : > { %1931 = vmatpush3.bf16.xpose.msra.mxu1 %v905_v41 }
  0xff   : > { %1960 = vmatprep.subr.bf16.mxu1 %v2097_v2 }
 0x105   : > { %1933 = vmatmul.mubr.msk.bf16.vlgmr.msra.gmra.mxu1 %vm900_vm2, %v2252_v37 }
 0x106   : > { %1968 = vmatprep.mubr.msk.bf16.mxu1 %vm2098_vm1, %v2097_v2 }
 0x157   : > { %v1028_v19 = vpop.permute.xlu1 %1027 }
 0x158   : > { %v1042_v21 = vsel %vm900_vm2, %v1028_v19, 0 }
 0x15b   : > { %v1026_v22 = vpop.permute.xlu1 %1025 }
 0x15c   : > { %v1039_v23 = vsel %vm900_vm2, %v1026_v22, 0 }
 0x15f   : > { %v1022_v27 = vpop.permute.xlu1 %1021 }
 0x160   : > { %v1033_v28 = vsel %vm900_vm2, %v1022_v27, 0 }
 0x163   : > { %v1016_v29 = vpop.permute.xlu1 %1015 }
 0x1c5   : > { %v950_v48 = vpop.f32.mrf.mxu1 }
 0x1c6   : > { %v957_v49 = vsel %vm956_vm3, %v950_v48, -inf }
 0x1c7   : > { %958 = vmax.xlane.f32.xlu0 %v957_v49  ;;  %v1934_v50 = vpop.f32.mrf.mxu1 }
 0x1c9   : > { %v953_v51 = vpop.f32.mrf.mxu1 }
 0x1cb   : > { %v1935_v52 = vpop.f32.mrf.mxu1 }
 0x250   : > { %v959_v11 = vpop.xlane.xlu0 %958 }
 0x251   : > { %v960_v12 = vsub.f32 %v950_v48, %v959_v11 }
 0x253   : > { %v961_v13 = vmul.f32 1.442695, %v960_v12 }
 0x255   : > { %2071 = vpow2.f32 %v961_v13 }
 0x262   : > { %v2072_v14 = vpop.eup %2071 }
 0x263   : > { %v963_v15 = vsel %vm956_vm3, %v2072_v14, 0.0 }
 0x264   : > { %964 = vadd.xlane.f32.xlu0 %v963_v15 }
 0x27a   : > { %1023 = vrot.lane.b32.xlu0 %v2255_v39, %s2099_s28 }
 0x2ed   : > { %v965_v16 = vpop.xlane.xlu0 %964 }
 0x2ee   : > { %2073 = vrcp.f32 %v965_v16 }
 0x2f1   : > { %v1024_v24 = vpop.permute.xlu0 %1023 }
 0x2f2   : > { %v1036_v26 = vsel %vm900_vm2, %v1024_v24, 0 }
 0x2fb   : > { %v2074_v17 = vpop.eup %2073 }
 0x2fc   : > { %v2309_v18 = vmul.f32 %v2074_v17, %v2072_v14 }
 0x2fe   : > { %v969_v20 = vpack.c.bf16 %v2309_v18, %v2309_v18 }
 0x300   : > { %1945 = vmatmul.mubr.msk.bf16.vlgmr.msra.gmra.mxu0 %vm956_vm3, %v969_v20 }
 0x301   : > { %1949 = vmatpush3.bf16.xpose.msra.mxu0 %v1042_v21  ;;  %1956 = vmatprep.mubr.msk.bf16.mxu0 %vm2098_vm1, %v2097_v2 }
 0x302   : > { %1950 = vmatprep.subr.bf16.mxu0 %v2097_v2 }
 0x309   : > { %1951 = vmatpush3.bf16.xpose.msra.mxu0 %v1039_v23 }
 0x30a   : > { %1952 = vmatprep.subr.bf16.mxu0 %v2097_v2 }
 0x311   : > { %1953 = vmatpush3.bf16.xpose.msra.mxu0 %v1036_v26 }
 0x312   : > { %1954 = vmatprep.subr.bf16.mxu0 %v2097_v2 }
 0x319   : > { %1955 = vmatpush3.bf16.xpose.msra.mxu0 %v1033_v28 }
 0x31a   : > { %1978 = vmatprep.subr.bf16.mxu0 %v2097_v2 }
 0x320   : > { %1957 = vmatmul.mubr.msk.bf16.vlgmr.msra.gmra.mxu0 %vm900_vm2, %v1016_v29 }
 0x321   : > { %1980 = vmatprep.mubr.msk.bf16.mxu0 %vm2098_vm1, %v2097_v2  ;;  %1979 = vmatpush3.bf16.msra.mxu0 %v1208_v32 }
 0x322   : > { %1996 = vmatprep.subr.bf16.mxu0 %v2097_v2 }
 0x3c0   : > { %v1007_v33 = vpop.f32.mrf.mxu0 }
 0x3c1   : > { %v1013_v35 = vpack.c.bf16 %v1007_v33, %v1007_v33 }
 0x3c2   : > { %v1946_v36 = vpop.f32.mrf.mxu0 }
 0x3c3   : > { %1981 = vmatmul.mubr.msk.bf16.vlgmr.msra.gmra.mxu0 %vm900_vm2, %v1013_v35 }
 0x3c4   : > { %v1010_v38 = vpop.f32.mrf.mxu0  ;;  %2004 = vmatprep.mubr.msk.bf16.mxu0 %vm2098_vm1, %v2097_v2 }
 0x3c6   : > { %v1947_v40 = vpop.f32.mrf.mxu0 }
 0x3e0   : > { %v1078_v41 = vpop.f32.mrf.mxu0 }
 0x3e1   : > { %v1084_v42 = vsel %vm956_vm3, %v1078_v41, -inf }
 0x3e2   : > { %1085 = vmax.xlane.f32.xlu1 %v1084_v42  ;;  %v1958_v43 = vpop.f32.mrf.mxu0  ;;  %v594_v42 = vld [vmem:[%s2502_s10 + $0x8] sm:$0xf] }
 0x3e4   : > { %v1081_v44 = vpop.f32.mrf.mxu0 }
 0x3e6   : > { %v1959_v45 = vpop.f32.mrf.mxu0 }
 0x3f3   : > { %1107 = vrot.lane.b32.xlu1 %v2290_v1, %s2099_s28 }
 0x3f7   : > { %1103 = vrot.lane.b32.xlu1 %v2296_v8, %s2099_s28 }
 0x3fb   : > { %1101 = vrot.lane.b32.xlu1 %v2300_v10, %s2099_s28 }
 0x3ff   : > { %1258 = vrot.lane.b32.xlu1 %v2232_v25, %s2100_s26 }
 0x403   : > { %1256 = vrot.lane.b32.xlu1 %v2241_v31, %s2100_s26 }
 0x407   : > { %1252 = vrot.lane.b32.xlu1 %v2246_v34, %s2100_s26 }
 0x46b   : > { %v1086_v46 = vpop.xlane.xlu1 %1085 }
 0x46c   : > { %v1087_v47 = vsub.f32 %v1078_v41, %v1086_v46 }
 0x46e   : > { %v1088_v48 = vmul.f32 1.442695, %v1087_v47 }
 0x46f   : > { %v1108_v49 = vpop.permute.xlu1 %1107 }
 0x470   : > { %2075 = vpow2.f32 %v1088_v48  ;;  %1961 = vmatpush3.bf16.msra.mxu1 %v1108_v49 }
 0x471   : > { %1962 = vmatprep.subr.bf16.mxu1 %v2097_v2 }
 0x473   : > { %v1104_v58 = vpop.permute.xlu1 %1103 }
 0x477   : > { %v1102_v60 = vpop.permute.xlu1 %1101 }
 0x47b   : > { %v1259_v7 = vpop.permute.xlu1 %1258 }
 0x47c   : > { %v1273_v13 = vsel %vm900_vm2, %v1259_v7, 0 }
 0x47d   : > { %v2076_v50 = vpop.eup %2075 }
 0x47e   : > { %v1090_v51 = vsel %vm956_vm3, %v2076_v50, 0.0 }
 0x47f   : > { %1091 = vadd.xlane.f32.xlu0 %v1090_v51  ;;  %v1257_v16 = vpop.permute.xlu1 %1256 }
 0x480   : > { %v1270_v17 = vsel %vm900_vm2, %v1257_v16, 0 }
 0x483   : > { %v2350_v52 = vpop.f32.mrf.mxu0  ;;  %v1253_v20 = vpop.permute.xlu1 %1252 }
 0x484   : > { %v1264_v21 = vsel %vm900_vm2, %v1253_v20, 0 }
 0x485   : > { %v1982_v53 = vpop.f32.mrf.mxu0 }
 0x487   : > { %v1247_v54 = vpop.f32.mrf.mxu0 }
 0x489   : > { %v1983_v55 = vpop.f32.mrf.mxu0 }
 0x495   : > { %1105 = vrot.lane.b32.xlu0 %v2292_v6, %s2099_s28 }
 0x499   : > { %1254 = vrot.lane.b32.xlu0 %v2255_v39, %s2100_s26 }
 0x49d   : > { %1250 = vrot.lane.b32.xlu0 %v2252_v37, %s2100_s26 }
 0x4a1   : > { %1334 = vrot.lane.b32.xlu0 %v2290_v1, %s2100_s26 }
 0x508   : > { %v1092_v56 = vpop.xlane.xlu0 %1091 }
 0x509   : > { %2077 = vrcp.f32 %v1092_v56 }
 0x50c   : > { %v1106_v57 = vpop.permute.xlu0 %1105 }
 0x50d   : > { %1963 = vmatpush3.bf16.msra.mxu1 %v1106_v57 }
 0x50e   : > { %1964 = vmatprep.subr.bf16.mxu1 %v2097_v2 }
 0x510   : > { %v1255_v59 = vpop.permute.xlu0 %1254 }
 0x511   : > { %1965 = vmatpush3.bf16.msra.mxu1 %v1104_v58  ;;  %v1267_v19 = vsel %vm900_vm2, %v1255_v59, 0 }
 0x512   : > { %1966 = vmatprep.subr.bf16.mxu1 %v2097_v2 }
 0x514   : > { %v1251_v61 = vpop.permute.xlu0 %1250 }
 0x515   : > { %1967 = vmatpush3.bf16.msra.mxu1 %v1102_v60 }
 0x516   : > { %v2078_v62 = vpop.eup %2077  ;;  %1972 = vmatprep.subr.bf16.mxu1 %v2097_v2 }
 0x517   : > { %v2366_v0 = vmul.f32 %v2078_v62, %v2076_v50 }
 0x518   : > { %v1335_v3 = vpop.permute.xlu0 %1334 }
 0x519   : > { %1997 = vmatpush3.bf16.msra.mxu0 %v1335_v3  ;;  %v1096_v4 = vpack.c.bf16 %v2366_v0, %v2366_v0  ;;  %v1095_v43 = vadd.f32 %v2366_v0, %v2309_v18 }
 0x51a   : > { %1998 = vmatprep.subr.bf16.mxu0 %v2097_v2 }
 0x51b   : > { %1969 = vmatmul.mubr.msk.bf16.vlgmr.msra.gmra.mxu1 %vm956_vm3, %v1096_v4 }
 0x51c   : > { %1973 = vmatpush3.bf16.msra.mxu1 %v1162_v5  ;;  %1974 = vmatprep.mubr.msk.bf16.mxu1 %vm2098_vm1, %v2097_v2 }
 0x51d   : > { %1984 = vmatprep.subr.bf16.mxu1 %v2097_v2 }
 0x5db   : > { %v1150_v9 = vpop.f32.mrf.mxu1 }
 0x5dc   : > { %v1156_v11 = vpack.c.bf16 %v1150_v9, %v1150_v9 }
 0x5dd   : > { %v1970_v12 = vpop.f32.mrf.mxu1 }
 0x5de   : > { %1975 = vmatmul.mubr.msk.bf16.vlgmr.msra.gmra.mxu1 %vm900_vm2, %v1156_v11 }
 0x5df   : > { %1985 = vmatpush3.bf16.xpose.msra.mxu1 %v1273_v13  ;;  %v1153_v14 = vpop.f32.mrf.mxu1  ;;  %1992 = vmatprep.mubr.msk.bf16.mxu1 %vm2098_vm1, %v2097_v2 }
 0x5e0   : > { %1986 = vmatprep.subr.bf16.mxu1 %v2097_v2 }
 0x5e1   : > { %v1971_v15 = vpop.f32.mrf.mxu1 }
 0x5e7   : > { %1987 = vmatpush3.bf16.xpose.msra.mxu1 %v1270_v17 }
 0x5e8   : > { %1988 = vmatprep.subr.bf16.mxu1 %v2097_v2 }
 0x5ef   : > { %1989 = vmatpush3.bf16.xpose.msra.mxu1 %v1267_v19 }
 0x5f0   : > { %1990 = vmatprep.subr.bf16.mxu1 %v2097_v2 }
 0x5f7   : > { %1991 = vmatpush3.bf16.xpose.msra.mxu1 %v1264_v21  ;;  %v595_v21 = vld [vmem:[%s2502_s10 + $0xc] sm:$0xf] }
 0x5f8   : > { %2026 = vmatprep.subr.bf16.mxu1 %v2097_v2 }
 0x5fe   : > { %1993 = vmatmul.mubr.msk.bf16.vlgmr.msra.gmra.mxu1 %vm900_vm2, %v1251_v61 }
 0x5ff   : > { %2034 = vmatprep.mubr.msk.bf16.mxu1 %vm2098_vm1, %v2097_v2 }
 0x69e   : > { %v2390_v22 = vpop.f32.mrf.mxu1 }
 0x69f   : > { %v1245_v60 = vadd.f32 %v2350_v52, %v2390_v22 }
 0x6a0   : > { %v1976_v23 = vpop.f32.mrf.mxu1 }
 0x6a2   : > { %v1201_v24 = vpop.f32.mrf.mxu1 }
 0x6a3   : > { %v1569_v24 = vsel %vm1160_vm4, %v595_v21, 0 }
 0x6a4   : > { %v1977_v26 = vpop.f32.mrf.mxu1 }
 0x6be   : > { %v1309_v27 = vpop.f32.mrf.mxu1 }
 0x6bf   : > { %v1315_v28 = vsel %vm956_vm3, %v1309_v27, -inf }
 0x6c0   : > { %1316 = vmax.xlane.f32.xlu1 %v1315_v28  ;;  %v1994_v29 = vpop.f32.mrf.mxu1 }
 0x6c2   : > { %v1312_v30 = vpop.f32.mrf.mxu1 }
 0x6c4   : > { %v1995_v32 = vpop.f32.mrf.mxu1 }
 0x6d1   : > { %1332 = vrot.lane.b32.xlu1 %v2292_v6, %s2100_s26 }
 0x6d5   : > { %1330 = vrot.lane.b32.xlu1 %v2296_v8, %s2100_s26 }
 0x6d9   : > { %1439 = vrot.lane.b32.xlu1 %v2232_v25, %s2101_s29 }
 0x6dd   : > { %1435 = vrot.lane.b32.xlu1 %v2255_v39, %s2101_s29 }
 0x6e1   : > { %1431 = vrot.lane.b32.xlu1 %v2252_v37, %s2101_s29 }
 0x6e5   : > { %1513 = vrot.lane.b32.xlu1 %v2292_v6, %s2101_s29 }
 0x749   : > { %v1317_v33 = vpop.xlane.xlu1 %1316 }
 0x74a   : > { %v1318_v35 = vsub.f32 %v1309_v27, %v1317_v33 }
 0x74c   : > { %v1319_v36 = vmul.f32 1.442695, %v1318_v35 }
 0x74d   : > { %v1333_v38 = vpop.permute.xlu1 %1332 }
 0x74e   : > { %2079 = vpow2.f32 %v1319_v36  ;;  %1999 = vmatpush3.bf16.msra.mxu0 %v1333_v38 }
 0x74f   : > { %2000 = vmatprep.subr.bf16.mxu0 %v2097_v2 }
 0x751   : > { %v1331_v40 = vpop.permute.xlu1 %1330 }
 0x752   : > { %2001 = vmatpush3.bf16.msra.mxu0 %v1331_v40 }
 0x753   : > { %2002 = vmatprep.subr.bf16.mxu0 %v2097_v2 }
 0x755   : > { %v1440_v46 = vpop.permute.xlu1 %1439 }
 0x756   : > { %v1454_v18 = vsel %vm900_vm2, %v1440_v46, 0 }
 0x759   : > { %v1436_v55 = vpop.permute.xlu1 %1435 }
 0x75a   : > { %v1448_v56 = vsel %vm900_vm2, %v1436_v55, 0 }
 0x75b   : > { %v2080_v25 = vpop.eup %2079 }
 0x75c   : > { %v1321_v39 = vsel %vm956_vm3, %v2080_v25, 0.0 }
 0x75d   : > { %1322 = vadd.xlane.f32.xlu0 %v1321_v39  ;;  %v1432_v59 = vpop.permute.xlu1 %1431 }
 0x761   : > { %v1514_v15 = vpop.permute.xlu1 %1513 }
 0x773   : > { %1328 = vrot.lane.b32.xlu0 %v2300_v10, %s2100_s26  ;;  %s549_s26 = scalar_lea.vmem %s2495_s3, %s2456_s21 }
 0x774   : > { %v576_v33 = vld [vmem:[%s549_s26] sm:$0xff] }
 0x777   : > { %1437 = vrot.lane.b32.xlu0 %v2241_v31, %s2101_s29 }
 0x77b   : > { %1433 = vrot.lane.b32.xlu0 %v2246_v34, %s2101_s29  ;;  %v1388_v34 = vsel %vm1160_vm4, %v594_v42, 0 }
 0x7e6   : > { %v1323_v37 = vpop.xlane.xlu0 %1322 }
 0x7e7   : > { %2081 = vrcp.f32 %v1323_v37 }
 0x7ea   : > { %v1329_v6 = vpop.permute.xlu0 %1328 }
 0x7eb   : > { %2003 = vmatpush3.bf16.msra.mxu0 %v1329_v6 }
 0x7ec   : > { %2008 = vmatprep.subr.bf16.mxu0 %v2097_v2 }
 0x7ee   : > { %v1438_v53 = vpop.permute.xlu0 %1437 }
 0x7ef   : > { %v1451_v54 = vsel %vm900_vm2, %v1438_v53, 0 }
 0x7f2   : > { %v1434_v57 = vpop.permute.xlu0 %1433 }
 0x7f3   : > { %v1445_v58 = vsel %vm900_vm2, %v1434_v57, 0 }
 0x7f4   : > { %v2082_v41 = vpop.eup %2081 }
 0x7f5   : > { %v1325_v44 = vmul.f32 %v2082_v41, %v2080_v25 }
 0x7f7   : > { %v2420_v45 = vadd.f32 %v1325_v44, %v1095_v43  ;;  %v1327_v31 = vpack.c.bf16 %v1325_v44, %v1325_v44 }
 0x7f9   : > { %2005 = vmatmul.mubr.msk.bf16.vlgmr.msra.gmra.mxu0 %vm956_vm3, %v1327_v31 }
 0x7fa   : > { %2009 = vmatpush3.bf16.msra.mxu0 %v1388_v34  ;;  %2010 = vmatprep.mubr.msk.bf16.mxu0 %vm2098_vm1, %v2097_v2 }
 0x7fb   : > { %2014 = vmatprep.subr.bf16.mxu0 %v2097_v2 }
 0x8b9   : > { %v1377_v47 = vpop.f32.mrf.mxu0 }
 0x8ba   : > { %v1383_v48 = vpack.c.bf16 %v1377_v47, %v1377_v47 }
 0x8bb   : > { %v2006_v49 = vpop.f32.mrf.mxu0 }
 0x8bc   : > { %2011 = vmatmul.mubr.msk.bf16.vlgmr.msra.gmra.mxu0 %vm900_vm2, %v1383_v48  ;;  %v1823_v48 = vld [vmem:[%s2504_s12] ss:$0 sm:$0xff] }
 0x8bd   : > { %2015 = vmatpush3.bf16.xpose.msra.mxu0 %v1454_v18  ;;  %v1380_v50 = vpop.f32.mrf.mxu0  ;;  %2022 = vmatprep.mubr.msk.bf16.mxu0 %vm2098_vm1, %v2097_v2  ;;  %v1824_v18 = vld [vmem:[%s2505_s13] ss:$0 sm:$0xff] }
 0x8be   : > { %2016 = vmatprep.subr.bf16.mxu0 %v2097_v2 }
 0x8bf   : > { %v2007_v51 = vpop.f32.mrf.mxu0 }
 0x8c5   : > { %2017 = vmatpush3.bf16.xpose.msra.mxu0 %v1451_v54 }
 0x8c6   : > { %2018 = vmatprep.subr.bf16.mxu0 %v2097_v2 }
 0x8cd   : > { %2019 = vmatpush3.bf16.xpose.msra.mxu0 %v1448_v56 }
 0x8ce   : > { %2020 = vmatprep.subr.bf16.mxu0 %v2097_v2 }
 0x8d5   : > { %2021 = vmatpush3.bf16.xpose.msra.mxu0 %v1445_v58 }
 0x8dc   : > { %2023 = vmatmul.mubr.msk.bf16.vlgmr.msra.gmra.mxu0 %vm900_vm2, %v1432_v59 }
 0x97c   : > { %v1424_v61 = vpop.f32.mrf.mxu0 }
 0x97d   : > { %v1430_v62 = vadd.f32 %v1424_v61, %v1245_v60 }
 0x97e   : > { %v2012_v63 = vpop.f32.mrf.mxu0 }
 0x980   : > { %v1427_v0 = vpop.f32.mrf.mxu0 }
 0x982   : > { %v2013_v3 = vpop.f32.mrf.mxu0 }
 0x99c   : > { %v1490_v4 = vpop.f32.mrf.mxu0 }
 0x99d   : > { %v1496_v5 = vsel %vm956_vm3, %v1490_v4, -inf }
 0x99e   : > { %1497 = vmax.xlane.f32.xlu0 %v1496_v5  ;;  %v2024_v7 = vpop.f32.mrf.mxu0 }
 0x9a0   : > { %v1493_v9 = vpop.f32.mrf.mxu0 }
 0x9a2   : > { %v2025_v11 = vpop.f32.mrf.mxu0 }
 0x9b4   : > { %1515 = vrot.lane.b32.xlu0 %v2290_v1, %s2101_s29 }
 0x9b8   : > { %1511 = vrot.lane.b32.xlu0 %v2296_v8, %s2101_s29 }
 0xa27   : > { %v1498_v12 = vpop.xlane.xlu0 %1497 }
 0xa28   : > { %v1499_v52 = vsub.f32 %v1490_v4, %v1498_v12 }
 0xa2a   : > { %v1500_v13 = vmul.f32 1.442695, %v1499_v52 }
 0xa2b   : > { %v1516_v14 = vpop.permute.xlu0 %1515 }
 0xa2c   : > { %2083 = vpow2.f32 %v1500_v13  ;;  %2027 = vmatpush3.bf16.msra.mxu1 %v1516_v14 }
 0xa2d   : > { %2028 = vmatprep.subr.bf16.mxu1 %v2097_v2 }
 0xa2f   : > { %v1512_v16 = vpop.permute.xlu0 %1511 }
 0xa30   : > { %2029 = vmatpush3.bf16.msra.mxu1 %v1514_v15 }
 0xa31   : > { %2030 = vmatprep.subr.bf16.mxu1 %v2097_v2 }
 0xa34   : > { %2031 = vmatpush3.bf16.msra.mxu1 %v1512_v16 }
 0xa35   : > { %2032 = vmatprep.subr.bf16.mxu1 %v2097_v2 }
 0xa39   : > { %v2084_v1 = vpop.eup %2083 }
 0xa3a   : > { %v1502_v8 = vsel %vm956_vm3, %v2084_v1, 0.0 }
 0xa3b   : > { %1503 = vadd.xlane.f32.xlu1 %v1502_v8 }
 0xa4c   : > { %1509 = vrot.lane.b32.xlu1 %v2300_v10, %s2101_s29 }
 0xac4   : > { %v1504_v17 = vpop.xlane.xlu1 %1503 }
 0xac5   : > { %2085 = vrcp.f32 %v1504_v17 }
 0xac8   : > { %v1510_v19 = vpop.permute.xlu1 %1509 }
 0xac9   : > { %2033 = vmatpush3.bf16.msra.mxu1 %v1510_v19 }
 0xaca   : > { %2038 = vmatprep.subr.bf16.mxu1 %v2097_v2 }
 0xad2   : > { %v2086_v20 = vpop.eup %2085 }
 0xad3   : > { %v1506_v22 = vmul.f32 %v2086_v20, %v2084_v1 }
 0xad5   : > { %v1508_v23 = vpack.c.bf16 %v1506_v22, %v1506_v22  ;;  %v1507_v10 = vadd.f32 %v1506_v22, %v2420_v45 }
 0xad7   : > { %2035 = vmatmul.mubr.msk.bf16.vlgmr.msra.gmra.mxu1 %vm956_vm3, %v1508_v23  ;;  %v1612_v26 = vmul.f32 0.25, %v1507_v10 }
 0xad8   : > { %2039 = vmatpush3.bf16.msra.mxu1 %v1569_v24  ;;  %2040 = vmatprep.mubr.msk.bf16.mxu1 %vm2098_vm1, %v2097_v2  ;;  %v1822_v2 = vld [vmem:[%s2503_s11] ss:$0 sm:$0xff] }
 0xad9   : > { %1613 = vst.msk [vmem:[%s557_s24] sm:$0xff] %vm956_vm3, %v1612_v26 }
 0xb97   : > { %v1558_v27 = vpop.f32.mrf.mxu1 }
 0xb98   : > { %v1564_v28 = vpack.c.bf16 %v1558_v27, %v1558_v27 }
 0xb99   : > { %v2036_v29 = vpop.f32.mrf.mxu1 }
 0xb9a   : > { %2041 = vmatmul.mubr.msk.bf16.vlgmr.msra.gmra.mxu1 %vm900_vm2, %v1564_v28 }
 0xb9b   : > { %v1561_v30 = vpop.f32.mrf.mxu1 }
 0xb9d   : > { %v2037_v32 = vpop.f32.mrf.mxu1 }
 0xc5a   : > { %v1605_v35 = vpop.f32.mrf.mxu1 }
 0xc5b   : > { %v1611_v36 = vadd.f32 %v1605_v35, %v1430_v62 }
 0xc5c   : > { %v2042_v38 = vpop.f32.mrf.mxu1 }
 0xc5d   : > { %v1614_v40 = vadd.f32 %v1611_v36, %v576_v33 }
 0xc5e   : > { %v1608_v25 = vpop.f32.mrf.mxu1 }
 0xc5f   : > { %v1621_v39 = vadd.f32 %v1822_v2, %v1614_v40 }
 0xc60   : > { %v2043_v37 = vpop.f32.mrf.mxu1 }
 0xc61   : > { %v1622_v6 = vsel %vm617_vm0, %v1621_v39, 0.0 }
 0xc62   : > { %1623 = vadd.xlane.f32.xlu0 %v1622_v6 }
 0xceb   : > { %v1624_v41 = vpop.xlane.xlu0 %1623 }
 0xcec   : > { %v1626_v42 = vmul.f32 0.03125, %v1624_v41 }
 0xcee   : > { %v1627_v43 = vsub.f32 %v1621_v39, %v1626_v42 }
 0xcf0   : > { %v1628_v44 = vmul.f32 %v1627_v43, %v1627_v43 }
 0xcf2   : > { %v1629_v45 = vsel %vm617_vm0, %v1628_v44, 0.0 }
 0xcf3   : > { %1630 = vadd.xlane.f32.xlu1 %v1629_v45 }
 0xd7c   : > { %v1631_v31 = vpop.xlane.xlu1 %1630 }
 0xd7d   : > { %v1632_v34 = vmul.f32 0.03125, %v1631_v31 }
 0xd7f   : > { %v1633_v46 = vadd.f32 1e-05, %v1632_v34 }
 0xd81   : > { %2087 = vrsqrt.f32 %v1633_v46 }
 0xd8e   : > { %v2088_v47 = vpop.eup %2087 }
 0xd8f   : > { %v1635_v49 = vmul.f32 %v2088_v47, %v1627_v43 }
 0xd91   : > { %v1642_v50 = vmul.f32 %v1823_v48, %v1635_v49 }
 0xd93   : > { %v1649_v51 = vadd.f32 %v1824_v18, %v1642_v50 }
 0xd95   : > { %1650 = vst.msk [vmem:[%s553_s23] sm:$0xff] %vm617_vm0, %v1649_v51 }
 0xd96 PF: > { %s26_s18 = sadd.s32 1, %s2095_s18  }
 0xd97   : > { %p23_p4 = scmp.ge.s32.totalorder %s26_s18, 4  }
 0xd99   :  { %25 = sbr.rel (!%p23_p4) target bundleno = 1 (0x1), region = 127 }

// kernel: transformer_decoder_forward.26
= control target key start
LH: loop header
LB: loop body
LE: loop exit
PB: predicated region body
PF: predicated region fallthrough
CT: control target
= control target key end

     0   :  { %s2250_s0 = inlined_call_operand.vmem [shape: bf16[2,8,32], index: 0, kind: input, shape index: {}]   ;;  %s2251_s1 = inlined_call_operand.vmem [shape: bf16[2,8,32], index: 1, kind: input, shape index: {}, may-alias: {1,2}]   ;;  %s2252_s2 = inlined_call_operand.vmem [shape: bf16[2,8,32], index: 2, kind: input, shape index: {}, may-alias: {1,2}]   ;;  %s2253_s3 = inlined_call_operand.vmem [shape: f32[2,8,32], index: 3, kind: input, shape index: {}]   ;;  %s2254_s4 = inlined_call_operand.vmem [shape: bf16[32,32], index: 4, kind: input, shape index: {}]   ;;  %s2255_s5 = inlined_call_operand.vmem [shape: bf16[32,32], index: 5, kind: input, shape index: {}]   ;;  %s2256_s6 = inlined_call_operand.vmem [shape: bf16[32,32], index: 6, kind: input, shape index: {}]   ;;  %s2257_s7 = inlined_call_operand.vmem [shape: f32[1,32], index: 7, kind: input, shape index: {}, may-alias: {7,8,9,11,13}]   ;;  %s2258_s8 = inlined_call_operand.vmem [shape: f32[1,32], index: 8, kind: input, shape index: {}, may-alias: {7,8,9,11,13}]   ;;  %s2259_s9 = inlined_call_operand.vmem [shape: f32[1,32], index: 9, kind: input, shape index: {}, may-alias: {7,8,9,11,13}]   ;;  %s2260_s10 = inlined_call_operand.vmem [shape: bf16[32,32], index: 10, kind: input, shape index: {}]   ;;  %s2261_s11 = inlined_call_operand.vmem [shape: f32[1,32], index: 11, kind: input, shape index: {}, may-alias: {7,8,9,11,13}]   ;;  %s2262_s12 = inlined_call_operand.vmem [shape: f32[1,32], index: 12, kind: input, shape index: {}]   ;;  %s2263_s13 = inlined_call_operand.vmem [shape: f32[1,32], index: 13, kind: input, shape index: {}, may-alias: {7,8,9,11,13}]   ;;  %s2264_s14 = inlined_call_operand.vmem [shape: f32[2,8,32], index: 14, kind: output, shape index: {0}]   ;;  %s2265_s15 = inlined_call_operand.hbm [shape: f32[2,8,8], index: 15, kind: output, shape index: {1}]  }
   0x1   :  { %2268 = sst [smem:[#allocation5_spill]] %s2250_s0 }
   0x2   :  { %2269 = sst [smem:[#allocation6_spill]] %s2251_s1 }
   0x3   :  { %2270 = sst [smem:[#allocation7_spill]] %s2252_s2 }
   0x4   :  { %2271 = sst [smem:[#allocation8_spill]] %s2253_s3 }
   0x5   :  { %2272 = sst [smem:[#allocation9_spill]] %s2254_s4 }
   0x6   :  { %2273 = sst [smem:[#allocation10_spill]] %s2255_s5 }
   0x7   :  { %2274 = sst [smem:[#allocation11_spill]] %s2256_s6 }
   0x8   :  { %21 = vsyncpa [#allocation3], 0 }
   0x9   :  { %23 = vsyncpa [#allocation3 + $0x1], 0  ;;  %s1964_s18 = smov 0   ;;  %s1966_s19 = smov 0  }
   0xa   :  { %s1968_s20 = smov 0   ;;  %s1970_s21 = smov 0  }
   0xb LB: > { %s1985_s22 = sadd.s32 4294967295, %s1876_s21   ;;  %s1578_s23 = sadd.s32 4294967294, %s1876_s21   ;;  %s1876_s21 = sphi %s1970_s21, %s2289_s21   ;;  %s1872_s20 = sphi %s1968_s20, %s2288_s20   ;;  %s1868_s19 = sphi %s1966_s19, %s2287_s19   ;;  %s1864_s18 = sphi %s1964_s18, %s2286_s18  }
   0xc   : > { %s1989_s24 = sadd.s32 1, %s1876_s21   ;;  %s376_s25 = sadd.s32 1, %s1872_s20 }
   0xd   : > { %s373_s26 = ssub.s32 %s1876_s21, %s1989_s24  ;;  %p386_p0 = scmp.ne.s32.totalorder %s1872_s20, %s1868_s19 }
   0xe   : > { %p374_p1 = scmp.eq.s32.totalorder %s373_s26, 0  ;;  %p387_p2 = scmp.eq.s32.totalorder %s1985_s22, 1 }
   0xf   : > { %p392_p3 = scmp.ne.s32.totalorder %s1868_s19, %s1864_s18  ;;  %p393_p4 = scmp.eq.s32.totalorder %s1578_s23, 1 }
  0x10   : > { %s2000_s27 = scalar_select %p374_p1, %s1872_s20, %s376_s25  }
  0x11   : > { %p2002_p5 = por %p387_p2, %p386_p0  ;;  %p2006_p6 = por %p393_p4, %p392_p3 }
  0x12   : > { %p1581_p7 = scmp.ge.s32.totalorder %s1876_s21, 1  ;;  %p469_p8 = scmp.lt.s32.totalorder %s1876_s21, 3 }
  0x14   : > { %p470_p9 = pnand %p1581_p7, %p469_p8 }
  0x15   : > { %s2277_s5 = sld [smem:[#allocation10_spill]] (!%p470_p9)  ;;  %p532_p10 = scmp.lt.s32.totalorder (!%p470_p9), %s1985_s22, 1 }
  0x16   : > { %473 = sbr.rel (%p470_p9) target bundleno = 2791 (0xae7), region = 76  ;;  %s2278_s4 = sld [smem:[#allocation9_spill]] (!%p470_p9) }
  0x17   : > { %s2279_s1 = sld [smem:[#allocation6_spill]] (!%p470_p9)  ;;  %s529_s26 = sand.u32 (!%p470_p9), 1, %s1868_s19  }
  0x18   : > { %s2280_s0 = sld [smem:[#allocation5_spill]] (!%p470_p9) }
  0x19   : > { %s2281_s6 = sld [smem:[#allocation11_spill]] (!%p470_p9) }
  0x1a   : > { %s2282_s2 = sld [smem:[#allocation7_spill]] (!%p470_p9) }
  0x1b   : > { %v1792_v0 = vld [vmem:[%s2277_s5 + $0x8] sm:$0xff]   ;;  %v1878_v1 = vmov 0.0   ;;  %v1794_v3 = vld [vmem:[%s2277_s5] sm:$0xff]   ;;  %vm1879_vm0 = vmmov 0   ;;  %s2032_s17 = scalar_select %p532_p10, %s1985_s22, 1  ;;  %vm597_vm1 = vcmask 261120  }
  0x1c   : > { %1660 = vmatprep.subr.bf16.mxu1 %v1878_v1  ;;  %1652 = vmatprep.subr.bf16.mxu0 %v1878_v1  ;;  %v1793_v2 = vld [vmem:[%s2278_s4 + $0x8] sm:$0xff]   ;;  %v1795_v4 = vld [vmem:[%s2278_s4] sm:$0xff]   ;;  %vm766_vm2 = vcmask 64512   ;;  %vm829_vm3 = vcmask 1043456   ;;  %s2186_s4 = sshll.u32 %s529_s26, 3  ;;  %s2284_s3 = sld [smem:[#allocation8_spill]] }
  0x1d   : > { %1661 = vmatpush3.bf16.msra.mxu1 %v1792_v0  ;;  %1664 = vmatprep.mubr.msk.bf16.mxu1 %vm1879_vm0, %v1878_v1  ;;  %s2037_s23 = sshll.u32 %s2032_s17, 2  ;;  %v1592_v7 = vld [vmem:[%s2258_s8] ss:$0 sm:$0xff]  ;;  %v573_v60 = vld [vmem:[%s2260_s10 + $0x4] sm:$0xf]  ;;  %s531_s16 = scalar_lea.vmem [#allocation2], %s2186_s4 }
  0x1e   : > { %1653 = vmatpush3.bf16.msra.mxu0 %v1793_v2  ;;  %1662 = vmatprep.subr.bf16.mxu1 %v1878_v1  ;;  %s539_s30 = scalar_lea.vmem %s2279_s1, %s2037_s23  ;;  %s535_s5 = scalar_lea.vmem %s2280_s0, %s2037_s23  ;;  %v1588_v8 = vld [vmem:[%s2257_s7] ss:$0 sm:$0xff]  ;;  %v993_v61 = vsel %vm829_vm3, %v573_v60, 0 }
  0x1f   : > { %1654 = vmatprep.subr.bf16.mxu0 %v1878_v1  ;;  %1656 = vmatprep.mubr.msk.bf16.mxu0 %vm1879_vm0, %v1878_v1  ;;  %v554_v5 = vld [vmem:[%s539_s30] sm:$0xf]  ;;  %v1796_v22 = vld [vmem:[%s2281_s6 + $0x8] sm:$0xff]   ;;  %s2283_s30 = smov 120   ;;  %s1882_s0 = smov 104  }
  0x20   : > { %v553_v6 = vld [vmem:[%s535_s5] sm:$0xf]  ;;  %s2266_s5 = smov 120  }
  0x21   : > { %1663 = vmatpush3.bf16.msra.mxu1 %v1794_v3  ;;  %v1797_v23 = vld [vmem:[%s2281_s6] sm:$0xff]  }
  0x22   : > { %1655 = vmatpush3.bf16.msra.mxu0 %v1795_v4  ;;  %1676 = vmatprep.subr.bf16.mxu1 %v1878_v1  ;;  %v1596_v47 = vld [vmem:[%s2259_s9] ss:$0 sm:$0xff] }
  0x23   : > { %1668 = vmatprep.subr.bf16.mxu0 %v1878_v1  ;;  %v572_v3 = vld [vmem:[%s2260_s10] sm:$0xf] }
  0x24   : > { %1665 = vmatmul.mubr.msk.bf16.vlgmr.msra.gmra.mxu1 %vm597_vm1, %v554_v5 }
  0x25   : > { %1657 = vmatmul.mubr.msk.bf16.vlgmr.msra.gmra.mxu0 %vm597_vm1, %v553_v6  ;;  %1678 = vmatprep.mubr.msk.bf16.mxu1 %vm1879_vm0, %v1878_v1  ;;  %v1039_v6 = vsel %vm829_vm3, %v572_v3, 0 }
  0x26   : > { %1672 = vmatprep.mubr.msk.bf16.mxu0 %vm1879_vm0, %v1878_v1  ;;  %1669 = vmatpush3.bf16.msra.mxu0 %v1796_v22 }
  0x27   : > { %1670 = vmatprep.subr.bf16.mxu0 %v1878_v1 }
  0x2a   : > { %1671 = vmatpush3.bf16.msra.mxu0 %v1797_v23 }
  0x2b   : > { %1682 = vmatprep.subr.bf16.mxu0 %v1878_v1 }
  0xe4   : > { %v697_v9 = vpop.f32.mrf.mxu1 }
  0xe5   : > { %v698_v10 = vadd.f32 %v1592_v7, %v697_v9  ;;  %v635_v11 = vpop.f32.mrf.mxu0 }
  0xe6   : > { %v1666_v12 = vpop.f32.mrf.mxu1  ;;  %v636_v13 = vadd.f32 %v1588_v8, %v635_v11 }
  0xe7   : > { %v2061_v14 = vpack.c.bf16 %v698_v10, %v698_v10  ;;  %v1658_v15 = vpop.f32.mrf.mxu0 }
  0xe8   : > { %v700_v16 = vpop.f32.mrf.mxu1  ;;  %v2063_v17 = vpack.c.bf16 %v636_v13, %v636_v13 }
  0xe9   : > { %878 = vrot.lane.b32.xlu0 %v2061_v14, %s2266_s5  ;;  %v771_v18 = vsel %vm766_vm2, %v2061_v14, 0  ;;  %v638_v19 = vpop.f32.mrf.mxu0 }
  0xea   : > { %v1667_v20 = vpop.f32.mrf.mxu1  ;;  %1677 = vmatpush3.bf16.xpose.msra.mxu1 %v771_v18 }
  0xeb   : > { %v1659_v21 = vpop.f32.mrf.mxu0  ;;  %1688 = vmatprep.subr.bf16.mxu1 %v1878_v1 }
  0xed   : > { %875 = vrot.lane.b32.xlu0 %v2063_v17, %s2266_s5  ;;  %s543_s5 = scalar_lea.vmem %s2282_s2, %s2037_s23  ;;  %s1616_s23 = sshll.u32 %s1985_s22, 7 }
  0xee   : > { %v555_v24 = vld [vmem:[%s543_s5] sm:$0xf]  ;;  %s1881_s5 = smov 112   ;;  %s1457_s4 = scalar_lea.hbm %s2265_s15, %s1616_s23 }
  0xef   : > { %1673 = vmatmul.mubr.msk.bf16.vlgmr.msra.gmra.mxu0 %vm597_vm1, %v555_v24  ;;  %s1883_s2 = smov [#allocation2]  }
  0xf0   : > { %1684 = vmatprep.mubr.msk.bf16.mxu0 %vm1879_vm0, %v1878_v1 }
  0xf1   : > { %1679 = vmatmul.mubr.msk.bf16.vlgmr.msra.gmra.mxu1 %vm766_vm2, %v2063_v17 }
  0xf2   : > { %1690 = vmatprep.mubr.msk.bf16.mxu1 %vm1879_vm0, %v1878_v1 }
 0x15b   : > { %v879_v25 = vpop.permute.xlu0 %878 }
 0x15c   : > { %v884_v26 = vsel %vm766_vm2, %v879_v25, 0 }
 0x15d   : > { %1689 = vmatpush3.bf16.xpose.msra.mxu1 %v884_v26 }
 0x15e   : > { %1700 = vmatprep.subr.bf16.mxu1 %v1878_v1 }
 0x15f   : > { %v876_v27 = vpop.permute.xlu0 %875 }
 0x164   : > { %1691 = vmatmul.mubr.msk.bf16.vlgmr.msra.gmra.mxu1 %vm766_vm2, %v876_v27 }
 0x165   : > { %1702 = vmatprep.mubr.msk.bf16.mxu1 %vm1879_vm0, %v1878_v1  ;;  %1701 = vmatpush3.bf16.msra.mxu1 %v993_v61 }
 0x166   : > { %1712 = vmatprep.subr.bf16.mxu1 %v1878_v1 }
 0x1af   : > { %v759_v41 = vpop.f32.mrf.mxu0 }
 0x1b0   : > { %v760_v48 = vadd.f32 %v1596_v47, %v759_v41 }
 0x1b1   : > { %v807_v28 = vpop.f32.mrf.mxu1  ;;  %v1674_v42 = vpop.f32.mrf.mxu0 }
 0x1b2   : > { %v813_v29 = vsel %vm766_vm2, %v807_v28, -inf  ;;  %v2102_v49 = vpack.c.bf16 %v760_v48, %v760_v48 }
 0x1b3   : > { %814 = vmax.xlane.f32.xlu1 %v813_v29  ;;  %v1680_v30 = vpop.f32.mrf.mxu1  ;;  %v762_v43 = vpop.f32.mrf.mxu0 }
 0x1b4   : > { %v831_v50 = vsel %vm829_vm3, %v2102_v49, 0 }
 0x1b5   : > { %v810_v31 = vpop.f32.mrf.mxu1  ;;  %v1675_v44 = vpop.f32.mrf.mxu0  ;;  %1683 = vmatpush3.bf16.msra.mxu0 %v831_v50 }
 0x1b6   : > { %1694 = vmatprep.subr.bf16.mxu0 %v1878_v1 }
 0x1b7   : > { %v1681_v32 = vpop.f32.mrf.mxu1 }
 0x224   : > { %v920_v33 = vpop.f32.mrf.mxu1 }
 0x225   : > { %v926_v34 = vsel %vm766_vm2, %v920_v33, -inf }
 0x226   : > { %927 = vmax.xlane.f32.xlu1 %v926_v34  ;;  %v1692_v35 = vpop.f32.mrf.mxu1 }
 0x228   : > { %v923_v36 = vpop.f32.mrf.mxu1 }
 0x22a   : > { %v1693_v37 = vpop.f32.mrf.mxu1 }
 0x23c   : > { %v815_v38 = vpop.xlane.xlu1 %814 }
 0x23d   : > { %v816_v39 = vsub.f32 %v807_v28, %v815_v38 }
 0x23f   : > { %v817_v40 = vmul.f32 1.442695, %v816_v39 }
 0x241   : > { %1798 = vpow2.f32 %v817_v40 }
 0x24e   : > { %v1799_v45 = vpop.eup %1798 }
 0x24f   : > { %v819_v46 = vsel %vm766_vm2, %v1799_v45, 0.0 }
 0x250   : > { %820 = vadd.xlane.f32.xlu0 %v819_v46 }
 0x266   : > { %1144 = vrot.lane.b32.xlu0 %v2102_v49, %s1881_s5 }
 0x2af   : > { %v928_v51 = vpop.xlane.xlu1 %927 }
 0x2b0   : > { %v929_v52 = vsub.f32 %v920_v33, %v928_v51 }
 0x2b2   : > { %v930_v53 = vmul.f32 1.442695, %v929_v52 }
 0x2b4   : > { %1800 = vpow2.f32 %v930_v53 }
 0x2c1   : > { %v1801_v54 = vpop.eup %1800 }
 0x2c2   : > { %v932_v55 = vsel %vm766_vm2, %v1801_v54, 0.0 }
 0x2c3   : > { %933 = vadd.xlane.f32.xlu1 %v932_v55 }
 0x2d4   : > { %940 = vrot.lane.b32.xlu1 %v2102_v49, %s2283_s30 }
 0x2d8   : > { %1083 = vrot.lane.b32.xlu1 %v2061_v14, %s1881_s5 }
 0x2d9   : > { %v821_v56 = vpop.xlane.xlu0 %820 }
 0x2da   : > { %1802 = vrcp.f32 %v821_v56 }
 0x2dc   : > { %1081 = vrot.lane.b32.xlu1 %v2063_v17, %s1881_s5  ;;  %s1459_s5 = sshll.u32 %s531_s16, 4  ;;  %s1460_s5 = int_to_ptr.vmem [resolvable:$true] %s1459_s5 }
 0x2dd   : > { %v1145_v7 = vpop.permute.xlu0 %1144  ;;  %s1816_s1 = scalar_lea.vmem %s1460_s5, 128 }
 0x2de   : > { %v1150_v11 = vsel %vm829_vm3, %v1145_v7, 0  ;;  %p1817_p11 = scmp.ne.s32.totalorder %s1460_s5, %s1816_s1 }
 0x2e0   : > { %p1818_p12 = pnand %p1817_p11, %p2002_p5 }
 0x2e2   : > { %p1819_p13 = pneg %p1818_p12 }
 0x2e7   : > { %v1803_v57 = vpop.eup %1802 }
 0x2e8   : > { %v2113_v58 = vmul.f32 %v1803_v57, %v1799_v45 }
 0x2ea   : > { %v825_v59 = vpack.c.bf16 %v2113_v58, %v2113_v58 }
 0x2ec   : > { %1685 = vmatmul.mubr.msk.bf16.vlgmr.msra.gmra.mxu0 %vm766_vm2, %v825_v59 }
 0x2ed   : > { %1696 = vmatprep.mubr.msk.bf16.mxu0 %vm1879_vm0, %v1878_v1 }
 0x34c   : > { %v934_v62 = vpop.xlane.xlu1 %933 }
 0x34d   : > { %1804 = vrcp.f32 %v934_v62 }
 0x350   : > { %v941_v63 = vpop.permute.xlu1 %940 }
 0x351   : > { %v946_v0 = vsel %vm829_vm3, %v941_v63, 0 }
 0x352   : > { %1695 = vmatpush3.bf16.msra.mxu0 %v946_v0 }
 0x353   : > { %1706 = vmatprep.subr.bf16.mxu0 %v1878_v1 }
 0x354   : > { %v1084_v15 = vpop.permute.xlu1 %1083 }
 0x355   : > { %v1089_v20 = vsel %vm766_vm2, %v1084_v15, 0 }
 0x358   : > { %v1082_v23 = vpop.permute.xlu1 %1081 }
 0x35a   : > { %v1805_v2 = vpop.eup %1804 }
 0x35b   : > { %v936_v4 = vmul.f32 %v1805_v2, %v1801_v54 }
 0x35d   : > { %v938_v5 = vpack.c.bf16 %v936_v4, %v936_v4  ;;  %v937_v45 = vadd.f32 %v936_v4, %v2113_v58 }
 0x35f   : > { %1697 = vmatmul.mubr.msk.bf16.vlgmr.msra.gmra.mxu0 %vm766_vm2, %v938_v5  ;;  %v575_v5 = vld [vmem:[%s2260_s10 + $0xc] sm:$0xf] }
 0x360   : > { %1707 = vmatpush3.bf16.msra.mxu0 %v1039_v6  ;;  %1708 = vmatprep.mubr.msk.bf16.mxu0 %vm1879_vm0, %v1878_v1  ;;  %v1356_v7 = vsel %vm829_vm3, %v575_v5, 0 }
 0x361   : > { %1718 = vmatprep.subr.bf16.mxu0 %v1878_v1 }
 0x3ac   : > { %v867_v8 = vpop.f32.mrf.mxu0 }
 0x3ad   : > { %v873_v9 = vpack.c.bf16 %v867_v8, %v867_v8 }
 0x3ae   : > { %v1686_v10 = vpop.f32.mrf.mxu0 }
 0x3af   : > { %1709 = vmatmul.mubr.msk.bf16.vlgmr.msra.gmra.mxu0 %vm766_vm2, %v873_v9 }
 0x3b0   : > { %1719 = vmatpush3.bf16.msra.mxu0 %v1150_v11  ;;  %v870_v12 = vpop.f32.mrf.mxu0  ;;  %1720 = vmatprep.mubr.msk.bf16.mxu0 %vm1879_vm0, %v1878_v1 }
 0x3b1   : > { %1730 = vmatprep.subr.bf16.mxu0 %v1878_v1 }
 0x3b2   : > { %v1687_v13 = vpop.f32.mrf.mxu0 }
 0x41f   : > { %v982_v16 = vpop.f32.mrf.mxu0 }
 0x420   : > { %v988_v18 = vpack.c.bf16 %v982_v16, %v982_v16 }
 0x421   : > { %v1698_v19 = vpop.f32.mrf.mxu0 }
 0x422   : > { %1703 = vmatmul.mubr.msk.bf16.vlgmr.msra.gmra.mxu1 %vm766_vm2, %v988_v18 }
 0x423   : > { %1713 = vmatpush3.bf16.xpose.msra.mxu1 %v1089_v20  ;;  %v985_v21 = vpop.f32.mrf.mxu0  ;;  %1714 = vmatprep.mubr.msk.bf16.mxu1 %vm1879_vm0, %v1878_v1 }
 0x424   : > { %1724 = vmatprep.subr.bf16.mxu1 %v1878_v1 }
 0x425   : > { %v1699_v22 = vpop.f32.mrf.mxu0 }
 0x42a   : > { %1715 = vmatmul.mubr.msk.bf16.vlgmr.msra.gmra.mxu1 %vm766_vm2, %v1082_v23 }
 0x42b   : > { %1726 = vmatprep.mubr.msk.bf16.mxu1 %vm1879_vm0, %v1878_v1 }
 0x46f   : > { %v2148_v24 = vpop.f32.mrf.mxu0 }
 0x471   : > { %v1710_v25 = vpop.f32.mrf.mxu0 }
 0x473   : > { %v1078_v26 = vpop.f32.mrf.mxu0 }
 0x475   : > { %v1711_v27 = vpop.f32.mrf.mxu0 }
 0x4e2   : > { %v1029_v28 = vpop.f32.mrf.mxu1 }
 0x4e4   : > { %v1704_v29 = vpop.f32.mrf.mxu1 }
 0x4e5   : > { %v1612_v29 = vld [vmem:[%s2261_s11] ss:$0 sm:$0xff] }
 0x4e6   : > { %v1032_v30 = vpop.f32.mrf.mxu1 }
 0x4e8   : > { %v1705_v31 = vpop.f32.mrf.mxu1 }
 0x4ea   : > { %v1125_v32 = vpop.f32.mrf.mxu1 }
 0x4eb   : > { %v1131_v33 = vsel %vm766_vm2, %v1125_v32, -inf }
 0x4ec   : > { %1132 = vmax.xlane.f32.xlu1 %v1131_v33  ;;  %v1716_v34 = vpop.f32.mrf.mxu1 }
 0x4ee   : > { %v1128_v35 = vpop.f32.mrf.mxu1 }
 0x4f0   : > { %v1717_v36 = vpop.f32.mrf.mxu1 }
 0x575   : > { %v1133_v37 = vpop.xlane.xlu1 %1132 }
 0x576   : > { %v1134_v38 = vsub.f32 %v1125_v32, %v1133_v37 }
 0x578   : > { %v1135_v39 = vmul.f32 1.442695, %v1134_v38 }
 0x57a   : > { %1806 = vpow2.f32 %v1135_v39 }
 0x587   : > { %v1807_v40 = vpop.eup %1806 }
 0x588   : > { %v1137_v41 = vsel %vm766_vm2, %v1807_v40, 0.0 }
 0x589   : > { %1138 = vadd.xlane.f32.xlu0 %v1137_v41 }
 0x59f   : > { %1242 = vrot.lane.b32.xlu0 %v2061_v14, %s1882_s0 }
 0x5a3   : > { %1240 = vrot.lane.b32.xlu0 %v2063_v17, %s1882_s0  ;;  %v574_v17 = vld [vmem:[%s2260_s10 + $0x8] sm:$0xf] }
 0x5a4   : > { %v1197_v51 = vsel %vm829_vm3, %v574_v17, 0 }
 0x5a5   : > { %1725 = vmatpush3.bf16.msra.mxu1 %v1197_v51 }
 0x5a6   : > { %1736 = vmatprep.subr.bf16.mxu1 %v1878_v1 }
 0x612   : > { %v1139_v42 = vpop.xlane.xlu0 %1138 }
 0x613   : > { %1808 = vrcp.f32 %v1139_v42 }
 0x616   : > { %v1243_v46 = vpop.permute.xlu0 %1242 }
 0x617   : > { %v1248_v50 = vsel %vm766_vm2, %v1243_v46, 0 }
 0x61a   : > { %v1241_v14 = vpop.permute.xlu0 %1240 }
 0x620   : > { %v1809_v43 = vpop.eup %1808 }
 0x621   : > { %v1141_v44 = vmul.f32 %v1809_v43, %v1807_v40 }
 0x623   : > { %v1143_v47 = vpack.c.bf16 %v1141_v44, %v1141_v44  ;;  %v1142_v48 = vadd.f32 %v1141_v44, %v937_v45 }
 0x625   : > { %1721 = vmatmul.mubr.msk.bf16.vlgmr.msra.gmra.mxu0 %vm766_vm2, %v1143_v47 }
 0x626   : > { %1731 = vmatpush3.bf16.xpose.msra.mxu0 %v1248_v50  ;;  %1732 = vmatprep.mubr.msk.bf16.mxu0 %vm1879_vm0, %v1878_v1 }
 0x627   : > { %1742 = vmatprep.subr.bf16.mxu0 %v1878_v1 }
 0x62d   : > { %1733 = vmatmul.mubr.msk.bf16.vlgmr.msra.gmra.mxu0 %vm766_vm2, %v1241_v14 }
 0x62e   : > { %1744 = vmatprep.mubr.msk.bf16.mxu0 %vm1879_vm0, %v1878_v1  ;;  %1743 = vmatpush3.bf16.msra.mxu0 %v1356_v7 }
 0x6e5   : > { %v1186_v52 = vpop.f32.mrf.mxu0 }
 0x6e6   : > { %v1192_v53 = vpack.c.bf16 %v1186_v52, %v1186_v52 }
 0x6e7   : > { %v1722_v54 = vpop.f32.mrf.mxu0 }
 0x6e8   : > { %1727 = vmatmul.mubr.msk.bf16.vlgmr.msra.gmra.mxu1 %vm766_vm2, %v1192_v53 }
 0x6e9   : > { %v1189_v55 = vpop.f32.mrf.mxu0  ;;  %1738 = vmatprep.mubr.msk.bf16.mxu1 %vm1879_vm0, %v1878_v1  ;;  %v1076_v1 = vadd.f32 %v2148_v24, %v1029_v28 }
 0x6eb   : > { %v1723_v56 = vpop.f32.mrf.mxu0 }
 0x6ed   : > { %v1284_v57 = vpop.f32.mrf.mxu0 }
 0x6ee   : > { %v1290_v58 = vsel %vm766_vm2, %v1284_v57, -inf }
 0x6ef   : > { %1291 = vmax.xlane.f32.xlu0 %v1290_v58  ;;  %v1734_v59 = vpop.f32.mrf.mxu0 }
 0x6f1   : > { %v1287_v60 = vpop.f32.mrf.mxu0 }
 0x6f3   : > { %v1735_v61 = vpop.f32.mrf.mxu0 }
 0x778   : > { %v1292_v62 = vpop.xlane.xlu0 %1291 }
 0x779   : > { %v1293_v63 = vsub.f32 %v1284_v57, %v1292_v62 }
 0x77b   : > { %v1294_v0 = vmul.f32 1.442695, %v1293_v63 }
 0x77d   : > { %1810 = vpow2.f32 %v1294_v0 }
 0x78a   : > { %v1811_v2 = vpop.eup %1810 }
 0x78b   : > { %v1296_v3 = vsel %vm766_vm2, %v1811_v2, 0.0 }
 0x78c   : > { %1297 = vadd.xlane.f32.xlu1 %v1296_v3 }
 0x79d   : > { %1303 = vrot.lane.b32.xlu1 %v2102_v49, %s1882_s0  ;;  %s2267_s0 = sshll.u32 %s2032_s17, 3 }
 0x79e   : > { %s547_s30 = scalar_lea.vmem %s2284_s3, %s2267_s0  ;;  %s1443_s0 = scalar_lea.sflag [#allocation3], %s529_s26 }
 0x79f   : > { %v556_v25 = vld [vmem:[%s547_s30] sm:$0xff]  ;;  %s1820_s3 = sshll.u32 %s1883_s2, 4  ;;  %s1821_s3 = int_to_ptr.vmem [resolvable:$false] %s1820_s3 }
 0x7a0   : > { %s1822_s6 = scalar_lea.vmem %s1821_s3, 256  ;;  %p1823_p0 = scmp.lt.s32.totalorder %s1460_s5, %s1821_s3 }
 0x7a1   : > { %p1824_p1 = scmp.lt.s32.totalorder %s1822_s6, %s1816_s1 }
 0x7a3   : > { %p1825_p2 = por %p1824_p1, %p1823_p0 }
 0x7a5   : > { %p1826_p3 = pnand %p1825_p2, %p1819_p13 }
 0x7a8   : > { %v1233_v4 = vpop.f32.mrf.mxu1 }
 0x7a9   : > { %v1239_v6 = vadd.f32 %v1233_v4, %v1076_v1 }
 0x7aa   : > { %v1728_v8 = vpop.f32.mrf.mxu1 }
 0x7ac   : > { %v1236_v9 = vpop.f32.mrf.mxu1 }
 0x7ae   : > { %v1729_v10 = vpop.f32.mrf.mxu1 }
 0x815   : > { %v1298_v11 = vpop.xlane.xlu1 %1297 }
 0x816   : > { %1812 = vrcp.f32 %v1298_v11 }
 0x819   : > { %v1304_v12 = vpop.permute.xlu1 %1303 }
 0x81a   : > { %v1309_v49 = vsel %vm829_vm3, %v1304_v12, 0 }
 0x81b   : > { %1737 = vmatpush3.bf16.msra.mxu1 %v1309_v49 }
 0x823   : > { %v1813_v13 = vpop.eup %1812 }
 0x824   : > { %v1300_v15 = vmul.f32 %v1813_v13, %v1811_v2 }
 0x826   : > { %v1302_v16 = vpack.c.bf16 %v1300_v15, %v1300_v15  ;;  %v1301_v18 = vadd.f32 %v1300_v15, %v1142_v48 }
 0x828   : > { %1739 = vmatmul.mubr.msk.bf16.vlgmr.msra.gmra.mxu1 %vm766_vm2, %v1302_v16  ;;  %v1399_v19 = vmul.f32 0.25, %v1301_v18 }
 0x82a   : > { %1400 = vst.msk [vmem:[%s531_s16] sm:$0xff] %vm766_vm2, %v1399_v19 }
 0x8e8   : > { %v1345_v20 = vpop.f32.mrf.mxu1 }
 0x8e9   : > { %v1351_v21 = vpack.c.bf16 %v1345_v20, %v1345_v20 }
 0x8ea   : > { %v1740_v22 = vpop.f32.mrf.mxu1 }
 0x8eb   : > { %1745 = vmatmul.mubr.msk.bf16.vlgmr.msra.gmra.mxu0 %vm766_vm2, %v1351_v21 }
 0x8ec   : > { %v1348_v23 = vpop.f32.mrf.mxu1 }
 0x8ee   : > { %v1741_v24 = vpop.f32.mrf.mxu1 }
 0x9ab   : > { %v1392_v26 = vpop.f32.mrf.mxu0 }
 0x9ac   : > { %v1398_v27 = vadd.f32 %v1392_v26, %v1239_v6 }
 0x9ad   : > { %v1746_v28 = vpop.f32.mrf.mxu0 }
 0x9ae   : > { %v1401_v30 = vadd.f32 %v1398_v27, %v556_v25 }
 0x9af   : > { %v1395_v31 = vpop.f32.mrf.mxu0 }
 0x9b0   : > { %v1408_v32 = vadd.f32 %v1612_v29, %v1401_v30 }
 0x9b1   : > { %v1747_v33 = vpop.f32.mrf.mxu0 }
 0x9b2   : > { %v1409_v34 = vsel %vm597_vm1, %v1408_v32, 0.0 }
 0x9b3   : > { %1410 = vadd.xlane.f32.xlu1 %v1409_v34 }
 0xa3c   : > { %v1411_v35 = vpop.xlane.xlu1 %1410 }
 0xa3d   : > { %v1413_v36 = vmul.f32 0.03125, %v1411_v35 }
 0xa3f   : > { %v1414_v37 = vsub.f32 %v1408_v32, %v1413_v36 }
 0xa41   : > { %v1415_v38 = vmul.f32 %v1414_v37, %v1414_v37 }
 0xa43   : > { %v1416_v39 = vsel %vm597_vm1, %v1415_v38, 0.0 }
 0xa44   : > { %1417 = vadd.xlane.f32.xlu0 %v1416_v39 }
 0xa45   : > { %1829 = shalt.err (!%p1826_p3)
}
 0xa46   : > { %s1830_s22 = scalar_lea.hbm %s1457_s4, 128  ;;  %s1834_s23 = scalar_lea.hbm %s2265_s15, 256 }
 0xa47   : > { %p1831_p4 = scmp.ne.s32.totalorder %s1457_s4, %s1830_s22  ;;  %p1835_p9 = scmp.lt.s32.totalorder %s1457_s4, %s2265_s15 }
 0xa48   : > { %p1836_p10 = scmp.lt.s32.totalorder %s1834_s23, %s1830_s22 }
 0xa49   : > { %p1832_p7 = pnand %p1831_p4, %p2002_p5 }
 0xa4a   : > { %p1837_p11 = por %p1836_p10, %p1835_p9 }
 0xa4b   : > { %p1833_p8 = pneg %p1832_p7 }
 0xa4d   : > { %p1838_p12 = pnand %p1837_p11, %p1833_p8 }
 0xa4f   : > { %1841 = shalt.err (!%p1838_p12)
}
 0xa50   : > { %1748 = dma.vmem_to_hbm [thread:$0]  (%p2002_p5), %s1460_s5, 128, %s1457_s4, %s1443_s0   ;;  %v1613_v44 = vld [vmem:[%s2262_s12] ss:$0 sm:$0xff] }
 0xa51   : > { %v1614_v46 = vld [vmem:[%s2263_s13] ss:$0 sm:$0xff]  ;;  %s2285_s22 = sshll.u32 %s2032_s17, 3 }
 0xa52   : > { %s551_s0 = scalar_lea.vmem %s2264_s14, %s2285_s22 }
 0xacd   : > { %v1418_v40 = vpop.xlane.xlu0 %1417 }
 0xace   : > { %v1419_v41 = vmul.f32 0.03125, %v1418_v40 }
 0xad0   : > { %v1420_v42 = vadd.f32 1e-05, %v1419_v41 }
 0xad2   : > { %1814 = vrsqrt.f32 %v1420_v42 }
 0xadf   : > { %v1815_v43 = vpop.eup %1814 }
 0xae0   : > { %v1422_v45 = vmul.f32 %v1815_v43, %v1414_v37 }
 0xae2   : > { %v1429_v47 = vmul.f32 %v1613_v44, %v1422_v45 }
 0xae4   : > { %v1436_v48 = vadd.f32 %v1614_v46, %v1429_v47 }
 0xae6   : > { %1437 = vst.msk [vmem:[%s551_s0] sm:$0xff] %vm597_vm1, %v1436_v48 }
 0xae7 PF: > { %p1754_p5 = scmp.ge.s32.totalorder %s1876_s21, 2  ;;  %s1478_s5 = sand.u32 1, %s1864_s18  }
 0xae8   : > { %s1479_s4 = scalar_lea.sflag [#allocation3], %s1478_s5 }
 0xae9   : > { %p1751_p13 = pnand %p1754_p5, %p2006_p6 }
 0xaeb   : > { %p1752_p0 = pneg %p1751_p13 }
 0xaed   : > { %1859 = dma.done.wait (%p1752_p0), %s1479_s4, 128  }
 0xaee   : > { %1861 = vsyncadd (%p1752_p0), %s1479_s4, 4294967168  ;;  %p26_p1 = scmp.ge.s32.totalorder %s1989_s24, 4   ;;  %s2286_s18 = smov %s1868_s19 }
 0xaef   : > { %s2287_s19 = smov %s1872_s20  ;;  %s2288_s20 = smov %s2000_s27 }
 0xaf0   : > { %s2289_s21 = smov %s1989_s24  ;;  %28 = sbr.rel (!%p26_p1) target bundleno = 11 (0xb), region = 132 }
 0xaf5   :  { %1484 = vsyncpa [#allocation3], 1 }
 0xaf6   :  { %1486 = vsyncpa [#allocation3 + $0x1], 1 }

// kernel: transformer_decoder_forward.15
= control target key start
LH: loop header
LB: loop body
LE: loop exit
PB: predicated region body
PF: predicated region fallthrough
CT: control target
= control target key end

     0   :  { %s2748_s0 = inlined_call_operand.vmem [shape: bf16[2,8,32], index: 0, kind: input, shape index: {}]   ;;  %s2749_s1 = inlined_call_operand.vmem [shape: bf16[2,64,32], index: 1, kind: input, shape index: {}]   ;;  %s2750_s2 = inlined_call_operand.vmem [shape: bf16[2,64,32], index: 2, kind: input, shape index: {}]   ;;  %s2751_s3 = inlined_call_operand.vmem [shape: f32[2,8,32], index: 3, kind: input, shape index: {}]   ;;  %s2752_s4 = inlined_call_operand.vmem [shape: f32[2,1,64], index: 4, kind: input, shape index: {}]   ;;  %s2753_s5 = inlined_call_operand.vmem [shape: bf16[32,32], index: 5, kind: input, shape index: {}]   ;;  %s2754_s6 = inlined_call_operand.vmem [shape: bf16[32,32], index: 6, kind: input, shape index: {}]   ;;  %s2755_s7 = inlined_call_operand.vmem [shape: bf16[32,32], index: 7, kind: input, shape index: {}]   ;;  %s2756_s8 = inlined_call_operand.vmem [shape: f32[1,32], index: 8, kind: input, shape index: {}, may-alias: {8,9,10,12,14}]   ;;  %s2757_s9 = inlined_call_operand.vmem [shape: f32[1,32], index: 9, kind: input, shape index: {}, may-alias: {8,9,10,12,14}]   ;;  %s2758_s10 = inlined_call_operand.vmem [shape: f32[1,32], index: 10, kind: input, shape index: {}, may-alias: {8,9,10,12,14}]   ;;  %s2759_s11 = inlined_call_operand.vmem [shape: bf16[32,32], index: 11, kind: input, shape index: {}]   ;;  %s2760_s12 = inlined_call_operand.vmem [shape: f32[1,32], index: 12, kind: input, shape index: {}, may-alias: {8,9,10,12,14}]   ;;  %s2761_s13 = inlined_call_operand.vmem [shape: f32[1,32], index: 13, kind: input, shape index: {}]   ;;  %s2762_s14 = inlined_call_operand.vmem [shape: f32[1,32], index: 14, kind: input, shape index: {}, may-alias: {8,9,10,12,14}]   ;;  %s2763_s15 = inlined_call_operand.vmem [shape: f32[2,8,32], index: 15, kind: output, shape index: {0}]   ;;  %s2764_s16 = inlined_call_operand.hbm [shape: f32[2,8,64], index: 16, kind: output, shape index: {1}]  }
   0x1   :  { %2770 = sst [smem:[#allocation9_spill]] %s2748_s0 }
   0x2   :  { %2771 = sst [smem:[#allocation10_spill]] %s2749_s1 }
   0x3   :  { %2772 = sst [smem:[#allocation11_spill]] %s2753_s5 }
   0x4   :  { %2773 = sst [smem:[#allocation12_spill]] %s2754_s6 }
   0x5   :  { %22 = vsyncpa [#allocation3], 0 }
   0x6   :  { %24 = vsyncpa [#allocation3 + $0x1], 0  ;;  %s2352_s21 = smov 0   ;;  %s2354_s22 = smov 0  }
   0x7   :  { %s2356_s23 = smov 0   ;;  %s2358_s24 = smov 0  }
   0x8 LB: > { %2774 = sst [smem:[#allocation5_spill]] %s2255_s23  ;;  %s2373_s25 = sadd.s32 4294967295, %s2259_s24   ;;  %s2259_s24 = sphi %s2358_s24, %s2786_s24   ;;  %s2255_s23 = sphi %s2356_s23, %s2788_s23   ;;  %s2251_s22 = sphi %s2354_s22, %s2790_s22   ;;  %s2247_s21 = sphi %s2352_s21, %s2789_s21  }
   0x9   : > { %s1848_s26 = sadd.s32 4294967294, %s2259_s24   ;;  %s2377_s27 = sadd.s32 1, %s2259_s24  }
   0xa   : > { %2775 = sst [smem:[#allocation6_spill]] %s2377_s27  ;;  %s403_s28 = sadd.s32 1, %s2255_s23 }
   0xb   : > { %s400_s29 = ssub.s32 %s2259_s24, %s2377_s27  ;;  %p413_p0 = scmp.ne.s32.totalorder %s2255_s23, %s2251_s22 }
   0xc   : > { %p401_p1 = scmp.eq.s32.totalorder %s400_s29, 0  ;;  %p414_p2 = scmp.eq.s32.totalorder %s2373_s25, 1 }
   0xd   : > { %p419_p3 = scmp.ne.s32.totalorder %s2251_s22, %s2247_s21  ;;  %p420_p4 = scmp.eq.s32.totalorder %s1848_s26, 1 }
   0xe   : > { %s2388_s30 = scalar_select %p401_p1, %s2255_s23, %s403_s28  }
   0xf   : > { %p2390_p5 = por %p414_p2, %p413_p0  ;;  %p2394_p6 = por %p420_p4, %p419_p3 }
  0x10   : > { %2776 = sst [smem:[#allocation7_spill]] %s2388_s30  ;;  %p1851_p7 = scmp.ge.s32.totalorder %s2259_s24, 1 }
  0x11   : > { %s2778_s17 = scalar_select %p2394_p6, 1, 0 }
  0x12   : > { %p504_p8 = scmp.lt.s32.totalorder %s2259_s24, 3 }
  0x13   : > { %2779 = sst [smem:[#allocation8_spill]] %s2778_s17 }
  0x14   : > { %p505_p9 = pnand %p1851_p7, %p504_p8 }
  0x15   : > { %s2780_s6 = sld [smem:[#allocation12_spill]] (!%p505_p9)  ;;  %p574_p10 = scmp.lt.s32.totalorder (!%p505_p9), %s2373_s25, 1 }
  0x16   : > { %508 = sbr.rel (%p505_p9) target bundleno = 3502 (0xdae), region = 80  ;;  %s2781_s5 = sld [smem:[#allocation11_spill]] (!%p505_p9) }
  0x17   : > { %s2782_s1 = sld [smem:[#allocation10_spill]] (!%p505_p9)  ;;  %s2264_s30 = smov (!%p505_p9), 112  }
  0x18   : > { %s2783_s17 = sld [smem:[#allocation9_spill]] (!%p505_p9) }
  0x1b   : > { %v2167_v0 = vld [vmem:[%s2780_s6 + $0x8] sm:$0xff]   ;;  %v2168_v1 = vld [vmem:[%s2780_s6] sm:$0xff]   ;;  %s2408_s28 = scalar_select %p574_p10, %s2373_s25, 1  ;;  %v2261_v2 = vmov 0.0   ;;  %vm659_vm0 = vcmask 261120   ;;  %vm2262_vm1 = vmmov 0  }
  0x1c   : > { %1979 = vmatprep.subr.bf16.mxu1 %v2167_v0  ;;  %1971 = vmatprep.subr.bf16.mxu0 %v2261_v2  ;;  %v2173_v3 = vld [vmem:[%s2781_s5 + $0x8] sm:$0xff]   ;;  %v2174_v4 = vld [vmem:[%s2781_s5] sm:$0xff]   ;;  %vm948_vm2 = vcmask 64512   ;;  %vm1004_vm3 = vcmask 523264   ;;  %vm1208_vm4 = vcmask 1043456   ;;  %s2266_s5 = smov [#allocation2]  }
  0x1d   : > { %1980 = vmatpush3.bf16.msra.mxu1 %v2167_v0  ;;  %s1906_s18 = sshll.u32 %s2408_s28, 5  ;;  %1975 = vmatprep.mubr.msk.bf16.mxu0 %vm2262_vm1, %v2261_v2  ;;  %s1853_s20 = sshll.u32 %s2408_s28, 2  ;;  %v1864_v20 = vld [vmem:[%s2757_s9] ss:$0 sm:$0xff]  ;;  %v2175_v42 = vld [vmem:[%s2755_s7 + $0x8] sm:$0xff]  }
  0x1e   : > { %1981 = vmatprep.subr.bf16.mxu1 %v2168_v1  ;;  %s582_s27 = scalar_lea.vmem %s2782_s1, %s1906_s18  ;;  %1972 = vmatpush3.bf16.msra.mxu0 %v2173_v3  ;;  %s577_s23 = scalar_lea.vmem %s2783_s17, %s1853_s20  ;;  %v1860_v29 = vld [vmem:[%s2756_s8] ss:$0 sm:$0xff] }
  0x1f   : > { %v2169_v5 = vld [vmem:[%s582_s27] sm:$0xff]   ;;  %1973 = vmatprep.subr.bf16.mxu0 %v2261_v2  ;;  %v2170_v6 = vld [vmem:[%s582_s27 + $0x8] sm:$0xff]   ;;  %v2171_v7 = vld [vmem:[%s582_s27 + $0x10] sm:$0xff]   ;;  %s2433_s6 = scalar_lea.vmem %s2750_s2, %s1906_s18  ;;  %s594_s17 = scalar_lea.vmem %s2752_s4, %s2408_s28 }
  0x20   : > { %1983 = vmatprep.mubr.msk.bf16.mxu1 %vm659_vm0, %v2169_v5  ;;  %v600_v8 = vld [vmem:[%s577_s23] sm:$0xf]  ;;  %v2172_v9 = vld [vmem:[%s582_s27 + $0x18] sm:$0xff]   ;;  %s2263_s27 = smov 120   ;;  %v2178_v45 = vld [vmem:[%s2433_s6 + $0x8] sm:$0xff]   ;;  %s2265_s23 = smov 104  }
  0x21   : > { %1982 = vmatpush3.bf16.msra.mxu1 %v2168_v1  ;;  %v2176_v43 = vld [vmem:[%s2755_s7] sm:$0xff]   ;;  %v2179_v46 = vld [vmem:[%s2433_s6 + $0x10] sm:$0xff]   ;;  %v2180_v47 = vld [vmem:[%s2433_s6 + $0x18] sm:$0xff]  }
  0x22   : > { %2003 = vmatprep.subr.bf16.mxu1 %v2261_v2  ;;  %1974 = vmatpush3.bf16.msra.mxu0 %v2174_v4  ;;  %v2177_v44 = vld [vmem:[%s2433_s6] sm:$0xff]   ;;  %s1903_s6 = sshll.u32 %s2373_s25, 7 }
  0x23   : > { %1991 = vmatprep.subr.bf16.mxu0 %v2175_v42  ;;  %v2502_v48 = vld [vmem:[%s594_s17] ss:$0 sm:$0xff]  ;;  %s571_s17 = sand.u32 1, %s2251_s22   ;;  %s1718_s29 = scalar_lea.hbm %s2764_s16, %s1903_s6 }
  0x24   : > { %1984 = vmatmul.mubr.msk.bf16.vlgmr.msra.gmra.mxu1 %vm659_vm0, %v2170_v6  ;;  %v1875_v59 = vld [vmem:[%s2758_s10] ss:$0 sm:$0xff]  ;;  %s2680_s20 = sshll.u32 %s571_s17, 3 }
  0x25   : > { %1987 = vmatprep.mubr.msk.bf16.mxu1 %vm659_vm0, %v2171_v7  ;;  %1976 = vmatmul.mubr.msk.bf16.vlgmr.msra.gmra.mxu0 %vm659_vm0, %v600_v8  ;;  %s573_s26 = scalar_lea.vmem [#allocation2], %s2680_s20 }
  0x26   : > { %1995 = vmatprep.mubr.msk.bf16.mxu0 %vm659_vm0, %v2177_v44  ;;  %1992 = vmatpush3.bf16.msra.mxu0 %v2175_v42  ;;  %s1720_s18 = sshll.u32 %s573_s26, 4  ;;  %s1721_s18 = int_to_ptr.vmem [resolvable:$true] %s1720_s18 }
  0x27   : > { %1993 = vmatprep.subr.bf16.mxu0 %v2176_v43  ;;  %s2199_s19 = scalar_lea.vmem %s1721_s18, 128 }
  0x28   : > { %p2200_p11 = scmp.ne.s32.totalorder %s1721_s18, %s2199_s19 }
  0x2a   : > { %1994 = vmatpush3.bf16.msra.mxu0 %v2176_v43  ;;  %p2201_p12 = pnand %p2200_p11, %p2390_p5 }
  0x2b   : > { %2015 = vmatprep.subr.bf16.mxu0 %v2261_v2 }
  0x2c   : > { %1988 = vmatmul.mubr.msk.bf16.gmra.mxu1 %vm659_vm0, %v2172_v9  ;;  %p2202_p13 = pneg %p2201_p12 }
  0x2d   : > { %2011 = vmatprep.mubr.msk.bf16.mxu1 %vm2262_vm1, %v2261_v2  ;;  %1996 = vmatmul.mubr.msk.bf16.vlgmr.msra.gmra.mxu0 %vm659_vm0, %v2178_v45 }
  0x2e   : > { %1999 = vmatprep.mubr.msk.bf16.mxu0 %vm659_vm0, %v2179_v46 }
  0x35   : > { %2000 = vmatmul.mubr.msk.bf16.gmra.mxu0 %vm659_vm0, %v2180_v47 }
  0x36   : > { %2023 = vmatprep.mubr.msk.bf16.mxu0 %vm2262_vm1, %v2261_v2 }
  0xe4   : > { %v1985_v10 = vpop.f32.mrf.mxu1 }
  0xe5   : > { %v697_v12 = vpop.f32.mrf.mxu0  ;;  %v797_v38 = vadd.f32 %v1985_v10, %v1864_v20 }
  0xe6   : > { %v788_v11 = vpop.f32.mrf.mxu1  ;;  %v698_v33 = vadd.f32 %v1860_v29, %v697_v12 }
  0xe7   : > { %v1977_v14 = vpop.f32.mrf.mxu0  ;;  %v789_v32 = vadd.f32 %v1864_v20, %v788_v11 }
  0xe8   : > { %v1986_v13 = vpop.f32.mrf.mxu1  ;;  %v2464_v37 = vpack.c.bf16 %v698_v33, %v698_v33  ;;  %v634_v33 = vld [vmem:[%s2759_s11] sm:$0xf] }
  0xe9   : > { %v700_v16 = vpop.f32.mrf.mxu0  ;;  %v800_v35 = vadd.f32 %v1986_v13, %v1864_v20 }
  0xea   : > { %v791_v15 = vpop.f32.mrf.mxu1 }
  0xeb   : > { %v1978_v18 = vpop.f32.mrf.mxu0  ;;  %v792_v30 = vadd.f32 %v1864_v20, %v791_v15  ;;  %v2467_v39 = vpack.c.bf16 %v800_v35, %v797_v38  ;;  %v1256_v35 = vsel %vm1208_vm4, %v634_v33, 0 }
  0xec   : > { %v1989_v17 = vpop.f32.mrf.mxu1 }
  0xed   : > { %v813_v22 = vadd.f32 %v1989_v17, %v1864_v20  ;;  %v2458_v34 = vpack.c.bf16 %v792_v30, %v789_v32  ;;  %v956_v40 = vsel %vm948_vm2, %v2467_v39, 0  ;;  %v1997_v55 = vpop.f32.mrf.mxu0 }
  0xee   : > { %v804_v19 = vpop.f32.mrf.mxu1  ;;  %v916_v6 = vadd.f32 %v1997_v55, %v1875_v59 }
  0xef   : > { %v805_v27 = vadd.f32 %v1864_v20, %v804_v19  ;;  %v953_v41 = vsel %vm948_vm2, %v2458_v34, 0  ;;  %v907_v56 = vpop.f32.mrf.mxu0 }
  0xf0   : > { %v1990_v21 = vpop.f32.mrf.mxu1  ;;  %v908_v9 = vadd.f32 %v1875_v59, %v907_v56 }
  0xf1   : > { %v816_v23 = vadd.f32 %v1990_v21, %v1864_v20  ;;  %v1998_v57 = vpop.f32.mrf.mxu0 }
  0xf2   : > { %v807_v24 = vpop.f32.mrf.mxu1  ;;  %v919_v7 = vadd.f32 %v1998_v57, %v1875_v59 }
  0xf3   : > { %v2444_v25 = vpack.c.bf16 %v816_v23, %v813_v22  ;;  %v808_v26 = vadd.f32 %v1864_v20, %v807_v24  ;;  %v910_v58 = vpop.f32.mrf.mxu0 }
  0xf4   : > { %v2515_v10 = vpack.c.bf16 %v919_v7, %v916_v6  ;;  %v911_v11 = vadd.f32 %v1875_v59, %v910_v58 }
  0xf5   : > { %1075 = vrot.lane.b32.xlu1 %v2444_v25, %s2263_s27  ;;  %v962_v28 = vsel %vm948_vm2, %v2444_v25, 0  ;;  %v2453_v31 = vpack.c.bf16 %v808_v26, %v805_v27  ;;  %v2001_v60 = vpop.f32.mrf.mxu0 }
  0xf6   : > { %2004 = vmatpush3.bf16.xpose.msra.mxu1 %v962_v28  ;;  %v932_v62 = vadd.f32 %v2001_v60, %v1875_v59  ;;  %v2519_v12 = vpack.c.bf16 %v911_v11, %v908_v9 }
  0xf7   : > { %2005 = vmatprep.subr.bf16.mxu1 %v2261_v2  ;;  %v959_v36 = vsel %vm948_vm2, %v2453_v31, 0  ;;  %v923_v61 = vpop.f32.mrf.mxu0 }
  0xf8   : > { %v924_v0 = vadd.f32 %v1875_v59, %v923_v61 }
  0xf9   : > { %1073 = vrot.lane.b32.xlu1 %v2453_v31, %s2263_s27  ;;  %v2002_v63 = vpop.f32.mrf.mxu0 }
  0xfa   : > { %v935_v1 = vadd.f32 %v2002_v63, %v1875_v59 }
  0xfb   : > { %v926_v3 = vpop.f32.mrf.mxu0 }
  0xfc   : > { %v2509_v4 = vpack.c.bf16 %v935_v1, %v932_v62  ;;  %v927_v5 = vadd.f32 %v1875_v59, %v926_v3 }
  0xfd   : > { %1069 = vrot.lane.b32.xlu1 %v2458_v34, %s2263_s27 }
  0xfe   : > { %2006 = vmatpush3.bf16.xpose.msra.mxu1 %v959_v36  ;;  %v2511_v8 = vpack.c.bf16 %v927_v5, %v924_v0  ;;  %2016 = vmatpush3.bf16.msra.mxu0 %v2509_v4  ;;  %v635_v5 = vld [vmem:[%s2759_s11 + $0x4] sm:$0xf] }
  0xff   : > { %2007 = vmatprep.subr.bf16.mxu1 %v2261_v2  ;;  %2017 = vmatprep.subr.bf16.mxu0 %v2261_v2  ;;  %v1210_v11 = vsel %vm1208_vm4, %v635_v5, 0 }
 0x101   : > { %1063 = vrot.lane.b32.xlu1 %v2464_v37, %s2263_s27 }
 0x102   : > { %2018 = vmatpush3.bf16.msra.mxu0 %v2511_v8 }
 0x103   : > { %2019 = vmatprep.subr.bf16.mxu0 %v2261_v2 }
 0x106   : > { %2008 = vmatpush3.bf16.xpose.msra.mxu1 %v956_v40  ;;  %2020 = vmatpush3.bf16.msra.mxu0 %v2515_v10 }
 0x107   : > { %2009 = vmatprep.subr.bf16.mxu1 %v2261_v2  ;;  %2021 = vmatprep.subr.bf16.mxu0 %v2261_v2 }
 0x10a   : > { %2022 = vmatpush3.bf16.msra.mxu0 %v2519_v12 }
 0x10b   : > { %2027 = vmatprep.subr.bf16.mxu0 %v2261_v2 }
 0x10e   : > { %2010 = vmatpush3.bf16.xpose.msra.mxu1 %v953_v41 }
 0x10f   : > { %2039 = vmatprep.subr.bf16.mxu1 %v2261_v2 }
 0x115   : > { %2012 = vmatmul.mubr.msk.bf16.vlgmr.msra.gmra.mxu1 %vm948_vm2, %v2464_v37 }
 0x116   : > { %2047 = vmatprep.mubr.msk.bf16.mxu1 %vm2262_vm1, %v2261_v2 }
 0x167   : > { %v1076_v21 = vpop.permute.xlu1 %1075 }
 0x168   : > { %v1090_v23 = vsel %vm948_vm2, %v1076_v21, 0 }
 0x16b   : > { %v1074_v24 = vpop.permute.xlu1 %1073 }
 0x16c   : > { %v1087_v26 = vsel %vm948_vm2, %v1074_v24, 0 }
 0x16f   : > { %v1070_v29 = vpop.permute.xlu1 %1069 }
 0x170   : > { %v1081_v30 = vsel %vm948_vm2, %v1070_v29, 0 }
 0x173   : > { %v1064_v32 = vpop.permute.xlu1 %1063 }
 0x1d5   : > { %v998_v49 = vpop.f32.mrf.mxu1 }
 0x1d6   : > { %v999_v50 = vadd.f32 %v2502_v48, %v998_v49 }
 0x1d7   : > { %v2013_v51 = vpop.f32.mrf.mxu1 }
 0x1d8   : > { %v1005_v52 = vsel %vm1004_vm3, %v999_v50, -inf }
 0x1d9   : > { %1006 = vmax.xlane.f32.xlu0 %v1005_v52  ;;  %v1001_v53 = vpop.f32.mrf.mxu1 }
 0x1db   : > { %v2014_v54 = vpop.f32.mrf.mxu1 }
 0x262   : > { %v1007_v13 = vpop.xlane.xlu0 %1006 }
 0x263   : > { %v1008_v14 = vsub.f32 %v999_v50, %v1007_v13 }
 0x265   : > { %v1009_v15 = vmul.f32 1.442695, %v1008_v14 }
 0x267   : > { %2181 = vpow2.f32 %v1009_v15 }
 0x274   : > { %v2182_v16 = vpop.eup %2181 }
 0x275   : > { %v1011_v17 = vsel %vm1004_vm3, %v2182_v16, 0.0 }
 0x276   : > { %1012 = vadd.xlane.f32.xlu0 %v1011_v17 }
 0x28c   : > { %1071 = vrot.lane.b32.xlu0 %v2467_v39, %s2263_s27 }
 0x2ff   : > { %v1013_v18 = vpop.xlane.xlu0 %1012 }
 0x300   : > { %2183 = vrcp.f32 %v1013_v18 }
 0x303   : > { %v1072_v27 = vpop.permute.xlu0 %1071 }
 0x304   : > { %v1084_v28 = vsel %vm948_vm2, %v1072_v27, 0 }
 0x30d   : > { %v2184_v19 = vpop.eup %2183 }
 0x30e   : > { %v2528_v20 = vmul.f32 %v2184_v19, %v2182_v16 }
 0x310   : > { %v1017_v22 = vpack.c.bf16 %v2528_v20, %v2528_v20 }
 0x312   : > { %2024 = vmatmul.mubr.msk.bf16.vlgmr.msra.gmra.mxu0 %vm1004_vm3, %v1017_v22 }
 0x313   : > { %2028 = vmatpush3.bf16.xpose.msra.mxu0 %v1090_v23  ;;  %2035 = vmatprep.mubr.msk.bf16.mxu0 %vm2262_vm1, %v2261_v2 }
 0x314   : > { %2029 = vmatprep.subr.bf16.mxu0 %v2261_v2 }
 0x31b   : > { %2030 = vmatpush3.bf16.xpose.msra.mxu0 %v1087_v26 }
 0x31c   : > { %2031 = vmatprep.subr.bf16.mxu0 %v2261_v2 }
 0x323   : > { %2032 = vmatpush3.bf16.xpose.msra.mxu0 %v1084_v28 }
 0x324   : > { %2033 = vmatprep.subr.bf16.mxu0 %v2261_v2 }
 0x32b   : > { %2034 = vmatpush3.bf16.xpose.msra.mxu0 %v1081_v30 }
 0x32c   : > { %2057 = vmatprep.subr.bf16.mxu0 %v2261_v2 }
 0x332   : > { %2036 = vmatmul.mubr.msk.bf16.vlgmr.msra.gmra.mxu0 %vm948_vm2, %v1064_v32 }
 0x333   : > { %2059 = vmatprep.mubr.msk.bf16.mxu0 %vm2262_vm1, %v2261_v2  ;;  %2058 = vmatpush3.bf16.msra.mxu0 %v1256_v35 }
 0x334   : > { %2075 = vmatprep.subr.bf16.mxu0 %v2261_v2 }
 0x3d2   : > { %v1055_v36 = vpop.f32.mrf.mxu0 }
 0x3d3   : > { %v1061_v38 = vpack.c.bf16 %v1055_v36, %v1055_v36 }
 0x3d4   : > { %v2025_v40 = vpop.f32.mrf.mxu0 }
 0x3d5   : > { %2060 = vmatmul.mubr.msk.bf16.vlgmr.msra.gmra.mxu0 %vm948_vm2, %v1061_v38 }
 0x3d6   : > { %v1058_v41 = vpop.f32.mrf.mxu0  ;;  %2083 = vmatprep.mubr.msk.bf16.mxu0 %vm2262_vm1, %v2261_v2 }
 0x3d8   : > { %v2026_v42 = vpop.f32.mrf.mxu0 }
 0x3f2   : > { %v1126_v43 = vpop.f32.mrf.mxu0 }
 0x3f3   : > { %v1127_v44 = vadd.f32 %v2502_v48, %v1126_v43 }
 0x3f4   : > { %v2037_v45 = vpop.f32.mrf.mxu0 }
 0x3f5   : > { %v1132_v46 = vsel %vm1004_vm3, %v1127_v44, -inf }
 0x3f6   : > { %1133 = vmax.xlane.f32.xlu1 %v1132_v46  ;;  %v1129_v47 = vpop.f32.mrf.mxu0 }
 0x3f7   : > { %v636_v47 = vld [vmem:[%s2759_s11 + $0x8] sm:$0xf] }
 0x3f8   : > { %v2038_v49 = vpop.f32.mrf.mxu0 }
 0x407   : > { %1155 = vrot.lane.b32.xlu1 %v2509_v4, %s2263_s27 }
 0x40b   : > { %1151 = vrot.lane.b32.xlu1 %v2515_v10, %s2263_s27 }
 0x40f   : > { %1149 = vrot.lane.b32.xlu1 %v2519_v12, %s2263_s27 }
 0x413   : > { %1306 = vrot.lane.b32.xlu1 %v2444_v25, %s2264_s30 }
 0x417   : > { %1304 = vrot.lane.b32.xlu1 %v2453_v31, %s2264_s30 }
 0x41b   : > { %1300 = vrot.lane.b32.xlu1 %v2458_v34, %s2264_s30 }
 0x47f   : > { %v1134_v50 = vpop.xlane.xlu1 %1133 }
 0x480   : > { %v1135_v51 = vsub.f32 %v1127_v44, %v1134_v50 }
 0x482   : > { %v1136_v52 = vmul.f32 1.442695, %v1135_v51 }
 0x483   : > { %v1156_v53 = vpop.permute.xlu1 %1155 }
 0x484   : > { %2185 = vpow2.f32 %v1136_v52  ;;  %2040 = vmatpush3.bf16.msra.mxu1 %v1156_v53 }
 0x485   : > { %2041 = vmatprep.subr.bf16.mxu1 %v2261_v2 }
 0x487   : > { %v1152_v62 = vpop.permute.xlu1 %1151 }
 0x48b   : > { %v1150_v0 = vpop.permute.xlu1 %1149 }
 0x48f   : > { %v1307_v13 = vpop.permute.xlu1 %1306 }
 0x490   : > { %v1321_v17 = vsel %vm948_vm2, %v1307_v13, 0 }
 0x491   : > { %v2186_v54 = vpop.eup %2185 }
 0x492   : > { %v1138_v55 = vsel %vm1004_vm3, %v2186_v54, 0.0 }
 0x493   : > { %1139 = vadd.xlane.f32.xlu0 %v1138_v55  ;;  %v1305_v21 = vpop.permute.xlu1 %1304 }
 0x494   : > { %v1318_v22 = vsel %vm948_vm2, %v1305_v21, 0 }
 0x495   : > { %v2570_v56 = vpop.f32.mrf.mxu0 }
 0x497   : > { %v2061_v57 = vpop.f32.mrf.mxu0  ;;  %v1301_v24 = vpop.permute.xlu1 %1300 }
 0x498   : > { %v1312_v26 = vsel %vm948_vm2, %v1301_v24, 0 }
 0x499   : > { %v1295_v58 = vpop.f32.mrf.mxu0 }
 0x49b   : > { %v2062_v59 = vpop.f32.mrf.mxu0 }
 0x4a9   : > { %1153 = vrot.lane.b32.xlu0 %v2511_v8, %s2263_s27 }
 0x4ad   : > { %1302 = vrot.lane.b32.xlu0 %v2467_v39, %s2264_s30 }
 0x4b1   : > { %1298 = vrot.lane.b32.xlu0 %v2464_v37, %s2264_s30 }
 0x4b5   : > { %1382 = vrot.lane.b32.xlu0 %v2509_v4, %s2264_s30 }
 0x51c   : > { %v1140_v60 = vpop.xlane.xlu0 %1139 }
 0x51d   : > { %2187 = vrcp.f32 %v1140_v60 }
 0x520   : > { %v1154_v61 = vpop.permute.xlu0 %1153 }
 0x521   : > { %2042 = vmatpush3.bf16.msra.mxu1 %v1154_v61 }
 0x522   : > { %2043 = vmatprep.subr.bf16.mxu1 %v2261_v2 }
 0x524   : > { %v1303_v63 = vpop.permute.xlu0 %1302 }
 0x525   : > { %2044 = vmatpush3.bf16.msra.mxu1 %v1152_v62  ;;  %v1315_v23 = vsel %vm948_vm2, %v1303_v63, 0 }
 0x526   : > { %2045 = vmatprep.subr.bf16.mxu1 %v2261_v2 }
 0x528   : > { %v1299_v1 = vpop.permute.xlu0 %1298 }
 0x529   : > { %2046 = vmatpush3.bf16.msra.mxu1 %v1150_v0 }
 0x52a   : > { %v2188_v3 = vpop.eup %2187  ;;  %2051 = vmatprep.subr.bf16.mxu1 %v2261_v2 }
 0x52b   : > { %v2586_v6 = vmul.f32 %v2188_v3, %v2186_v54 }
 0x52c   : > { %v1383_v7 = vpop.permute.xlu0 %1382 }
 0x52d   : > { %2076 = vmatpush3.bf16.msra.mxu0 %v1383_v7  ;;  %v1144_v9 = vpack.c.bf16 %v2586_v6, %v2586_v6  ;;  %v1143_v50 = vadd.f32 %v2586_v6, %v2528_v20 }
 0x52e   : > { %2077 = vmatprep.subr.bf16.mxu0 %v2261_v2 }
 0x52f   : > { %2048 = vmatmul.mubr.msk.bf16.vlgmr.msra.gmra.mxu1 %vm1004_vm3, %v1144_v9 }
 0x530   : > { %2052 = vmatpush3.bf16.msra.mxu1 %v1210_v11  ;;  %2053 = vmatprep.mubr.msk.bf16.mxu1 %vm2262_vm1, %v2261_v2 }
 0x531   : > { %2063 = vmatprep.subr.bf16.mxu1 %v2261_v2 }
 0x5ef   : > { %v1198_v14 = vpop.f32.mrf.mxu1 }
 0x5f0   : > { %v1204_v15 = vpack.c.bf16 %v1198_v14, %v1198_v14 }
 0x5f1   : > { %v2049_v16 = vpop.f32.mrf.mxu1 }
 0x5f2   : > { %2054 = vmatmul.mubr.msk.bf16.vlgmr.msra.gmra.mxu1 %vm948_vm2, %v1204_v15 }
 0x5f3   : > { %2064 = vmatpush3.bf16.xpose.msra.mxu1 %v1321_v17  ;;  %v1201_v18 = vpop.f32.mrf.mxu1  ;;  %2071 = vmatprep.mubr.msk.bf16.mxu1 %vm2262_vm1, %v2261_v2 }
 0x5f4   : > { %2065 = vmatprep.subr.bf16.mxu1 %v2261_v2 }
 0x5f5   : > { %v2050_v19 = vpop.f32.mrf.mxu1 }
 0x5fb   : > { %2066 = vmatpush3.bf16.xpose.msra.mxu1 %v1318_v22 }
 0x5fc   : > { %2067 = vmatprep.subr.bf16.mxu1 %v2261_v2 }
 0x603   : > { %2068 = vmatpush3.bf16.xpose.msra.mxu1 %v1315_v23 }
 0x604   : > { %2069 = vmatprep.subr.bf16.mxu1 %v2261_v2 }
 0x60b   : > { %2070 = vmatpush3.bf16.xpose.msra.mxu1 %v1312_v26 }
 0x60c   : > { %2105 = vmatprep.subr.bf16.mxu1 %v2261_v2 }
 0x612   : > { %2072 = vmatmul.mubr.msk.bf16.vlgmr.msra.gmra.mxu1 %vm948_vm2, %v1299_v1 }
 0x613   : > { %2113 = vmatprep.mubr.msk.bf16.mxu1 %vm2262_vm1, %v2261_v2 }
 0x6b2   : > { %v2610_v27 = vpop.f32.mrf.mxu1 }
 0x6b3   : > { %v1293_v3 = vadd.f32 %v2570_v56, %v2610_v27 }
 0x6b4   : > { %v2055_v28 = vpop.f32.mrf.mxu1 }
 0x6b5   : > { %v637_v28 = vld [vmem:[%s2759_s11 + $0xc] sm:$0xf] }
 0x6b6   : > { %v1249_v29 = vpop.f32.mrf.mxu1 }
 0x6b8   : > { %v2056_v30 = vpop.f32.mrf.mxu1 }
 0x6d2   : > { %v1357_v32 = vpop.f32.mrf.mxu1 }
 0x6d3   : > { %v1358_v33 = vadd.f32 %v2502_v48, %v1357_v32 }
 0x6d4   : > { %v2073_v35 = vpop.f32.mrf.mxu1 }
 0x6d5   : > { %v1363_v36 = vsel %vm1004_vm3, %v1358_v33, -inf }
 0x6d6   : > { %1364 = vmax.xlane.f32.xlu1 %v1363_v36  ;;  %v1360_v38 = vpop.f32.mrf.mxu1 }
 0x6d8   : > { %v2074_v40 = vpop.f32.mrf.mxu1 }
 0x6e7   : > { %1380 = vrot.lane.b32.xlu1 %v2511_v8, %s2264_s30 }
 0x6eb   : > { %1378 = vrot.lane.b32.xlu1 %v2515_v10, %s2264_s30 }
 0x6ef   : > { %1487 = vrot.lane.b32.xlu1 %v2444_v25, %s2265_s23 }
 0x6f3   : > { %1483 = vrot.lane.b32.xlu1 %v2467_v39, %s2265_s23 }
 0x6f7   : > { %1479 = vrot.lane.b32.xlu1 %v2464_v37, %s2265_s23 }
 0x6fb   : > { %1561 = vrot.lane.b32.xlu1 %v2511_v8, %s2265_s23 }
 0x75f   : > { %v1365_v41 = vpop.xlane.xlu1 %1364 }
 0x760   : > { %v1366_v42 = vsub.f32 %v1358_v33, %v1365_v41 }
 0x762   : > { %v1367_v43 = vmul.f32 1.442695, %v1366_v42 }
 0x763   : > { %v1381_v44 = vpop.permute.xlu1 %1380 }
 0x764   : > { %2189 = vpow2.f32 %v1367_v43  ;;  %2078 = vmatpush3.bf16.msra.mxu0 %v1381_v44 }
 0x765   : > { %2079 = vmatprep.subr.bf16.mxu0 %v2261_v2 }
 0x767   : > { %v1379_v45 = vpop.permute.xlu1 %1378 }
 0x768   : > { %2080 = vmatpush3.bf16.msra.mxu0 %v1379_v45  ;;  %v1899_v45 = vld [vmem:[%s2760_s12] ss:$0 sm:$0xff] }
 0x769   : > { %2081 = vmatprep.subr.bf16.mxu0 %v2261_v2 }
 0x771   : > { %v2190_v25 = vpop.eup %2189 }
 0x772   : > { %v1369_v39 = vsel %vm1004_vm3, %v2190_v25, 0.0 }
 0x773   : > { %1370 = vadd.xlane.f32.xlu0 %v1369_v39 }
 0x789   : > { %1376 = vrot.lane.b32.xlu0 %v2519_v12, %s2264_s30  ;;  %s2769_s30 = sshll.u32 %s2408_s28, 3 }
 0x78d   : > { %1485 = vrot.lane.b32.xlu0 %v2453_v31, %s2265_s23  ;;  %v1436_v31 = vsel %vm1208_vm4, %v636_v47, 0 }
 0x791   : > { %1481 = vrot.lane.b32.xlu0 %v2458_v34, %s2265_s23  ;;  %v1488_v34 = vpop.permute.xlu1 %1487 }
 0x792   : > { %v1502_v57 = vsel %vm948_vm2, %v1488_v34, 0 }
 0x795   : > { %v1484_v61 = vpop.permute.xlu1 %1483 }
 0x796   : > { %v1496_v62 = vsel %vm948_vm2, %v1484_v61, 0 }
 0x799   : > { %v1480_v1 = vpop.permute.xlu1 %1479 }
 0x7fc   : > { %v1371_v37 = vpop.xlane.xlu0 %1370 }
 0x7fd   : > { %2191 = vrcp.f32 %v1371_v37 }
 0x800   : > { %v1377_v8 = vpop.permute.xlu0 %1376 }
 0x801   : > { %2082 = vmatpush3.bf16.msra.mxu0 %v1377_v8 }
 0x802   : > { %2087 = vmatprep.subr.bf16.mxu0 %v2261_v2 }
 0x804   : > { %v1486_v59 = vpop.permute.xlu0 %1485 }
 0x805   : > { %v1499_v60 = vsel %vm948_vm2, %v1486_v59, 0 }
 0x808   : > { %v1482_v63 = vpop.permute.xlu0 %1481 }
 0x809   : > { %v1493_v0 = vsel %vm948_vm2, %v1482_v63, 0 }
 0x80a   : > { %v2192_v46 = vpop.eup %2191 }
 0x80b   : > { %v1373_v49 = vmul.f32 %v2192_v46, %v2190_v25 }
 0x80d   : > { %v1375_v51 = vpack.c.bf16 %v1373_v49, %v1373_v49  ;;  %v2642_v52 = vadd.f32 %v1373_v49, %v1143_v50 }
 0x80f   : > { %2084 = vmatmul.mubr.msk.bf16.vlgmr.msra.gmra.mxu0 %vm1004_vm3, %v1375_v51 }
 0x810   : > { %2088 = vmatpush3.bf16.msra.mxu0 %v1436_v31  ;;  %2089 = vmatprep.mubr.msk.bf16.mxu0 %vm2262_vm1, %v2261_v2 }
 0x811   : > { %2093 = vmatprep.subr.bf16.mxu0 %v2261_v2 }
 0x8cf   : > { %v1425_v53 = vpop.f32.mrf.mxu0 }
 0x8d0   : > { %v1431_v54 = vpack.c.bf16 %v1425_v53, %v1425_v53 }
 0x8d1   : > { %v2085_v55 = vpop.f32.mrf.mxu0 }
 0x8d2   : > { %2090 = vmatmul.mubr.msk.bf16.vlgmr.msra.gmra.mxu0 %vm948_vm2, %v1431_v54 }
 0x8d3   : > { %2094 = vmatpush3.bf16.xpose.msra.mxu0 %v1502_v57  ;;  %v1428_v20 = vpop.f32.mrf.mxu0  ;;  %2101 = vmatprep.mubr.msk.bf16.mxu0 %vm2262_vm1, %v2261_v2 }
 0x8d4   : > { %2095 = vmatprep.subr.bf16.mxu0 %v2261_v2 }
 0x8d5   : > { %v2086_v58 = vpop.f32.mrf.mxu0 }
 0x8db   : > { %2096 = vmatpush3.bf16.xpose.msra.mxu0 %v1499_v60 }
 0x8dc   : > { %2097 = vmatprep.subr.bf16.mxu0 %v2261_v2 }
 0x8e3   : > { %2098 = vmatpush3.bf16.xpose.msra.mxu0 %v1496_v62 }
 0x8e4   : > { %2099 = vmatprep.subr.bf16.mxu0 %v2261_v2 }
 0x8eb   : > { %2100 = vmatpush3.bf16.xpose.msra.mxu0 %v1493_v0 }
 0x8f2   : > { %2102 = vmatmul.mubr.msk.bf16.vlgmr.msra.gmra.mxu0 %vm948_vm2, %v1480_v1 }
 0x992   : > { %v1472_v5 = vpop.f32.mrf.mxu0 }
 0x993   : > { %v1478_v6 = vadd.f32 %v1472_v5, %v1293_v3 }
 0x994   : > { %v2091_v7 = vpop.f32.mrf.mxu0 }
 0x996   : > { %v1475_v9 = vpop.f32.mrf.mxu0 }
 0x998   : > { %v2092_v11 = vpop.f32.mrf.mxu0 }
 0x9b2   : > { %v1538_v13 = vpop.f32.mrf.mxu0 }
 0x9b3   : > { %v1539_v14 = vadd.f32 %v2502_v48, %v1538_v13  ;;  %v1562_v48 = vpop.permute.xlu1 %1561 }
 0x9b4   : > { %v2103_v15 = vpop.f32.mrf.mxu0 }
 0x9b5   : > { %v1544_v16 = vsel %vm1004_vm3, %v1539_v14, -inf }
 0x9b6   : > { %1545 = vmax.xlane.f32.xlu0 %v1544_v16  ;;  %v1541_v17 = vpop.f32.mrf.mxu0 }
 0x9b8   : > { %v2104_v18 = vpop.f32.mrf.mxu0 }
 0x9cc   : > { %1563 = vrot.lane.b32.xlu0 %v2509_v4, %s2265_s23 }
 0x9d0   : > { %1559 = vrot.lane.b32.xlu0 %v2515_v10, %s2265_s23 }
 0xa3f   : > { %v1546_v56 = vpop.xlane.xlu0 %1545 }
 0xa40   : > { %v1547_v19 = vsub.f32 %v1539_v14, %v1546_v56 }
 0xa42   : > { %v1548_v21 = vmul.f32 1.442695, %v1547_v19 }
 0xa43   : > { %v1564_v22 = vpop.permute.xlu0 %1563 }
 0xa44   : > { %2193 = vpow2.f32 %v1548_v21  ;;  %2106 = vmatpush3.bf16.msra.mxu1 %v1564_v22 }
 0xa45   : > { %2107 = vmatprep.subr.bf16.mxu1 %v2261_v2 }
 0xa47   : > { %v1560_v23 = vpop.permute.xlu0 %1559 }
 0xa48   : > { %2108 = vmatpush3.bf16.msra.mxu1 %v1562_v48 }
 0xa49   : > { %2109 = vmatprep.subr.bf16.mxu1 %v2261_v2 }
 0xa4c   : > { %2110 = vmatpush3.bf16.msra.mxu1 %v1560_v23 }
 0xa4d   : > { %2111 = vmatprep.subr.bf16.mxu1 %v2261_v2 }
 0xa51   : > { %v2194_v4 = vpop.eup %2193 }
 0xa52   : > { %v1550_v10 = vsel %vm1004_vm3, %v2194_v4, 0.0 }
 0xa53   : > { %1551 = vadd.xlane.f32.xlu1 %v1550_v10 }
 0xa64   : > { %1557 = vrot.lane.b32.xlu1 %v2519_v12, %s2265_s23  ;;  %v1617_v12 = vsel %vm1208_vm4, %v637_v28, 0  ;;  %s591_s23 = scalar_lea.vmem %s2751_s3, %s2769_s30  ;;  %s2203_s30 = sshll.u32 %s2266_s5, 4  ;;  %s2204_s30 = int_to_ptr.vmem [resolvable:$false] %s2203_s30 }
 0xa65   : > { %v617_v42 = vld [vmem:[%s591_s23] sm:$0xff]  ;;  %s1704_s23 = scalar_lea.sflag [#allocation3], %s571_s17  ;;  %s2205_s1 = scalar_lea.vmem %s2204_s30, 256 }
 0xa66   : > { %p2206_p0 = scmp.lt.s32.totalorder %s1721_s18, %s2204_s30  ;;  %p2207_p1 = scmp.lt.s32.totalorder %s2205_s1, %s2199_s19 }
 0xa68   : > { %p2208_p2 = por %p2207_p1, %p2206_p0 }
 0xa6a   : > { %p2209_p3 = pnand %p2208_p2, %p2202_p13 }
 0xadc   : > { %v1552_v24 = vpop.xlane.xlu1 %1551 }
 0xadd   : > { %2195 = vrcp.f32 %v1552_v24 }
 0xae0   : > { %v1558_v26 = vpop.permute.xlu1 %1557 }
 0xae1   : > { %2112 = vmatpush3.bf16.msra.mxu1 %v1558_v26 }
 0xae2   : > { %2117 = vmatprep.subr.bf16.mxu1 %v2261_v2 }
 0xaea   : > { %v2196_v27 = vpop.eup %2195 }
 0xaeb   : > { %v1554_v29 = vmul.f32 %v2196_v27, %v2194_v4 }
 0xaed   : > { %v1556_v30 = vpack.c.bf16 %v1554_v29, %v1554_v29  ;;  %v1555_v32 = vadd.f32 %v1554_v29, %v2642_v52 }
 0xaef   : > { %2114 = vmatmul.mubr.msk.bf16.vlgmr.msra.gmra.mxu1 %vm1004_vm3, %v1556_v30  ;;  %v1660_v33 = vmul.f32 0.25, %v1555_v32 }
 0xaf0   : > { %2118 = vmatpush3.bf16.msra.mxu1 %v1617_v12  ;;  %2119 = vmatprep.mubr.msk.bf16.mxu1 %vm2262_vm1, %v2261_v2 }
 0xaf1   : > { %1661 = vst.msk [vmem:[%s573_s26] sm:$0xff] %vm1004_vm3, %v1660_v33 }
 0xbaf   : > { %v1606_v35 = vpop.f32.mrf.mxu1 }
 0xbb0   : > { %v1612_v36 = vpack.c.bf16 %v1606_v35, %v1606_v35 }
 0xbb1   : > { %v2115_v38 = vpop.f32.mrf.mxu1 }
 0xbb2   : > { %2120 = vmatmul.mubr.msk.bf16.vlgmr.msra.gmra.mxu1 %vm948_vm2, %v1612_v36 }
 0xbb3   : > { %v1609_v40 = vpop.f32.mrf.mxu1 }
 0xbb5   : > { %v2116_v41 = vpop.f32.mrf.mxu1 }
 0xc72   : > { %v1653_v43 = vpop.f32.mrf.mxu1 }
 0xc73   : > { %v1659_v2 = vadd.f32 %v1653_v43, %v1478_v6 }
 0xc74   : > { %v2121_v44 = vpop.f32.mrf.mxu1 }
 0xc75   : > { %v1662_v25 = vadd.f32 %v1659_v2, %v617_v42 }
 0xc76   : > { %v1656_v39 = vpop.f32.mrf.mxu1 }
 0xc77   : > { %v1669_v37 = vadd.f32 %v1899_v45, %v1662_v25 }
 0xc78   : > { %v2122_v8 = vpop.f32.mrf.mxu1 }
 0xc79   : > { %v1670_v46 = vsel %vm659_vm0, %v1669_v37, 0.0 }
 0xc7a   : > { %1671 = vadd.xlane.f32.xlu0 %v1670_v46 }
 0xd03   : > { %v1672_v47 = vpop.xlane.xlu0 %1671 }
 0xd04   : > { %v1674_v49 = vmul.f32 0.03125, %v1672_v47 }
 0xd06   : > { %v1675_v50 = vsub.f32 %v1669_v37, %v1674_v49 }
 0xd08   : > { %v1676_v51 = vmul.f32 %v1675_v50, %v1675_v50 }
 0xd0a   : > { %v1677_v31 = vsel %vm659_vm0, %v1676_v51, 0.0 }
 0xd0b   : > { %1678 = vadd.xlane.f32.xlu1 %v1677_v31 }
 0xd0c   : > { %2212 = shalt.err (!%p2209_p3)
}
 0xd0d   : > { %s2213_s25 = scalar_lea.hbm %s1718_s29, 128  ;;  %s2217_s6 = scalar_lea.hbm %s2764_s16, 256 }
 0xd0e   : > { %p2214_p4 = scmp.ne.s32.totalorder %s1718_s29, %s2213_s25  ;;  %p2218_p9 = scmp.lt.s32.totalorder %s1718_s29, %s2764_s16 }
 0xd0f   : > { %p2219_p10 = scmp.lt.s32.totalorder %s2217_s6, %s2213_s25 }
 0xd10   : > { %p2215_p7 = pnand %p2214_p4, %p2390_p5 }
 0xd11   : > { %p2220_p11 = por %p2219_p10, %p2218_p9 }
 0xd12   : > { %p2216_p8 = pneg %p2215_p7 }
 0xd14   : > { %p2221_p12 = pnand %p2220_p11, %p2216_p8 }
 0xd16   : > { %2224 = shalt.err (!%p2221_p12)
}
 0xd17   : > { %2123 = dma.vmem_to_hbm [thread:$0]  (%p2390_p5), %s1721_s18, 128, %s1718_s29, %s1704_s23   ;;  %v1900_v55 = vld [vmem:[%s2761_s13] ss:$0 sm:$0xff] }
 0xd18   : > { %v1901_v20 = vld [vmem:[%s2762_s14] ss:$0 sm:$0xff]  ;;  %s2784_s25 = sshll.u32 %s2408_s28, 3 }
 0xd19   : > { %s598_s18 = scalar_lea.vmem %s2763_s15, %s2784_s25 }
 0xd94   : > { %v1679_v52 = vpop.xlane.xlu1 %1678 }
 0xd95   : > { %v1680_v34 = vmul.f32 0.03125, %v1679_v52 }
 0xd97   : > { %v1681_v53 = vadd.f32 1e-05, %v1680_v34 }
 0xd99   : > { %2197 = vrsqrt.f32 %v1681_v53 }
 0xda6   : > { %v2198_v54 = vpop.eup %2197 }
 0xda7   : > { %v1683_v57 = vmul.f32 %v2198_v54, %v1675_v50 }
 0xda9   : > { %v1690_v58 = vmul.f32 %v1900_v55, %v1683_v57 }
 0xdab   : > { %v1697_v59 = vadd.f32 %v1901_v20, %v1690_v58 }
 0xdad   : > { %1698 = vst.msk [vmem:[%s598_s18] sm:$0xff] %vm659_vm0, %v1697_v59 }
 0xdae PF: > { %p2129_p5 = scmp.ge.s32.totalorder %s2259_s24, 2  ;;  %s1739_s23 = sand.u32 1, %s2247_s21  }
 0xdaf   : > { %s1740_s26 = scalar_lea.sflag [#allocation3], %s1739_s23 }
 0xdb0   : > { %p2126_p13 = pnand %p2129_p5, %p2394_p6 }
 0xdb2   : > { %p2127_p0 = pneg %p2126_p13 }
 0xdb4   : > { %2242 = dma.done.wait (%p2127_p0), %s1740_s26, 128  }
 0xdb5   : > { %2244 = vsyncadd (%p2127_p0), %s1740_s26, 4294967168  ;;  %s2786_s24 = sld [smem:[#allocation6_spill]]  ;;  %s2789_s21 = smov %s2251_s22 }
 0xdb6   : > { %s2787_s28 = sld [smem:[#allocation5_spill]] }
 0xdb7   : > { %s2788_s23 = sld [smem:[#allocation7_spill]] }
 0xdbb   : > { %p27_p1 = scmp.ge.s32.totalorder %s2786_s24, 4  }
 0xdbc   : > { %s2790_s22 = smov %s2787_s28 }
 0xdbd   :  { %29 = sbr.rel (!%p27_p1) target bundleno = 8 (0x8), region = 139 }
 0xdc2   :  { %1745 = vsyncpa [#allocation3], 1 }
 0xdc3   :  { %1747 = vsyncpa [#allocation3 + $0x1], 1 }

// kernel: transformer_decoder_forward.18
= control target key start
LH: loop header
LB: loop body
LE: loop exit
PB: predicated region body
PF: predicated region fallthrough
CT: control target
= control target key end

     0   :  { %s2245_s21 = smov 0   ;;  %s2565_s0 = inlined_call_operand.vmem [shape: bf16[2,8,32], index: 0, kind: input, shape index: {}]   ;;  %s2566_s1 = inlined_call_operand.vmem [shape: bf16[2,64,32], index: 1, kind: input, shape index: {}]   ;;  %s2567_s2 = inlined_call_operand.vmem [shape: bf16[2,64,32], index: 2, kind: input, shape index: {}]   ;;  %s2568_s3 = inlined_call_operand.vmem [shape: f32[2,8,32], index: 3, kind: input, shape index: {}]   ;;  %s2569_s4 = inlined_call_operand.vmem [shape: f32[2,1,64], index: 4, kind: input, shape index: {}]   ;;  %s2570_s5 = inlined_call_operand.vmem [shape: bf16[32,32], index: 5, kind: input, shape index: {}]   ;;  %s2571_s6 = inlined_call_operand.vmem [shape: bf16[32,32], index: 6, kind: input, shape index: {}]   ;;  %s2572_s7 = inlined_call_operand.vmem [shape: bf16[32,32], index: 7, kind: input, shape index: {}]   ;;  %s2573_s8 = inlined_call_operand.vmem [shape: f32[1,32], index: 8, kind: input, shape index: {}, may-alias: {8,9,10,12,14}]   ;;  %s2574_s9 = inlined_call_operand.vmem [shape: f32[1,32], index: 9, kind: input, shape index: {}, may-alias: {8,9,10,12,14}]   ;;  %s2575_s10 = inlined_call_operand.vmem [shape: f32[1,32], index: 10, kind: input, shape index: {}, may-alias: {8,9,10,12,14}]   ;;  %s2576_s11 = inlined_call_operand.vmem [shape: bf16[32,32], index: 11, kind: input, shape index: {}]   ;;  %s2577_s12 = inlined_call_operand.vmem [shape: f32[1,32], index: 12, kind: input, shape index: {}, may-alias: {8,9,10,12,14}]   ;;  %s2578_s13 = inlined_call_operand.vmem [shape: f32[1,32], index: 13, kind: input, shape index: {}]   ;;  %s2579_s14 = inlined_call_operand.vmem [shape: f32[1,32], index: 14, kind: input, shape index: {}, may-alias: {8,9,10,12,14}]   ;;  %s2580_s15 = inlined_call_operand.vmem [shape: f32[2,8,32], index: 15, kind: output, shape index: {0}]   ;;  %s2581_s16 = inlined_call_operand.vmem [shape: f32[2,8,64], index: 16, kind: output, shape index: {1}]  }
   0x1   :  { %2582 = sst [smem:[#allocation2_spill]] %s2565_s0 }
   0x2 LB: > { %s1828_s22 = sadd.s32 4294967295, %s2153_s21   ;;  %p1832_p0 = scmp.ge.s32.totalorder %s2153_s21, 1  ;;  %s2153_s21 = sphi %s2245_s21, %s27_s21  }
   0x3   : > { %p501_p1 = scmp.lt.s32.totalorder %s2153_s21, 3 }
   0x5   : > { %p502_p2 = pnand %p1832_p0, %p501_p1 }
   0x6   : > { %p570_p3 = scmp.lt.s32.totalorder (!%p502_p2), %s1828_s22, 1  ;;  %s2583_s25 = sld [smem:[#allocation2_spill]] (!%p502_p2) }
   0x7   : > { %505 = sbr.rel (%p502_p2) target bundleno = 3487 (0xd9f), region = 80  ;;  %s2158_s19 = smov (!%p502_p2), 112  }
   0x8   : > { %s2159_s23 = smov (!%p502_p2), 104  }
   0xc   : > { %v2115_v0 = vld [vmem:[%s2571_s6 + $0x8] sm:$0xff]   ;;  %v2116_v1 = vld [vmem:[%s2571_s6] sm:$0xff]   ;;  %s2585_s22 = smov (!%p570_p3, %s1828_s22), 1  ;;  %v2155_v2 = vmov 0.0   ;;  %vm659_vm0 = vcmask 261120   ;;  %vm2156_vm1 = vmmov 0  }
   0xd   : > { %1958 = vmatprep.subr.bf16.mxu1 %v2115_v0  ;;  %1950 = vmatprep.subr.bf16.mxu0 %v2155_v2  ;;  %v2121_v3 = vld [vmem:[%s2570_s5 + $0x8] sm:$0xff]   ;;  %s1885_s29 = sshll.u32 %s2585_s22, 5  ;;  %v2122_v4 = vld [vmem:[%s2570_s5] sm:$0xff]   ;;  %s1833_s17 = sshll.u32 %s2585_s22, 2  ;;  %vm948_vm2 = vcmask 64512   ;;  %vm1004_vm3 = vcmask 523264  }
   0xe   : > { %1959 = vmatpush3.bf16.msra.mxu1 %v2115_v0  ;;  %1954 = vmatprep.mubr.msk.bf16.mxu0 %vm2156_vm1, %v2155_v2  ;;  %s578_s20 = scalar_lea.vmem %s2566_s1, %s1885_s29  ;;  %s573_s26 = scalar_lea.vmem %s2583_s25, %s1833_s17  ;;  %v1845_v20 = vld [vmem:[%s2574_s9] ss:$0 sm:$0xff]  ;;  %v2123_v42 = vld [vmem:[%s2572_s7 + $0x8] sm:$0xff]   ;;  %vm1208_vm4 = vcmask 1043456  }
   0xf   : > { %1960 = vmatprep.subr.bf16.mxu1 %v2116_v1  ;;  %1951 = vmatpush3.bf16.msra.mxu0 %v2121_v3  ;;  %v2117_v5 = vld [vmem:[%s578_s20] sm:$0xff]   ;;  %v2118_v6 = vld [vmem:[%s578_s20 + $0x8] sm:$0xff]   ;;  %v2119_v7 = vld [vmem:[%s578_s20 + $0x10] sm:$0xff]   ;;  %s2284_s30 = scalar_lea.vmem %s2567_s2, %s1885_s29  ;;  %s2157_s17 = smov 120  }
  0x10   : > { %1952 = vmatprep.subr.bf16.mxu0 %v2155_v2  ;;  %1962 = vmatprep.mubr.msk.bf16.mxu1 %vm659_vm0, %v2117_v5  ;;  %v600_v8 = vld [vmem:[%s573_s26] sm:$0xf]  ;;  %v2120_v9 = vld [vmem:[%s578_s20 + $0x18] sm:$0xff]   ;;  %v2126_v45 = vld [vmem:[%s2284_s30 + $0x8] sm:$0xff]   ;;  %s590_s28 = scalar_lea.vmem %s2569_s4, %s2585_s22 }
  0x11   : > { %v1841_v29 = vld [vmem:[%s2573_s8] ss:$0 sm:$0xff]  ;;  %v2127_v46 = vld [vmem:[%s2284_s30 + $0x10] sm:$0xff]   ;;  %v2128_v47 = vld [vmem:[%s2284_s30 + $0x18] sm:$0xff]  }
  0x12   : > { %1961 = vmatpush3.bf16.msra.mxu1 %v2116_v1  ;;  %v2124_v43 = vld [vmem:[%s2572_s7] sm:$0xff]  }
  0x13   : > { %1982 = vmatprep.subr.bf16.mxu1 %v2155_v2  ;;  %1953 = vmatpush3.bf16.msra.mxu0 %v2122_v4  ;;  %v2125_v44 = vld [vmem:[%s2284_s30] sm:$0xff]  }
  0x14   : > { %1970 = vmatprep.subr.bf16.mxu0 %v2123_v42  ;;  %v2353_v48 = vld [vmem:[%s590_s28] ss:$0 sm:$0xff]  ;;  %s2529_s28 = sshll.u32 %s2585_s22, 3 }
  0x15   : > { %1963 = vmatmul.mubr.msk.bf16.vlgmr.msra.gmra.mxu1 %vm659_vm0, %v2118_v6  ;;  %v1856_v59 = vld [vmem:[%s2575_s10] ss:$0 sm:$0xff]  ;;  %s598_s0 = scalar_lea.vmem %s2581_s16, %s2529_s28  ;;  %s594_s29 = scalar_lea.vmem %s2580_s15, %s2529_s28 }
  0x16   : > { %1966 = vmatprep.mubr.msk.bf16.mxu1 %vm659_vm0, %v2119_v7  ;;  %1955 = vmatmul.mubr.msk.bf16.vlgmr.msra.gmra.mxu0 %vm659_vm0, %v600_v8 }
  0x17   : > { %1974 = vmatprep.mubr.msk.bf16.mxu0 %vm659_vm0, %v2125_v44  ;;  %1971 = vmatpush3.bf16.msra.mxu0 %v2123_v42 }
  0x18   : > { %1972 = vmatprep.subr.bf16.mxu0 %v2124_v43 }
  0x1b   : > { %1973 = vmatpush3.bf16.msra.mxu0 %v2124_v43 }
  0x1c   : > { %1994 = vmatprep.subr.bf16.mxu0 %v2155_v2 }
  0x1d   : > { %1967 = vmatmul.mubr.msk.bf16.gmra.mxu1 %vm659_vm0, %v2120_v9 }
  0x1e   : > { %1990 = vmatprep.mubr.msk.bf16.mxu1 %vm2156_vm1, %v2155_v2  ;;  %1975 = vmatmul.mubr.msk.bf16.vlgmr.msra.gmra.mxu0 %vm659_vm0, %v2126_v45 }
  0x1f   : > { %1978 = vmatprep.mubr.msk.bf16.mxu0 %vm659_vm0, %v2127_v46 }
  0x26   : > { %1979 = vmatmul.mubr.msk.bf16.gmra.mxu0 %vm659_vm0, %v2128_v47 }
  0x27   : > { %2002 = vmatprep.mubr.msk.bf16.mxu0 %vm2156_vm1, %v2155_v2 }
  0xd5   : > { %v1964_v10 = vpop.f32.mrf.mxu1 }
  0xd6   : > { %v697_v12 = vpop.f32.mrf.mxu0  ;;  %v797_v38 = vadd.f32 %v1964_v10, %v1845_v20 }
  0xd7   : > { %v788_v11 = vpop.f32.mrf.mxu1  ;;  %v698_v33 = vadd.f32 %v1841_v29, %v697_v12 }
  0xd8   : > { %v1956_v14 = vpop.f32.mrf.mxu0  ;;  %v789_v32 = vadd.f32 %v1845_v20, %v788_v11 }
  0xd9   : > { %v1965_v13 = vpop.f32.mrf.mxu1  ;;  %v2315_v37 = vpack.c.bf16 %v698_v33, %v698_v33  ;;  %v634_v33 = vld [vmem:[%s2576_s11] sm:$0xf] }
  0xda   : > { %v700_v16 = vpop.f32.mrf.mxu0  ;;  %v800_v35 = vadd.f32 %v1965_v13, %v1845_v20 }
  0xdb   : > { %v791_v15 = vpop.f32.mrf.mxu1 }
  0xdc   : > { %v1957_v18 = vpop.f32.mrf.mxu0  ;;  %v792_v30 = vadd.f32 %v1845_v20, %v791_v15  ;;  %v2318_v39 = vpack.c.bf16 %v800_v35, %v797_v38  ;;  %v1256_v35 = vsel %vm1208_vm4, %v634_v33, 0 }
  0xdd   : > { %v1968_v17 = vpop.f32.mrf.mxu1 }
  0xde   : > { %v813_v22 = vadd.f32 %v1968_v17, %v1845_v20  ;;  %v2309_v34 = vpack.c.bf16 %v792_v30, %v789_v32  ;;  %v956_v40 = vsel %vm948_vm2, %v2318_v39, 0  ;;  %v1976_v55 = vpop.f32.mrf.mxu0 }
  0xdf   : > { %v804_v19 = vpop.f32.mrf.mxu1  ;;  %v916_v6 = vadd.f32 %v1976_v55, %v1856_v59 }
  0xe0   : > { %v805_v27 = vadd.f32 %v1845_v20, %v804_v19  ;;  %v953_v41 = vsel %vm948_vm2, %v2309_v34, 0  ;;  %v907_v56 = vpop.f32.mrf.mxu0 }
  0xe1   : > { %v1969_v21 = vpop.f32.mrf.mxu1  ;;  %v908_v9 = vadd.f32 %v1856_v59, %v907_v56 }
  0xe2   : > { %v816_v23 = vadd.f32 %v1969_v21, %v1845_v20  ;;  %v1977_v57 = vpop.f32.mrf.mxu0 }
  0xe3   : > { %v807_v24 = vpop.f32.mrf.mxu1  ;;  %v919_v7 = vadd.f32 %v1977_v57, %v1856_v59 }
  0xe4   : > { %v2295_v25 = vpack.c.bf16 %v816_v23, %v813_v22  ;;  %v808_v26 = vadd.f32 %v1845_v20, %v807_v24  ;;  %v910_v58 = vpop.f32.mrf.mxu0 }
  0xe5   : > { %v2366_v10 = vpack.c.bf16 %v919_v7, %v916_v6  ;;  %v911_v11 = vadd.f32 %v1856_v59, %v910_v58 }
  0xe6   : > { %1075 = vrot.lane.b32.xlu1 %v2295_v25, %s2157_s17  ;;  %v962_v28 = vsel %vm948_vm2, %v2295_v25, 0  ;;  %v2304_v31 = vpack.c.bf16 %v808_v26, %v805_v27  ;;  %v1980_v60 = vpop.f32.mrf.mxu0 }
  0xe7   : > { %1983 = vmatpush3.bf16.xpose.msra.mxu1 %v962_v28  ;;  %v932_v62 = vadd.f32 %v1980_v60, %v1856_v59  ;;  %v2370_v12 = vpack.c.bf16 %v911_v11, %v908_v9 }
  0xe8   : > { %1984 = vmatprep.subr.bf16.mxu1 %v2155_v2  ;;  %v959_v36 = vsel %vm948_vm2, %v2304_v31, 0  ;;  %v923_v61 = vpop.f32.mrf.mxu0 }
  0xe9   : > { %v924_v0 = vadd.f32 %v1856_v59, %v923_v61 }
  0xea   : > { %1073 = vrot.lane.b32.xlu1 %v2304_v31, %s2157_s17  ;;  %v1981_v63 = vpop.f32.mrf.mxu0 }
  0xeb   : > { %v935_v1 = vadd.f32 %v1981_v63, %v1856_v59 }
  0xec   : > { %v926_v3 = vpop.f32.mrf.mxu0 }
  0xed   : > { %v2360_v4 = vpack.c.bf16 %v935_v1, %v932_v62  ;;  %v927_v5 = vadd.f32 %v1856_v59, %v926_v3 }
  0xee   : > { %1069 = vrot.lane.b32.xlu1 %v2309_v34, %s2157_s17 }
  0xef   : > { %1985 = vmatpush3.bf16.xpose.msra.mxu1 %v959_v36  ;;  %v2362_v8 = vpack.c.bf16 %v927_v5, %v924_v0  ;;  %1995 = vmatpush3.bf16.msra.mxu0 %v2360_v4  ;;  %v635_v5 = vld [vmem:[%s2576_s11 + $0x4] sm:$0xf] }
  0xf0   : > { %1986 = vmatprep.subr.bf16.mxu1 %v2155_v2  ;;  %1996 = vmatprep.subr.bf16.mxu0 %v2155_v2  ;;  %v1210_v11 = vsel %vm1208_vm4, %v635_v5, 0 }
  0xf2   : > { %1063 = vrot.lane.b32.xlu1 %v2315_v37, %s2157_s17 }
  0xf3   : > { %1997 = vmatpush3.bf16.msra.mxu0 %v2362_v8 }
  0xf4   : > { %1998 = vmatprep.subr.bf16.mxu0 %v2155_v2 }
  0xf7   : > { %1987 = vmatpush3.bf16.xpose.msra.mxu1 %v956_v40  ;;  %1999 = vmatpush3.bf16.msra.mxu0 %v2366_v10 }
  0xf8   : > { %1988 = vmatprep.subr.bf16.mxu1 %v2155_v2  ;;  %2000 = vmatprep.subr.bf16.mxu0 %v2155_v2 }
  0xfb   : > { %2001 = vmatpush3.bf16.msra.mxu0 %v2370_v12 }
  0xfc   : > { %2006 = vmatprep.subr.bf16.mxu0 %v2155_v2 }
  0xff   : > { %1989 = vmatpush3.bf16.xpose.msra.mxu1 %v953_v41 }
 0x100   : > { %2018 = vmatprep.subr.bf16.mxu1 %v2155_v2 }
 0x106   : > { %1991 = vmatmul.mubr.msk.bf16.vlgmr.msra.gmra.mxu1 %vm948_vm2, %v2315_v37 }
 0x107   : > { %2026 = vmatprep.mubr.msk.bf16.mxu1 %vm2156_vm1, %v2155_v2 }
 0x158   : > { %v1076_v21 = vpop.permute.xlu1 %1075 }
 0x159   : > { %v1090_v23 = vsel %vm948_vm2, %v1076_v21, 0 }
 0x15c   : > { %v1074_v24 = vpop.permute.xlu1 %1073 }
 0x15d   : > { %v1087_v26 = vsel %vm948_vm2, %v1074_v24, 0 }
 0x160   : > { %v1070_v29 = vpop.permute.xlu1 %1069 }
 0x161   : > { %v1081_v30 = vsel %vm948_vm2, %v1070_v29, 0 }
 0x164   : > { %v1064_v32 = vpop.permute.xlu1 %1063 }
 0x1c6   : > { %v998_v49 = vpop.f32.mrf.mxu1 }
 0x1c7   : > { %v999_v50 = vadd.f32 %v2353_v48, %v998_v49 }
 0x1c8   : > { %v1992_v51 = vpop.f32.mrf.mxu1 }
 0x1c9   : > { %v1005_v52 = vsel %vm1004_vm3, %v999_v50, -inf }
 0x1ca   : > { %1006 = vmax.xlane.f32.xlu0 %v1005_v52  ;;  %v1001_v53 = vpop.f32.mrf.mxu1 }
 0x1cc   : > { %v1993_v54 = vpop.f32.mrf.mxu1 }
 0x253   : > { %v1007_v13 = vpop.xlane.xlu0 %1006 }
 0x254   : > { %v1008_v14 = vsub.f32 %v999_v50, %v1007_v13 }
 0x256   : > { %v1009_v15 = vmul.f32 1.442695, %v1008_v14 }
 0x258   : > { %2129 = vpow2.f32 %v1009_v15 }
 0x265   : > { %v2130_v16 = vpop.eup %2129 }
 0x266   : > { %v1011_v17 = vsel %vm1004_vm3, %v2130_v16, 0.0 }
 0x267   : > { %1012 = vadd.xlane.f32.xlu0 %v1011_v17 }
 0x27d   : > { %1071 = vrot.lane.b32.xlu0 %v2318_v39, %s2157_s17 }
 0x2f0   : > { %v1013_v18 = vpop.xlane.xlu0 %1012 }
 0x2f1   : > { %2131 = vrcp.f32 %v1013_v18 }
 0x2f4   : > { %v1072_v27 = vpop.permute.xlu0 %1071 }
 0x2f5   : > { %v1084_v28 = vsel %vm948_vm2, %v1072_v27, 0 }
 0x2fe   : > { %v2132_v19 = vpop.eup %2131 }
 0x2ff   : > { %v2379_v20 = vmul.f32 %v2132_v19, %v2130_v16 }
 0x301   : > { %v1017_v22 = vpack.c.bf16 %v2379_v20, %v2379_v20 }
 0x303   : > { %2003 = vmatmul.mubr.msk.bf16.vlgmr.msra.gmra.mxu0 %vm1004_vm3, %v1017_v22 }
 0x304   : > { %2007 = vmatpush3.bf16.xpose.msra.mxu0 %v1090_v23  ;;  %2014 = vmatprep.mubr.msk.bf16.mxu0 %vm2156_vm1, %v2155_v2 }
 0x305   : > { %2008 = vmatprep.subr.bf16.mxu0 %v2155_v2 }
 0x30c   : > { %2009 = vmatpush3.bf16.xpose.msra.mxu0 %v1087_v26 }
 0x30d   : > { %2010 = vmatprep.subr.bf16.mxu0 %v2155_v2 }
 0x314   : > { %2011 = vmatpush3.bf16.xpose.msra.mxu0 %v1084_v28 }
 0x315   : > { %2012 = vmatprep.subr.bf16.mxu0 %v2155_v2 }
 0x31c   : > { %2013 = vmatpush3.bf16.xpose.msra.mxu0 %v1081_v30 }
 0x31d   : > { %2036 = vmatprep.subr.bf16.mxu0 %v2155_v2 }
 0x323   : > { %2015 = vmatmul.mubr.msk.bf16.vlgmr.msra.gmra.mxu0 %vm948_vm2, %v1064_v32 }
 0x324   : > { %2038 = vmatprep.mubr.msk.bf16.mxu0 %vm2156_vm1, %v2155_v2  ;;  %2037 = vmatpush3.bf16.msra.mxu0 %v1256_v35 }
 0x325   : > { %2054 = vmatprep.subr.bf16.mxu0 %v2155_v2 }
 0x3c3   : > { %v1055_v36 = vpop.f32.mrf.mxu0 }
 0x3c4   : > { %v1061_v38 = vpack.c.bf16 %v1055_v36, %v1055_v36 }
 0x3c5   : > { %v2004_v40 = vpop.f32.mrf.mxu0 }
 0x3c6   : > { %2039 = vmatmul.mubr.msk.bf16.vlgmr.msra.gmra.mxu0 %vm948_vm2, %v1061_v38 }
 0x3c7   : > { %v1058_v41 = vpop.f32.mrf.mxu0  ;;  %2062 = vmatprep.mubr.msk.bf16.mxu0 %vm2156_vm1, %v2155_v2 }
 0x3c9   : > { %v2005_v42 = vpop.f32.mrf.mxu0 }
 0x3e3   : > { %v1126_v43 = vpop.f32.mrf.mxu0 }
 0x3e4   : > { %v1127_v44 = vadd.f32 %v2353_v48, %v1126_v43 }
 0x3e5   : > { %v2016_v45 = vpop.f32.mrf.mxu0 }
 0x3e6   : > { %v1132_v46 = vsel %vm1004_vm3, %v1127_v44, -inf }
 0x3e7   : > { %1133 = vmax.xlane.f32.xlu1 %v1132_v46  ;;  %v1129_v47 = vpop.f32.mrf.mxu0 }
 0x3e8   : > { %v636_v47 = vld [vmem:[%s2576_s11 + $0x8] sm:$0xf] }
 0x3e9   : > { %v2017_v49 = vpop.f32.mrf.mxu0 }
 0x3f8   : > { %1155 = vrot.lane.b32.xlu1 %v2360_v4, %s2157_s17 }
 0x3fc   : > { %1151 = vrot.lane.b32.xlu1 %v2366_v10, %s2157_s17 }
 0x400   : > { %1149 = vrot.lane.b32.xlu1 %v2370_v12, %s2157_s17 }
 0x404   : > { %1306 = vrot.lane.b32.xlu1 %v2295_v25, %s2158_s19 }
 0x408   : > { %1304 = vrot.lane.b32.xlu1 %v2304_v31, %s2158_s19 }
 0x40c   : > { %1300 = vrot.lane.b32.xlu1 %v2309_v34, %s2158_s19 }
 0x470   : > { %v1134_v50 = vpop.xlane.xlu1 %1133 }
 0x471   : > { %v1135_v51 = vsub.f32 %v1127_v44, %v1134_v50 }
 0x473   : > { %v1136_v52 = vmul.f32 1.442695, %v1135_v51 }
 0x474   : > { %v1156_v53 = vpop.permute.xlu1 %1155 }
 0x475   : > { %2133 = vpow2.f32 %v1136_v52  ;;  %2019 = vmatpush3.bf16.msra.mxu1 %v1156_v53 }
 0x476   : > { %2020 = vmatprep.subr.bf16.mxu1 %v2155_v2 }
 0x478   : > { %v1152_v62 = vpop.permute.xlu1 %1151 }
 0x47c   : > { %v1150_v0 = vpop.permute.xlu1 %1149 }
 0x480   : > { %v1307_v13 = vpop.permute.xlu1 %1306 }
 0x481   : > { %v1321_v17 = vsel %vm948_vm2, %v1307_v13, 0 }
 0x482   : > { %v2134_v54 = vpop.eup %2133 }
 0x483   : > { %v1138_v55 = vsel %vm1004_vm3, %v2134_v54, 0.0 }
 0x484   : > { %1139 = vadd.xlane.f32.xlu0 %v1138_v55  ;;  %v1305_v21 = vpop.permute.xlu1 %1304 }
 0x485   : > { %v1318_v22 = vsel %vm948_vm2, %v1305_v21, 0 }
 0x486   : > { %v2421_v56 = vpop.f32.mrf.mxu0 }
 0x488   : > { %v2040_v57 = vpop.f32.mrf.mxu0  ;;  %v1301_v24 = vpop.permute.xlu1 %1300 }
 0x489   : > { %v1312_v26 = vsel %vm948_vm2, %v1301_v24, 0 }
 0x48a   : > { %v1295_v58 = vpop.f32.mrf.mxu0 }
 0x48c   : > { %v2041_v59 = vpop.f32.mrf.mxu0 }
 0x49a   : > { %1153 = vrot.lane.b32.xlu0 %v2362_v8, %s2157_s17 }
 0x49e   : > { %1302 = vrot.lane.b32.xlu0 %v2318_v39, %s2158_s19 }
 0x4a2   : > { %1298 = vrot.lane.b32.xlu0 %v2315_v37, %s2158_s19 }
 0x4a6   : > { %1382 = vrot.lane.b32.xlu0 %v2360_v4, %s2158_s19 }
 0x50d   : > { %v1140_v60 = vpop.xlane.xlu0 %1139 }
 0x50e   : > { %2135 = vrcp.f32 %v1140_v60 }
 0x511   : > { %v1154_v61 = vpop.permute.xlu0 %1153 }
 0x512   : > { %2021 = vmatpush3.bf16.msra.mxu1 %v1154_v61 }
 0x513   : > { %2022 = vmatprep.subr.bf16.mxu1 %v2155_v2 }
 0x515   : > { %v1303_v63 = vpop.permute.xlu0 %1302 }
 0x516   : > { %2023 = vmatpush3.bf16.msra.mxu1 %v1152_v62  ;;  %v1315_v23 = vsel %vm948_vm2, %v1303_v63, 0 }
 0x517   : > { %2024 = vmatprep.subr.bf16.mxu1 %v2155_v2 }
 0x519   : > { %v1299_v1 = vpop.permute.xlu0 %1298 }
 0x51a   : > { %2025 = vmatpush3.bf16.msra.mxu1 %v1150_v0 }
 0x51b   : > { %v2136_v3 = vpop.eup %2135  ;;  %2030 = vmatprep.subr.bf16.mxu1 %v2155_v2 }
 0x51c   : > { %v2437_v6 = vmul.f32 %v2136_v3, %v2134_v54 }
 0x51d   : > { %v1383_v7 = vpop.permute.xlu0 %1382 }
 0x51e   : > { %2055 = vmatpush3.bf16.msra.mxu0 %v1383_v7  ;;  %v1144_v9 = vpack.c.bf16 %v2437_v6, %v2437_v6  ;;  %v1143_v49 = vadd.f32 %v2437_v6, %v2379_v20 }
 0x51f   : > { %2056 = vmatprep.subr.bf16.mxu0 %v2155_v2 }
 0x520   : > { %2027 = vmatmul.mubr.msk.bf16.vlgmr.msra.gmra.mxu1 %vm1004_vm3, %v1144_v9 }
 0x521   : > { %2031 = vmatpush3.bf16.msra.mxu1 %v1210_v11  ;;  %2032 = vmatprep.mubr.msk.bf16.mxu1 %vm2156_vm1, %v2155_v2 }
 0x522   : > { %2042 = vmatprep.subr.bf16.mxu1 %v2155_v2 }
 0x5e0   : > { %v1198_v14 = vpop.f32.mrf.mxu1 }
 0x5e1   : > { %v1204_v15 = vpack.c.bf16 %v1198_v14, %v1198_v14 }
 0x5e2   : > { %v2028_v16 = vpop.f32.mrf.mxu1 }
 0x5e3   : > { %2033 = vmatmul.mubr.msk.bf16.vlgmr.msra.gmra.mxu1 %vm948_vm2, %v1204_v15 }
 0x5e4   : > { %2043 = vmatpush3.bf16.xpose.msra.mxu1 %v1321_v17  ;;  %v1201_v18 = vpop.f32.mrf.mxu1  ;;  %2050 = vmatprep.mubr.msk.bf16.mxu1 %vm2156_vm1, %v2155_v2 }
 0x5e5   : > { %2044 = vmatprep.subr.bf16.mxu1 %v2155_v2 }
 0x5e6   : > { %v2029_v19 = vpop.f32.mrf.mxu1 }
 0x5ec   : > { %2045 = vmatpush3.bf16.xpose.msra.mxu1 %v1318_v22 }
 0x5ed   : > { %2046 = vmatprep.subr.bf16.mxu1 %v2155_v2 }
 0x5f4   : > { %2047 = vmatpush3.bf16.xpose.msra.mxu1 %v1315_v23 }
 0x5f5   : > { %2048 = vmatprep.subr.bf16.mxu1 %v2155_v2 }
 0x5fc   : > { %2049 = vmatpush3.bf16.xpose.msra.mxu1 %v1312_v26 }
 0x5fd   : > { %2084 = vmatprep.subr.bf16.mxu1 %v2155_v2 }
 0x603   : > { %2051 = vmatmul.mubr.msk.bf16.vlgmr.msra.gmra.mxu1 %vm948_vm2, %v1299_v1 }
 0x604   : > { %2092 = vmatprep.mubr.msk.bf16.mxu1 %vm2156_vm1, %v2155_v2 }
 0x6a3   : > { %v2461_v27 = vpop.f32.mrf.mxu1 }
 0x6a4   : > { %v1293_v3 = vadd.f32 %v2421_v56, %v2461_v27 }
 0x6a5   : > { %v2034_v28 = vpop.f32.mrf.mxu1 }
 0x6a6   : > { %v637_v28 = vld [vmem:[%s2576_s11 + $0xc] sm:$0xf] }
 0x6a7   : > { %v1249_v29 = vpop.f32.mrf.mxu1 }
 0x6a9   : > { %v2035_v30 = vpop.f32.mrf.mxu1 }
 0x6c3   : > { %v1357_v32 = vpop.f32.mrf.mxu1 }
 0x6c4   : > { %v1358_v33 = vadd.f32 %v2353_v48, %v1357_v32  ;;  %v1617_v32 = vsel %vm1208_vm4, %v637_v28, 0 }
 0x6c5   : > { %v2052_v35 = vpop.f32.mrf.mxu1 }
 0x6c6   : > { %v1363_v36 = vsel %vm1004_vm3, %v1358_v33, -inf }
 0x6c7   : > { %1364 = vmax.xlane.f32.xlu1 %v1363_v36  ;;  %v1360_v38 = vpop.f32.mrf.mxu1 }
 0x6c9   : > { %v2053_v40 = vpop.f32.mrf.mxu1 }
 0x6d8   : > { %1380 = vrot.lane.b32.xlu1 %v2362_v8, %s2158_s19 }
 0x6dc   : > { %1378 = vrot.lane.b32.xlu1 %v2366_v10, %s2158_s19 }
 0x6e0   : > { %1487 = vrot.lane.b32.xlu1 %v2295_v25, %s2159_s23 }
 0x6e4   : > { %1483 = vrot.lane.b32.xlu1 %v2318_v39, %s2159_s23 }
 0x6e8   : > { %1479 = vrot.lane.b32.xlu1 %v2315_v37, %s2159_s23 }
 0x6ec   : > { %1561 = vrot.lane.b32.xlu1 %v2362_v8, %s2159_s23 }
 0x750   : > { %v1365_v41 = vpop.xlane.xlu1 %1364 }
 0x751   : > { %v1366_v42 = vsub.f32 %v1358_v33, %v1365_v41 }
 0x753   : > { %v1367_v43 = vmul.f32 1.442695, %v1366_v42 }
 0x754   : > { %v1381_v44 = vpop.permute.xlu1 %1380 }
 0x755   : > { %2137 = vpow2.f32 %v1367_v43  ;;  %2057 = vmatpush3.bf16.msra.mxu0 %v1381_v44 }
 0x756   : > { %2058 = vmatprep.subr.bf16.mxu0 %v2155_v2 }
 0x758   : > { %v1379_v45 = vpop.permute.xlu1 %1378 }
 0x759   : > { %2059 = vmatpush3.bf16.msra.mxu0 %v1379_v45 }
 0x75a   : > { %2060 = vmatprep.subr.bf16.mxu0 %v2155_v2 }
 0x75c   : > { %v1488_v52 = vpop.permute.xlu1 %1487 }
 0x75d   : > { %v1502_v20 = vsel %vm948_vm2, %v1488_v52, 0 }
 0x760   : > { %v1484_v61 = vpop.permute.xlu1 %1483 }
 0x761   : > { %v1496_v62 = vsel %vm948_vm2, %v1484_v61, 0 }
 0x762   : > { %v2138_v25 = vpop.eup %2137 }
 0x763   : > { %v1369_v39 = vsel %vm1004_vm3, %v2138_v25, 0.0 }
 0x764   : > { %1370 = vadd.xlane.f32.xlu0 %v1369_v39  ;;  %v1480_v1 = vpop.permute.xlu1 %1479 }
 0x77a   : > { %1376 = vrot.lane.b32.xlu0 %v2370_v12, %s2158_s19  ;;  %s587_s19 = scalar_lea.vmem %s2568_s3, %s2529_s28 }
 0x77b   : > { %v617_v42 = vld [vmem:[%s587_s19] sm:$0xff] }
 0x77e   : > { %1485 = vrot.lane.b32.xlu0 %v2304_v31, %s2159_s23 }
 0x782   : > { %1481 = vrot.lane.b32.xlu0 %v2309_v34, %s2159_s23  ;;  %v1436_v34 = vsel %vm1208_vm4, %v636_v47, 0 }
 0x7ed   : > { %v1371_v37 = vpop.xlane.xlu0 %1370 }
 0x7ee   : > { %2139 = vrcp.f32 %v1371_v37 }
 0x7f1   : > { %v1377_v8 = vpop.permute.xlu0 %1376 }
 0x7f2   : > { %2061 = vmatpush3.bf16.msra.mxu0 %v1377_v8 }
 0x7f3   : > { %2066 = vmatprep.subr.bf16.mxu0 %v2155_v2 }
 0x7f5   : > { %v1486_v59 = vpop.permute.xlu0 %1485 }
 0x7f6   : > { %v1499_v60 = vsel %vm948_vm2, %v1486_v59, 0 }
 0x7f9   : > { %v1482_v63 = vpop.permute.xlu0 %1481 }
 0x7fa   : > { %v1493_v0 = vsel %vm948_vm2, %v1482_v63, 0 }
 0x7fb   : > { %v2140_v46 = vpop.eup %2139 }
 0x7fc   : > { %v1373_v50 = vmul.f32 %v2140_v46, %v2138_v25 }
 0x7fe   : > { %v2492_v51 = vadd.f32 %v1373_v50, %v1143_v49  ;;  %v1375_v31 = vpack.c.bf16 %v1373_v50, %v1373_v50 }
 0x800   : > { %2063 = vmatmul.mubr.msk.bf16.vlgmr.msra.gmra.mxu0 %vm1004_vm3, %v1375_v31 }
 0x801   : > { %2067 = vmatpush3.bf16.msra.mxu0 %v1436_v34  ;;  %2068 = vmatprep.mubr.msk.bf16.mxu0 %vm2156_vm1, %v2155_v2 }
 0x802   : > { %2072 = vmatprep.subr.bf16.mxu0 %v2155_v2 }
 0x8c0   : > { %v1425_v53 = vpop.f32.mrf.mxu0 }
 0x8c1   : > { %v1431_v54 = vpack.c.bf16 %v1425_v53, %v1425_v53 }
 0x8c2   : > { %v2064_v55 = vpop.f32.mrf.mxu0 }
 0x8c3   : > { %2069 = vmatmul.mubr.msk.bf16.vlgmr.msra.gmra.mxu0 %vm948_vm2, %v1431_v54  ;;  %v1881_v55 = vld [vmem:[%s2578_s13] ss:$0 sm:$0xff] }
 0x8c4   : > { %2073 = vmatpush3.bf16.xpose.msra.mxu0 %v1502_v20  ;;  %v1428_v57 = vpop.f32.mrf.mxu0  ;;  %2080 = vmatprep.mubr.msk.bf16.mxu0 %vm2156_vm1, %v2155_v2 }
 0x8c5   : > { %2074 = vmatprep.subr.bf16.mxu0 %v2155_v2  ;;  %v1882_v57 = vld [vmem:[%s2579_s14] ss:$0 sm:$0xff] }
 0x8c6   : > { %v2065_v58 = vpop.f32.mrf.mxu0 }
 0x8cc   : > { %2075 = vmatpush3.bf16.xpose.msra.mxu0 %v1499_v60 }
 0x8cd   : > { %2076 = vmatprep.subr.bf16.mxu0 %v2155_v2 }
 0x8d4   : > { %2077 = vmatpush3.bf16.xpose.msra.mxu0 %v1496_v62 }
 0x8d5   : > { %2078 = vmatprep.subr.bf16.mxu0 %v2155_v2 }
 0x8dc   : > { %2079 = vmatpush3.bf16.xpose.msra.mxu0 %v1493_v0 }
 0x8e3   : > { %2081 = vmatmul.mubr.msk.bf16.vlgmr.msra.gmra.mxu0 %vm948_vm2, %v1480_v1 }
 0x983   : > { %v1472_v5 = vpop.f32.mrf.mxu0 }
 0x984   : > { %v1478_v6 = vadd.f32 %v1472_v5, %v1293_v3 }
 0x985   : > { %v2070_v7 = vpop.f32.mrf.mxu0 }
 0x987   : > { %v1475_v9 = vpop.f32.mrf.mxu0 }
 0x989   : > { %v2071_v11 = vpop.f32.mrf.mxu0 }
 0x9a3   : > { %v1538_v13 = vpop.f32.mrf.mxu0 }
 0x9a4   : > { %v1539_v14 = vadd.f32 %v2353_v48, %v1538_v13  ;;  %v1562_v48 = vpop.permute.xlu1 %1561 }
 0x9a5   : > { %v2082_v15 = vpop.f32.mrf.mxu0 }
 0x9a6   : > { %v1544_v16 = vsel %vm1004_vm3, %v1539_v14, -inf }
 0x9a7   : > { %1545 = vmax.xlane.f32.xlu0 %v1544_v16  ;;  %v1541_v17 = vpop.f32.mrf.mxu0 }
 0x9a9   : > { %v2083_v18 = vpop.f32.mrf.mxu0 }
 0x9bd   : > { %1563 = vrot.lane.b32.xlu0 %v2360_v4, %s2159_s23 }
 0x9c1   : > { %1559 = vrot.lane.b32.xlu0 %v2366_v10, %s2159_s23 }
 0xa30   : > { %v1546_v56 = vpop.xlane.xlu0 %1545 }
 0xa31   : > { %v1547_v19 = vsub.f32 %v1539_v14, %v1546_v56 }
 0xa33   : > { %v1548_v21 = vmul.f32 1.442695, %v1547_v19 }
 0xa34   : > { %v1564_v22 = vpop.permute.xlu0 %1563 }
 0xa35   : > { %2141 = vpow2.f32 %v1548_v21  ;;  %2085 = vmatpush3.bf16.msra.mxu1 %v1564_v22 }
 0xa36   : > { %2086 = vmatprep.subr.bf16.mxu1 %v2155_v2 }
 0xa38   : > { %v1560_v23 = vpop.permute.xlu0 %1559 }
 0xa39   : > { %2087 = vmatpush3.bf16.msra.mxu1 %v1562_v48 }
 0xa3a   : > { %2088 = vmatprep.subr.bf16.mxu1 %v2155_v2 }
 0xa3d   : > { %2089 = vmatpush3.bf16.msra.mxu1 %v1560_v23 }
 0xa3e   : > { %2090 = vmatprep.subr.bf16.mxu1 %v2155_v2 }
 0xa42   : > { %v2142_v4 = vpop.eup %2141 }
 0xa43   : > { %v1550_v10 = vsel %vm1004_vm3, %v2142_v4, 0.0 }
 0xa44   : > { %1551 = vadd.xlane.f32.xlu1 %v1550_v10 }
 0xa55   : > { %1557 = vrot.lane.b32.xlu1 %v2370_v12, %s2159_s23 }
 0xacd   : > { %v1552_v24 = vpop.xlane.xlu1 %1551 }
 0xace   : > { %2143 = vrcp.f32 %v1552_v24 }
 0xad1   : > { %v1558_v26 = vpop.permute.xlu1 %1557 }
 0xad2   : > { %2091 = vmatpush3.bf16.msra.mxu1 %v1558_v26 }
 0xad3   : > { %2096 = vmatprep.subr.bf16.mxu1 %v2155_v2 }
 0xadb   : > { %v2144_v27 = vpop.eup %2143 }
 0xadc   : > { %v1554_v29 = vmul.f32 %v2144_v27, %v2142_v4 }
 0xade   : > { %v1556_v30 = vpack.c.bf16 %v1554_v29, %v1554_v29  ;;  %v1555_v12 = vadd.f32 %v1554_v29, %v2492_v51 }
 0xae0   : > { %2093 = vmatmul.mubr.msk.bf16.vlgmr.msra.gmra.mxu1 %vm1004_vm3, %v1556_v30  ;;  %v1660_v33 = vmul.f32 0.25, %v1555_v12 }
 0xae1   : > { %2097 = vmatpush3.bf16.msra.mxu1 %v1617_v32  ;;  %2098 = vmatprep.mubr.msk.bf16.mxu1 %vm2156_vm1, %v2155_v2  ;;  %v1880_v2 = vld [vmem:[%s2577_s12] ss:$0 sm:$0xff] }
 0xae2   : > { %1661 = vst.msk [vmem:[%s598_s0] sm:$0xff] %vm1004_vm3, %v1660_v33 }
 0xba0   : > { %v1606_v35 = vpop.f32.mrf.mxu1 }
 0xba1   : > { %v1612_v36 = vpack.c.bf16 %v1606_v35, %v1606_v35 }
 0xba2   : > { %v2094_v38 = vpop.f32.mrf.mxu1 }
 0xba3   : > { %2099 = vmatmul.mubr.msk.bf16.vlgmr.msra.gmra.mxu1 %vm948_vm2, %v1612_v36 }
 0xba4   : > { %v1609_v40 = vpop.f32.mrf.mxu1 }
 0xba6   : > { %v2095_v41 = vpop.f32.mrf.mxu1 }
 0xc63   : > { %v1653_v43 = vpop.f32.mrf.mxu1 }
 0xc64   : > { %v1659_v44 = vadd.f32 %v1653_v43, %v1478_v6 }
 0xc65   : > { %v2100_v45 = vpop.f32.mrf.mxu1 }
 0xc66   : > { %v1662_v25 = vadd.f32 %v1659_v44, %v617_v42 }
 0xc67   : > { %v1656_v39 = vpop.f32.mrf.mxu1 }
 0xc68   : > { %v1669_v37 = vadd.f32 %v1880_v2, %v1662_v25 }
 0xc69   : > { %v2101_v8 = vpop.f32.mrf.mxu1 }
 0xc6a   : > { %v1670_v46 = vsel %vm659_vm0, %v1669_v37, 0.0 }
 0xc6b   : > { %1671 = vadd.xlane.f32.xlu0 %v1670_v46 }
 0xcf4   : > { %v1672_v47 = vpop.xlane.xlu0 %1671 }
 0xcf5   : > { %v1674_v49 = vmul.f32 0.03125, %v1672_v47 }
 0xcf7   : > { %v1675_v50 = vsub.f32 %v1669_v37, %v1674_v49 }
 0xcf9   : > { %v1676_v51 = vmul.f32 %v1675_v50, %v1675_v50 }
 0xcfb   : > { %v1677_v31 = vsel %vm659_vm0, %v1676_v51, 0.0 }
 0xcfc   : > { %1678 = vadd.xlane.f32.xlu1 %v1677_v31 }
 0xd85   : > { %v1679_v34 = vpop.xlane.xlu1 %1678 }
 0xd86   : > { %v1680_v52 = vmul.f32 0.03125, %v1679_v34 }
 0xd88   : > { %v1681_v53 = vadd.f32 1e-05, %v1680_v52 }
 0xd8a   : > { %2145 = vrsqrt.f32 %v1681_v53 }
 0xd97   : > { %v2146_v54 = vpop.eup %2145 }
 0xd98   : > { %v1683_v20 = vmul.f32 %v2146_v54, %v1675_v50 }
 0xd9a   : > { %v1690_v58 = vmul.f32 %v1881_v55, %v1683_v20 }
 0xd9c   : > { %v1697_v59 = vadd.f32 %v1882_v57, %v1690_v58 }
 0xd9e   : > { %1698 = vst.msk [vmem:[%s594_s29] sm:$0xff] %vm659_vm0, %v1697_v59 }
 0xd9f PF: > { %s27_s21 = sadd.s32 1, %s2153_s21  }
 0xda0   : > { %p24_p4 = scmp.ge.s32.totalorder %s27_s21, 4  }
 0xda2   :  { %26 = sbr.rel (!%p24_p4) target bundleno = 2 (0x2), region = 134 }

// kernel: transformer_decoder_forward.27
= control target key start
LH: loop header
LB: loop body
LE: loop exit
PB: predicated region body
PF: predicated region fallthrough
CT: control target
= control target key end

     0   :  { %s2325_s0 = inlined_call_operand.vmem [shape: bf16[2,8,32], index: 0, kind: input, shape index: {}, may-alias: {0,1,2}]   ;;  %s2326_s1 = inlined_call_operand.vmem [shape: bf16[2,8,32], index: 1, kind: input, shape index: {}, may-alias: {0,1,2}]   ;;  %s2327_s2 = inlined_call_operand.vmem [shape: bf16[2,8,32], index: 2, kind: input, shape index: {}, may-alias: {0,1,2}]   ;;  %s2328_s3 = inlined_call_operand.vmem [shape: f32[2,8,32], index: 3, kind: input, shape index: {}]   ;;  %s2329_s4 = inlined_call_operand.vmem [shape: bf16[32,32], index: 4, kind: input, shape index: {}]   ;;  %s2330_s5 = inlined_call_operand.vmem [shape: bf16[32,32], index: 5, kind: input, shape index: {}]   ;;  %s2331_s6 = inlined_call_operand.vmem [shape: bf16[32,32], index: 6, kind: input, shape index: {}]   ;;  %s2332_s7 = inlined_call_operand.vmem [shape: f32[1,32], index: 7, kind: input, shape index: {}, may-alias: {7,8,9,11,13}]   ;;  %s2333_s8 = inlined_call_operand.vmem [shape: f32[1,32], index: 8, kind: input, shape index: {}, may-alias: {7,8,9,11,13}]   ;;  %s2334_s9 = inlined_call_operand.vmem [shape: f32[1,32], index: 9, kind: input, shape index: {}, may-alias: {7,8,9,11,13}]   ;;  %s2335_s10 = inlined_call_operand.vmem [shape: bf16[32,32], index: 10, kind: input, shape index: {}]   ;;  %s2336_s11 = inlined_call_operand.vmem [shape: f32[1,32], index: 11, kind: input, shape index: {}, may-alias: {7,8,9,11,13}]   ;;  %s2337_s12 = inlined_call_operand.vmem [shape: f32[1,32], index: 12, kind: input, shape index: {}]   ;;  %s2338_s13 = inlined_call_operand.vmem [shape: f32[1,32], index: 13, kind: input, shape index: {}, may-alias: {7,8,9,11,13}]   ;;  %s2339_s14 = inlined_call_operand.hbm [shape: f32[2,8,32], index: 14, kind: output, shape index: {0}]   ;;  %s2340_s15 = inlined_call_operand.hbm [shape: f32[2,8,8], index: 15, kind: output, shape index: {1}]  }
   0x1   :  { %2344 = sst [smem:[#allocation8_spill]] %s2325_s0 }
   0x2   :  { %2345 = sst [smem:[#allocation9_spill]] %s2326_s1 }
   0x3   :  { %2346 = sst [smem:[#allocation10_spill]] %s2327_s2 }
   0x4   :  { %2347 = sst [smem:[#allocation11_spill]] %s2328_s3 }
   0x5   :  { %2348 = sst [smem:[#allocation12_spill]] %s2329_s4 }
   0x6   :  { %2349 = sst [smem:[#allocation13_spill]] %s2330_s5 }
   0x7   :  { %2350 = sst [smem:[#allocation14_spill]] %s2331_s6 }
   0x8   :  { %2351 = sst [smem:[#allocation15_spill]] %s2332_s7 }
   0x9   :  { %21 = vsyncpa [#allocation3], 0 }
   0xa   :  { %23 = vsyncpa [#allocation3 + $0x1], 0 }
   0xb   :  { %24 = vsyncpa [#allocation5], 0 }
   0xc   :  { %26 = vsyncpa [#allocation5 + $0x1], 0  ;;  %s2021_s18 = smov 0   ;;  %s2023_s19 = smov 0  }
   0xd   :  { %s2025_s20 = smov 0   ;;  %s2027_s21 = smov 0  }
   0xe LB: > { %s2042_s22 = sadd.s32 4294967295, %s1932_s21   ;;  %s1597_s23 = sadd.s32 4294967294, %s1932_s21   ;;  %s1932_s21 = sphi %s2027_s21, %s2368_s21   ;;  %s1928_s20 = sphi %s2025_s20, %s2367_s20   ;;  %s1924_s19 = sphi %s2023_s19, %s2366_s19   ;;  %s1920_s18 = sphi %s2021_s18, %s2365_s18  }
   0xf   : > { %s2046_s24 = sadd.s32 1, %s1932_s21   ;;  %s353_s25 = sadd.s32 1, %s1928_s20 }
  0x10   : > { %s350_s26 = ssub.s32 %s1932_s21, %s2046_s24  ;;  %p363_p0 = scmp.ne.s32.totalorder %s1928_s20, %s1924_s19 }
  0x11   : > { %p351_p1 = scmp.eq.s32.totalorder %s350_s26, 0  ;;  %p364_p2 = scmp.eq.s32.totalorder %s2042_s22, 1 }
  0x12   : > { %p369_p3 = scmp.ne.s32.totalorder %s1924_s19, %s1920_s18  ;;  %p370_p4 = scmp.eq.s32.totalorder %s1597_s23, 1 }
  0x13   : > { %s2057_s27 = scalar_select %p351_p1, %s1928_s20, %s353_s25  }
  0x14   : > { %p2059_p5 = por %p364_p2, %p363_p0  ;;  %p2063_p6 = por %p370_p4, %p369_p3 }
  0x15   : > { %p1600_p7 = scmp.ge.s32.totalorder %s1932_s21, 1  ;;  %p472_p8 = scmp.lt.s32.totalorder %s1932_s21, 3 }
  0x17   : > { %p473_p9 = pnand %p1600_p7, %p472_p8 }
  0x18   : > { %s2354_s5 = sld [smem:[#allocation13_spill]] (!%p473_p9)  ;;  %p536_p10 = scmp.lt.s32.totalorder (!%p473_p9), %s2042_s22, 1 }
  0x19   : > { %476 = sbr.rel (%p473_p9) target bundleno = 2806 (0xaf6), region = 76  ;;  %s2355_s4 = sld [smem:[#allocation12_spill]] (!%p473_p9) }
  0x1a   : > { %s2356_s1 = sld [smem:[#allocation9_spill]] (!%p473_p9)  ;;  %s2241_s26 = sand.u32 (!%p473_p9), 1, %s1924_s19  }
  0x1b   : > { %s2357_s0 = sld [smem:[#allocation8_spill]] (!%p473_p9) }
  0x1c   : > { %s2358_s7 = sld [smem:[#allocation15_spill]] (!%p473_p9) }
  0x1d   : > { %s2359_s6 = sld [smem:[#allocation14_spill]] (!%p473_p9) }
  0x1e   : > { %v1818_v0 = vld [vmem:[%s2354_s5 + $0x8] sm:$0xff]   ;;  %v1934_v1 = vmov 0.0   ;;  %v1820_v3 = vld [vmem:[%s2354_s5] sm:$0xff]   ;;  %vm1935_vm0 = vmmov 0   ;;  %s2089_s17 = scalar_select %p536_p10, %s2042_s22, 1  ;;  %vm597_vm1 = vcmask 261120  }
  0x1f   : > { %1681 = vmatprep.subr.bf16.mxu1 %v1934_v1  ;;  %1673 = vmatprep.subr.bf16.mxu0 %v1934_v1  ;;  %v1819_v2 = vld [vmem:[%s2355_s4 + $0x8] sm:$0xff]   ;;  %v1821_v4 = vld [vmem:[%s2355_s4] sm:$0xff]   ;;  %vm766_vm2 = vcmask 64512   ;;  %s2360_s2 = sld [smem:[#allocation10_spill]]  ;;  %vm829_vm3 = vcmask 1043456   ;;  %s2342_s4 = sshll.u32 %s2241_s26, 3 }
  0x20   : > { %1682 = vmatpush3.bf16.msra.mxu1 %v1818_v0  ;;  %1685 = vmatprep.mubr.msk.bf16.mxu1 %vm1935_vm0, %v1934_v1  ;;  %s2094_s23 = sshll.u32 %s2089_s17, 2  ;;  %v1611_v7 = vld [vmem:[%s2333_s8] ss:$0 sm:$0xff]  ;;  %v573_v60 = vld [vmem:[%s2335_s10 + $0x4] sm:$0xf]  ;;  %s2247_s16 = scalar_lea.vmem [#allocation4], %s2342_s4 }
  0x21   : > { %1674 = vmatpush3.bf16.msra.mxu0 %v1819_v2  ;;  %1683 = vmatprep.subr.bf16.mxu1 %v1934_v1  ;;  %s543_s30 = scalar_lea.vmem %s2356_s1, %s2094_s23  ;;  %s539_s5 = scalar_lea.vmem %s2357_s0, %s2094_s23  ;;  %v1615_v47 = vld [vmem:[%s2334_s9] ss:$0 sm:$0xff]  ;;  %v993_v61 = vsel %vm829_vm3, %v573_v60, 0 }
  0x22   : > { %1675 = vmatprep.subr.bf16.mxu0 %v1934_v1  ;;  %1677 = vmatprep.mubr.msk.bf16.mxu0 %vm1935_vm0, %v1934_v1  ;;  %v554_v5 = vld [vmem:[%s543_s30] sm:$0xf]  ;;  %s2361_s30 = smov 120   ;;  %s1938_s0 = smov 104  }
  0x23   : > { %v553_v6 = vld [vmem:[%s539_s5] sm:$0xf]  ;;  %s2341_s5 = smov 120   ;;  %v1822_v22 = vld [vmem:[%s2359_s6 + $0x8] sm:$0xff]   ;;  %s2362_s3 = sld [smem:[#allocation11_spill]] }
  0x24   : > { %1684 = vmatpush3.bf16.msra.mxu1 %v1820_v3  ;;  %v1607_v8 = vld [vmem:[%s2358_s7] ss:$0 sm:$0xff]  ;;  %s1939_s1 = smov [#allocation4]  }
  0x25   : > { %1676 = vmatpush3.bf16.msra.mxu0 %v1821_v4  ;;  %1697 = vmatprep.subr.bf16.mxu1 %v1934_v1  ;;  %v1823_v23 = vld [vmem:[%s2359_s6] sm:$0xff]  }
  0x26   : > { %1689 = vmatprep.subr.bf16.mxu0 %v1934_v1  ;;  %v572_v3 = vld [vmem:[%s2335_s10] sm:$0xf] }
  0x27   : > { %1686 = vmatmul.mubr.msk.bf16.vlgmr.msra.gmra.mxu1 %vm597_vm1, %v554_v5 }
  0x28   : > { %1678 = vmatmul.mubr.msk.bf16.vlgmr.msra.gmra.mxu0 %vm597_vm1, %v553_v6  ;;  %1699 = vmatprep.mubr.msk.bf16.mxu1 %vm1935_vm0, %v1934_v1  ;;  %v1039_v6 = vsel %vm829_vm3, %v572_v3, 0 }
  0x29   : > { %1693 = vmatprep.mubr.msk.bf16.mxu0 %vm1935_vm0, %v1934_v1  ;;  %1690 = vmatpush3.bf16.msra.mxu0 %v1822_v22 }
  0x2a   : > { %1691 = vmatprep.subr.bf16.mxu0 %v1934_v1 }
  0x2d   : > { %1692 = vmatpush3.bf16.msra.mxu0 %v1823_v23 }
  0x2e   : > { %1703 = vmatprep.subr.bf16.mxu0 %v1934_v1 }
  0xe7   : > { %v697_v9 = vpop.f32.mrf.mxu1 }
  0xe8   : > { %v698_v10 = vadd.f32 %v1611_v7, %v697_v9  ;;  %v635_v11 = vpop.f32.mrf.mxu0 }
  0xe9   : > { %v1687_v12 = vpop.f32.mrf.mxu1  ;;  %v636_v13 = vadd.f32 %v1607_v8, %v635_v11 }
  0xea   : > { %v2118_v14 = vpack.c.bf16 %v698_v10, %v698_v10  ;;  %v1679_v15 = vpop.f32.mrf.mxu0 }
  0xeb   : > { %v700_v16 = vpop.f32.mrf.mxu1  ;;  %v2120_v17 = vpack.c.bf16 %v636_v13, %v636_v13 }
  0xec   : > { %878 = vrot.lane.b32.xlu0 %v2118_v14, %s2341_s5  ;;  %v771_v18 = vsel %vm766_vm2, %v2118_v14, 0  ;;  %v638_v19 = vpop.f32.mrf.mxu0 }
  0xed   : > { %v1688_v20 = vpop.f32.mrf.mxu1  ;;  %1698 = vmatpush3.bf16.xpose.msra.mxu1 %v771_v18 }
  0xee   : > { %v1680_v21 = vpop.f32.mrf.mxu0  ;;  %1709 = vmatprep.subr.bf16.mxu1 %v1934_v1 }
  0xf0   : > { %875 = vrot.lane.b32.xlu0 %v2120_v17, %s2341_s5  ;;  %s547_s5 = scalar_lea.vmem %s2360_s2, %s2094_s23  ;;  %s1846_s2 = sshll.u32 %s1939_s1, 4  ;;  %s1847_s2 = int_to_ptr.vmem [resolvable:$false] %s1846_s2 }
  0xf1   : > { %v555_v24 = vld [vmem:[%s547_s5] sm:$0xf]  ;;  %s1937_s5 = smov 112  }
  0xf2   : > { %1694 = vmatmul.mubr.msk.bf16.vlgmr.msra.gmra.mxu0 %vm597_vm1, %v555_v24 }
  0xf3   : > { %1705 = vmatprep.mubr.msk.bf16.mxu0 %vm1935_vm0, %v1934_v1 }
  0xf4   : > { %1700 = vmatmul.mubr.msk.bf16.vlgmr.msra.gmra.mxu1 %vm766_vm2, %v2120_v17 }
  0xf5   : > { %1711 = vmatprep.mubr.msk.bf16.mxu1 %vm1935_vm0, %v1934_v1 }
 0x15e   : > { %v879_v25 = vpop.permute.xlu0 %878 }
 0x15f   : > { %v884_v26 = vsel %vm766_vm2, %v879_v25, 0 }
 0x160   : > { %1710 = vmatpush3.bf16.xpose.msra.mxu1 %v884_v26 }
 0x161   : > { %1721 = vmatprep.subr.bf16.mxu1 %v1934_v1 }
 0x162   : > { %v876_v27 = vpop.permute.xlu0 %875 }
 0x167   : > { %1712 = vmatmul.mubr.msk.bf16.vlgmr.msra.gmra.mxu1 %vm766_vm2, %v876_v27 }
 0x168   : > { %1723 = vmatprep.mubr.msk.bf16.mxu1 %vm1935_vm0, %v1934_v1  ;;  %1722 = vmatpush3.bf16.msra.mxu1 %v993_v61 }
 0x169   : > { %1733 = vmatprep.subr.bf16.mxu1 %v1934_v1 }
 0x1b2   : > { %v759_v41 = vpop.f32.mrf.mxu0 }
 0x1b3   : > { %v760_v48 = vadd.f32 %v1615_v47, %v759_v41 }
 0x1b4   : > { %v807_v28 = vpop.f32.mrf.mxu1  ;;  %v1695_v42 = vpop.f32.mrf.mxu0 }
 0x1b5   : > { %v813_v29 = vsel %vm766_vm2, %v807_v28, -inf  ;;  %v2159_v49 = vpack.c.bf16 %v760_v48, %v760_v48 }
 0x1b6   : > { %814 = vmax.xlane.f32.xlu1 %v813_v29  ;;  %v1701_v30 = vpop.f32.mrf.mxu1  ;;  %v762_v43 = vpop.f32.mrf.mxu0 }
 0x1b7   : > { %v831_v50 = vsel %vm829_vm3, %v2159_v49, 0 }
 0x1b8   : > { %v810_v31 = vpop.f32.mrf.mxu1  ;;  %v1696_v44 = vpop.f32.mrf.mxu0  ;;  %1704 = vmatpush3.bf16.msra.mxu0 %v831_v50 }
 0x1b9   : > { %1715 = vmatprep.subr.bf16.mxu0 %v1934_v1 }
 0x1ba   : > { %v1702_v32 = vpop.f32.mrf.mxu1 }
 0x227   : > { %v920_v33 = vpop.f32.mrf.mxu1 }
 0x228   : > { %v926_v34 = vsel %vm766_vm2, %v920_v33, -inf }
 0x229   : > { %927 = vmax.xlane.f32.xlu1 %v926_v34  ;;  %v1713_v35 = vpop.f32.mrf.mxu1 }
 0x22b   : > { %v923_v36 = vpop.f32.mrf.mxu1 }
 0x22d   : > { %v1714_v37 = vpop.f32.mrf.mxu1 }
 0x23f   : > { %v815_v38 = vpop.xlane.xlu1 %814 }
 0x240   : > { %v816_v39 = vsub.f32 %v807_v28, %v815_v38 }
 0x242   : > { %v817_v40 = vmul.f32 1.442695, %v816_v39 }
 0x244   : > { %1824 = vpow2.f32 %v817_v40 }
 0x251   : > { %v1825_v45 = vpop.eup %1824 }
 0x252   : > { %v819_v46 = vsel %vm766_vm2, %v1825_v45, 0.0 }
 0x253   : > { %820 = vadd.xlane.f32.xlu0 %v819_v46 }
 0x269   : > { %1144 = vrot.lane.b32.xlu0 %v2159_v49, %s1937_s5 }
 0x2b2   : > { %v928_v51 = vpop.xlane.xlu1 %927 }
 0x2b3   : > { %v929_v52 = vsub.f32 %v920_v33, %v928_v51 }
 0x2b5   : > { %v930_v53 = vmul.f32 1.442695, %v929_v52 }
 0x2b7   : > { %1826 = vpow2.f32 %v930_v53 }
 0x2c4   : > { %v1827_v54 = vpop.eup %1826 }
 0x2c5   : > { %v932_v55 = vsel %vm766_vm2, %v1827_v54, 0.0 }
 0x2c6   : > { %933 = vadd.xlane.f32.xlu1 %v932_v55 }
 0x2d7   : > { %940 = vrot.lane.b32.xlu1 %v2159_v49, %s2361_s30 }
 0x2db   : > { %1083 = vrot.lane.b32.xlu1 %v2118_v14, %s1937_s5 }
 0x2dc   : > { %v821_v56 = vpop.xlane.xlu0 %820 }
 0x2dd   : > { %1828 = vrcp.f32 %v821_v56 }
 0x2df   : > { %1081 = vrot.lane.b32.xlu1 %v2120_v17, %s1937_s5  ;;  %s1470_s5 = sshll.u32 %s2247_s16, 4  ;;  %s1471_s5 = int_to_ptr.vmem [resolvable:$true] %s1470_s5 }
 0x2e0   : > { %v1145_v7 = vpop.permute.xlu0 %1144  ;;  %s1842_s25 = scalar_lea.vmem %s1471_s5, 128  ;;  %p1849_p0 = scmp.lt.s32.totalorder %s1471_s5, %s1847_s2 }
 0x2e1   : > { %v1150_v11 = vsel %vm829_vm3, %v1145_v7, 0  ;;  %p1843_p11 = scmp.ne.s32.totalorder %s1471_s5, %s1842_s25 }
 0x2e3   : > { %p1844_p12 = pnand %p1843_p11, %p2059_p5 }
 0x2e5   : > { %p1845_p13 = pneg %p1844_p12 }
 0x2ea   : > { %v1829_v57 = vpop.eup %1828 }
 0x2eb   : > { %v2170_v58 = vmul.f32 %v1829_v57, %v1825_v45 }
 0x2ed   : > { %v825_v59 = vpack.c.bf16 %v2170_v58, %v2170_v58 }
 0x2ef   : > { %1706 = vmatmul.mubr.msk.bf16.vlgmr.msra.gmra.mxu0 %vm766_vm2, %v825_v59 }
 0x2f0   : > { %1717 = vmatprep.mubr.msk.bf16.mxu0 %vm1935_vm0, %v1934_v1 }
 0x34f   : > { %v934_v62 = vpop.xlane.xlu1 %933 }
 0x350   : > { %1830 = vrcp.f32 %v934_v62 }
 0x353   : > { %v941_v63 = vpop.permute.xlu1 %940 }
 0x354   : > { %v946_v0 = vsel %vm829_vm3, %v941_v63, 0 }
 0x355   : > { %1716 = vmatpush3.bf16.msra.mxu0 %v946_v0 }
 0x356   : > { %1727 = vmatprep.subr.bf16.mxu0 %v1934_v1 }
 0x357   : > { %v1084_v15 = vpop.permute.xlu1 %1083 }
 0x358   : > { %v1089_v20 = vsel %vm766_vm2, %v1084_v15, 0 }
 0x35b   : > { %v1082_v23 = vpop.permute.xlu1 %1081 }
 0x35d   : > { %v1831_v2 = vpop.eup %1830 }
 0x35e   : > { %v936_v4 = vmul.f32 %v1831_v2, %v1827_v54 }
 0x360   : > { %v938_v5 = vpack.c.bf16 %v936_v4, %v936_v4  ;;  %v937_v45 = vadd.f32 %v936_v4, %v2170_v58 }
 0x362   : > { %1718 = vmatmul.mubr.msk.bf16.vlgmr.msra.gmra.mxu0 %vm766_vm2, %v938_v5  ;;  %v575_v5 = vld [vmem:[%s2335_s10 + $0xc] sm:$0xf] }
 0x363   : > { %1728 = vmatpush3.bf16.msra.mxu0 %v1039_v6  ;;  %1729 = vmatprep.mubr.msk.bf16.mxu0 %vm1935_vm0, %v1934_v1  ;;  %v1356_v7 = vsel %vm829_vm3, %v575_v5, 0 }
 0x364   : > { %1739 = vmatprep.subr.bf16.mxu0 %v1934_v1 }
 0x3af   : > { %v867_v8 = vpop.f32.mrf.mxu0 }
 0x3b0   : > { %v873_v9 = vpack.c.bf16 %v867_v8, %v867_v8 }
 0x3b1   : > { %v1707_v10 = vpop.f32.mrf.mxu0 }
 0x3b2   : > { %1730 = vmatmul.mubr.msk.bf16.vlgmr.msra.gmra.mxu0 %vm766_vm2, %v873_v9 }
 0x3b3   : > { %1740 = vmatpush3.bf16.msra.mxu0 %v1150_v11  ;;  %v870_v12 = vpop.f32.mrf.mxu0  ;;  %1741 = vmatprep.mubr.msk.bf16.mxu0 %vm1935_vm0, %v1934_v1 }
 0x3b4   : > { %1751 = vmatprep.subr.bf16.mxu0 %v1934_v1 }
 0x3b5   : > { %v1708_v13 = vpop.f32.mrf.mxu0 }
 0x422   : > { %v982_v16 = vpop.f32.mrf.mxu0 }
 0x423   : > { %v988_v18 = vpack.c.bf16 %v982_v16, %v982_v16 }
 0x424   : > { %v1719_v19 = vpop.f32.mrf.mxu0 }
 0x425   : > { %1724 = vmatmul.mubr.msk.bf16.vlgmr.msra.gmra.mxu1 %vm766_vm2, %v988_v18 }
 0x426   : > { %1734 = vmatpush3.bf16.xpose.msra.mxu1 %v1089_v20  ;;  %v985_v21 = vpop.f32.mrf.mxu0  ;;  %1735 = vmatprep.mubr.msk.bf16.mxu1 %vm1935_vm0, %v1934_v1 }
 0x427   : > { %1745 = vmatprep.subr.bf16.mxu1 %v1934_v1 }
 0x428   : > { %v1720_v22 = vpop.f32.mrf.mxu0 }
 0x42d   : > { %1736 = vmatmul.mubr.msk.bf16.vlgmr.msra.gmra.mxu1 %vm766_vm2, %v1082_v23 }
 0x42e   : > { %1747 = vmatprep.mubr.msk.bf16.mxu1 %vm1935_vm0, %v1934_v1 }
 0x472   : > { %v2205_v24 = vpop.f32.mrf.mxu0 }
 0x474   : > { %v1731_v25 = vpop.f32.mrf.mxu0 }
 0x476   : > { %v1078_v26 = vpop.f32.mrf.mxu0 }
 0x478   : > { %v1732_v27 = vpop.f32.mrf.mxu0 }
 0x4e5   : > { %v1029_v28 = vpop.f32.mrf.mxu1 }
 0x4e7   : > { %v1725_v29 = vpop.f32.mrf.mxu1 }
 0x4e8   : > { %v1631_v29 = vld [vmem:[%s2336_s11] ss:$0 sm:$0xff] }
 0x4e9   : > { %v1032_v30 = vpop.f32.mrf.mxu1 }
 0x4eb   : > { %v1726_v31 = vpop.f32.mrf.mxu1 }
 0x4ed   : > { %v1125_v32 = vpop.f32.mrf.mxu1 }
 0x4ee   : > { %v1131_v33 = vsel %vm766_vm2, %v1125_v32, -inf }
 0x4ef   : > { %1132 = vmax.xlane.f32.xlu1 %v1131_v33  ;;  %v1737_v34 = vpop.f32.mrf.mxu1 }
 0x4f1   : > { %v1128_v35 = vpop.f32.mrf.mxu1 }
 0x4f3   : > { %v1738_v36 = vpop.f32.mrf.mxu1 }
 0x578   : > { %v1133_v37 = vpop.xlane.xlu1 %1132 }
 0x579   : > { %v1134_v38 = vsub.f32 %v1125_v32, %v1133_v37 }
 0x57b   : > { %v1135_v39 = vmul.f32 1.442695, %v1134_v38 }
 0x57d   : > { %1832 = vpow2.f32 %v1135_v39 }
 0x58a   : > { %v1833_v40 = vpop.eup %1832 }
 0x58b   : > { %v1137_v41 = vsel %vm766_vm2, %v1833_v40, 0.0 }
 0x58c   : > { %1138 = vadd.xlane.f32.xlu0 %v1137_v41 }
 0x5a2   : > { %1242 = vrot.lane.b32.xlu0 %v2118_v14, %s1938_s0 }
 0x5a6   : > { %1240 = vrot.lane.b32.xlu0 %v2120_v17, %s1938_s0  ;;  %v574_v17 = vld [vmem:[%s2335_s10 + $0x8] sm:$0xf] }
 0x5a7   : > { %v1197_v51 = vsel %vm829_vm3, %v574_v17, 0 }
 0x5a8   : > { %1746 = vmatpush3.bf16.msra.mxu1 %v1197_v51 }
 0x5a9   : > { %1757 = vmatprep.subr.bf16.mxu1 %v1934_v1 }
 0x615   : > { %v1139_v42 = vpop.xlane.xlu0 %1138 }
 0x616   : > { %1834 = vrcp.f32 %v1139_v42 }
 0x619   : > { %v1243_v46 = vpop.permute.xlu0 %1242 }
 0x61a   : > { %v1248_v50 = vsel %vm766_vm2, %v1243_v46, 0 }
 0x61d   : > { %v1241_v14 = vpop.permute.xlu0 %1240 }
 0x623   : > { %v1835_v43 = vpop.eup %1834 }
 0x624   : > { %v1141_v44 = vmul.f32 %v1835_v43, %v1833_v40 }
 0x626   : > { %v1143_v47 = vpack.c.bf16 %v1141_v44, %v1141_v44  ;;  %v1142_v48 = vadd.f32 %v1141_v44, %v937_v45 }
 0x628   : > { %1742 = vmatmul.mubr.msk.bf16.vlgmr.msra.gmra.mxu0 %vm766_vm2, %v1143_v47 }
 0x629   : > { %1752 = vmatpush3.bf16.xpose.msra.mxu0 %v1248_v50  ;;  %1753 = vmatprep.mubr.msk.bf16.mxu0 %vm1935_vm0, %v1934_v1 }
 0x62a   : > { %1763 = vmatprep.subr.bf16.mxu0 %v1934_v1 }
 0x630   : > { %1754 = vmatmul.mubr.msk.bf16.vlgmr.msra.gmra.mxu0 %vm766_vm2, %v1241_v14 }
 0x631   : > { %1765 = vmatprep.mubr.msk.bf16.mxu0 %vm1935_vm0, %v1934_v1  ;;  %1764 = vmatpush3.bf16.msra.mxu0 %v1356_v7 }
 0x6e8   : > { %v1186_v52 = vpop.f32.mrf.mxu0 }
 0x6e9   : > { %v1192_v53 = vpack.c.bf16 %v1186_v52, %v1186_v52 }
 0x6ea   : > { %v1743_v54 = vpop.f32.mrf.mxu0 }
 0x6eb   : > { %1748 = vmatmul.mubr.msk.bf16.vlgmr.msra.gmra.mxu1 %vm766_vm2, %v1192_v53 }
 0x6ec   : > { %v1189_v55 = vpop.f32.mrf.mxu0  ;;  %1759 = vmatprep.mubr.msk.bf16.mxu1 %vm1935_vm0, %v1934_v1  ;;  %v1076_v1 = vadd.f32 %v2205_v24, %v1029_v28 }
 0x6ee   : > { %v1744_v56 = vpop.f32.mrf.mxu0 }
 0x6f0   : > { %v1284_v57 = vpop.f32.mrf.mxu0 }
 0x6f1   : > { %v1290_v58 = vsel %vm766_vm2, %v1284_v57, -inf }
 0x6f2   : > { %1291 = vmax.xlane.f32.xlu0 %v1290_v58  ;;  %v1755_v59 = vpop.f32.mrf.mxu0 }
 0x6f4   : > { %v1287_v60 = vpop.f32.mrf.mxu0 }
 0x6f6   : > { %v1756_v61 = vpop.f32.mrf.mxu0 }
 0x77b   : > { %v1292_v62 = vpop.xlane.xlu0 %1291 }
 0x77c   : > { %v1293_v63 = vsub.f32 %v1284_v57, %v1292_v62 }
 0x77e   : > { %v1294_v0 = vmul.f32 1.442695, %v1293_v63 }
 0x780   : > { %1836 = vpow2.f32 %v1294_v0 }
 0x78d   : > { %v1837_v2 = vpop.eup %1836 }
 0x78e   : > { %v1296_v3 = vsel %vm766_vm2, %v1837_v2, 0.0 }
 0x78f   : > { %1297 = vadd.xlane.f32.xlu1 %v1296_v3 }
 0x7a0   : > { %1303 = vrot.lane.b32.xlu1 %v2159_v49, %s1938_s0  ;;  %s1606_s0 = sshll.u32 %s2089_s17, 3  ;;  %s2343_s17 = sshll.u32 %s2042_s22, 7 }
 0x7a1   : > { %s551_s30 = scalar_lea.vmem %s2362_s3, %s1606_s0  ;;  %s1468_s23 = scalar_lea.hbm %s2340_s15, %s2343_s17 }
 0x7a2   : > { %v556_v25 = vld [vmem:[%s551_s30] sm:$0xff]  ;;  %s1444_s30 = scalar_lea.sflag [#allocation5], %s2241_s26  ;;  %s1848_s3 = scalar_lea.vmem %s1847_s2, 256 }
 0x7a3   : > { %p1850_p1 = scmp.lt.s32.totalorder %s1848_s3, %s1842_s25 }
 0x7a5   : > { %p1851_p2 = por %p1850_p1, %p1849_p0 }
 0x7a7   : > { %p1852_p3 = pnand %p1851_p2, %p1845_p13 }
 0x7ab   : > { %v1233_v4 = vpop.f32.mrf.mxu1 }
 0x7ac   : > { %v1239_v6 = vadd.f32 %v1233_v4, %v1076_v1 }
 0x7ad   : > { %v1749_v8 = vpop.f32.mrf.mxu1 }
 0x7af   : > { %v1236_v9 = vpop.f32.mrf.mxu1 }
 0x7b1   : > { %v1750_v10 = vpop.f32.mrf.mxu1 }
 0x818   : > { %v1298_v11 = vpop.xlane.xlu1 %1297 }
 0x819   : > { %1838 = vrcp.f32 %v1298_v11 }
 0x81c   : > { %v1304_v12 = vpop.permute.xlu1 %1303 }
 0x81d   : > { %v1309_v13 = vsel %vm829_vm3, %v1304_v12, 0 }
 0x81e   : > { %1758 = vmatpush3.bf16.msra.mxu1 %v1309_v13 }
 0x826   : > { %v1839_v49 = vpop.eup %1838 }
 0x827   : > { %v1300_v15 = vmul.f32 %v1839_v49, %v1837_v2 }
 0x829   : > { %v1302_v16 = vpack.c.bf16 %v1300_v15, %v1300_v15  ;;  %v1301_v18 = vadd.f32 %v1300_v15, %v1142_v48 }
 0x82b   : > { %1760 = vmatmul.mubr.msk.bf16.vlgmr.msra.gmra.mxu1 %vm766_vm2, %v1302_v16  ;;  %v1399_v19 = vmul.f32 0.25, %v1301_v18 }
 0x82d   : > { %1400 = vst.msk [vmem:[%s2247_s16] sm:$0xff] %vm766_vm2, %v1399_v19 }
 0x8eb   : > { %v1345_v20 = vpop.f32.mrf.mxu1 }
 0x8ec   : > { %v1351_v21 = vpack.c.bf16 %v1345_v20, %v1345_v20 }
 0x8ed   : > { %v1761_v22 = vpop.f32.mrf.mxu1 }
 0x8ee   : > { %1766 = vmatmul.mubr.msk.bf16.vlgmr.msra.gmra.mxu0 %vm766_vm2, %v1351_v21 }
 0x8ef   : > { %v1348_v23 = vpop.f32.mrf.mxu1 }
 0x8f1   : > { %v1762_v24 = vpop.f32.mrf.mxu1 }
 0x9ae   : > { %v1392_v26 = vpop.f32.mrf.mxu0 }
 0x9af   : > { %v1398_v27 = vadd.f32 %v1392_v26, %v1239_v6 }
 0x9b0   : > { %v1767_v28 = vpop.f32.mrf.mxu0 }
 0x9b1   : > { %v1401_v30 = vadd.f32 %v1398_v27, %v556_v25 }
 0x9b2   : > { %v1395_v31 = vpop.f32.mrf.mxu0 }
 0x9b3   : > { %v1408_v32 = vadd.f32 %v1631_v29, %v1401_v30 }
 0x9b4   : > { %v1768_v33 = vpop.f32.mrf.mxu0 }
 0x9b5   : > { %v1409_v34 = vsel %vm597_vm1, %v1408_v32, 0.0 }
 0x9b6   : > { %1410 = vadd.xlane.f32.xlu1 %v1409_v34 }
 0xa3f   : > { %v1411_v35 = vpop.xlane.xlu1 %1410 }
 0xa40   : > { %v1413_v36 = vmul.f32 0.03125, %v1411_v35 }
 0xa42   : > { %v1414_v37 = vsub.f32 %v1408_v32, %v1413_v36 }
 0xa44   : > { %v1415_v38 = vmul.f32 %v1414_v37, %v1414_v37 }
 0xa46   : > { %v1416_v39 = vsel %vm597_vm1, %v1415_v38, 0.0 }
 0xa47   : > { %1417 = vadd.xlane.f32.xlu0 %v1416_v39 }
 0xa48   : > { %1855 = shalt.err (!%p1852_p3)
}
 0xa49   : > { %s1856_s6 = scalar_lea.hbm %s1468_s23, 128  ;;  %s1860_s0 = scalar_lea.hbm %s2340_s15, 256 }
 0xa4a   : > { %p1857_p4 = scmp.ne.s32.totalorder %s1468_s23, %s1856_s6  ;;  %p1861_p9 = scmp.lt.s32.totalorder %s1468_s23, %s2340_s15 }
 0xa4b   : > { %p1862_p10 = scmp.lt.s32.totalorder %s1860_s0, %s1856_s6 }
 0xa4c   : > { %p1858_p7 = pnand %p1857_p4, %p2059_p5 }
 0xa4d   : > { %p1863_p11 = por %p1862_p10, %p1861_p9 }
 0xa4e   : > { %p1859_p8 = pneg %p1858_p7 }
 0xa50   : > { %p1864_p12 = pnand %p1863_p11, %p1859_p8 }
 0xa52   : > { %1867 = shalt.err (!%p1864_p12)
}
 0xa53   : > { %1770 = dma.vmem_to_hbm [thread:$0]  (%p2059_p5), %s1471_s5, 128, %s1468_s23, %s1444_s30   ;;  %v1632_v44 = vld [vmem:[%s2337_s12] ss:$0 sm:$0xff] }
 0xa54   : > { %v1633_v46 = vld [vmem:[%s2338_s13] ss:$0 sm:$0xff]  ;;  %s2363_s7 = sshll.u32 %s2241_s26, 3  ;;  %s2364_s23 = sshll.u32 %s2042_s22, 7 }
 0xa55   : > { %s528_s17 = scalar_lea.vmem [#allocation2], %s2363_s7  ;;  %s1455_s16 = scalar_lea.hbm %s2339_s14, %s2364_s23 }
 0xa56   : > { %s1457_s25 = sshll.u32 %s528_s17, 4  ;;  %s1439_s4 = scalar_lea.sflag [#allocation3], %s2241_s26  ;;  %s1458_s25 = int_to_ptr.vmem [resolvable:$true] %s1457_s25 }
 0xa57   : > { %s1868_s0 = scalar_lea.vmem %s1458_s25, 128  ;;  %s1940_s1 = smov [#allocation2]  }
 0xa58   : > { %p1869_p13 = scmp.ne.s32.totalorder %s1458_s25, %s1868_s0  ;;  %s1872_s2 = sshll.u32 %s1940_s1, 4  ;;  %s1873_s2 = int_to_ptr.vmem [resolvable:$false] %s1872_s2 }
 0xa59   : > { %s1874_s3 = scalar_lea.vmem %s1873_s2, 256  ;;  %p1875_p2 = scmp.lt.s32.totalorder %s1458_s25, %s1873_s2 }
 0xa5a   : > { %p1870_p0 = pnand %p1869_p13, %p2059_p5  ;;  %p1876_p3 = scmp.lt.s32.totalorder %s1874_s3, %s1868_s0 }
 0xa5c   : > { %p1871_p1 = pneg %p1870_p0  ;;  %p1877_p4 = por %p1876_p3, %p1875_p2 }
 0xa5e   : > { %p1878_p7 = pnand %p1877_p4, %p1871_p1 }
 0xad0   : > { %v1418_v40 = vpop.xlane.xlu0 %1417 }
 0xad1   : > { %v1419_v41 = vmul.f32 0.03125, %v1418_v40 }
 0xad3   : > { %v1420_v42 = vadd.f32 1e-05, %v1419_v41 }
 0xad5   : > { %1840 = vrsqrt.f32 %v1420_v42 }
 0xae2   : > { %v1841_v43 = vpop.eup %1840 }
 0xae3   : > { %v1422_v45 = vmul.f32 %v1841_v43, %v1414_v37 }
 0xae5   : > { %v1429_v47 = vmul.f32 %v1632_v44, %v1422_v45 }
 0xae7   : > { %v1436_v48 = vadd.f32 %v1633_v46, %v1429_v47 }
 0xae9   : > { %1437 = vst.msk [vmem:[%s528_s17] sm:$0xff] %vm597_vm1, %v1436_v48 }
 0xaea   : > { %1881 = shalt.err (!%p1878_p7)
}
 0xaeb   : > { %s1882_s22 = scalar_lea.hbm %s1455_s16, 128  ;;  %s1886_s7 = scalar_lea.hbm %s2339_s14, 256 }
 0xaec   : > { %p1883_p8 = scmp.ne.s32.totalorder %s1455_s16, %s1882_s22  ;;  %p1887_p11 = scmp.lt.s32.totalorder %s1455_s16, %s2339_s14 }
 0xaed   : > { %p1888_p12 = scmp.lt.s32.totalorder %s1886_s7, %s1882_s22 }
 0xaee   : > { %p1884_p9 = pnand %p1883_p8, %p2059_p5 }
 0xaef   : > { %p1889_p13 = por %p1888_p12, %p1887_p11 }
 0xaf0   : > { %p1885_p10 = pneg %p1884_p9 }
 0xaf2   : > { %p1890_p0 = pnand %p1889_p13, %p1885_p10 }
 0xaf4   : > { %1893 = shalt.err (!%p1890_p0)
}
 0xaf5   : > { %1769 = dma.vmem_to_hbm [thread:$0]  (%p2059_p5), %s1458_s25, 128, %s1455_s16, %s1439_s4  }
 0xaf6 PF: > { %p1780_p1 = scmp.ge.s32.totalorder %s1932_s21, 2  ;;  %s1482_s5 = sand.u32 1, %s1920_s18  }
 0xaf7   : > { %s1483_s30 = scalar_lea.sflag [#allocation3], %s1482_s5 }
 0xaf8   : > { %p1774_p2 = pnand %p1780_p1, %p2063_p6 }
 0xafa   : > { %p1775_p3 = pneg %p1774_p2 }
 0xafc   : > { %1911 = dma.done.wait (%p1775_p3), %s1483_s30, 128  }
 0xafd   : > { %1913 = vsyncadd (%p1775_p3), %s1483_s30, 4294967168  ;;  %s1492_s0 = scalar_lea.sflag [#allocation5], %s1482_s5 }
 0xafe   : > { %1915 = dma.done.wait (%p1775_p3), %s1492_s0, 128  }
 0xaff   : > { %1917 = vsyncadd (%p1775_p3), %s1492_s0, 4294967168  ;;  %p29_p5 = scmp.ge.s32.totalorder %s2046_s24, 4   ;;  %s2365_s18 = smov %s1924_s19 }
 0xb00   : > { %s2366_s19 = smov %s1928_s20  ;;  %s2367_s20 = smov %s2057_s27 }
 0xb01   : > { %s2368_s21 = smov %s2046_s24  ;;  %31 = sbr.rel (!%p29_p5) target bundleno = 14 (0xe), region = 137 }
 0xb06   :  { %1497 = vsyncpa [#allocation3], 1 }
 0xb07   :  { %1499 = vsyncpa [#allocation3 + $0x1], 1 }
 0xb08   :  { %1500 = vsyncpa [#allocation5], 1 }
 0xb09   :  { %1502 = vsyncpa [#allocation5 + $0x1], 1 }

</bundles_post_ra>
